<compile_context>
chip_gen: v7x
topology: tpu7x:2x2x1
jax: 0.10.0
libtpu: 0.0.40
codegen_flags: <defaults>
</compile_context>

<pallas_src>
import jax
import jax.numpy as jnp
from jax.experimental import pallas as pl
from jax.experimental.pallas import tpu as pltpu


def _cdiv(a, b):
    return -(-a // b)


def _round_up(x, m):
    return ((x + m - 1) // m) * m


# ----------------------------------------------------------------------------
# Pallas kernels
# ----------------------------------------------------------------------------
def _conv_mm_kernel(w_ref, p_ref, b_ref, o_ref):
    """out = relu(W @ P + b); W:(OC,K) bf16, P:(K,TM) bf16, b:(OC,1) f32."""
    acc = jnp.dot(w_ref[...], p_ref[...], preferred_element_type=jnp.float32)
    acc = jnp.maximum(acc + b_ref[...], 0.0)
    o_ref[...] = acc.astype(o_ref.dtype)


def conv_matmul(w, p, b, tile_m):
    """Lane-dense conv matmul: out (OC, Mpad) = relu(w @ p + b), tiled over M.

    p is pre-padded so Mpad % tile_m == 0 and tile_m % 128 == 0: every grid step
    is a full, unmasked, lane-dense store.
    """
    OC, K = w.shape
    Mpad = p.shape[1]
    assert tile_m % 128 == 0 and Mpad % tile_m == 0
    grid = (Mpad // tile_m,)
    return pl.pallas_call(
        _conv_mm_kernel,
        out_shape=jax.ShapeDtypeStruct((OC, Mpad), jnp.bfloat16),
        grid=grid,
        in_specs=[
            pl.BlockSpec((OC, K), lambda j: (0, 0)),
            pl.BlockSpec((K, tile_m), lambda j: (0, j)),
            pl.BlockSpec((OC, 1), lambda j: (0, 0)),
        ],
        out_specs=pl.BlockSpec((OC, tile_m), lambda j: (0, j)),
        compiler_params=pltpu.CompilerParams(
            dimension_semantics=("parallel",)),
    )(w, p, b)


def _fc_head_kernel(x_ref, w1_ref, b1_ref, w2_ref, b2_ref, o_ref, acc_ref):
    """Fused fc1(+relu) -> out -> softmax, grid over fc1's N axis."""
    j = pl.program_id(0)

    @pl.when(j == 0)
    def _():
        acc_ref[...] = jnp.zeros_like(acc_ref)

    h = jnp.dot(x_ref[...], w1_ref[...], preferred_element_type=jnp.float32)
    h = jnp.maximum(h + b1_ref[...], 0.0)
    # dropout(p=0.2): eval-mode identity.
    acc_ref[...] += jnp.dot(h.astype(w2_ref.dtype), w2_ref[...],
                            preferred_element_type=jnp.float32)

    @pl.when(j == pl.num_programs(0) - 1)
    def _():
        logits = acc_ref[...] + b2_ref[...]
        m = jnp.max(logits, axis=-1, keepdims=True)
        e = jnp.exp(logits - m)
        o_ref[...] = (e / jnp.sum(e, axis=-1, keepdims=True)).astype(o_ref.dtype)


def fc_head(x, w1, b1, w2, b2, tile_n=2048):
    """x:(B,1152) bf16, w1:(1152,2048) bf16, w2:(2048,10) bf16 -> (B,10) f32.

    Default tile_n=2048 -> single grid step (the head is DMA bound; extra steps
    hide nothing and only add per-step overhead).
    """
    B, K1 = x.shape
    N1 = w1.shape[1]
    N2 = w2.shape[1]
    assert N1 % tile_n == 0, "tile_n must divide fc1 output width"
    grid = (N1 // tile_n,)
    return pl.pallas_call(
        _fc_head_kernel,
        out_shape=jax.ShapeDtypeStruct((B, N2), jnp.float32),
        grid=grid,
        in_specs=[
            pl.BlockSpec((B, K1), lambda j: (0, 0)),
            pl.BlockSpec((K1, tile_n), lambda j: (0, j)),
            pl.BlockSpec((1, tile_n), lambda j: (0, j)),
            pl.BlockSpec((tile_n, N2), lambda j: (j, 0)),
            pl.BlockSpec((1, N2), lambda j: (0, 0)),
        ],
        out_specs=pl.BlockSpec((B, N2), lambda j: (0, 0)),
        scratch_shapes=[pltpu.VMEM((B, N2), jnp.float32)],
        compiler_params=pltpu.CompilerParams(
            dimension_semantics=("arbitrary",),
            vmem_limit_bytes=32 * 1024 * 1024),
    )(x, w1, b1, w2, b2)


# ----------------------------------------------------------------------------
# Plain-JAX glue (layout plumbing only)
# ----------------------------------------------------------------------------
def conv2d_relu_cm(x_cbhw, w_mat, b_col, stride=2, ksize=3, max_tile_m=2048):
    """Channel-major conv: x (C,B,H,W) bf16, w_mat (OC, k*k*C) bf16.

    Patch row order is (kh, kw, ic), matching the weight layout produced in
    prepare_params. Returns (OC, B, OH, OW) bf16.
    """
    C, B, H, W = x_cbhw.shape
    OH = (H - ksize) // stride + 1
    OW = (W - ksize) // stride + 1
    M = B * OH * OW

    # im2col patch extraction (bf16 layout glue).
    # TODO(synk): im2col is not fused into the conv kernel.
    slices = []
    for dy in range(ksize):
        for dx in range(ksize):
            slices.append(
                x_cbhw[:, :,
                       dy:dy + stride * (OH - 1) + 1:stride,
                       dx:dx + stride * (OW - 1) + 1:stride])
    patches = jnp.concatenate(slices, axis=0).reshape(ksize * ksize * C, M)

    # Few, large, fully-populated tiles: cap at max_tile_m columns, round the
    # tile up to a multiple of 128 and pad M so the last tile is full too
    # (unmasked lane-dense stores, <=3 grid steps for conv1, 1 for conv2/3).
    n_steps = _cdiv(M, max_tile_m)
    tile_m = _round_up(_cdiv(M, n_steps), 128)
    Mpad = tile_m * n_steps
    if Mpad != M:
        patches = jnp.pad(patches, ((0, 0), (0, Mpad - M)))

    OC = w_mat.shape[0]
    y = conv_matmul(w_mat, patches, b_col, tile_m)        # (OC, Mpad) bf16
    return y[:, :M].reshape(OC, B, OH, OW)


def maxpool_2x2_cm(x_cbhw):
    """2x2/2 max pool on (C, B, H, W); tiny (~18 KB) -> plain jnp."""
    C, B, H, W = x_cbhw.shape
    OH, OW = H // 2, W // 2
    x = x_cbhw[:, :, :2 * OH, :2 * OW].reshape(C, B, OH, 2, OW, 2)
    return jnp.max(x, axis=(3, 5))


# ----------------------------------------------------------------------------
# Parameters: PyTorch-like shapes, converted ONCE to kernel layouts (bf16).
# ----------------------------------------------------------------------------
def init_params(key):
    def nrm(k, shape, scale):
        return scale * jax.random.normal(k, shape, dtype=jnp.float32)

    ks = jax.random.split(key, 10)
    return {
        # Conv weights: (OC, IC, KH, KW) as in nn.Conv2d.
        "conv1": (nrm(ks[0], (32, 3, 3, 3), 0.1),   nrm(ks[1], (32,), 0.01)),
        "conv2": (nrm(ks[2], (64, 32, 3, 3), 0.05), nrm(ks[3], (64,), 0.01)),
        "conv3": (nrm(ks[4], (32, 64, 3, 3), 0.05), nrm(ks[5], (32,), 0.01)),
        # Linear weights: (out_features, in_features) as in nn.Linear.
        "fc1":   (nrm(ks[6], (2048, 1152), 0.02),   nrm(ks[7], (2048,), 0.01)),
        "out":   (nrm(ks[8], (10, 2048), 0.02),     nrm(ks[9], (10,), 0.01)),
    }


def prepare_params(p):
    """One-time conversion to kernel-friendly layouts (no per-forward transposes)."""
    out = {}
    for name in ("conv1", "conv2", "conv3"):
        w, b = p[name]
        oc = w.shape[0]
        # (OC, IC, KH, KW) -> (OC, KH, KW, IC) -> (OC, KH*KW*IC): (kh,kw,ic) order.
        wm = jnp.transpose(w, (0, 2, 3, 1)).reshape(oc, -1).astype(jnp.bfloat16)
        out[name] = (wm, b.reshape(oc, 1).astype(jnp.float32))
    w1, b1 = p["fc1"]
    out["fc1"] = (w1.T.astype(jnp.bfloat16), b1.reshape(1, -1).astype(jnp.float32))
    w2, b2 = p["out"]
    out["out"] = (w2.T.astype(jnp.bfloat16), b2.reshape(1, -1).astype(jnp.float32))
    return out


# ----------------------------------------------------------------------------
# Forward pass (mirrors CNN.forward)
# ----------------------------------------------------------------------------
def cnn_forward(x_nchw, params):
    B = x_nchw.shape[0]
    # NCHW -> channel-major (C, B, H, W), bf16.
    x = jnp.transpose(x_nchw, (1, 0, 2, 3)).astype(jnp.bfloat16)

    x = conv2d_relu_cm(x, *params["conv1"])                 # (32, B, 51, 51)
    x = conv2d_relu_cm(x, *params["conv2"])                 # (64, B, 25, 25)
    x = conv2d_relu_cm(x, *params["conv3"])                 # (32, B, 12, 12)
    x = maxpool_2x2_cm(x)                                   # (32, B, 6, 6)

    # PyTorch NCHW flatten order: (B, 32, 6, 6) -> (B, 1152).
    flat = jnp.transpose(x, (1, 0, 2, 3)).reshape(B, 1152)

    # dropout(p=0.2) before fc1: eval-mode identity (fused kernel does the rest).
    # TODO(synk): fc1 weight DMA is not prefetched across calls nor quantized.
    return fc_head(flat, *params["fc1"], *params["out"])    # (B, 10) f32


if __name__ == "__main__":
    key = jax.random.PRNGKey(0)
    k_params, k_x = jax.random.split(key)

    params = prepare_params(init_params(k_params))
    # Input size implied by the module: 104x104 -> 1152 flatten before fc1.
    x = jax.random.normal(k_x, (2, 3, 104, 104), dtype=jnp.float32)

    out = jax.jit(cnn_forward)(x, params)
    out = jax.block_until_ready(out)

    assert out.shape == (2, 10)
    assert bool(jnp.all(jnp.isfinite(out)))
    assert bool(jnp.allclose(jnp.sum(out, axis=-1), 1.0, atol=1e-4))
    print("KERNEL_OK")
</pallas_src>

<mosaic_0001>
module attributes {stable_mosaic.version = 11 : i64} {
  func.func @_conv_mm_kernel(%arg0: i32, %arg1: memref<32x27xbf16, #tpu.memory_space<vmem>>, %arg2: memref<27x1792xbf16, #tpu.memory_space<vmem>>, %arg3: memref<32x1xf32, #tpu.memory_space<vmem>>, %arg4: memref<32x1792xbf16, #tpu.memory_space<vmem>>) attributes {dimension_semantics = [#tpu.dimension_semantics<parallel>], iteration_bounds = array<i64: 3>, scalar_prefetch = 0 : i64, scratch_operands = 0 : i64, tpu.core_type = #tpu.core_type<tc>, window_params = [{pipeline_mode = #tpu.pipeline_mode<synchronous>, transform_indices = @transform_0, window_bounds = array<i64: 32, 27>}, {transform_indices = @transform_1, window_bounds = array<i64: 27, 1792>}, {pipeline_mode = #tpu.pipeline_mode<synchronous>, transform_indices = @transform_2, window_bounds = array<i64: 32, 1>}, {transform_indices = @transform_3, window_bounds = array<i64: 32, 1792>}]} {
    %c0 = arith.constant 0 : index
    %c0_0 = arith.constant 0 : index
    %0 = vector.load %arg1[%c0, %c0_0] : memref<32x27xbf16, #tpu.memory_space<vmem>>, vector<32x27xbf16>
    %c0_1 = arith.constant 0 : index
    %c0_2 = arith.constant 0 : index
    %1 = vector.load %arg2[%c0_1, %c0_2] : memref<27x1792xbf16, #tpu.memory_space<vmem>>, vector<27x1792xbf16>
    %cst = arith.constant dense<0.000000e+00> : vector<32x1792xf32>
    %2 = tpu.matmul %0, %1, %cst {dimension_numbers = #tpu.dot_dimension_numbers<[1], [0], [0], [1], [0, 0, 1, 1], [], []>} : vector<32x27xbf16>, vector<27x1792xbf16>, vector<32x1792xf32> -> vector<32x1792xf32>
    %c0_3 = arith.constant 0 : index
    %c0_4 = arith.constant 0 : index
    %3 = vector.load %arg3[%c0_3, %c0_4] : memref<32x1xf32, #tpu.memory_space<vmem>>, vector<32x1xf32>
    %4 = vector.broadcast %3 : vector<32x1xf32> to vector<32x1792xf32>
    %5 = arith.addf %2, %4 : vector<32x1792xf32>
    %cst_5 = arith.constant 0.000000e+00 : f32
    %6 = vector.broadcast %cst_5 : f32 to vector<32x1792xf32>
    %7 = arith.maximumf %5, %6 : vector<32x1792xf32>
    %8 = arith.truncf %7 : vector<32x1792xf32> to vector<32x1792xbf16>
    %c0_6 = arith.constant 0 : index
    %c0_7 = arith.constant 0 : index
    %9 = vector.load %arg4[%c0_6, %c0_7] : memref<32x1792xbf16, #tpu.memory_space<vmem>>, vector<32x1792xbf16>
    tpu.vector_store %arg4[%c0_6, %c0_7], %8 {strides = array<i32>} : memref<32x1792xbf16, #tpu.memory_space<vmem>>, vector<32x1792xbf16>,
    return
  }
  func.func @transform_0(%arg0: i32) -> (i32, i32) {
    %c0_i32 = arith.constant 0 : i32
    %c0_i32_0 = arith.constant 0 : i32
    %c0_i32_1 = arith.constant 0 : i32
    return %c0_i32, %c0_i32_0 : i32, i32
  }
  func.func @transform_1(%arg0: i32) -> (i32, i32) {
    %c0_i32 = arith.constant 0 : i32
    %c0_i32_0 = arith.constant 0 : i32
    return %c0_i32, %arg0 : i32, i32
  }
  func.func @transform_2(%arg0: i32) -> (i32, i32) {
    %c0_i32 = arith.constant 0 : i32
    %c0_i32_0 = arith.constant 0 : i32
    %c0_i32_1 = arith.constant 0 : i32
    return %c0_i32, %c0_i32_0 : i32, i32
  }
  func.func @transform_3(%arg0: i32) -> (i32, i32) {
    %c0_i32 = arith.constant 0 : i32
    %c0_i32_0 = arith.constant 0 : i32
    return %c0_i32, %arg0 : i32, i32
  }
}

module attributes {stable_mosaic.version = 11 : i64} {
  func.func @_conv_mm_kernel(%arg0: i32, %arg1: memref<64x288xbf16, #tpu.memory_space<vmem>>, %arg2: memref<288x1280xbf16, #tpu.memory_space<vmem>>, %arg3: memref<64x1xf32, #tpu.memory_space<vmem>>, %arg4: memref<64x1280xbf16, #tpu.memory_space<vmem>>) attributes {dimension_semantics = [#tpu.dimension_semantics<parallel>], iteration_bounds = array<i64: 1>, scalar_prefetch = 0 : i64, scratch_operands = 0 : i64, tpu.core_type = #tpu.core_type<tc>, window_params = [{pipeline_mode = #tpu.pipeline_mode<synchronous>, transform_indices = @transform_0, window_bounds = array<i64: 64, 288>}, {transform_indices = @transform_1, window_bounds = array<i64: 288, 1280>}, {pipeline_mode = #tpu.pipeline_mode<synchronous>, transform_indices = @transform_2, window_bounds = array<i64: 64, 1>}, {transform_indices = @transform_3, window_bounds = array<i64: 64, 1280>}]} {
    %c0 = arith.constant 0 : index
    %c0_0 = arith.constant 0 : index
    %0 = vector.load %arg1[%c0, %c0_0] : memref<64x288xbf16, #tpu.memory_space<vmem>>, vector<64x288xbf16>
    %c0_1 = arith.constant 0 : index
    %c0_2 = arith.constant 0 : index
    %1 = vector.load %arg2[%c0_1, %c0_2] : memref<288x1280xbf16, #tpu.memory_space<vmem>>, vector<288x1280xbf16>
    %cst = arith.constant dense<0.000000e+00> : vector<64x1280xf32>
    %2 = tpu.matmul %0, %1, %cst {dimension_numbers = #tpu.dot_dimension_numbers<[1], [0], [0], [1], [0, 0, 1, 1], [], []>} : vector<64x288xbf16>, vector<288x1280xbf16>, vector<64x1280xf32> -> vector<64x1280xf32>
    %c0_3 = arith.constant 0 : index
    %c0_4 = arith.constant 0 : index
    %3 = vector.load %arg3[%c0_3, %c0_4] : memref<64x1xf32, #tpu.memory_space<vmem>>, vector<64x1xf32>
    %4 = vector.broadcast %3 : vector<64x1xf32> to vector<64x1280xf32>
    %5 = arith.addf %2, %4 : vector<64x1280xf32>
    %cst_5 = arith.constant 0.000000e+00 : f32
    %6 = vector.broadcast %cst_5 : f32 to vector<64x1280xf32>
    %7 = arith.maximumf %5, %6 : vector<64x1280xf32>
    %8 = arith.truncf %7 : vector<64x1280xf32> to vector<64x1280xbf16>
    %c0_6 = arith.constant 0 : index
    %c0_7 = arith.constant 0 : index
    %9 = vector.load %arg4[%c0_6, %c0_7] : memref<64x1280xbf16, #tpu.memory_space<vmem>>, vector<64x1280xbf16>
    tpu.vector_store %arg4[%c0_6, %c0_7], %8 {strides = array<i32>} : memref<64x1280xbf16, #tpu.memory_space<vmem>>, vector<64x1280xbf16>,
    return
  }
  func.func @transform_0(%arg0: i32) -> (i32, i32) {
    %c0_i32 = arith.constant 0 : i32
    %c0_i32_0 = arith.constant 0 : i32
    %c0_i32_1 = arith.constant 0 : i32
    return %c0_i32, %c0_i32_0 : i32, i32
  }
  func.func @transform_1(%arg0: i32) -> (i32, i32) {
    %c0_i32 = arith.constant 0 : i32
    %c0_i32_0 = arith.constant 0 : i32
    return %c0_i32, %arg0 : i32, i32
  }
  func.func @transform_2(%arg0: i32) -> (i32, i32) {
    %c0_i32 = arith.constant 0 : i32
    %c0_i32_0 = arith.constant 0 : i32
    %c0_i32_1 = arith.constant 0 : i32
    return %c0_i32, %c0_i32_0 : i32, i32
  }
  func.func @transform_3(%arg0: i32) -> (i32, i32) {
    %c0_i32 = arith.constant 0 : i32
    %c0_i32_0 = arith.constant 0 : i32
    return %c0_i32, %arg0 : i32, i32
  }
}

module attributes {stable_mosaic.version = 11 : i64} {
  func.func @_conv_mm_kernel(%arg0: i32, %arg1: memref<32x576xbf16, #tpu.memory_space<vmem>>, %arg2: memref<576x384xbf16, #tpu.memory_space<vmem>>, %arg3: memref<32x1xf32, #tpu.memory_space<vmem>>, %arg4: memref<32x384xbf16, #tpu.memory_space<vmem>>) attributes {dimension_semantics = [#tpu.dimension_semantics<parallel>], iteration_bounds = array<i64: 1>, scalar_prefetch = 0 : i64, scratch_operands = 0 : i64, tpu.core_type = #tpu.core_type<tc>, window_params = [{pipeline_mode = #tpu.pipeline_mode<synchronous>, transform_indices = @transform_0, window_bounds = array<i64: 32, 576>}, {transform_indices = @transform_1, window_bounds = array<i64: 576, 384>}, {pipeline_mode = #tpu.pipeline_mode<synchronous>, transform_indices = @transform_2, window_bounds = array<i64: 32, 1>}, {transform_indices = @transform_3, window_bounds = array<i64: 32, 384>}]} {
    %c0 = arith.constant 0 : index
    %c0_0 = arith.constant 0 : index
    %0 = vector.load %arg1[%c0, %c0_0] : memref<32x576xbf16, #tpu.memory_space<vmem>>, vector<32x576xbf16>
    %c0_1 = arith.constant 0 : index
    %c0_2 = arith.constant 0 : index
    %1 = vector.load %arg2[%c0_1, %c0_2] : memref<576x384xbf16, #tpu.memory_space<vmem>>, vector<576x384xbf16>
    %cst = arith.constant dense<0.000000e+00> : vector<32x384xf32>
    %2 = tpu.matmul %0, %1, %cst {dimension_numbers = #tpu.dot_dimension_numbers<[1], [0], [0], [1], [0, 0, 1, 1], [], []>} : vector<32x576xbf16>, vector<576x384xbf16>, vector<32x384xf32> -> vector<32x384xf32>
    %c0_3 = arith.constant 0 : index
    %c0_4 = arith.constant 0 : index
    %3 = vector.load %arg3[%c0_3, %c0_4] : memref<32x1xf32, #tpu.memory_space<vmem>>, vector<32x1xf32>
    %4 = vector.broadcast %3 : vector<32x1xf32> to vector<32x384xf32>
    %5 = arith.addf %2, %4 : vector<32x384xf32>
    %cst_5 = arith.constant 0.000000e+00 : f32
    %6 = vector.broadcast %cst_5 : f32 to vector<32x384xf32>
    %7 = arith.maximumf %5, %6 : vector<32x384xf32>
    %8 = arith.truncf %7 : vector<32x384xf32> to vector<32x384xbf16>
    %c0_6 = arith.constant 0 : index
    %c0_7 = arith.constant 0 : index
    %9 = vector.load %arg4[%c0_6, %c0_7] : memref<32x384xbf16, #tpu.memory_space<vmem>>, vector<32x384xbf16>
    tpu.vector_store %arg4[%c0_6, %c0_7], %8 {strides = array<i32>} : memref<32x384xbf16, #tpu.memory_space<vmem>>, vector<32x384xbf16>,
    return
  }
  func.func @transform_0(%arg0: i32) -> (i32, i32) {
    %c0_i32 = arith.constant 0 : i32
    %c0_i32_0 = arith.constant 0 : i32
    %c0_i32_1 = arith.constant 0 : i32
    return %c0_i32, %c0_i32_0 : i32, i32
  }
  func.func @transform_1(%arg0: i32) -> (i32, i32) {
    %c0_i32 = arith.constant 0 : i32
    %c0_i32_0 = arith.constant 0 : i32
    return %c0_i32, %arg0 : i32, i32
  }
  func.func @transform_2(%arg0: i32) -> (i32, i32) {
    %c0_i32 = arith.constant 0 : i32
    %c0_i32_0 = arith.constant 0 : i32
    %c0_i32_1 = arith.constant 0 : i32
    return %c0_i32, %c0_i32_0 : i32, i32
  }
  func.func @transform_3(%arg0: i32) -> (i32, i32) {
    %c0_i32 = arith.constant 0 : i32
    %c0_i32_0 = arith.constant 0 : i32
    return %c0_i32, %arg0 : i32, i32
  }
}

module attributes {stable_mosaic.version = 11 : i64} {
  func.func @_fc_head_kernel(%arg0: i32, %arg1: memref<2x1152xbf16, #tpu.memory_space<vmem>>, %arg2: memref<1152x2048xbf16, #tpu.memory_space<vmem>>, %arg3: memref<1x2048xf32, #tpu.memory_space<vmem>>, %arg4: memref<2048x10xbf16, #tpu.memory_space<vmem>>, %arg5: memref<1x10xf32, #tpu.memory_space<vmem>>, %arg6: memref<2x10xf32, #tpu.memory_space<vmem>>, %arg7: memref<2x10xf32, #tpu.memory_space<vmem>>) attributes {dimension_semantics = [#tpu.dimension_semantics<arbitrary>], iteration_bounds = array<i64: 1>, scalar_prefetch = 0 : i64, scratch_operands = 1 : i64, tpu.core_type = #tpu.core_type<tc>, window_params = [{pipeline_mode = #tpu.pipeline_mode<synchronous>, transform_indices = @transform_0, window_bounds = array<i64: 2, 1152>}, {transform_indices = @transform_1, window_bounds = array<i64: 1152, 2048>}, {transform_indices = @transform_2, window_bounds = array<i64: 1, 2048>}, {transform_indices = @transform_3, window_bounds = array<i64: 2048, 10>}, {pipeline_mode = #tpu.pipeline_mode<synchronous>, transform_indices = @transform_4, window_bounds = array<i64: 1, 10>}, {pipeline_mode = #tpu.pipeline_mode<synchronous>, transform_indices = @transform_5, window_bounds = array<i64: 2, 10>}]} {
    %c0_i32 = arith.constant 0 : i32
    %0 = arith.cmpi eq, %arg0, %c0_i32 : i32
    %1 = arith.extui %0 : i1 to i32
    %c0_i32_0 = arith.constant 0 : i32
    %2 = arith.cmpi ne, %1, %c0_i32_0 : i32
    scf.if %2 {
      %cst_16 = arith.constant 0.000000e+00 : f32
      %20 = vector.broadcast %cst_16 : f32 to vector<2x10xf32>
      %c0_17 = arith.constant 0 : index
      %c0_18 = arith.constant 0 : index
      %21 = vector.load %arg7[%c0_17, %c0_18] : memref<2x10xf32, #tpu.memory_space<vmem>>, vector<2x10xf32>
      tpu.vector_store %arg7[%c0_17, %c0_18], %20 {strides = array<i32>} : memref<2x10xf32, #tpu.memory_space<vmem>>, vector<2x10xf32>,
    } else {
    }
    %c0 = arith.constant 0 : index
    %c0_1 = arith.constant 0 : index
    %3 = vector.load %arg1[%c0, %c0_1] : memref<2x1152xbf16, #tpu.memory_space<vmem>>, vector<2x1152xbf16>
    %c0_2 = arith.constant 0 : index
    %c0_3 = arith.constant 0 : index
    %4 = vector.load %arg2[%c0_2, %c0_3] : memref<1152x2048xbf16, #tpu.memory_space<vmem>>, vector<1152x2048xbf16>
    %cst = arith.constant dense<0.000000e+00> : vector<2x2048xf32>
    %5 = tpu.matmul %3, %4, %cst {dimension_numbers = #tpu.dot_dimension_numbers<[1], [0], [0], [1], [0, 0, 1, 1], [], []>} : vector<2x1152xbf16>, vector<1152x2048xbf16>, vector<2x2048xf32> -> vector<2x2048xf32>
    %c0_4 = arith.constant 0 : index
    %c0_5 = arith.constant 0 : index
    %6 = vector.load %arg3[%c0_4, %c0_5] : memref<1x2048xf32, #tpu.memory_space<vmem>>, vector<1x2048xf32>
    %7 = vector.broadcast %6 : vector<1x2048xf32> to vector<2x2048xf32>
    %8 = arith.addf %5, %7 : vector<2x2048xf32>
    %cst_6 = arith.constant 0.000000e+00 : f32
    %9 = vector.broadcast %cst_6 : f32 to vector<2x2048xf32>
    %10 = arith.maximumf %8, %9 : vector<2x2048xf32>
    %c0_7 = arith.constant 0 : index
    %c0_8 = arith.constant 0 : index
    %11 = vector.load %arg7[%c0_7, %c0_8] : memref<2x10xf32, #tpu.memory_space<vmem>>, vector<2x10xf32>
    %12 = arith.truncf %10 : vector<2x2048xf32> to vector<2x2048xbf16>
    %c0_9 = arith.constant 0 : index
    %c0_10 = arith.constant 0 : index
    %13 = vector.load %arg4[%c0_9, %c0_10] : memref<2048x10xbf16, #tpu.memory_space<vmem>>, vector<2048x10xbf16>
    %cst_11 = arith.constant dense<0.000000e+00> : vector<2x10xf32>
    %14 = tpu.matmul %12, %13, %cst_11 {dimension_numbers = #tpu.dot_dimension_numbers<[1], [0], [0], [1], [0, 0, 1, 1], [], []>} : vector<2x2048xbf16>, vector<2048x10xbf16>, vector<2x10xf32> -> vector<2x10xf32>
    %15 = arith.addf %11, %14 : vector<2x10xf32>
    %c0_12 = arith.constant 0 : index
    %c0_13 = arith.constant 0 : index
    %16 = vector.load %arg7[%c0_12, %c0_13] : memref<2x10xf32, #tpu.memory_space<vmem>>, vector<2x10xf32>
    tpu.vector_store %arg7[%c0_12, %c0_13], %15 {strides = array<i32>} : memref<2x10xf32, #tpu.memory_space<vmem>>, vector<2x10xf32>,
    %c0_i32_14 = arith.constant 0 : i32
    %17 = arith.cmpi eq, %arg0, %c0_i32_14 : i32
    %18 = arith.extui %17 : i1 to i32
    %c0_i32_15 = arith.constant 0 : i32
    %19 = arith.cmpi ne, %18, %c0_i32_15 : i32
    scf.if %19 {
      %c0_16 = arith.constant 0 : index
      %c0_17 = arith.constant 0 : index
      %20 = vector.load %arg7[%c0_16, %c0_17] : memref<2x10xf32, #tpu.memory_space<vmem>>, vector<2x10xf32>
      %c0_18 = arith.constant 0 : index
      %c0_19 = arith.constant 0 : index
      %21 = vector.load %arg5[%c0_18, %c0_19] : memref<1x10xf32, #tpu.memory_space<vmem>>, vector<1x10xf32>
      %22 = vector.broadcast %21 : vector<1x10xf32> to vector<2x10xf32>
      %23 = arith.addf %20, %22 : vector<2x10xf32>
      %cst_20 = arith.constant dense<0xFF800000> : vector<2xf32>
      %24 = vector.multi_reduction <maximumf>, %23, %cst_20 [1] : vector<2x10xf32> to vector<2xf32>
      %25 = vector.shape_cast %24 : vector<2xf32> to vector<2x1xf32>
      %26 = vector.broadcast %25 : vector<2x1xf32> to vector<2x10xf32>
      %27 = arith.subf %23, %26 : vector<2x10xf32>
      %28 = math.exp %27 : vector<2x10xf32>
      %cst_21 = arith.constant dense<0.000000e+00> : vector<2xf32>
      %29 = vector.multi_reduction <add>, %28, %cst_21 [1] : vector<2x10xf32> to vector<2xf32>
      %30 = vector.shape_cast %29 : vector<2xf32> to vector<2x1xf32>
      %31 = vector.broadcast %30 : vector<2x1xf32> to vector<2x10xf32>
      %32 = arith.divf %28, %31 : vector<2x10xf32>
      %c0_22 = arith.constant 0 : index
      %c0_23 = arith.constant 0 : index
      %33 = vector.load %arg6[%c0_22, %c0_23] : memref<2x10xf32, #tpu.memory_space<vmem>>, vector<2x10xf32>
      tpu.vector_store %arg6[%c0_22, %c0_23], %32 {strides = array<i32>} : memref<2x10xf32, #tpu.memory_space<vmem>>, vector<2x10xf32>,
    } else {
    }
    return
  }
  func.func @transform_0(%arg0: i32) -> (i32, i32) {
    %c0_i32 = arith.constant 0 : i32
    %c0_i32_0 = arith.constant 0 : i32
    %c0_i32_1 = arith.constant 0 : i32
    return %c0_i32, %c0_i32_0 : i32, i32
  }
  func.func @transform_1(%arg0: i32) -> (i32, i32) {
    %c0_i32 = arith.constant 0 : i32
    %c0_i32_0 = arith.constant 0 : i32
    return %c0_i32, %arg0 : i32, i32
  }
  func.func @transform_2(%arg0: i32) -> (i32, i32) {
    %c0_i32 = arith.constant 0 : i32
    %c0_i32_0 = arith.constant 0 : i32
    return %c0_i32, %arg0 : i32, i32
  }
  func.func @transform_3(%arg0: i32) -> (i32, i32) {
    %c0_i32 = arith.constant 0 : i32
    %c0_i32_0 = arith.constant 0 : i32
    return %arg0, %c0_i32 : i32, i32
  }
  func.func @transform_4(%arg0: i32) -> (i32, i32) {
    %c0_i32 = arith.constant 0 : i32
    %c0_i32_0 = arith.constant 0 : i32
    %c0_i32_1 = arith.constant 0 : i32
    return %c0_i32, %c0_i32_0 : i32, i32
  }
  func.func @transform_5(%arg0: i32) -> (i32, i32) {
    %c0_i32 = arith.constant 0 : i32
    %c0_i32_0 = arith.constant 0 : i32
    %c0_i32_1 = arith.constant 0 : i32
    return %c0_i32, %c0_i32_0 : i32, i32
  }
}

</mosaic_0001>

<bundles_post_ra>
// kernel: cnn_forward.4
= control target key start
LH: loop header
LB: loop body
LE: loop exit
PB: predicated region body
PF: predicated region fallthrough
CT: control target
= control target key end

     0   :  { %s1482_s12 = smov 0   ;;  %s1484_s13 = smov 0   ;;  %s1870_s0 = inlined_call_operand.vmem [shape: bf16[32,27], index: 0, kind: input, shape index: {}]   ;;  %s1871_s1 = inlined_call_operand.vmem [shape: bf16[27,5376], index: 1, kind: input, shape index: {}]   ;;  %s1872_s2 = inlined_call_operand.vmem [shape: f32[32,1], index: 2, kind: input, shape index: {}]   ;;  %s1873_s3 = inlined_call_operand.vmem [shape: bf16[32,5376], index: 3, kind: output, shape index: {}]  }
   0x1   :  { %s1486_s14 = smov 0  }
   0x2 LB: > { %s1247_s15 = sadd.s32 4294967295, %s1458_s14   ;;  %s1499_s16 = sadd.s32 1, %s1458_s14   ;;  %s1458_s14 = sphi %s1486_s14, %s1877_s14   ;;  %s1454_s13 = sphi %s1484_s13, %s1876_s13   ;;  %s1450_s12 = sphi %s1482_s12, %s1875_s12  }
   0x3   : > { %s38_s17 = ssub.s32 %s1458_s14, %s1499_s16  ;;  %s41_s18 = sadd.s32 1, %s1454_s13 }
   0x4   : > { %p39_p0 = scmp.eq.s32.totalorder %s38_s17, 0  ;;  %p48_p1 = scmp.ne.s32.totalorder %s1454_s13, %s1450_s12 }
   0x5   : > { %p49_p2 = scmp.eq.s32.totalorder %s1458_s14, 0  ;;  %p99_p3 = scmp.eq.s32.totalorder %s1247_s15, 2 }
   0x6   : > { %s1510_s19 = scalar_select %p39_p0, %s1454_s13, %s41_s18  }
   0x7   : > { %p50_p4 = por %p49_p2, %p48_p1  ;;  %p1512_p5 = por %p99_p3, %p48_p1 }
   0x8   : > { %p1250_p6 = scmp.ge.s32.totalorder %s1458_s14, 3 }
   0xa   : > { %127 = sbr.rel (%p1250_p6) target bundleno = 36 (0x24), region = 24 }
  0x11   : > { %130 = sbr.rel (!%p50_p4) target bundleno = 36 (0x24), region = 28  ;;  %s132_s21 = sand.u32 (%p50_p4), 1, %s1454_s13  }
  0x12   : > { %s1328_s22 = smul.u32 (%p50_p4), 56, %s1458_s14 }
  0x13   : > { %s1362_s23 = smul.u32 (%p50_p4), 224, %s132_s21 }
  0x14   : > { %s1522_s26 = scalar_lea.vmem (%p50_p4), %s1871_s1, %s1328_s22 }
  0x15   : > { %v150_v0 = vld [vmem:[%s1522_s26] sm:$0xff] (%p50_p4)  ;;  %v152_v1 = vld [vmem:[%s1522_s26 + $0x8] sm:$0xff] (%p50_p4)  ;;  %v154_v2 = vld [vmem:[%s1522_s26 + $0x10] sm:$0xff] (%p50_p4)  ;;  %s1527_s27 = scalar_lea.vmem (%p50_p4), [#allocation2], %s1362_s23 }
  0x16   : > { %151 = vst [vmem:[%s1527_s27] sm:$0xff] (%p50_p4), %v150_v0  ;;  %153 = vst [vmem:[%s1527_s27 + $0x8] sm:$0xff] (%p50_p4), %v152_v1  ;;  %v156_v3 = vld [vmem:[%s1522_s26 + $0x18] sm:$0xff] (%p50_p4)  ;;  %v158_v4 = vld [vmem:[%s1522_s26 + $0x20] sm:$0xff] (%p50_p4) }
  0x17   : > { %155 = vst [vmem:[%s1527_s27 + $0x10] sm:$0xff] (%p50_p4), %v154_v2  ;;  %v160_v5 = vld [vmem:[%s1522_s26 + $0x28] sm:$0xff] (%p50_p4)  ;;  %157 = vst [vmem:[%s1527_s27 + $0x18] sm:$0xff] (%p50_p4), %v156_v3  ;;  %v162_v6 = vld [vmem:[%s1522_s26 + $0x30] sm:$0xff] (%p50_p4) }
  0x18   : > { %159 = vst [vmem:[%s1527_s27 + $0x20] sm:$0xff] %v158_v4  ;;  %161 = vst [vmem:[%s1527_s27 + $0x28] sm:$0xff] %v160_v5  ;;  %v164_v7 = vld [vmem:[%s1522_s26 + $0xa8] sm:$0xff]  ;;  %v166_v8 = vld [vmem:[%s1522_s26 + $0xb0] sm:$0xff] }
  0x19   : > { %163 = vst [vmem:[%s1527_s27 + $0x30] sm:$0xff] %v162_v6  ;;  %165 = vst [vmem:[%s1527_s27 + $0x38] sm:$0xff] %v164_v7  ;;  %v168_v9 = vld [vmem:[%s1522_s26 + $0xb8] sm:$0xff]  ;;  %v170_v10 = vld [vmem:[%s1522_s26 + $0xc0] sm:$0xff] }
  0x1a   : > { %167 = vst [vmem:[%s1527_s27 + $0x40] sm:$0xff] %v166_v8  ;;  %v172_v11 = vld [vmem:[%s1522_s26 + $0xc8] sm:$0xff]  ;;  %169 = vst [vmem:[%s1527_s27 + $0x48] sm:$0xff] %v168_v9  ;;  %v174_v12 = vld [vmem:[%s1522_s26 + $0xd0] sm:$0xff] }
  0x1b   : > { %171 = vst [vmem:[%s1527_s27 + $0x50] sm:$0xff] %v170_v10  ;;  %173 = vst [vmem:[%s1527_s27 + $0x58] sm:$0xff] %v172_v11  ;;  %v176_v13 = vld [vmem:[%s1522_s26 + $0xd8] sm:$0xff]  ;;  %v178_v14 = vld [vmem:[%s1522_s26 + $0x150] sm:$0xff] }
  0x1c   : > { %175 = vst [vmem:[%s1527_s27 + $0x60] sm:$0xff] %v174_v12  ;;  %177 = vst [vmem:[%s1527_s27 + $0x68] sm:$0xff] %v176_v13  ;;  %v180_v15 = vld [vmem:[%s1522_s26 + $0x158] sm:$0xff]  ;;  %v182_v16 = vld [vmem:[%s1522_s26 + $0x160] sm:$0xff] }
  0x1d   : > { %179 = vst [vmem:[%s1527_s27 + $0x70] sm:$0xff] %v178_v14  ;;  %v184_v17 = vld [vmem:[%s1522_s26 + $0x168] sm:$0xff]  ;;  %181 = vst [vmem:[%s1527_s27 + $0x78] sm:$0xff] %v180_v15  ;;  %v186_v18 = vld [vmem:[%s1522_s26 + $0x170] sm:$0xff] }
  0x1e   : > { %183 = vst [vmem:[%s1527_s27 + $0x80] sm:$0xff] %v182_v16  ;;  %185 = vst [vmem:[%s1527_s27 + $0x88] sm:$0xff] %v184_v17  ;;  %v188_v19 = vld [vmem:[%s1522_s26 + $0x178] sm:$0xff]  ;;  %v190_v20 = vld [vmem:[%s1522_s26 + $0x180] sm:$0xff] }
  0x1f   : > { %187 = vst [vmem:[%s1527_s27 + $0x90] sm:$0xff] %v186_v18  ;;  %189 = vst [vmem:[%s1527_s27 + $0x98] sm:$0xff] %v188_v19  ;;  %v192_v21 = vld [vmem:[%s1522_s26 + $0x1f8] sm:$0xff]  ;;  %v194_v22 = vld [vmem:[%s1522_s26 + $0x200] sm:$0xff] }
  0x20   : > { %191 = vst [vmem:[%s1527_s27 + $0xa0] sm:$0xff] %v190_v20  ;;  %v196_v23 = vld [vmem:[%s1522_s26 + $0x208] sm:$0xff]  ;;  %193 = vst [vmem:[%s1527_s27 + $0xa8] sm:$0xff] %v192_v21  ;;  %v198_v24 = vld [vmem:[%s1522_s26 + $0x210] sm:$0xff] }
  0x21   : > { %195 = vst [vmem:[%s1527_s27 + $0xb0] sm:$0xff] %v194_v22  ;;  %197 = vst [vmem:[%s1527_s27 + $0xb8] sm:$0xff] %v196_v23  ;;  %v200_v25 = vld [vmem:[%s1522_s26 + $0x218] sm:$0xff]  ;;  %v202_v26 = vld [vmem:[%s1522_s26 + $0x220] sm:$0xff] }
  0x22   : > { %199 = vst [vmem:[%s1527_s27 + $0xc0] sm:$0xff] %v198_v24  ;;  %201 = vst [vmem:[%s1527_s27 + $0xc8] sm:$0xff] %v200_v25  ;;  %v204_v27 = vld [vmem:[%s1522_s26 + $0x228] sm:$0xff] }
  0x23   : > { %203 = vst [vmem:[%s1527_s27 + $0xd0] sm:$0xff] %v202_v26  ;;  %205 = vst [vmem:[%s1527_s27 + $0xd8] sm:$0xff] %v204_v27 }
  0x24 PF: > { %p1252_p7 = scmp.ge.s32.totalorder %s1458_s14, 1  ;;  %p210_p8 = scmp.lt.s32.totalorder %s1458_s14, 4 }
  0x26   : > { %p211_p9 = pnand %p1252_p7, %p210_p8 }
  0x27   : > { %s217_s28 = sand.u32 (!%p211_p9), 1, %s1450_s12   ;;  %vm441_vm0 = vcmask (!%p211_p9), 1044480   ;;  %v1460_v28 = vmov (!%p211_p9), 0   ;;  %vm442_vm1 = vcmask (!%p211_p9), 1045504   ;;  %v1461_v29 = vmov (!%p211_p9), 65535   ;;  %v276_v31 = vld [vmem:[%s1872_s2 + $0x10] sm:$0xff] (!%p211_p9) }
  0x28   : > { %214 = sbr.rel (%p211_p9) target bundleno = 331 (0x14b), region = 51  ;;  %519 = vmatprep.mubr.bf16.mxu0 (!%p211_p9), %v1460_v28  ;;  %529 = vmatprep.mubr.bf16.mxu1 (!%p211_p9), %v1460_v28  ;;  %v443_v30 = vsel (!%p211_p9), %vm441_vm0, 4294967295, %v1461_v29  ;;  %v274_v32 = vld [vmem:[%s1872_s2] sm:$0xff] (!%p211_p9)  ;;  %v1616_v41 = vld [vmem:[%s1870_s0 + $0x8] sm:$0xff] (!%p211_p9)   ;;  %vm434_vm2 = vcmask (!%p211_p9), 220160   ;;  %v277_v4 = vld [vmem:[%s1872_s2 + $0x18] sm:$0xff] (!%p211_p9) }
  0x29   : > { %s1585_s29 = smul.u32 (!%p211_p9), 224, %s217_s28  ;;  %1391 = vset.pattern.permute.xlu1 (!%p211_p9), %v1460_v28  ;;  %1390 = vset.pattern.permute.xlu0 (!%p211_p9), %v1460_v28  ;;  %v1602_v35 = vsel (!%p211_p9), %vm442_vm1, %v443_v30, 0  ;;  %v1611_v40 = vld [vmem:[%s1870_s0] sm:$0xff] (!%p211_p9)   ;;  %v275_v5 = vld [vmem:[%s1872_s2 + $0x8] sm:$0xff] (!%p211_p9) }
  0x2a   : > { %290 = vperm.xlu1 (!%p211_p9), %1391, %v276_v31   ;;  %280 = vperm.xlu0 (!%p211_p9), %1390, %v274_v32  }
  0x2b   : > { %s1598_s7 = scalar_lea.vmem (!%p211_p9), [#allocation2], %s1585_s29  ;;  %s1717_s22 = scalar_lea.vmem (!%p211_p9), [#allocation3], %s1585_s29 }
  0x2c   : > { %v1392_v33 = vld [vmem:[%s1598_s7 + $0x4] ss:$56 sps:$4 sm:$0xff] (!%p211_p9)   ;;  %v1394_v34 = vld [vmem:[%s1598_s7] ss:$56 sps:$4 sm:$0xff] (!%p211_p9)   ;;  %v1403_v44 = vld [vmem:[%s1598_s7 + $0x10] ss:$56 sps:$4 sm:$0xff] (!%p211_p9)  }
  0x2d   : > { %487 = vmatprep.subr.bf16.mxu0 (!%p211_p9), %v1392_v33  ;;  %1358 = vmatprep.subr.bf16.mxu1 (!%p211_p9), %v1392_v33  ;;  %v1395_v36 = vld [vmem:[%s1598_s7 + $0x74] ss:$56 sps:$4 sm:$0x3f] (!%p211_p9)   ;;  %v1397_v37 = vld [vmem:[%s1598_s7 + $0x70] ss:$56 sps:$4 sm:$0x3f] (!%p211_p9)  }
  0x2e   : > { %488 = vmatpush1.bf16.msra.mxu0 (!%p211_p9), %v1394_v34  ;;  %1360 = vmatpush1.bf16.msra.mxu1 (!%p211_p9), %v1394_v34  ;;  %v449_v38 = vand.u32 (!%p211_p9), %v1395_v36, %v1602_v35  ;;  %v446_v39 = vand.u32 (!%p211_p9), %v1397_v37, %v1602_v35  ;;  %v1402_v42 = vld [vmem:[%s1598_s7 + $0xc] ss:$56 sps:$4 sm:$0xff] (!%p211_p9)   ;;  %v1400_v43 = vld [vmem:[%s1598_s7 + $0x8] ss:$56 sps:$4 sm:$0xff] (!%p211_p9)   ;;  %v1414_v54 = vld [vmem:[%s1598_s7 + $0x1c] ss:$56 sps:$4 sm:$0xff] (!%p211_p9)  }
  0x2f   : > { %v1405_v45 = vld [vmem:[%s1598_s7 + $0x14] ss:$56 sps:$4 sm:$0xff]   ;;  %v1406_v46 = vld [vmem:[%s1598_s7 + $0x78] ss:$56 sps:$4 sm:$0x3f]   ;;  %295 = vperm.xlu1 %1391, %v277_v4   ;;  %285 = vperm.xlu0 %1390, %v275_v5   ;;  %s1357_s23 = smul.u32 (%p1512_p5), 56, %s1247_s15 }
  0x30   : > { %489 = vmatprep.subr.bf16.mxu0 %v449_v38  ;;  %1359 = vmatprep.subr.bf16.mxu1 %v449_v38  ;;  %v1408_v47 = vld [vmem:[%s1598_s7 + $0x7c] ss:$56 sps:$4 sm:$0x3f]   ;;  %v1409_v48 = vld [vmem:[%s1598_s7 + $0x80] ss:$56 sps:$4 sm:$0x3f]   ;;  %v452_v52 = vand.u32 %v1406_v46, %v1602_v35 }
  0x31   : > { %v1411_v49 = vld [vmem:[%s1598_s7 + $0x84] ss:$56 sps:$4 sm:$0x3f]   ;;  %v455_v50 = vand.u32 %v1408_v47, %v1602_v35  ;;  %v458_v53 = vand.u32 %v1409_v48, %v1602_v35  ;;  %v1412_v56 = vld [vmem:[%s1598_s7 + $0x18] ss:$56 sps:$4 sm:$0xff]   ;;  %s1808_s24 = scalar_lea.vmem (%p1512_p5), %s1873_s3, %s1357_s23 }
  0x32   : > { %490 = vmatpush1.bf16.msra.mxu0 %v446_v39  ;;  %1361 = vmatpush1.bf16.msra.mxu1 %v446_v39  ;;  %v461_v51 = vand.u32 %v1411_v49, %v1602_v35  ;;  %v1417_v55 = vld [vmem:[%s1598_s7 + $0x24] ss:$56 sps:$4 sm:$0xff]   ;;  %v1418_v57 = vld [vmem:[%s1598_s7 + $0x88] ss:$56 sps:$4 sm:$0x3f]  }
  0x33   : > { %540 = vmatprep.subr.bf16.mxu1 %v1402_v42  ;;  %593 = vmatprep.subr.bf16.mxu0 %v1405_v45  ;;  %v1420_v58 = vld [vmem:[%s1598_s7 + $0x8c] ss:$56 sps:$4 sm:$0x3f]   ;;  %v1415_v60 = vld [vmem:[%s1598_s7 + $0x20] ss:$56 sps:$4 sm:$0xff]   ;;  %v464_v0 = vand.u32 %v1418_v57, %v1602_v35 }
  0x34   : > { %v1423_v59 = vld [vmem:[%s1598_s7 + $0x94] ss:$56 sps:$4 sm:$0x3f]   ;;  %v1421_v61 = vld [vmem:[%s1598_s7 + $0x90] ss:$56 sps:$4 sm:$0x3f]   ;;  %v467_v62 = vand.u32 %v1420_v58, %v1602_v35 }
  0x35   : > { %1283 = vmatmul.mubr.msk.bf16.vlgmr.msra.gmra.mrb[0].mxu0 %vm434_vm2, %v1611_v40  ;;  %1284 = vmatmul.mubr.msk.bf16.vlgmr.msra.gmra.mrb[0].mxu1 %vm434_vm2, %v1616_v41  ;;  %v473_v63 = vand.u32 %v1423_v59, %v1602_v35  ;;  %v470_v1 = vand.u32 %v1421_v61, %v1602_v35  ;;  %v1426_v2 = vld [vmem:[%s1598_s7 + $0x2c] ss:$56 sps:$4 sm:$0xff]   ;;  %v1432_v6 = vld [vmem:[%s1598_s7 + $0x9c] ss:$56 sps:$4 sm:$0x3f]  }
  0x36   : > { %541 = vmatpush1.bf16.msra.mxu1 %v1400_v43  ;;  %594 = vmatpush1.bf16.msra.mxu0 %v1403_v44  ;;  %v1429_v3 = vld [vmem:[%s1598_s7 + $0x34] ss:$56 sps:$4 sm:$0xff]   ;;  %v1435_v7 = vld [vmem:[%s1598_s7 + $0xa4] ss:$56 sps:$4 sm:$0x3f]   ;;  %v479_v12 = vand.u32 %v1432_v6, %v1602_v35 }
  0x37   : > { %542 = vmatprep.subr.bf16.mxu1 %v455_v50  ;;  %595 = vmatprep.subr.bf16.mxu0 %v461_v51  ;;  %v1424_v8 = vld [vmem:[%s1598_s7 + $0x28] ss:$56 sps:$4 sm:$0xff]   ;;  %v1430_v10 = vld [vmem:[%s1598_s7 + $0x98] ss:$56 sps:$4 sm:$0x3f]   ;;  %v485_v13 = vand.u32 %v1435_v7, %v1602_v35 }
  0x38   : > { %572 = vmatprep.mubr.bf16.mxu1 %v1460_v28  ;;  %625 = vmatprep.mubr.bf16.mxu0 %v1460_v28  ;;  %v1427_v9 = vld [vmem:[%s1598_s7 + $0x30] ss:$56 sps:$4 sm:$0xff]   ;;  %v1433_v11 = vld [vmem:[%s1598_s7 + $0xa0] ss:$56 sps:$4 sm:$0x3f]   ;;  %v476_v14 = vand.u32 %v1430_v10, %v1602_v35 }
  0x39   : > { %v482_v15 = vand.u32 %v1433_v11, %v1602_v35 }
  0x3a   : > { %543 = vmatpush1.bf16.msra.mxu1 %v452_v52  ;;  %596 = vmatpush1.bf16.msra.mxu0 %v458_v53 }
  0x3b   : > { %646 = vmatprep.subr.bf16.mxu1 %v1414_v54  ;;  %699 = vmatprep.subr.bf16.mxu0 %v1417_v55 }
  0x3d   : > { %1285 = vmatmul.mubr.msk.bf16.vlgmr.msra.gmra.mrb[4].mxu1 %vm434_vm2, %v1611_v40  ;;  %1287 = vmatmul.mubr.msk.bf16.vlgmr.msra.gmra.mrb[4].mxu0 %vm434_vm2, %v1611_v40 }
  0x3e   : > { %647 = vmatpush1.bf16.msra.mxu1 %v1412_v56  ;;  %700 = vmatpush1.bf16.msra.mxu0 %v1415_v60 }
  0x3f   : > { %582 = vmatprep.mubr.bf16.mxu1 %v1460_v28  ;;  %635 = vmatprep.mubr.bf16.mxu0 %v1460_v28 }
  0x40   : > { %648 = vmatprep.subr.bf16.mxu1 %v467_v62  ;;  %701 = vmatprep.subr.bf16.mxu0 %v473_v63 }
  0x42   : > { %649 = vmatpush1.bf16.msra.mxu1 %v464_v0  ;;  %702 = vmatpush1.bf16.msra.mxu0 %v470_v1 }
  0x43   : > { %752 = vmatprep.subr.bf16.mxu1 %v1426_v2  ;;  %805 = vmatprep.subr.bf16.mxu0 %v1429_v3 }
  0x45   : > { %1286 = vmatmul.mubr.msk.bf16.gmra.mrb[8].mxu1 %vm434_vm2, %v1616_v41  ;;  %1288 = vmatmul.mubr.msk.bf16.gmra.mrb[8].mxu0 %vm434_vm2, %v1616_v41 }
  0x46   : > { %678 = vmatprep.mubr.bf16.mxu1 %v1460_v28  ;;  %731 = vmatprep.mubr.bf16.mxu0 %v1460_v28 }
  0x4d   : > { %1289 = vmatmul.mubr.msk.bf16.vlgmr.msra.gmra.mrb[12].mxu1 %vm434_vm2, %v1611_v40  ;;  %1291 = vmatmul.mubr.msk.bf16.vlgmr.msra.gmra.mrb[12].mxu0 %vm434_vm2, %v1611_v40 }
  0x4e   : > { %753 = vmatpush1.bf16.msra.mxu1 %v1424_v8  ;;  %806 = vmatpush1.bf16.msra.mxu0 %v1427_v9 }
  0x4f   : > { %688 = vmatprep.mubr.bf16.mxu1 %v1460_v28  ;;  %741 = vmatprep.mubr.bf16.mxu0 %v1460_v28 }
  0x50   : > { %754 = vmatprep.subr.bf16.mxu1 %v479_v12  ;;  %807 = vmatprep.subr.bf16.mxu0 %v485_v13 }
  0x52   : > { %755 = vmatpush1.bf16.msra.mxu1 %v476_v14  ;;  %808 = vmatpush1.bf16.msra.mxu0 %v482_v15 }
  0x55   : > { %1290 = vmatmul.mubr.msk.bf16.gmra.mrb[16].mxu1 %vm434_vm2, %v1616_v41  ;;  %1292 = vmatmul.mubr.msk.bf16.gmra.mrb[16].mxu0 %vm434_vm2, %v1616_v41 }
  0x56   : > { %784 = vmatprep.mubr.bf16.mxu1 %v1460_v28  ;;  %837 = vmatprep.mubr.bf16.mxu0 %v1460_v28 }
  0x5d   : > { %1293 = vmatmul.mubr.msk.bf16.vlgmr.msra.gmra.mrb[20].mxu1 %vm434_vm2, %v1611_v40  ;;  %1295 = vmatmul.mubr.msk.bf16.vlgmr.msra.gmra.mrb[20].mxu0 %vm434_vm2, %v1611_v40 }
  0x5e   : > { %794 = vmatprep.mubr.bf16.mxu1 %v1460_v28  ;;  %847 = vmatprep.mubr.bf16.mxu0 %v1460_v28 }
  0x65   : > { %1294 = vmatmul.mubr.msk.bf16.gmra.mrb[24].mxu1 %vm434_vm2, %v1616_v41  ;;  %1296 = vmatmul.mubr.msk.bf16.gmra.mrb[24].mxu0 %vm434_vm2, %v1616_v41 }
  0xa9   : > { %v1700_v16 = vpop.permute.xlu1 %290  ;;  %v1702_v17 = vpop.permute.xlu0 %280 }
  0xae   : > { %v1704_v18 = vpop.permute.xlu1 %295  ;;  %v1706_v19 = vpop.permute.xlu0 %285 }
 0x108   : > { %v521_v20 = vpop.f32.mrb[0].mxu0  ;;  %v531_v21 = vpop.f32.mrb[0].mxu1 }
 0x109   : > { %v522_v22 = vadd.f32 %v521_v20, %v1702_v17  ;;  %v532_v23 = vadd.f32 %v531_v21, %v1700_v16  ;;  %v523_v24 = vpop.f32.mrb[1].mxu0  ;;  %v533_v25 = vpop.f32.mrb[1].mxu1 }
 0x10a   : > { %v524_v26 = vadd.f32 %v523_v24, %v1702_v17  ;;  %v534_v27 = vadd.f32 %v533_v25, %v1700_v16  ;;  %v525_v28 = vpop.f32.mrb[2].mxu0  ;;  %v535_v29 = vpop.f32.mrb[2].mxu1 }
 0x10b   : > { %v858_v30 = vmax.f32 %v522_v22, 0.0  ;;  %v886_v31 = vmax.f32 %v532_v23, 0.0  ;;  %v526_v32 = vadd.f32 %v525_v28, %v1706_v19  ;;  %v536_v33 = vadd.f32 %v535_v29, %v1704_v18  ;;  %v527_v34 = vpop.f32.mrb[3].mxu0  ;;  %v537_v35 = vpop.f32.mrb[3].mxu1 }
 0x10c   : > { %v859_v36 = vmax.f32 %v524_v26, 0.0  ;;  %v887_v37 = vmax.f32 %v534_v27, 0.0  ;;  %v528_v38 = vadd.f32 %v527_v34, %v1706_v19  ;;  %v538_v39 = vadd.f32 %v537_v35, %v1704_v18 }
 0x10d   : > { %v872_v40 = vmax.f32 %v526_v32, 0.0  ;;  %v900_v41 = vmax.f32 %v536_v33, 0.0 }
 0x10e   : > { %v1329_v42 = vpack.c.bf16 %v859_v36, %v858_v30  ;;  %v1343_v43 = vpack.c.bf16 %v887_v37, %v886_v31  ;;  %v873_v44 = vmax.f32 %v528_v38, 0.0  ;;  %v901_v45 = vmax.f32 %v538_v39, 0.0 }
 0x110   : > { %1082 = vst [vmem:[%s1717_s22] sm:$0xff] %v1329_v42  ;;  %1096 = vst [vmem:[%s1717_s22 + $0x70] sm:$0xff] %v1343_v43  ;;  %v1336_v46 = vpack.c.bf16 %v873_v44, %v872_v40  ;;  %v1350_v47 = vpack.c.bf16 %v901_v45, %v900_v41  ;;  %v574_v48 = vpop.f32.mrb[4].mxu1  ;;  %v627_v49 = vpop.f32.mrb[4].mxu0 }
 0x111   : > { %v575_v50 = vadd.f32 %v574_v48, %v1702_v17  ;;  %v628_v51 = vadd.f32 %v627_v49, %v1702_v17  ;;  %v576_v52 = vpop.f32.mrb[5].mxu1  ;;  %v629_v53 = vpop.f32.mrb[5].mxu0 }
 0x112   : > { %1089 = vst [vmem:[%s1717_s22 + $0x38] sm:$0xff] %v1336_v46  ;;  %1103 = vst [vmem:[%s1717_s22 + $0xa8] sm:$0xff] %v1350_v47  ;;  %v577_v54 = vadd.f32 %v576_v52, %v1702_v17  ;;  %v630_v55 = vadd.f32 %v629_v53, %v1702_v17  ;;  %v578_v56 = vpop.f32.mrb[6].mxu1  ;;  %v631_v57 = vpop.f32.mrb[6].mxu0 }
 0x113   : > { %v860_v58 = vmax.f32 %v575_v50, 0.0  ;;  %v862_v59 = vmax.f32 %v628_v51, 0.0  ;;  %v579_v60 = vadd.f32 %v578_v56, %v1706_v19  ;;  %v632_v61 = vadd.f32 %v631_v57, %v1706_v19  ;;  %v580_v62 = vpop.f32.mrb[7].mxu1  ;;  %v633_v63 = vpop.f32.mrb[7].mxu0 }
 0x114   : > { %v861_v0 = vmax.f32 %v577_v54, 0.0  ;;  %v863_v1 = vmax.f32 %v630_v55, 0.0  ;;  %v581_v2 = vadd.f32 %v580_v62, %v1706_v19  ;;  %v634_v3 = vadd.f32 %v633_v63, %v1706_v19 }
 0x115   : > { %v874_v4 = vmax.f32 %v579_v60, 0.0  ;;  %v876_v5 = vmax.f32 %v632_v61, 0.0 }
 0x116   : > { %v1330_v6 = vpack.c.bf16 %v861_v0, %v860_v58  ;;  %v1331_v7 = vpack.c.bf16 %v863_v1, %v862_v59  ;;  %v875_v8 = vmax.f32 %v581_v2, 0.0  ;;  %v877_v9 = vmax.f32 %v634_v3, 0.0 }
 0x118   : > { %1083 = vst [vmem:[%s1717_s22 + $0x8] sm:$0xff] %v1330_v6  ;;  %1084 = vst [vmem:[%s1717_s22 + $0x10] sm:$0xff] %v1331_v7  ;;  %v1337_v10 = vpack.c.bf16 %v875_v8, %v874_v4  ;;  %v1338_v11 = vpack.c.bf16 %v877_v9, %v876_v5  ;;  %v584_v12 = vpop.f32.mrb[8].mxu1  ;;  %v637_v13 = vpop.f32.mrb[8].mxu0 }
 0x119   : > { %v585_v14 = vadd.f32 %v584_v12, %v1700_v16  ;;  %v638_v15 = vadd.f32 %v637_v13, %v1700_v16  ;;  %v586_v20 = vpop.f32.mrb[9].mxu1  ;;  %v639_v21 = vpop.f32.mrb[9].mxu0 }
 0x11a   : > { %1090 = vst [vmem:[%s1717_s22 + $0x40] sm:$0xff] %v1337_v10  ;;  %1091 = vst [vmem:[%s1717_s22 + $0x48] sm:$0xff] %v1338_v11  ;;  %v587_v22 = vadd.f32 %v586_v20, %v1700_v16  ;;  %v640_v23 = vadd.f32 %v639_v21, %v1700_v16  ;;  %v588_v24 = vpop.f32.mrb[10].mxu1  ;;  %v641_v25 = vpop.f32.mrb[10].mxu0 }
 0x11b   : > { %v888_v26 = vmax.f32 %v585_v14, 0.0  ;;  %v890_v27 = vmax.f32 %v638_v15, 0.0  ;;  %v589_v28 = vadd.f32 %v588_v24, %v1704_v18  ;;  %v642_v29 = vadd.f32 %v641_v25, %v1704_v18  ;;  %v590_v30 = vpop.f32.mrb[11].mxu1  ;;  %v643_v31 = vpop.f32.mrb[11].mxu0 }
 0x11c   : > { %v889_v32 = vmax.f32 %v587_v22, 0.0  ;;  %v891_v33 = vmax.f32 %v640_v23, 0.0  ;;  %v591_v34 = vadd.f32 %v590_v30, %v1704_v18  ;;  %v644_v35 = vadd.f32 %v643_v31, %v1704_v18 }
 0x11d   : > { %v902_v36 = vmax.f32 %v589_v28, 0.0  ;;  %v904_v37 = vmax.f32 %v642_v29, 0.0 }
 0x11e   : > { %v1344_v38 = vpack.c.bf16 %v889_v32, %v888_v26  ;;  %v1345_v39 = vpack.c.bf16 %v891_v33, %v890_v27  ;;  %v903_v40 = vmax.f32 %v591_v34, 0.0  ;;  %v905_v41 = vmax.f32 %v644_v35, 0.0 }
 0x120   : > { %1097 = vst [vmem:[%s1717_s22 + $0x78] sm:$0xff] %v1344_v38  ;;  %1098 = vst [vmem:[%s1717_s22 + $0x80] sm:$0xff] %v1345_v39  ;;  %v1351_v42 = vpack.c.bf16 %v903_v40, %v902_v36  ;;  %v1352_v43 = vpack.c.bf16 %v905_v41, %v904_v37  ;;  %v680_v44 = vpop.f32.mrb[12].mxu1  ;;  %v733_v45 = vpop.f32.mrb[12].mxu0 }
 0x121   : > { %v681_v46 = vadd.f32 %v680_v44, %v1702_v17  ;;  %v734_v47 = vadd.f32 %v733_v45, %v1702_v17  ;;  %v682_v48 = vpop.f32.mrb[13].mxu1  ;;  %v735_v49 = vpop.f32.mrb[13].mxu0 }
 0x122   : > { %1104 = vst [vmem:[%s1717_s22 + $0xb0] sm:$0xff] %v1351_v42  ;;  %1105 = vst [vmem:[%s1717_s22 + $0xb8] sm:$0xff] %v1352_v43  ;;  %v683_v50 = vadd.f32 %v682_v48, %v1702_v17  ;;  %v736_v51 = vadd.f32 %v735_v49, %v1702_v17  ;;  %v684_v52 = vpop.f32.mrb[14].mxu1  ;;  %v737_v53 = vpop.f32.mrb[14].mxu0 }
 0x123   : > { %v864_v54 = vmax.f32 %v681_v46, 0.0  ;;  %v866_v55 = vmax.f32 %v734_v47, 0.0  ;;  %v685_v56 = vadd.f32 %v684_v52, %v1706_v19  ;;  %v738_v57 = vadd.f32 %v737_v53, %v1706_v19  ;;  %v686_v58 = vpop.f32.mrb[15].mxu1  ;;  %v739_v59 = vpop.f32.mrb[15].mxu0 }
 0x124   : > { %v865_v60 = vmax.f32 %v683_v50, 0.0  ;;  %v867_v61 = vmax.f32 %v736_v51, 0.0  ;;  %v687_v62 = vadd.f32 %v686_v58, %v1706_v19  ;;  %v740_v63 = vadd.f32 %v739_v59, %v1706_v19 }
 0x125   : > { %v878_v0 = vmax.f32 %v685_v56, 0.0  ;;  %v880_v1 = vmax.f32 %v738_v57, 0.0 }
 0x126   : > { %v1332_v2 = vpack.c.bf16 %v865_v60, %v864_v54  ;;  %v1333_v3 = vpack.c.bf16 %v867_v61, %v866_v55  ;;  %v879_v4 = vmax.f32 %v687_v62, 0.0  ;;  %v881_v5 = vmax.f32 %v740_v63, 0.0 }
 0x128   : > { %1085 = vst [vmem:[%s1717_s22 + $0x18] sm:$0xff] %v1332_v2  ;;  %1086 = vst [vmem:[%s1717_s22 + $0x20] sm:$0xff] %v1333_v3  ;;  %v1339_v6 = vpack.c.bf16 %v879_v4, %v878_v0  ;;  %v1340_v7 = vpack.c.bf16 %v881_v5, %v880_v1  ;;  %v690_v8 = vpop.f32.mrb[16].mxu1  ;;  %v743_v9 = vpop.f32.mrb[16].mxu0 }
 0x129   : > { %v691_v10 = vadd.f32 %v690_v8, %v1700_v16  ;;  %v744_v11 = vadd.f32 %v743_v9, %v1700_v16  ;;  %v692_v12 = vpop.f32.mrb[17].mxu1  ;;  %v745_v13 = vpop.f32.mrb[17].mxu0 }
 0x12a   : > { %1092 = vst [vmem:[%s1717_s22 + $0x50] sm:$0xff] %v1339_v6  ;;  %1093 = vst [vmem:[%s1717_s22 + $0x58] sm:$0xff] %v1340_v7  ;;  %v693_v14 = vadd.f32 %v692_v12, %v1700_v16  ;;  %v746_v15 = vadd.f32 %v745_v13, %v1700_v16  ;;  %v694_v20 = vpop.f32.mrb[18].mxu1  ;;  %v747_v21 = vpop.f32.mrb[18].mxu0 }
 0x12b   : > { %v892_v22 = vmax.f32 %v691_v10, 0.0  ;;  %v894_v23 = vmax.f32 %v744_v11, 0.0  ;;  %v695_v24 = vadd.f32 %v694_v20, %v1704_v18  ;;  %v748_v25 = vadd.f32 %v747_v21, %v1704_v18  ;;  %v696_v26 = vpop.f32.mrb[19].mxu1  ;;  %v749_v27 = vpop.f32.mrb[19].mxu0 }
 0x12c   : > { %v893_v28 = vmax.f32 %v693_v14, 0.0  ;;  %v895_v29 = vmax.f32 %v746_v15, 0.0  ;;  %v697_v30 = vadd.f32 %v696_v26, %v1704_v18  ;;  %v750_v31 = vadd.f32 %v749_v27, %v1704_v18 }
 0x12d   : > { %v906_v32 = vmax.f32 %v695_v24, 0.0  ;;  %v908_v33 = vmax.f32 %v748_v25, 0.0 }
 0x12e   : > { %v1346_v34 = vpack.c.bf16 %v893_v28, %v892_v22  ;;  %v1347_v35 = vpack.c.bf16 %v895_v29, %v894_v23  ;;  %v907_v36 = vmax.f32 %v697_v30, 0.0  ;;  %v909_v37 = vmax.f32 %v750_v31, 0.0 }
 0x130   : > { %1099 = vst [vmem:[%s1717_s22 + $0x88] sm:$0xff] %v1346_v34  ;;  %1100 = vst [vmem:[%s1717_s22 + $0x90] sm:$0xff] %v1347_v35  ;;  %v1353_v38 = vpack.c.bf16 %v907_v36, %v906_v32  ;;  %v1354_v39 = vpack.c.bf16 %v909_v37, %v908_v33  ;;  %v786_v40 = vpop.f32.mrb[20].mxu1  ;;  %v839_v41 = vpop.f32.mrb[20].mxu0  ;;  %v1134_v33 = vld [vmem:[%s1717_s22 + $0x8] sm:$0xff] (%p1512_p5)  ;;  %v1136_v34 = vld [vmem:[%s1717_s22 + $0x10] sm:$0xff] (%p1512_p5) }
 0x131   : > { %v787_v42 = vadd.f32 %v786_v40, %v1702_v17  ;;  %v840_v43 = vadd.f32 %v839_v41, %v1702_v17  ;;  %v788_v44 = vpop.f32.mrb[21].mxu1  ;;  %v841_v45 = vpop.f32.mrb[21].mxu0  ;;  %v1138_v35 = vld [vmem:[%s1717_s22 + $0x18] sm:$0xff] (%p1512_p5)  ;;  %v1140_v36 = vld [vmem:[%s1717_s22 + $0x20] sm:$0xff] (%p1512_p5)  ;;  %1135 = vst [vmem:[%s1808_s24 + $0x8] sm:$0xff] (%p1512_p5), %v1134_v33  ;;  %1137 = vst [vmem:[%s1808_s24 + $0x10] sm:$0xff] (%p1512_p5), %v1136_v34 }
 0x132   : > { %1106 = vst [vmem:[%s1717_s22 + $0xc0] sm:$0xff] %v1353_v38  ;;  %1107 = vst [vmem:[%s1717_s22 + $0xc8] sm:$0xff] %v1354_v39  ;;  %v789_v46 = vadd.f32 %v788_v44, %v1702_v17  ;;  %v842_v47 = vadd.f32 %v841_v45, %v1702_v17  ;;  %v790_v48 = vpop.f32.mrb[22].mxu1  ;;  %v843_v49 = vpop.f32.mrb[22].mxu0  ;;  %v1146_v39 = vld [vmem:[%s1717_s22 + $0x38] sm:$0xff] (%p1512_p5)  ;;  %v1148_v40 = vld [vmem:[%s1717_s22 + $0x40] sm:$0xff] (%p1512_p5) }
 0x133   : > { %v868_v50 = vmax.f32 %v787_v42, 0.0  ;;  %v870_v51 = vmax.f32 %v840_v43, 0.0  ;;  %v791_v52 = vadd.f32 %v790_v48, %v1706_v19  ;;  %v844_v53 = vadd.f32 %v843_v49, %v1706_v19  ;;  %v792_v54 = vpop.f32.mrb[23].mxu1  ;;  %v845_v55 = vpop.f32.mrb[23].mxu0  ;;  %1139 = vst [vmem:[%s1808_s24 + $0x18] sm:$0xff] (%p1512_p5), %v1138_v35  ;;  %1141 = vst [vmem:[%s1808_s24 + $0x20] sm:$0xff] (%p1512_p5), %v1140_v36 }
 0x134   : > { %v869_v56 = vmax.f32 %v789_v46, 0.0  ;;  %v871_v57 = vmax.f32 %v842_v47, 0.0  ;;  %v793_v58 = vadd.f32 %v792_v54, %v1706_v19  ;;  %v846_v59 = vadd.f32 %v845_v55, %v1706_v19  ;;  %1147 = vst [vmem:[%s1808_s24 + $0xa8] sm:$0xff] (%p1512_p5), %v1146_v39  ;;  %1149 = vst [vmem:[%s1808_s24 + $0xb0] sm:$0xff] (%p1512_p5), %v1148_v40  ;;  %v1150_v41 = vld [vmem:[%s1717_s22 + $0x48] sm:$0xff] (%p1512_p5)  ;;  %v1152_v42 = vld [vmem:[%s1717_s22 + $0x50] sm:$0xff] (%p1512_p5) }
 0x135   : > { %v882_v60 = vmax.f32 %v791_v52, 0.0  ;;  %v884_v17 = vmax.f32 %v844_v53, 0.0  ;;  %v1154_v43 = vld [vmem:[%s1717_s22 + $0x58] sm:$0xff] (%p1512_p5)  ;;  %1151 = vst [vmem:[%s1808_s24 + $0xb8] sm:$0xff] (%p1512_p5), %v1150_v41  ;;  %1153 = vst [vmem:[%s1808_s24 + $0xc0] sm:$0xff] (%p1512_p5), %v1152_v42  ;;  %v1160_v46 = vld [vmem:[%s1717_s22 + $0x70] sm:$0xff] (%p1512_p5) }
 0x136   : > { %v1334_v61 = vpack.c.bf16 %v869_v56, %v868_v50  ;;  %v1335_v62 = vpack.c.bf16 %v871_v57, %v870_v51  ;;  %v883_v63 = vmax.f32 %v793_v58, 0.0  ;;  %v885_v0 = vmax.f32 %v846_v59, 0.0  ;;  %1155 = vst [vmem:[%s1808_s24 + $0xc8] sm:$0xff] (%p1512_p5), %v1154_v43  ;;  %1161 = vst [vmem:[%s1808_s24 + $0x150] sm:$0xff] (%p1512_p5), %v1160_v46  ;;  %v1162_v47 = vld [vmem:[%s1717_s22 + $0x78] sm:$0xff] (%p1512_p5)  ;;  %v1164_v48 = vld [vmem:[%s1717_s22 + $0x80] sm:$0xff] (%p1512_p5) }
 0x137   : > { %v1166_v49 = vld [vmem:[%s1717_s22 + $0x88] sm:$0xff] (%p1512_p5)  ;;  %1163 = vst [vmem:[%s1808_s24 + $0x158] sm:$0xff] (%p1512_p5), %v1162_v47  ;;  %1165 = vst [vmem:[%s1808_s24 + $0x160] sm:$0xff] (%p1512_p5), %v1164_v48  ;;  %v1168_v50 = vld [vmem:[%s1717_s22 + $0x90] sm:$0xff] (%p1512_p5) }
 0x138   : > { %1087 = vst [vmem:[%s1717_s22 + $0x28] sm:$0xff] %v1334_v61  ;;  %1088 = vst [vmem:[%s1717_s22 + $0x30] sm:$0xff] %v1335_v62  ;;  %v1341_v1 = vpack.c.bf16 %v883_v63, %v882_v60  ;;  %v1342_v2 = vpack.c.bf16 %v885_v0, %v884_v17  ;;  %v796_v3 = vpop.f32.mrb[24].mxu1  ;;  %v849_v4 = vpop.f32.mrb[24].mxu0  ;;  %v1174_v53 = vld [vmem:[%s1717_s22 + $0xa8] sm:$0xff] (%p1512_p5)  ;;  %v1176_v54 = vld [vmem:[%s1717_s22 + $0xb0] sm:$0xff] (%p1512_p5) }
 0x139   : > { %v797_v5 = vadd.f32 %v796_v3, %v1700_v16  ;;  %v850_v6 = vadd.f32 %v849_v4, %v1700_v16  ;;  %v798_v7 = vpop.f32.mrb[25].mxu1  ;;  %v851_v19 = vpop.f32.mrb[25].mxu0  ;;  %1167 = vst [vmem:[%s1808_s24 + $0x168] sm:$0xff] (%p1512_p5), %v1166_v49  ;;  %1169 = vst [vmem:[%s1808_s24 + $0x170] sm:$0xff] (%p1512_p5), %v1168_v50  ;;  %v1178_v55 = vld [vmem:[%s1717_s22 + $0xb8] sm:$0xff] (%p1512_p5)  ;;  %v1180_v56 = vld [vmem:[%s1717_s22 + $0xc0] sm:$0xff] (%p1512_p5) }
 0x13a   : > { %1094 = vst [vmem:[%s1717_s22 + $0x60] sm:$0xff] %v1341_v1  ;;  %1095 = vst [vmem:[%s1717_s22 + $0x68] sm:$0xff] %v1342_v2  ;;  %v799_v8 = vadd.f32 %v798_v7, %v1700_v16  ;;  %v852_v9 = vadd.f32 %v851_v19, %v1700_v16  ;;  %v800_v10 = vpop.f32.mrb[26].mxu1  ;;  %v853_v11 = vpop.f32.mrb[26].mxu0  ;;  %v1182_v57 = vld [vmem:[%s1717_s22 + $0xc8] sm:$0xff] (%p1512_p5) }
 0x13b   : > { %v896_v12 = vmax.f32 %v797_v5, 0.0  ;;  %v898_v13 = vmax.f32 %v850_v6, 0.0  ;;  %v801_v14 = vadd.f32 %v800_v10, %v1704_v18  ;;  %v854_v15 = vadd.f32 %v853_v11, %v1704_v18  ;;  %v802_v20 = vpop.f32.mrb[27].mxu1  ;;  %v855_v21 = vpop.f32.mrb[27].mxu0  ;;  %1175 = vst [vmem:[%s1808_s24 + $0x1f8] sm:$0xff] (%p1512_p5), %v1174_v53  ;;  %1177 = vst [vmem:[%s1808_s24 + $0x200] sm:$0xff] (%p1512_p5), %v1176_v54 }
 0x13c   : > { %v897_v22 = vmax.f32 %v799_v8, 0.0  ;;  %v899_v23 = vmax.f32 %v852_v9, 0.0  ;;  %v803_v24 = vadd.f32 %v802_v20, %v1704_v18  ;;  %v856_v16 = vadd.f32 %v855_v21, %v1704_v18  ;;  %1116 = sbr.rel (!%p1512_p5) target bundleno = 331 (0x14b), region = 59  ;;  %v1132_v18 = vld [vmem:[%s1717_s22] sm:$0xff] (%p1512_p5)  ;;  %1179 = vst [vmem:[%s1808_s24 + $0x208] sm:$0xff] (%p1512_p5), %v1178_v55  ;;  %1181 = vst [vmem:[%s1808_s24 + $0x210] sm:$0xff] (%p1512_p5), %v1180_v56 }
 0x13d   : > { %v910_v25 = vmax.f32 %v801_v14, 0.0  ;;  %v912_v26 = vmax.f32 %v854_v15, 0.0  ;;  %1133 = vst [vmem:[%s1808_s24] sm:$0xff] (%p1512_p5), %v1132_v18  ;;  %1183 = vst [vmem:[%s1808_s24 + $0x218] sm:$0xff] (%p1512_p5), %v1182_v57 }
 0x13e   : > { %v1348_v27 = vpack.c.bf16 %v897_v22, %v896_v12  ;;  %v1349_v28 = vpack.c.bf16 %v899_v23, %v898_v13  ;;  %v911_v29 = vmax.f32 %v803_v24, 0.0  ;;  %v913_v30 = vmax.f32 %v856_v16, 0.0 }
 0x13f   : > { %v1142_v37 = vld [vmem:[%s1717_s22 + $0x28] sm:$0xff] (%p1512_p5)  ;;  %v1144_v38 = vld [vmem:[%s1717_s22 + $0x30] sm:$0xff] (%p1512_p5) }
 0x140   : > { %1101 = vst [vmem:[%s1717_s22 + $0x98] sm:$0xff] %v1348_v27  ;;  %1102 = vst [vmem:[%s1717_s22 + $0xa0] sm:$0xff] %v1349_v28  ;;  %v1355_v31 = vpack.c.bf16 %v911_v29, %v910_v25  ;;  %v1356_v32 = vpack.c.bf16 %v913_v30, %v912_v26 }
 0x141   : > { %1143 = vst [vmem:[%s1808_s24 + $0x28] sm:$0xff] (%p1512_p5), %v1142_v37  ;;  %1145 = vst [vmem:[%s1808_s24 + $0x30] sm:$0xff] (%p1512_p5), %v1144_v38  ;;  %v1156_v44 = vld [vmem:[%s1717_s22 + $0x60] sm:$0xff] (%p1512_p5)  ;;  %v1158_v45 = vld [vmem:[%s1717_s22 + $0x68] sm:$0xff] (%p1512_p5) }
 0x142   : > { %1108 = vst [vmem:[%s1717_s22 + $0xd0] sm:$0xff] %v1355_v31  ;;  %1109 = vst [vmem:[%s1717_s22 + $0xd8] sm:$0xff] %v1356_v32 }
 0x143   : > { %1157 = vst [vmem:[%s1808_s24 + $0xd0] sm:$0xff] %v1156_v44  ;;  %1159 = vst [vmem:[%s1808_s24 + $0xd8] sm:$0xff] %v1158_v45 }
 0x147   : > { %v1170_v51 = vld [vmem:[%s1717_s22 + $0x98] sm:$0xff]  ;;  %v1172_v52 = vld [vmem:[%s1717_s22 + $0xa0] sm:$0xff] }
 0x148   : > { %1171 = vst [vmem:[%s1808_s24 + $0x178] sm:$0xff] %v1170_v51  ;;  %1173 = vst [vmem:[%s1808_s24 + $0x180] sm:$0xff] %v1172_v52 }
 0x149   : > { %v1184_v58 = vld [vmem:[%s1717_s22 + $0xd0] sm:$0xff]  ;;  %v1186_v59 = vld [vmem:[%s1717_s22 + $0xd8] sm:$0xff] }
 0x14a   : > { %1185 = vst [vmem:[%s1808_s24 + $0x220] sm:$0xff] %v1184_v58  ;;  %1187 = vst [vmem:[%s1808_s24 + $0x228] sm:$0xff] %v1186_v59 }
 0x14b PF: > { %p10_p10 = scmp.ge.s32.totalorder %s1499_s16, 5   ;;  %s1875_s12 = smov %s1454_s13 }
 0x14c   : > { %s1876_s13 = smov %s1510_s19  ;;  %s1877_s14 = smov %s1499_s16 }
 0x14d   :  { %12 = sbr.rel (!%p10_p10) target bundleno = 2 (0x2), region = 113 }

// kernel: cnn_forward.5
= control target key start
LH: loop header
LB: loop body
LE: loop exit
PB: predicated region body
PF: predicated region fallthrough
CT: control target
= control target key end

     0   :  { %v3071_v1 = vmov 0   ;;  %vm1219_vm0 = vcmask 261120   ;;  %s4128_s1 = inlined_call_operand.vmem [shape: bf16[288,1280], index: 1, kind: input, shape index: {}]   ;;  %s4129_s0 = inlined_call_operand.vmem [shape: bf16[64,288], index: 0, kind: input, shape index: {}]   ;;  %s4130_s2 = inlined_call_operand.vmem [shape: f32[64,1], index: 2, kind: input, shape index: {}]   ;;  %s4131_s3 = inlined_call_operand.vmem [shape: bf16[64,1280], index: 3, kind: output, shape index: {}]  }
   0x1   :  { %v2781_v0 = vld [vmem:[%s4128_s1 + $0x4] ss:$40 sps:$4 sm:$0xff]   ;;  %1337 = vmatprep.mubr.bf16.mxu0 %v3071_v1  ;;  %2779 = vset.pattern.permute.xlu0 %v3071_v1  ;;  %v2785_v3 = vld [vmem:[%s4128_s1] ss:$40 sps:$4 sm:$0xff]   ;;  %v2787_v5 = vld [vmem:[%s4128_s1 + $0x54] ss:$40 sps:$4 sm:$0xff]  }
   0x2   :  { %v2783_v2 = vld [vmem:[%s4128_s1 + $0x504] ss:$40 sps:$4 sm:$0xff]   ;;  %2780 = vset.pattern.permute.xlu1 %v3071_v1  ;;  %1232 = vmatprep.subr.bf16.mxu1 %v2781_v0  ;;  %v2786_v4 = vld [vmem:[%s4128_s1 + $0x500] ss:$40 sps:$4 sm:$0xff]   ;;  %v2789_v6 = vld [vmem:[%s4128_s1 + $0x554] ss:$40 sps:$4 sm:$0xff]  }
   0x3   :  { %1305 = vmatprep.subr.bf16.mxu0 %v2783_v2  ;;  %1233 = vmatpush1.bf16.msra.mxu1 %v2785_v3  ;;  %v2791_v7 = vld [vmem:[%s4128_s1 + $0x50] ss:$40 sps:$4 sm:$0xff]   ;;  %v2793_v9 = vld [vmem:[%s4128_s1 + $0xa4] ss:$40 sps:$4 sm:$0xff]   ;;  %v3125_v10 = vld [vmem:[%s4129_s0 + $0x8] ss:$12 sps:$4 sm:$0xff]  }
   0x4   :  { %1306 = vmatpush1.bf16.msra.mxu0 %v2786_v4  ;;  %1234 = vmatprep.subr.bf16.mxu1 %v2787_v5  ;;  %v2792_v8 = vld [vmem:[%s4128_s1 + $0x550] ss:$40 sps:$4 sm:$0xff]   ;;  %v2798_v12 = vld [vmem:[%s4128_s1 + $0x50c] ss:$40 sps:$4 sm:$0xff]   ;;  %v2799_v13 = vld [vmem:[%s4128_s1 + $0xa0] ss:$40 sps:$4 sm:$0xff]  }
   0x5   :  { %1307 = vmatprep.subr.bf16.mxu0 %v2789_v6  ;;  %v2796_v11 = vld [vmem:[%s4128_s1 + $0x508] ss:$40 sps:$4 sm:$0xff]   ;;  %v2800_v14 = vld [vmem:[%s4128_s1 + $0xf4] ss:$40 sps:$4 sm:$0xff]   ;;  %v2803_v16 = vld [vmem:[%s4128_s1 + $0x144] ss:$40 sps:$4 sm:$0xff]  }
   0x6   :  { %v2802_v15 = vld [vmem:[%s4128_s1 + $0xf0] ss:$40 sps:$4 sm:$0xff]   ;;  %v3151_v17 = vld [vmem:[%s4129_s0 + $0x20] ss:$12 sps:$4 sm:$0xff]   ;;  %v2807_v19 = vld [vmem:[%s4128_s1 + $0x194] ss:$40 sps:$4 sm:$0xff]  }
   0x7   :  { %1235 = vmatpush1.bf16.msra.mxu1 %v2791_v7  ;;  %v2806_v18 = vld [vmem:[%s4128_s1 + $0x140] ss:$40 sps:$4 sm:$0xff]   ;;  %v2815_v21 = vld [vmem:[%s4128_s1 + $0x55c] ss:$40 sps:$4 sm:$0xff]   ;;  %v2809_v22 = vld [vmem:[%s4128_s1 + $0x190] ss:$40 sps:$4 sm:$0xff]  }
   0x8   :  { %1308 = vmatpush1.bf16.msra.mxu0 %v2792_v8  ;;  %1236 = vmatprep.subr.bf16.mxu1 %v2793_v9  ;;  %v2813_v20 = vld [vmem:[%s4128_s1 + $0x558] ss:$40 sps:$4 sm:$0xff]   ;;  %v2810_v23 = vld [vmem:[%s4128_s1 + $0x1e4] ss:$40 sps:$4 sm:$0xff]   ;;  %v2829_v25 = vld [vmem:[%s4128_s1 + $0x14] ss:$40 sps:$4 sm:$0xff]  }
   0x9   :  { %1451 = vmatprep.subr.bf16.mxu0 %v2798_v12  ;;  %v3177_v24 = vld [vmem:[%s4129_s0 + $0x38] ss:$12 sps:$4 sm:$0xff]   ;;  %v2816_v26 = vld [vmem:[%s4128_s1 + $0x1e0] ss:$40 sps:$4 sm:$0xff]   ;;  %v2817_v27 = vld [vmem:[%s4128_s1 + $0x234] ss:$40 sps:$4 sm:$0xff]  }
   0xa   :  { %v2819_v28 = vld [vmem:[%s4128_s1 + $0x230] ss:$40 sps:$4 sm:$0xff]   ;;  %v2820_v29 = vld [vmem:[%s4128_s1 + $0x284] ss:$40 sps:$4 sm:$0xff]   ;;  %v2823_v31 = vld [vmem:[%s4128_s1 + $0x280] ss:$40 sps:$4 sm:$0xff]  }
   0xb   :  { %2518 = vmatmul.mubr.msk.bf16.vlgmr.msra.gmra.mrb[0].mxu0 %vm1219_vm0, %v3125_v10  ;;  %1237 = vmatpush1.bf16.msra.mxu1 %v2799_v13  ;;  %v3200_v30 = vld [vmem:[%s4129_s0 + $0x50] ss:$12 sps:$4 sm:$0xff]   ;;  %v2830_v34 = vld [vmem:[%s4128_s1 + $0x324] ss:$40 sps:$4 sm:$0xff]   ;;  %v2832_v37 = vld [vmem:[%s4128_s1 + $0x320] ss:$40 sps:$4 sm:$0xff]  }
   0xc   :  { %1452 = vmatpush1.bf16.msra.mxu0 %v2796_v11  ;;  %1238 = vmatprep.subr.bf16.mxu1 %v2800_v14  ;;  %v2824_v32 = vld [vmem:[%s4128_s1 + $0x2d4] ss:$40 sps:$4 sm:$0xff]   ;;  %v2826_v33 = vld [vmem:[%s4128_s1 + $0x2d0] ss:$40 sps:$4 sm:$0xff]   ;;  %v2835_v38 = vld [vmem:[%s4128_s1 + $0x64] ss:$40 sps:$4 sm:$0xff]  }
   0xd   :  { %1347 = vmatprep.mubr.bf16.mxu0 %v3071_v1  ;;  %1453 = vmatprep.subr.bf16.mxu0 %v2815_v21  ;;  %v2827_v35 = vld [vmem:[%s4128_s1 + $0x10] ss:$40 sps:$4 sm:$0xff]   ;;  %v2836_v39 = vld [vmem:[%s4128_s1 + $0x374] ss:$40 sps:$4 sm:$0xff]   ;;  %v2833_v40 = vld [vmem:[%s4128_s1 + $0x60] ss:$40 sps:$4 sm:$0xff]  }
   0xe   :  { %v3223_v36 = vld [vmem:[%s4129_s0 + $0x4] ss:$12 sps:$4 sm:$0xff]   ;;  %v2841_v42 = vld [vmem:[%s4128_s1 + $0xb4] ss:$40 sps:$4 sm:$0xff]   ;;  %v2844_v45 = vld [vmem:[%s4128_s1 + $0x3c0] ss:$40 sps:$4 sm:$0xff]  }
   0xf   :  { %1239 = vmatpush1.bf16.msra.mxu1 %v2802_v15  ;;  %1264 = vmatprep.mubr.bf16.mxu1 %v3223_v36  ;;  %v2838_v41 = vld [vmem:[%s4128_s1 + $0x370] ss:$40 sps:$4 sm:$0xff]   ;;  %v2842_v43 = vld [vmem:[%s4128_s1 + $0x3c4] ss:$40 sps:$4 sm:$0xff]   ;;  %v2848_v47 = vld [vmem:[%s4128_s1 + $0x414] ss:$40 sps:$4 sm:$0xff]  }
  0x10   :  { %1240 = vmatprep.subr.bf16.mxu1 %v2803_v16  ;;  %1454 = vmatpush1.bf16.msra.mxu0 %v2813_v20  ;;  %v2839_v44 = vld [vmem:[%s4128_s1 + $0xb0] ss:$40 sps:$4 sm:$0xff]   ;;  %v2847_v46 = vld [vmem:[%s4128_s1 + $0x104] ss:$40 sps:$4 sm:$0xff]   ;;  %v2845_v48 = vld [vmem:[%s4128_s1 + $0x100] ss:$40 sps:$4 sm:$0xff]  }
  0x11   :  { %1524 = vmatprep.subr.bf16.mxu0 %v2829_v25  ;;  %v2850_v49 = vld [vmem:[%s4128_s1 + $0x410] ss:$40 sps:$4 sm:$0xff]   ;;  %v2853_v50 = vld [vmem:[%s4128_s1 + $0x154] ss:$40 sps:$4 sm:$0xff]   ;;  %v2854_v51 = vld [vmem:[%s4128_s1 + $0x464] ss:$40 sps:$4 sm:$0xff]  }
  0x12   :  { %v2851_v52 = vld [vmem:[%s4128_s1 + $0x150] ss:$40 sps:$4 sm:$0xff]   ;;  %v2856_v53 = vld [vmem:[%s4128_s1 + $0x460] ss:$40 sps:$4 sm:$0xff]   ;;  %v2859_v54 = vld [vmem:[%s4128_s1 + $0x1a4] ss:$40 sps:$4 sm:$0xff]  }
  0x13   :  { %2519 = vmatmul.mubr.msk.bf16.gmra.mrb[4].mxu0 %vm1219_vm0, %v3151_v17  ;;  %1241 = vmatpush1.bf16.msra.mxu1 %v2806_v18  ;;  %v2860_v55 = vld [vmem:[%s4128_s1 + $0x4b4] ss:$40 sps:$4 sm:$0xff]   ;;  %v2857_v56 = vld [vmem:[%s4128_s1 + $0x1a0] ss:$40 sps:$4 sm:$0xff]   ;;  %v2862_v57 = vld [vmem:[%s4128_s1 + $0x4b0] ss:$40 sps:$4 sm:$0xff]  }
  0x14   :  { %1357 = vmatprep.mubr.bf16.mxu0 %v3071_v1  ;;  %1242 = vmatprep.subr.bf16.mxu1 %v2807_v19  ;;  %v2867_v58 = vld [vmem:[%s4128_s1 + $0x1f4] ss:$40 sps:$4 sm:$0xff]   ;;  %v2865_v60 = vld [vmem:[%s4128_s1 + $0x1f0] ss:$40 sps:$4 sm:$0xff]   ;;  %v3310_v61 = vld [vmem:[%s4129_s0] ss:$12 sps:$4 sm:$0xff]  }
  0x15   :  { %v2871_v59 = vld [vmem:[%s4128_s1 + $0xc] ss:$40 sps:$4 sm:$0xff]   ;;  %v2869_v62 = vld [vmem:[%s4128_s1 + $0x8] ss:$40 sps:$4 sm:$0xff]   ;;  %v2877_v0 = vld [vmem:[%s4128_s1 + $0x5c] ss:$40 sps:$4 sm:$0xff]  }
  0x16   :  { %v2874_v63 = vld [vmem:[%s4128_s1 + $0x244] ss:$40 sps:$4 sm:$0xff]   ;;  %v3324_v2 = vld [vmem:[%s4129_s0 + $0x1c] ss:$12 sps:$4 sm:$0xff]   ;;  %v2875_v4 = vld [vmem:[%s4128_s1 + $0x58] ss:$40 sps:$4 sm:$0xff]  }
  0x17   :  { %1243 = vmatpush1.bf16.msra.mxu1 %v2809_v22  ;;  %v2872_v3 = vld [vmem:[%s4128_s1 + $0x240] ss:$40 sps:$4 sm:$0xff]   ;;  %v2882_v5 = vld [vmem:[%s4128_s1 + $0x294] ss:$40 sps:$4 sm:$0xff]   ;;  %v2880_v7 = vld [vmem:[%s4128_s1 + $0x290] ss:$40 sps:$4 sm:$0xff]  }
  0x18   :  { %1244 = vmatprep.subr.bf16.mxu1 %v2810_v23  ;;  %v2886_v6 = vld [vmem:[%s4128_s1 + $0xac] ss:$40 sps:$4 sm:$0xff]   ;;  %v3349_v8 = vld [vmem:[%s4129_s0 + $0x18] ss:$12 sps:$4 sm:$0xff]   ;;  %v2884_v9 = vld [vmem:[%s4128_s1 + $0xa8] ss:$40 sps:$4 sm:$0xff]  }
  0x19   :  { %v2889_v11 = vld [vmem:[%s4128_s1 + $0x2e4] ss:$40 sps:$4 sm:$0xff]   ;;  %v3363_v13 = vld [vmem:[%s4129_s0 + $0x34] ss:$12 sps:$4 sm:$0xff]   ;;  %v2895_v19 = vld [vmem:[%s4128_s1 + $0x330] ss:$40 sps:$4 sm:$0xff]  }
  0x1a   :  { %v2892_v12 = vld [vmem:[%s4128_s1 + $0xfc] ss:$40 sps:$4 sm:$0xff]   ;;  %v2887_v14 = vld [vmem:[%s4128_s1 + $0x2e0] ss:$40 sps:$4 sm:$0xff]   ;;  %v2901_v18 = vld [vmem:[%s4128_s1 + $0x14c] ss:$40 sps:$4 sm:$0xff]  }
  0x1b   :  { %2520 = vmatmul.mubr.msk.bf16.gmra.mrb[8].mxu0 %vm1219_vm0, %v3177_v24  ;;  %1245 = vmatpush1.bf16.msra.mxu1 %v2816_v26  ;;  %v2890_v15 = vld [vmem:[%s4128_s1 + $0xf8] ss:$40 sps:$4 sm:$0xff]   ;;  %v2897_v16 = vld [vmem:[%s4128_s1 + $0x334] ss:$40 sps:$4 sm:$0xff]   ;;  %v2899_v21 = vld [vmem:[%s4128_s1 + $0x148] ss:$40 sps:$4 sm:$0xff]  }
  0x1c   :  { %1367 = vmatprep.mubr.bf16.mxu0 %v3071_v1  ;;  %1246 = vmatprep.subr.bf16.mxu1 %v2817_v27  ;;  %v3385_v20 = vld [vmem:[%s4129_s0 + $0x30] ss:$12 sps:$4 sm:$0xff]   ;;  %v2904_v22 = vld [vmem:[%s4128_s1 + $0x384] ss:$40 sps:$4 sm:$0xff]   ;;  %v2902_v26 = vld [vmem:[%s4128_s1 + $0x380] ss:$40 sps:$4 sm:$0xff]  }
  0x1d   :  { %v2907_v23 = vld [vmem:[%s4128_s1 + $0x19c] ss:$40 sps:$4 sm:$0xff]   ;;  %v3399_v25 = vld [vmem:[%s4129_s0 + $0x4c] ss:$12 sps:$4 sm:$0xff]  }
  0x1e   :  { %v2905_v27 = vld [vmem:[%s4128_s1 + $0x198] ss:$40 sps:$4 sm:$0xff]  }
  0x1f   :  { %1247 = vmatpush1.bf16.msra.mxu1 %v2819_v28  ;;  %v2912_v28 = vld [vmem:[%s4128_s1 + $0x3d4] ss:$40 sps:$4 sm:$0xff]  }
  0x20   :  { %1248 = vmatprep.subr.bf16.mxu1 %v2820_v29  ;;  %v2916_v29 = vld [vmem:[%s4128_s1 + $0x1ec] ss:$40 sps:$4 sm:$0xff]  }
  0x23   :  { %2521 = vmatmul.mubr.msk.bf16.gmra.mrb[12].mxu0 %vm1219_vm0, %v3200_v30  ;;  %1249 = vmatpush1.bf16.msra.mxu1 %v2823_v31  ;;  %v2910_v31 = vld [vmem:[%s4128_s1 + $0x3d0] ss:$40 sps:$4 sm:$0xff]  }
  0x24   :  { %1483 = vmatprep.mubr.bf16.mxu0 %v3071_v1  ;;  %1250 = vmatprep.subr.bf16.mxu1 %v2824_v32  ;;  %v3421_v32 = vld [vmem:[%s4129_s0 + $0x48] ss:$12 sps:$4 sm:$0xff]  }
  0x27   :  { %1251 = vmatpush1.bf16.msra.mxu1 %v2826_v33  ;;  %v2914_v33 = vld [vmem:[%s4128_s1 + $0x1e8] ss:$40 sps:$4 sm:$0xff]  }
  0x28   :  { %1252 = vmatprep.subr.bf16.mxu1 %v2830_v34  ;;  %v2919_v34 = vld [vmem:[%s4128_s1 + $0x424] ss:$40 sps:$4 sm:$0xff]  }
  0x2b   :  { %2522 = vmatmul.mubr.msk.bf16.vlgmr.msra.gmra.mrb[16].mxu0 %vm1219_vm0, %v3125_v10  ;;  %1253 = vmatpush1.bf16.msra.mxu1 %v2832_v37  ;;  %v2917_v37 = vld [vmem:[%s4128_s1 + $0x420] ss:$40 sps:$4 sm:$0xff]  }
  0x2c   :  { %1525 = vmatpush1.bf16.msra.mxu0 %v2827_v35  ;;  %1254 = vmatprep.subr.bf16.mxu1 %v2836_v39  ;;  %v2922_v35 = vld [vmem:[%s4128_s1 + $0x23c] ss:$40 sps:$4 sm:$0xff]  }
  0x2d   :  { %1526 = vmatprep.subr.bf16.mxu0 %v2835_v38  ;;  %1493 = vmatprep.mubr.bf16.mxu0 %v3071_v1  ;;  %v2920_v38 = vld [vmem:[%s4128_s1 + $0x238] ss:$40 sps:$4 sm:$0xff]  }
  0x2e   :  { %v211_v39 = vld [vmem:[%s4130_s2] sm:$0xff] }
  0x2f   :  { %1255 = vmatpush1.bf16.msra.mxu1 %v2838_v41  ;;  %v2928_v41 = vld [vmem:[%s4128_s1 + $0x28c] ss:$40 sps:$4 sm:$0xff]   ;;  %221 = vperm.xlu0 %2779, %v211_v39  }
  0x30   :  { %1527 = vmatpush1.bf16.msra.mxu0 %v2833_v40  ;;  %1256 = vmatprep.subr.bf16.mxu1 %v2842_v43  ;;  %v2925_v40 = vld [vmem:[%s4128_s1 + $0x474] ss:$40 sps:$4 sm:$0xff]   ;;  %v2923_v43 = vld [vmem:[%s4128_s1 + $0x470] ss:$40 sps:$4 sm:$0xff]   ;;  %v2991_v39 = vld [vmem:[%s4128_s1 + $0x164] ss:$40 sps:$4 sm:$0xff]  }
  0x31   :  { %1528 = vmatprep.subr.bf16.mxu0 %v2841_v42  ;;  %v212_v42 = vld [vmem:[%s4130_s2 + $0x8] sm:$0xff] }
  0x33   :  { %2523 = vmatmul.mubr.msk.bf16.gmra.mrb[20].mxu0 %vm1219_vm0, %v3151_v17  ;;  %1257 = vmatpush1.bf16.msra.mxu1 %v2844_v45  ;;  %v2931_v45 = vld [vmem:[%s4128_s1 + $0x4c4] ss:$40 sps:$4 sm:$0xff]  }
  0x34   :  { %1529 = vmatpush1.bf16.msra.mxu0 %v2839_v44  ;;  %1258 = vmatprep.subr.bf16.mxu1 %v2848_v47  ;;  %v2926_v44 = vld [vmem:[%s4128_s1 + $0x288] ss:$40 sps:$4 sm:$0xff]  }
  0x35   :  { %1530 = vmatprep.subr.bf16.mxu0 %v2847_v46  ;;  %1503 = vmatprep.mubr.bf16.mxu0 %v3071_v1  ;;  %v2934_v46 = vld [vmem:[%s4128_s1 + $0x2dc] ss:$40 sps:$4 sm:$0xff]   ;;  %v213_v47 = vld [vmem:[%s4130_s2 + $0x10] sm:$0xff] }
  0x36   :  { %226 = vperm.xlu0 %2779, %v212_v42   ;;  %231 = vperm.xlu1 %2780, %v213_v47   ;;  %v2997_v42 = vld [vmem:[%s4128_s1 + $0x1b4] ss:$40 sps:$4 sm:$0xff]   ;;  %v3001_v47 = vld [vmem:[%s4128_s1 + $0x200] ss:$40 sps:$4 sm:$0xff]  }
  0x37   :  { %1259 = vmatpush1.bf16.msra.mxu1 %v2850_v49  ;;  %v2932_v49 = vld [vmem:[%s4128_s1 + $0x2d8] ss:$40 sps:$4 sm:$0xff]  }
  0x38   :  { %1531 = vmatpush1.bf16.msra.mxu0 %v2845_v48  ;;  %1260 = vmatprep.subr.bf16.mxu1 %v2854_v51  ;;  %v2929_v48 = vld [vmem:[%s4128_s1 + $0x4c0] ss:$40 sps:$4 sm:$0xff]   ;;  %v2940_v51 = vld [vmem:[%s4128_s1 + $0x32c] ss:$40 sps:$4 sm:$0xff]  }
  0x39   :  { %1532 = vmatprep.subr.bf16.mxu0 %v2853_v50  ;;  %v2937_v50 = vld [vmem:[%s4128_s1 + $0x514] ss:$40 sps:$4 sm:$0xff]  }
  0x3b   :  { %2524 = vmatmul.mubr.msk.bf16.gmra.mrb[24].mxu0 %vm1219_vm0, %v3177_v24  ;;  %1261 = vmatpush1.bf16.msra.mxu1 %v2856_v53  ;;  %v2935_v53 = vld [vmem:[%s4128_s1 + $0x510] ss:$40 sps:$4 sm:$0xff]  }
  0x3c   :  { %1533 = vmatpush1.bf16.msra.mxu0 %v2851_v52  ;;  %1262 = vmatprep.subr.bf16.mxu1 %v2860_v55  ;;  %v214_v52 = vld [vmem:[%s4130_s2 + $0x18] sm:$0xff] }
  0x3d   :  { %1534 = vmatprep.subr.bf16.mxu0 %v2859_v54  ;;  %1513 = vmatprep.mubr.bf16.mxu0 %v3071_v1  ;;  %v2938_v54 = vld [vmem:[%s4128_s1 + $0x328] ss:$40 sps:$4 sm:$0xff]   ;;  %v2943_v55 = vld [vmem:[%s4128_s1 + $0x37c] ss:$40 sps:$4 sm:$0xff]  }
  0x3e   :  { %236 = vperm.xlu1 %2780, %v214_v52   ;;  %v3010_v52 = vld [vmem:[%s4128_s1 + $0x2e8] ss:$40 sps:$4 sm:$0xff]  }
  0x3f   :  { %1263 = vmatpush1.bf16.msra.mxu1 %v2862_v57  ;;  %v2952_v57 = vld [vmem:[%s4128_s1 + $0x564] ss:$40 sps:$4 sm:$0xff]  }
  0x40   :  { %1535 = vmatpush1.bf16.msra.mxu0 %v2857_v56  ;;  %1378 = vmatprep.subr.bf16.mxu1 %v2871_v59  ;;  %v215_v56 = vld [vmem:[%s4130_s2 + $0x20] sm:$0xff] }
  0x41   :  { %1536 = vmatprep.subr.bf16.mxu0 %v2867_v58  ;;  %241 = vperm.xlu0 %2779, %v215_v56   ;;  %v216_v58 = vld [vmem:[%s4130_s2 + $0x28] sm:$0xff]  ;;  %v2941_v59 = vld [vmem:[%s4128_s1 + $0x378] ss:$40 sps:$4 sm:$0xff]   ;;  %v3021_v56 = vld [vmem:[%s4128_s1 + $0x2f4] ss:$40 sps:$4 sm:$0xff]  }
  0x42   :  { %1265 = vmatmul.mubr.bf16.vlgmr.msra.gmra.mrb[0].mxu1 %v3310_v61  ;;  %246 = vperm.xlu1 %2780, %v216_v58   ;;  %v3022_v58 = vld [vmem:[%s4128_s1 + $0x388] ss:$40 sps:$4 sm:$0xff]  }
  0x43   :  { %2525 = vmatmul.mubr.msk.bf16.gmra.mrb[28].mxu0 %vm1219_vm0, %v3200_v30  ;;  %1379 = vmatpush1.bf16.msra.mxu1 %v2869_v62  ;;  %v2946_v62 = vld [vmem:[%s4128_s1 + $0x3cc] ss:$40 sps:$4 sm:$0xff]  }
  0x44   :  { %1537 = vmatpush1.bf16.msra.mxu0 %v2865_v60  ;;  %1380 = vmatprep.subr.bf16.mxu1 %v2877_v0  ;;  %v2950_v60 = vld [vmem:[%s4128_s1 + $0x560] ss:$40 sps:$4 sm:$0xff]   ;;  %v217_v0 = vld [vmem:[%s4130_s2 + $0x30] sm:$0xff] }
  0x45   :  { %1538 = vmatprep.subr.bf16.mxu0 %v2874_v63  ;;  %1274 = vmatprep.mubr.bf16.mxu1 %v3324_v2  ;;  %v2967_v63 = vld [vmem:[%s4128_s1 + $0x24] ss:$40 sps:$4 sm:$0xff]  }
  0x46   :  { %1556 = vmatprep.mubr.bf16.mxu0 %v3223_v36  ;;  %251 = vperm.xlu0 %2779, %v217_v0   ;;  %v3033_v0 = vld [vmem:[%s4128_s1 + $0x394] ss:$40 sps:$4 sm:$0xff]  }
  0x47   :  { %1381 = vmatpush1.bf16.msra.mxu1 %v2875_v4  ;;  %v2949_v4 = vld [vmem:[%s4128_s1 + $0x41c] ss:$40 sps:$4 sm:$0xff]  }
  0x48   :  { %1539 = vmatpush1.bf16.msra.mxu0 %v2872_v3  ;;  %1382 = vmatprep.subr.bf16.mxu1 %v2886_v6  ;;  %v2944_v3 = vld [vmem:[%s4128_s1 + $0x3c8] ss:$40 sps:$4 sm:$0xff]   ;;  %v2947_v6 = vld [vmem:[%s4128_s1 + $0x418] ss:$40 sps:$4 sm:$0xff]  }
  0x49   :  { %1540 = vmatprep.subr.bf16.mxu0 %v2882_v5  ;;  %v218_v5 = vld [vmem:[%s4130_s2 + $0x38] sm:$0xff] }
  0x4a   :  { %1275 = vmatmul.mubr.bf16.gmra.mrb[4].mxu1 %v3349_v8  ;;  %256 = vperm.xlu1 %2780, %v218_v5   ;;  %v3034_v5 = vld [vmem:[%s4128_s1 + $0x428] ss:$40 sps:$4 sm:$0xff]  }
  0x4b   :  { %1383 = vmatpush1.bf16.msra.mxu1 %v2884_v9  ;;  %1284 = vmatprep.mubr.bf16.mxu1 %v3363_v13  ;;  %v2953_v9 = vld [vmem:[%s4128_s1 + $0x468] ss:$40 sps:$4 sm:$0xff]  }
  0x4c   :  { %1541 = vmatpush1.bf16.msra.mxu0 %v2880_v7  ;;  %1384 = vmatprep.subr.bf16.mxu1 %v2892_v12  ;;  %v2955_v7 = vld [vmem:[%s4128_s1 + $0x46c] ss:$40 sps:$4 sm:$0xff]   ;;  %v2956_v12 = vld [vmem:[%s4128_s1 + $0x4b8] ss:$40 sps:$4 sm:$0xff]  }
  0x4d   :  { %1542 = vmatprep.subr.bf16.mxu0 %v2889_v11  ;;  %v2958_v11 = vld [vmem:[%s4128_s1 + $0x4bc] ss:$40 sps:$4 sm:$0xff]  }
  0x4f   :  { %1385 = vmatpush1.bf16.msra.mxu1 %v2890_v15  ;;  %v2959_v15 = vld [vmem:[%s4128_s1 + $0x18] ss:$40 sps:$4 sm:$0xff]  }
  0x50   :  { %1543 = vmatpush1.bf16.msra.mxu0 %v2887_v14  ;;  %1386 = vmatprep.subr.bf16.mxu1 %v2901_v18  ;;  %v2961_v14 = vld [vmem:[%s4128_s1 + $0x1c] ss:$40 sps:$4 sm:$0xff]   ;;  %v2962_v18 = vld [vmem:[%s4128_s1 + $0x68] ss:$40 sps:$4 sm:$0xff]  }
  0x51   :  { %1544 = vmatprep.subr.bf16.mxu0 %v2897_v16  ;;  %v2964_v16 = vld [vmem:[%s4128_s1 + $0x6c] ss:$40 sps:$4 sm:$0xff]  }
  0x52   :  { %1285 = vmatmul.mubr.bf16.gmra.mrb[8].mxu1 %v3385_v20 }
  0x53   :  { %1387 = vmatpush1.bf16.msra.mxu1 %v2899_v21  ;;  %1294 = vmatprep.mubr.bf16.mxu1 %v3399_v25  ;;  %v2965_v21 = vld [vmem:[%s4128_s1 + $0x20] ss:$40 sps:$4 sm:$0xff]  }
  0x54   :  { %1545 = vmatpush1.bf16.msra.mxu0 %v2895_v19  ;;  %1388 = vmatprep.subr.bf16.mxu1 %v2907_v23  ;;  %v2970_v19 = vld [vmem:[%s4128_s1 + $0xbc] ss:$40 sps:$4 sm:$0xff]  }
  0x55   :  { %1546 = vmatprep.subr.bf16.mxu0 %v2904_v22  ;;  %v2968_v22 = vld [vmem:[%s4128_s1 + $0xb8] ss:$40 sps:$4 sm:$0xff]   ;;  %v2973_v23 = vld [vmem:[%s4128_s1 + $0x74] ss:$40 sps:$4 sm:$0xff]  }
  0x57   :  { %1389 = vmatpush1.bf16.msra.mxu1 %v2905_v27  ;;  %v2971_v27 = vld [vmem:[%s4128_s1 + $0x70] ss:$40 sps:$4 sm:$0xff]  }
  0x58   :  { %1547 = vmatpush1.bf16.msra.mxu0 %v2902_v26  ;;  %1390 = vmatprep.subr.bf16.mxu1 %v2916_v29  ;;  %v2976_v26 = vld [vmem:[%s4128_s1 + $0x10c] ss:$40 sps:$4 sm:$0xff]  }
  0x59   :  { %1548 = vmatprep.subr.bf16.mxu0 %v2912_v28  ;;  %v2974_v28 = vld [vmem:[%s4128_s1 + $0x108] ss:$40 sps:$4 sm:$0xff]   ;;  %v2979_v29 = vld [vmem:[%s4128_s1 + $0xc4] ss:$40 sps:$4 sm:$0xff]  }
  0x5a   :  { %1295 = vmatmul.mubr.bf16.gmra.mrb[12].mxu1 %v3421_v32 }
  0x5b   :  { %1391 = vmatpush1.bf16.msra.mxu1 %v2914_v33  ;;  %1410 = vmatprep.mubr.bf16.mxu1 %v3223_v36  ;;  %v2980_v33 = vld [vmem:[%s4128_s1 + $0x158] ss:$40 sps:$4 sm:$0xff]  }
  0x5c   :  { %1549 = vmatpush1.bf16.msra.mxu0 %v2910_v31  ;;  %1392 = vmatprep.subr.bf16.mxu1 %v2922_v35  ;;  %v2977_v31 = vld [vmem:[%s4128_s1 + $0xc0] ss:$40 sps:$4 sm:$0xff]   ;;  %v2988_v35 = vld [vmem:[%s4128_s1 + $0x1ac] ss:$40 sps:$4 sm:$0xff]  }
  0x5d   :  { %1550 = vmatprep.subr.bf16.mxu0 %v2919_v34  ;;  %v2985_v34 = vld [vmem:[%s4128_s1 + $0x114] ss:$40 sps:$4 sm:$0xff]  }
  0x5f   :  { %1393 = vmatpush1.bf16.msra.mxu1 %v2920_v38  ;;  %v2986_v38 = vld [vmem:[%s4128_s1 + $0x1a8] ss:$40 sps:$4 sm:$0xff]  }
  0x60   :  { %1551 = vmatpush1.bf16.msra.mxu0 %v2917_v37  ;;  %1394 = vmatprep.subr.bf16.mxu1 %v2928_v41  ;;  %v2983_v37 = vld [vmem:[%s4128_s1 + $0x110] ss:$40 sps:$4 sm:$0xff]  }
  0x61   :  { %1552 = vmatprep.subr.bf16.mxu0 %v2925_v40  ;;  %v2989_v40 = vld [vmem:[%s4128_s1 + $0x160] ss:$40 sps:$4 sm:$0xff]  }
  0x62   :  { %v2992_v41 = vld [vmem:[%s4128_s1 + $0x1f8] ss:$40 sps:$4 sm:$0xff]  }
  0x63   :  { %1395 = vmatpush1.bf16.msra.mxu1 %v2926_v44  ;;  %v2995_v44 = vld [vmem:[%s4128_s1 + $0x1b0] ss:$40 sps:$4 sm:$0xff]  }
  0x64   :  { %1553 = vmatpush1.bf16.msra.mxu0 %v2923_v43  ;;  %1396 = vmatprep.subr.bf16.mxu1 %v2934_v46  ;;  %v3000_v43 = vld [vmem:[%s4128_s1 + $0x24c] ss:$40 sps:$4 sm:$0xff]  }
  0x65   :  { %1554 = vmatprep.subr.bf16.mxu0 %v2931_v45  ;;  %v2998_v45 = vld [vmem:[%s4128_s1 + $0x248] ss:$40 sps:$4 sm:$0xff]   ;;  %v3003_v46 = vld [vmem:[%s4128_s1 + $0x204] ss:$40 sps:$4 sm:$0xff]  }
  0x67   :  { %1397 = vmatpush1.bf16.msra.mxu1 %v2932_v49  ;;  %v3009_v49 = vld [vmem:[%s4128_s1 + $0x254] ss:$40 sps:$4 sm:$0xff]  }
  0x68   :  { %1555 = vmatpush1.bf16.msra.mxu0 %v2929_v48  ;;  %1398 = vmatprep.subr.bf16.mxu1 %v2940_v51  ;;  %v3004_v48 = vld [vmem:[%s4128_s1 + $0x298] ss:$40 sps:$4 sm:$0xff]  }
  0x69   :  { %1597 = vmatprep.subr.bf16.mxu0 %v2937_v50  ;;  %v3012_v50 = vld [vmem:[%s4128_s1 + $0x2ec] ss:$40 sps:$4 sm:$0xff]   ;;  %v3007_v51 = vld [vmem:[%s4128_s1 + $0x250] ss:$40 sps:$4 sm:$0xff]  }
  0x6b   :  { %1557 = vmatmul.mubr.bf16.vlgmr.msra.gmra.mrb[32].mxu0 %v3310_v61  ;;  %1399 = vmatpush1.bf16.msra.mxu1 %v2938_v54  ;;  %v3013_v54 = vld [vmem:[%s4128_s1 + $0x2a0] ss:$40 sps:$4 sm:$0xff]  }
  0x6c   :  { %1598 = vmatpush1.bf16.msra.mxu0 %v2935_v53  ;;  %1400 = vmatprep.subr.bf16.mxu1 %v2943_v55  ;;  %v3015_v53 = vld [vmem:[%s4128_s1 + $0x2a4] ss:$40 sps:$4 sm:$0xff]   ;;  %v3016_v55 = vld [vmem:[%s4128_s1 + $0x338] ss:$40 sps:$4 sm:$0xff]  }
  0x6d   :  { %1566 = vmatprep.mubr.bf16.mxu0 %v3324_v2  ;;  %1599 = vmatprep.subr.bf16.mxu0 %v2952_v57  ;;  %v3019_v57 = vld [vmem:[%s4128_s1 + $0x2f0] ss:$40 sps:$4 sm:$0xff]  }
  0x6f   :  { %1401 = vmatpush1.bf16.msra.mxu1 %v2941_v59  ;;  %v3027_v59 = vld [vmem:[%s4128_s1 + $0x344] ss:$40 sps:$4 sm:$0xff]  }
  0x70   :  { %1600 = vmatpush1.bf16.msra.mxu0 %v2950_v60  ;;  %1402 = vmatprep.subr.bf16.mxu1 %v2946_v62  ;;  %v3030_v60 = vld [vmem:[%s4128_s1 + $0x3dc] ss:$40 sps:$4 sm:$0xff]   ;;  %v3025_v62 = vld [vmem:[%s4128_s1 + $0x340] ss:$40 sps:$4 sm:$0xff]  }
  0x71   :  { %1816 = vmatprep.subr.bf16.mxu0 %v2967_v63  ;;  %v3028_v63 = vld [vmem:[%s4128_s1 + $0x3d8] ss:$40 sps:$4 sm:$0xff]  }
  0x73   :  { %1567 = vmatmul.mubr.bf16.gmra.mrb[36].mxu0 %v3349_v8  ;;  %1403 = vmatpush1.bf16.msra.mxu1 %v2944_v3  ;;  %v3036_v3 = vld [vmem:[%s4128_s1 + $0x42c] ss:$40 sps:$4 sm:$0xff]  }
  0x74   :  { %1576 = vmatprep.mubr.bf16.mxu0 %v3363_v13  ;;  %1404 = vmatprep.subr.bf16.mxu1 %v2949_v4  ;;  %v3031_v4 = vld [vmem:[%s4128_s1 + $0x390] ss:$40 sps:$4 sm:$0xff]  }
  0x77   :  { %1405 = vmatpush1.bf16.msra.mxu1 %v2947_v6  ;;  %v3039_v6 = vld [vmem:[%s4128_s1 + $0x3e4] ss:$40 sps:$4 sm:$0xff]  }
  0x78   :  { %1406 = vmatprep.subr.bf16.mxu1 %v2955_v7  ;;  %v3042_v7 = vld [vmem:[%s4128_s1 + $0x47c] ss:$40 sps:$4 sm:$0xff]  }
  0x7b   :  { %1577 = vmatmul.mubr.bf16.gmra.mrb[40].mxu0 %v3385_v20  ;;  %1407 = vmatpush1.bf16.msra.mxu1 %v2953_v9  ;;  %v3037_v9 = vld [vmem:[%s4128_s1 + $0x3e0] ss:$40 sps:$4 sm:$0xff]  }
  0x7c   :  { %1586 = vmatprep.mubr.bf16.mxu0 %v3399_v25  ;;  %1408 = vmatprep.subr.bf16.mxu1 %v2958_v11  ;;  %v3040_v11 = vld [vmem:[%s4128_s1 + $0x478] ss:$40 sps:$4 sm:$0xff]  }
  0x7f   :  { %1409 = vmatpush1.bf16.msra.mxu1 %v2956_v12  ;;  %v3045_v12 = vld [vmem:[%s4128_s1 + $0x434] ss:$40 sps:$4 sm:$0xff]  }
  0x80   :  { %1670 = vmatprep.subr.bf16.mxu1 %v2961_v14  ;;  %v3048_v14 = vld [vmem:[%s4128_s1 + $0x4cc] ss:$40 sps:$4 sm:$0xff]  }
  0x82   :  { %1411 = vmatmul.mubr.bf16.vlgmr.msra.gmra.mrb[16].mxu1 %v3310_v61 }
  0x83   :  { %1587 = vmatmul.mubr.bf16.gmra.mrb[44].mxu0 %v3421_v32  ;;  %1671 = vmatpush1.bf16.msra.mxu1 %v2959_v15  ;;  %v3043_v15 = vld [vmem:[%s4128_s1 + $0x430] ss:$40 sps:$4 sm:$0xff]  }
  0x84   :  { %1629 = vmatprep.mubr.bf16.mxu0 %v3071_v1  ;;  %1672 = vmatprep.subr.bf16.mxu1 %v2964_v16  ;;  %v3046_v16 = vld [vmem:[%s4128_s1 + $0x4c8] ss:$40 sps:$4 sm:$0xff]  }
  0x85   :  { %1420 = vmatprep.mubr.bf16.mxu1 %v3324_v2 }
  0x87   :  { %1673 = vmatpush1.bf16.msra.mxu1 %v2962_v18  ;;  %v3051_v18 = vld [vmem:[%s4128_s1 + $0x484] ss:$40 sps:$4 sm:$0xff]  }
  0x88   :  { %1674 = vmatprep.subr.bf16.mxu1 %v2970_v19  ;;  %v3057_v19 = vld [vmem:[%s4128_s1 + $0x51c] ss:$40 sps:$4 sm:$0xff]  }
  0x8a   :  { %1421 = vmatmul.mubr.bf16.gmra.mrb[20].mxu1 %v3349_v8 }
  0x8b   :  { %2526 = vmatmul.mubr.msk.bf16.vlgmr.msra.gmra.mrb[32].mxu0 %vm1219_vm0, %v3125_v10  ;;  %1675 = vmatpush1.bf16.msra.mxu1 %v2968_v22  ;;  %v2982_v10 = vld [vmem:[%s4128_s1 + $0x15c] ss:$40 sps:$4 sm:$0xff]  }
  0x8c   :  { %1817 = vmatpush1.bf16.msra.mxu0 %v2965_v21  ;;  %1676 = vmatprep.subr.bf16.mxu1 %v2976_v26  ;;  %v3049_v21 = vld [vmem:[%s4128_s1 + $0x480] ss:$40 sps:$4 sm:$0xff]   ;;  %v3054_v22 = vld [vmem:[%s4128_s1 + $0x4d4] ss:$40 sps:$4 sm:$0xff]  }
  0x8d   :  { %1818 = vmatprep.subr.bf16.mxu0 %v2973_v23  ;;  %1639 = vmatprep.mubr.bf16.mxu0 %v3071_v1  ;;  %v3055_v23 = vld [vmem:[%s4128_s1 + $0x518] ss:$40 sps:$4 sm:$0xff]   ;;  %v3063_v26 = vld [vmem:[%s4128_s1 + $0x56c] ss:$40 sps:$4 sm:$0xff]  }
  0x8e   :  { %1430 = vmatprep.mubr.bf16.mxu1 %v3363_v13 }
  0x8f   :  { %1677 = vmatpush1.bf16.msra.mxu1 %v2974_v28  ;;  %v3060_v28 = vld [vmem:[%s4128_s1 + $0x524] ss:$40 sps:$4 sm:$0xff]  }
  0x90   :  { %1819 = vmatpush1.bf16.msra.mxu0 %v2971_v27  ;;  %1678 = vmatprep.subr.bf16.mxu1 %v2982_v10  ;;  %v3052_v27 = vld [vmem:[%s4128_s1 + $0x4d0] ss:$40 sps:$4 sm:$0xff]   ;;  %v3058_v10 = vld [vmem:[%s4128_s1 + $0x520] ss:$40 sps:$4 sm:$0xff]  }
  0x91   :  { %1820 = vmatprep.subr.bf16.mxu0 %v2979_v29  ;;  %v3061_v29 = vld [vmem:[%s4128_s1 + $0x568] ss:$40 sps:$4 sm:$0xff]  }
  0x92   :  { %1431 = vmatmul.mubr.bf16.gmra.mrb[24].mxu1 %v3385_v20 }
  0x93   :  { %2527 = vmatmul.mubr.msk.bf16.gmra.mrb[36].mxu0 %vm1219_vm0, %v3151_v17  ;;  %1679 = vmatpush1.bf16.msra.mxu1 %v2980_v33  ;;  %v2994_v17 = vld [vmem:[%s4128_s1 + $0x1fc] ss:$40 sps:$4 sm:$0xff]   ;;  %v3064_v33 = vld [vmem:[%s4128_s1 + $0x570] ss:$40 sps:$4 sm:$0xff]  }
  0x94   :  { %1821 = vmatpush1.bf16.msra.mxu0 %v2977_v31  ;;  %1680 = vmatprep.subr.bf16.mxu1 %v2988_v35  ;;  %v3066_v31 = vld [vmem:[%s4128_s1 + $0x574] ss:$40 sps:$4 sm:$0xff]  }
  0x95   :  { %1822 = vmatprep.subr.bf16.mxu0 %v2985_v34  ;;  %1649 = vmatprep.mubr.bf16.mxu0 %v3071_v1 }
  0x96   :  { %1440 = vmatprep.mubr.bf16.mxu1 %v3399_v25 }
  0x97   :  { %1681 = vmatpush1.bf16.msra.mxu1 %v2986_v38 }
  0x98   :  { %1823 = vmatpush1.bf16.msra.mxu0 %v2983_v37  ;;  %1682 = vmatprep.subr.bf16.mxu1 %v2994_v17 }
  0x99   :  { %1824 = vmatprep.subr.bf16.mxu0 %v2991_v39 }
  0x9a   :  { %1441 = vmatmul.mubr.bf16.gmra.mrb[28].mxu1 %v3421_v32 }
  0x9b   :  { %2528 = vmatmul.mubr.msk.bf16.gmra.mrb[40].mxu0 %vm1219_vm0, %v3177_v24  ;;  %1683 = vmatpush1.bf16.msra.mxu1 %v2992_v41  ;;  %v3006_v24 = vld [vmem:[%s4128_s1 + $0x29c] ss:$40 sps:$4 sm:$0xff]  }
  0x9c   :  { %1825 = vmatpush1.bf16.msra.mxu0 %v2989_v40  ;;  %1684 = vmatprep.subr.bf16.mxu1 %v3000_v43  ;;  %v3069_v41 = vld [vmem:[%s4129_s0 + $0x38] ss:$12 sps:$4 sm:$0xff]  }
  0x9d   :  { %1826 = vmatprep.subr.bf16.mxu0 %v2997_v42  ;;  %1659 = vmatprep.mubr.bf16.mxu0 %v3071_v1 }
  0x9e   :  { %1702 = vmatprep.mubr.bf16.mxu1 %v3223_v36 }
  0x9f   :  { %1685 = vmatpush1.bf16.msra.mxu1 %v2998_v45 }
  0xa0   :  { %1827 = vmatpush1.bf16.msra.mxu0 %v2995_v44  ;;  %1686 = vmatprep.subr.bf16.mxu1 %v3006_v24 }
  0xa1   :  { %1828 = vmatprep.subr.bf16.mxu0 %v3003_v46  ;;  %v3070_v46 = vld [vmem:[%s4129_s0 + $0x50] ss:$12 sps:$4 sm:$0xff]  }
  0xa3   :  { %2529 = vmatmul.mubr.msk.bf16.gmra.mrb[44].mxu0 %vm1219_vm0, %v3200_v30  ;;  %1687 = vmatpush1.bf16.msra.mxu1 %v3004_v48  ;;  %v3018_v30 = vld [vmem:[%s4128_s1 + $0x33c] ss:$40 sps:$4 sm:$0xff]  }
  0xa4   :  { %1829 = vmatpush1.bf16.msra.mxu0 %v3001_v47  ;;  %1688 = vmatprep.subr.bf16.mxu1 %v3012_v50 }
  0xa5   :  { %1830 = vmatprep.subr.bf16.mxu0 %v3009_v49  ;;  %1848 = vmatprep.mubr.bf16.mxu0 %v3223_v36  ;;  %v3024_v36 = vld [vmem:[%s4128_s1 + $0x38c] ss:$40 sps:$4 sm:$0xff]  }
  0xa7   :  { %1689 = vmatpush1.bf16.msra.mxu1 %v3010_v52 }
  0xa8   :  { %1831 = vmatpush1.bf16.msra.mxu0 %v3007_v51  ;;  %1690 = vmatprep.subr.bf16.mxu1 %v3018_v30 }
  0xa9   :  { %1832 = vmatprep.subr.bf16.mxu0 %v3015_v53 }
  0xab   :  { %1691 = vmatpush1.bf16.msra.mxu1 %v3016_v55 }
  0xac   :  { %1833 = vmatpush1.bf16.msra.mxu0 %v3013_v54  ;;  %1692 = vmatprep.subr.bf16.mxu1 %v3024_v36 }
  0xad   :  { %1834 = vmatprep.subr.bf16.mxu0 %v3021_v56 }
  0xaf   :  { %1693 = vmatpush1.bf16.msra.mxu1 %v3022_v58 }
  0xb0   :  { %1835 = vmatpush1.bf16.msra.mxu0 %v3019_v57  ;;  %1694 = vmatprep.subr.bf16.mxu1 %v3030_v60 }
  0xb1   :  { %1836 = vmatprep.subr.bf16.mxu0 %v3027_v59 }
  0xb3   :  { %1695 = vmatpush1.bf16.msra.mxu1 %v3028_v63 }
  0xb4   :  { %1837 = vmatpush1.bf16.msra.mxu0 %v3025_v62  ;;  %1696 = vmatprep.subr.bf16.mxu1 %v3036_v3 }
  0xb5   :  { %1838 = vmatprep.subr.bf16.mxu0 %v3033_v0  ;;  %v3878_v57 = vpop.permute.xlu1 %231 }
  0xb7   :  { %1697 = vmatpush1.bf16.msra.mxu1 %v3034_v5 }
  0xb8   :  { %1839 = vmatpush1.bf16.msra.mxu0 %v3031_v4  ;;  %1698 = vmatprep.subr.bf16.mxu1 %v3042_v7 }
  0xb9   :  { %1840 = vmatprep.subr.bf16.mxu0 %v3039_v6 }
  0xbb   :  { %1699 = vmatpush1.bf16.msra.mxu1 %v3040_v11 }
  0xbc   :  { %1841 = vmatpush1.bf16.msra.mxu0 %v3037_v9  ;;  %1700 = vmatprep.subr.bf16.mxu1 %v3048_v14 }
  0xbd   :  { %1842 = vmatprep.subr.bf16.mxu0 %v3045_v12 }
  0xbf   :  { %1701 = vmatpush1.bf16.msra.mxu1 %v3046_v16 }
  0xc0   :  { %1843 = vmatpush1.bf16.msra.mxu0 %v3043_v15  ;;  %1743 = vmatprep.subr.bf16.mxu1 %v3057_v19 }
  0xc1   :  { %1844 = vmatprep.subr.bf16.mxu0 %v3051_v18 }
  0xc2   :  { %1703 = vmatmul.mubr.bf16.vlgmr.msra.gmra.mrb[32].mxu1 %v3310_v61 }
  0xc3   :  { %1712 = vmatprep.mubr.bf16.mxu1 %v3324_v2  ;;  %1744 = vmatpush1.bf16.msra.mxu1 %v3055_v23 }
  0xc4   :  { %1845 = vmatpush1.bf16.msra.mxu0 %v3049_v21  ;;  %1745 = vmatprep.subr.bf16.mxu1 %v3063_v26  ;;  %v3894_v26 = vpop.permute.xlu1 %236 }
  0xc5   :  { %1846 = vmatprep.subr.bf16.mxu0 %v3054_v22 }
  0xc7   :  { %1746 = vmatpush1.bf16.msra.mxu1 %v3061_v29 }
  0xc8   :  { %1847 = vmatpush1.bf16.msra.mxu0 %v3052_v27 }
  0xc9   :  { %1889 = vmatprep.subr.bf16.mxu0 %v3060_v28 }
  0xca   :  { %1713 = vmatmul.mubr.bf16.gmra.mrb[36].mxu1 %v3349_v8 }
  0xcb   :  { %1849 = vmatmul.mubr.bf16.vlgmr.msra.gmra.mrb[48].mxu0 %v3310_v61  ;;  %1722 = vmatprep.mubr.bf16.mxu1 %v3363_v13 }
  0xcc   :  { %1890 = vmatpush1.bf16.msra.mxu0 %v3058_v10  ;;  %1858 = vmatprep.mubr.bf16.mxu0 %v3324_v2 }
  0xcd   :  { %1891 = vmatprep.subr.bf16.mxu0 %v3066_v31 }
  0xd0   :  { %1892 = vmatpush1.bf16.msra.mxu0 %v3064_v33 }
  0xd2   :  { %1723 = vmatmul.mubr.bf16.gmra.mrb[40].mxu1 %v3385_v20 }
  0xd3   :  { %1859 = vmatmul.mubr.bf16.gmra.mrb[52].mxu0 %v3349_v8  ;;  %1732 = vmatprep.mubr.bf16.mxu1 %v3399_v25  ;;  %v3067_v8 = vld [vmem:[%s4129_s0 + $0x8] ss:$12 sps:$4 sm:$0xff]  }
  0xd4   :  { %1868 = vmatprep.mubr.bf16.mxu0 %v3363_v13 }
  0xda   :  { %1733 = vmatmul.mubr.bf16.gmra.mrb[44].mxu1 %v3421_v32 }
  0xdb   :  { %1869 = vmatmul.mubr.bf16.gmra.mrb[56].mxu0 %v3385_v20  ;;  %1775 = vmatprep.mubr.bf16.mxu1 %v3071_v1 }
  0xdc   :  { %1878 = vmatprep.mubr.bf16.mxu0 %v3399_v25 }
  0xde   :  { %v1339_v61 = vpop.f32.mrb[0].mxu0 }
  0xdf   :  { %v1341_v2 = vpop.f32.mrb[1].mxu0 }
  0xe0   :  { %v3794_v34 = vpop.f32.mrb[2].mxu0 }
  0xe1   :  { %v3796_v35 = vpop.f32.mrb[3].mxu0 }
  0xe2   :  { %2530 = vmatmul.mubr.msk.bf16.vlgmr.msra.gmra.mrb[32].mxu1 %vm1219_vm0, %v3067_v8 }
  0xe3   :  { %1879 = vmatmul.mubr.bf16.gmra.mrb[60].mxu0 %v3421_v32  ;;  %1785 = vmatprep.mubr.bf16.mxu1 %v3071_v1  ;;  %v3068_v32 = vld [vmem:[%s4129_s0 + $0x20] ss:$12 sps:$4 sm:$0xff]  }
  0xe4   :  { %1921 = vmatprep.mubr.bf16.mxu0 %v3071_v1 }
  0xe6   :  { %v3805_v13 = vpop.f32.mrb[4].mxu0 }
  0xe7   :  { %v3807_v20 = vpop.f32.mrb[5].mxu0 }
  0xe8   :  { %v3809_v25 = vpop.f32.mrb[6].mxu0 }
  0xe9   :  { %v3811_v37 = vpop.f32.mrb[7].mxu0 }
  0xea   :  { %2531 = vmatmul.mubr.msk.bf16.gmra.mrb[36].mxu1 %vm1219_vm0, %v3068_v32 }
  0xeb   :  { %2534 = vmatmul.mubr.msk.bf16.vlgmr.msra.gmra.mrb[48].mxu0 %vm1219_vm0, %v3067_v8  ;;  %1795 = vmatprep.mubr.bf16.mxu1 %v3071_v1 }
  0xec   :  { %1931 = vmatprep.mubr.bf16.mxu0 %v3071_v1 }
  0xee   :  { %v3820_v38 = vpop.f32.mrb[8].mxu0 }
  0xef   :  { %v3822_v39 = vpop.f32.mrb[9].mxu0 }
  0xf0   :  { %v3824_v17 = vpop.f32.mrb[10].mxu0 }
  0xf1   :  { %v3826_v40 = vpop.f32.mrb[11].mxu0 }
  0xf2   :  { %2532 = vmatmul.mubr.msk.bf16.gmra.mrb[40].mxu1 %vm1219_vm0, %v3069_v41 }
  0xf3   :  { %2535 = vmatmul.mubr.msk.bf16.gmra.mrb[52].mxu0 %vm1219_vm0, %v3068_v32  ;;  %1805 = vmatprep.mubr.bf16.mxu1 %v3071_v1 }
  0xf4   :  { %1941 = vmatprep.mubr.bf16.mxu0 %v3071_v1 }
  0xf6   :  { %v3835_v42 = vpop.f32.mrb[12].mxu0 }
  0xf7   :  { %v3837_v43 = vpop.f32.mrb[13].mxu0 }
  0xf8   :  { %v3839_v44 = vpop.f32.mrb[14].mxu0 }
  0xf9   :  { %v3841_v45 = vpop.f32.mrb[15].mxu0 }
  0xfa   :  { %2533 = vmatmul.mubr.msk.bf16.gmra.mrb[44].mxu1 %vm1219_vm0, %v3070_v46 }
  0xfb   :  { %2536 = vmatmul.mubr.msk.bf16.gmra.mrb[56].mxu0 %vm1219_vm0, %v3069_v41 }
  0xfc   :  { %1951 = vmatprep.mubr.bf16.mxu0 %v3071_v1  ;;  %v3868_v1 = vpop.permute.xlu0 %221 }
  0xfe   :  { %v3849_v24 = vpop.f32.mrb[16].mxu0 }
  0xff   :  { %v3851_v47 = vpop.f32.mrb[17].mxu0 }
 0x100   :  { %v3853_v48 = vpop.f32.mrb[18].mxu0  ;;  %v3876_v36 = vpop.permute.xlu0 %226 }
 0x101   :  { %v3855_v49 = vpop.f32.mrb[19].mxu0 }
 0x103   :  { %2537 = vmatmul.mubr.msk.bf16.gmra.mrb[60].mxu0 %vm1219_vm0, %v3070_v46 }
 0x106   :  { %v3858_v50 = vpop.f32.mrb[20].mxu0 }
 0x107   :  { %v3860_v51 = vpop.f32.mrb[21].mxu0 }
 0x108   :  { %v3862_v52 = vpop.f32.mrb[22].mxu0 }
 0x109   :  { %v3864_v53 = vpop.f32.mrb[23].mxu0 }
 0x10e   :  { %v3866_v30 = vpop.f32.mrb[24].mxu0 }
 0x10f   :  { %v3870_v54 = vpop.f32.mrb[25].mxu0 }
 0x110   :  { %v3872_v55 = vpop.f32.mrb[26].mxu0 }
 0x111   :  { %v3874_v56 = vpop.f32.mrb[27].mxu0 }
 0x115   :  { %v1266_v58 = vpop.f32.mrb[0].mxu1 }
 0x116   :  { %v3880_v59 = vpop.f32.mrb[28].mxu0  ;;  %v1267_v60 = vadd.f32 %v1266_v58, %v3868_v1  ;;  %v1268_v62 = vpop.f32.mrb[1].mxu1 }
 0x117   :  { %v3883_v63 = vpop.f32.mrb[29].mxu0  ;;  %v1269_v0 = vadd.f32 %v1268_v62, %v3868_v1  ;;  %v1270_v3 = vpop.f32.mrb[2].mxu1 }
 0x118   :  { %v3886_v4 = vpop.f32.mrb[30].mxu0  ;;  %v1340_v5 = vadd.f32 %v1339_v61, %v1267_v60  ;;  %v1271_v6 = vadd.f32 %v1270_v3, %v3876_v36  ;;  %v1272_v7 = vpop.f32.mrb[3].mxu1 }
 0x119   :  { %v3889_v9 = vpop.f32.mrb[31].mxu0  ;;  %v1342_v11 = vadd.f32 %v1341_v2, %v1269_v0  ;;  %v1273_v12 = vadd.f32 %v1272_v7, %v3876_v36  ;;  %v3910_v58 = vpop.permute.xlu0 %241 }
 0x11a   :  { %v1962_v14 = vmax.f32 %v1340_v5, 0.0  ;;  %v1344_v15 = vadd.f32 %v3794_v34, %v1271_v6  ;;  %v3912_v3 = vpop.permute.xlu1 %246 }
 0x11b   :  { %v1963_v16 = vmax.f32 %v1342_v11, 0.0  ;;  %v1346_v18 = vadd.f32 %v3796_v35, %v1273_v12 }
 0x11c   :  { %v1972_v19 = vmax.f32 %v1344_v15, 0.0 }
 0x11d   :  { %v2578_v21 = vpack.c.bf16 %v1963_v16, %v1962_v14  ;;  %v1973_v22 = vmax.f32 %v1346_v18, 0.0  ;;  %v1276_v23 = vpop.f32.mrb[4].mxu1 }
 0x11e   :  { %v1277_v27 = vadd.f32 %v1276_v23, %v3878_v57  ;;  %v1278_v28 = vpop.f32.mrb[5].mxu1 }
 0x11f   :  { %2282 = vst [vmem:[%s4131_s3] sm:$0xff] %v2578_v21  ;;  %v2583_v29 = vpack.c.bf16 %v1973_v22, %v1972_v19  ;;  %v1279_v10 = vadd.f32 %v1278_v28, %v3878_v57  ;;  %v1280_v31 = vpop.f32.mrb[6].mxu1  ;;  %v3928_v22 = vpop.permute.xlu0 %251 }
 0x120   :  { %v1350_v33 = vadd.f32 %v3805_v13, %v1277_v27  ;;  %v1281_v61 = vadd.f32 %v1280_v31, %v3894_v26  ;;  %v1282_v2 = vpop.f32.mrb[7].mxu1 }
 0x121   :  { %2287 = vst [vmem:[%s4131_s3 + $0x28] sm:$0xff] %v2583_v29  ;;  %v1352_v34 = vadd.f32 %v3807_v20, %v1279_v10  ;;  %v1283_v35 = vadd.f32 %v1282_v2, %v3894_v26  ;;  %v3930_v29 = vpop.permute.xlu1 %256 }
 0x122   :  { %v1982_v8 = vmax.f32 %v1350_v33, 0.0  ;;  %v1354_v32 = vadd.f32 %v3809_v25, %v1281_v61 }
 0x123   :  { %v1983_v41 = vmax.f32 %v1352_v34, 0.0  ;;  %v1356_v46 = vadd.f32 %v3811_v37, %v1283_v35 }
 0x124   :  { %v1992_v13 = vmax.f32 %v1354_v32, 0.0 }
 0x125   :  { %v2588_v60 = vpack.c.bf16 %v1983_v41, %v1982_v8  ;;  %v1993_v62 = vmax.f32 %v1356_v46, 0.0  ;;  %v1286_v0 = vpop.f32.mrb[8].mxu1 }
 0x126   :  { %v1287_v5 = vadd.f32 %v1286_v0, %v3910_v58  ;;  %v1288_v6 = vpop.f32.mrb[9].mxu1 }
 0x127   :  { %2292 = vst [vmem:[%s4131_s3 + $0x50] sm:$0xff] %v2588_v60  ;;  %v2593_v20 = vpack.c.bf16 %v1993_v62, %v1992_v13  ;;  %v1289_v25 = vadd.f32 %v1288_v6, %v3910_v58  ;;  %v1290_v7 = vpop.f32.mrb[10].mxu1 }
 0x128   :  { %v1360_v37 = vadd.f32 %v3820_v38, %v1287_v5  ;;  %v1291_v11 = vadd.f32 %v1290_v7, %v3912_v3  ;;  %v1292_v12 = vpop.f32.mrb[11].mxu1 }
 0x129   :  { %2297 = vst [vmem:[%s4131_s3 + $0x78] sm:$0xff] %v2593_v20  ;;  %v1362_v14 = vadd.f32 %v3822_v39, %v1289_v25  ;;  %v1293_v15 = vadd.f32 %v1292_v12, %v3912_v3 }
 0x12a   :  { %v2002_v16 = vmax.f32 %v1360_v37, 0.0  ;;  %v1364_v18 = vadd.f32 %v3824_v17, %v1291_v11 }
 0x12b   :  { %v2003_v19 = vmax.f32 %v1362_v14, 0.0  ;;  %v1366_v21 = vadd.f32 %v3826_v40, %v1293_v15 }
 0x12c   :  { %v2012_v38 = vmax.f32 %v1364_v18, 0.0 }
 0x12d   :  { %v2598_v23 = vpack.c.bf16 %v2003_v19, %v2002_v16  ;;  %v2013_v27 = vmax.f32 %v1366_v21, 0.0  ;;  %v1296_v28 = vpop.f32.mrb[12].mxu1 }
 0x12e   :  { %v1297_v10 = vadd.f32 %v1296_v28, %v3928_v22  ;;  %v1298_v31 = vpop.f32.mrb[13].mxu1 }
 0x12f   :  { %2302 = vst [vmem:[%s4131_s3 + $0xa0] sm:$0xff] %v2598_v23  ;;  %v2603_v39 = vpack.c.bf16 %v2013_v27, %v2012_v38  ;;  %v1299_v17 = vadd.f32 %v1298_v31, %v3928_v22  ;;  %v1300_v33 = vpop.f32.mrb[14].mxu1 }
 0x130   :  { %v1370_v40 = vadd.f32 %v3835_v42, %v1297_v10  ;;  %v1301_v61 = vadd.f32 %v1300_v33, %v3930_v29  ;;  %v1302_v2 = vpop.f32.mrb[15].mxu1 }
 0x131   :  { %2307 = vst [vmem:[%s4131_s3 + $0xc8] sm:$0xff] %v2603_v39  ;;  %v1372_v34 = vadd.f32 %v3837_v43, %v1299_v17  ;;  %v1303_v35 = vadd.f32 %v1302_v2, %v3930_v29 }
 0x132   :  { %v2022_v8 = vmax.f32 %v1370_v40, 0.0  ;;  %v1374_v32 = vadd.f32 %v3839_v44, %v1301_v61 }
 0x133   :  { %v2023_v41 = vmax.f32 %v1372_v34, 0.0  ;;  %v1376_v46 = vadd.f32 %v3841_v45, %v1303_v35 }
 0x134   :  { %v2032_v13 = vmax.f32 %v1374_v32, 0.0 }
 0x135   :  { %v2608_v60 = vpack.c.bf16 %v2023_v41, %v2022_v8  ;;  %v2033_v42 = vmax.f32 %v1376_v46, 0.0 }
 0x137   :  { %2312 = vst [vmem:[%s4131_s3 + $0xf0] sm:$0xff] %v2608_v60  ;;  %v2613_v62 = vpack.c.bf16 %v2033_v42, %v2032_v13 }
 0x139   :  { %2317 = vst [vmem:[%s4131_s3 + $0x118] sm:$0xff] %v2613_v62 }
 0x155   :  { %v1412_v43 = vpop.f32.mrb[16].mxu1 }
 0x156   :  { %v1413_v0 = vadd.f32 %v1412_v43, %v3868_v1  ;;  %v1414_v5 = vpop.f32.mrb[17].mxu1 }
 0x157   :  { %v1415_v44 = vadd.f32 %v1414_v5, %v3868_v1  ;;  %v1416_v6 = vpop.f32.mrb[18].mxu1 }
 0x158   :  { %v1486_v45 = vadd.f32 %v3849_v24, %v1413_v0  ;;  %v1417_v20 = vadd.f32 %v1416_v6, %v3876_v36  ;;  %v1418_v25 = vpop.f32.mrb[19].mxu1 }
 0x159   :  { %v1488_v7 = vadd.f32 %v3851_v47, %v1415_v44  ;;  %v1419_v37 = vadd.f32 %v1418_v25, %v3876_v36 }
 0x15a   :  { %v1964_v11 = vmax.f32 %v1486_v45, 0.0  ;;  %v1490_v12 = vadd.f32 %v3853_v48, %v1417_v20 }
 0x15b   :  { %v1965_v14 = vmax.f32 %v1488_v7, 0.0  ;;  %v1492_v15 = vadd.f32 %v3855_v49, %v1419_v37 }
 0x15c   :  { %v1974_v16 = vmax.f32 %v1490_v12, 0.0 }
 0x15d   :  { %v2579_v18 = vpack.c.bf16 %v1965_v14, %v1964_v11  ;;  %v1975_v19 = vmax.f32 %v1492_v15, 0.0  ;;  %v1422_v38 = vpop.f32.mrb[20].mxu1 }
 0x15e   :  { %v1631_v21 = vpop.f32.mrb[32].mxu0  ;;  %v1423_v23 = vadd.f32 %v1422_v38, %v3878_v57  ;;  %v1424_v28 = vpop.f32.mrb[21].mxu1 }
 0x15f   :  { %v2682_v24 = vadd.f32 %v1631_v21, %v3868_v1  ;;  %v1633_v27 = vpop.f32.mrb[33].mxu0  ;;  %2283 = vst [vmem:[%s4131_s3 + $0x8] sm:$0xff] %v2579_v18  ;;  %v2584_v47 = vpack.c.bf16 %v1975_v19, %v1974_v16  ;;  %v1425_v49 = vadd.f32 %v1424_v28, %v3878_v57  ;;  %v1426_v31 = vpop.f32.mrb[22].mxu1 }
 0x160   :  { %v2683_v48 = vadd.f32 %v1633_v27, %v3868_v1  ;;  %v1635_v10 = vpop.f32.mrb[34].mxu0  ;;  %v1496_v17 = vadd.f32 %v3858_v50, %v1423_v23  ;;  %v1427_v40 = vadd.f32 %v1426_v31, %v3894_v26  ;;  %v1428_v2 = vpop.f32.mrb[23].mxu1 }
 0x161   :  { %v1966_v39 = vmax.f32 %v2682_v24, 0.0  ;;  %v2684_v33 = vadd.f32 %v1635_v10, %v3876_v36  ;;  %v1637_v61 = vpop.f32.mrb[35].mxu0  ;;  %2288 = vst [vmem:[%s4131_s3 + $0x30] sm:$0xff] %v2584_v47  ;;  %v1498_v35 = vadd.f32 %v3860_v51, %v1425_v49  ;;  %v1429_v32 = vadd.f32 %v1428_v2, %v3894_v26 }
 0x162   :  { %v1967_v34 = vmax.f32 %v2683_v48, 0.0  ;;  %v2685_v8 = vadd.f32 %v1637_v61, %v3876_v36  ;;  %v1984_v41 = vmax.f32 %v1496_v17, 0.0  ;;  %v1500_v50 = vadd.f32 %v3862_v52, %v1427_v40 }
 0x163   :  { %v1976_v46 = vmax.f32 %v2684_v33, 0.0  ;;  %v1985_v60 = vmax.f32 %v1498_v35, 0.0  ;;  %v1502_v62 = vadd.f32 %v3864_v53, %v1429_v32 }
 0x164   :  { %v2580_v13 = vpack.c.bf16 %v1967_v34, %v1966_v39  ;;  %v1977_v42 = vmax.f32 %v2685_v8, 0.0  ;;  %v1994_v43 = vmax.f32 %v1500_v50, 0.0 }
 0x165   :  { %v2589_v0 = vpack.c.bf16 %v1985_v60, %v1984_v41  ;;  %v1995_v5 = vmax.f32 %v1502_v62, 0.0  ;;  %v1432_v6 = vpop.f32.mrb[24].mxu1 }
 0x166   :  { %2284 = vst [vmem:[%s4131_s3 + $0x10] sm:$0xff] %v2580_v13  ;;  %v2585_v51 = vpack.c.bf16 %v1977_v42, %v1976_v46  ;;  %v1641_v44 = vpop.f32.mrb[36].mxu0  ;;  %v1433_v20 = vadd.f32 %v1432_v6, %v3910_v58  ;;  %v1434_v25 = vpop.f32.mrb[25].mxu1 }
 0x167   :  { %v2686_v45 = vadd.f32 %v1641_v44, %v3878_v57  ;;  %v1643_v52 = vpop.f32.mrb[37].mxu0  ;;  %2293 = vst [vmem:[%s4131_s3 + $0x58] sm:$0xff] %v2589_v0  ;;  %v2594_v53 = vpack.c.bf16 %v1995_v5, %v1994_v43  ;;  %v1435_v37 = vadd.f32 %v1434_v25, %v3910_v58  ;;  %v1436_v12 = vpop.f32.mrb[26].mxu1 }
 0x168   :  { %2289 = vst [vmem:[%s4131_s3 + $0x38] sm:$0xff] %v2585_v51  ;;  %v2687_v7 = vadd.f32 %v1643_v52, %v3878_v57  ;;  %v1645_v11 = vpop.f32.mrb[38].mxu0  ;;  %v1506_v15 = vadd.f32 %v3866_v30, %v1433_v20  ;;  %v1437_v18 = vadd.f32 %v1436_v12, %v3912_v3  ;;  %v1438_v21 = vpop.f32.mrb[27].mxu1 }
 0x169   :  { %v1986_v14 = vmax.f32 %v2686_v45, 0.0  ;;  %v2688_v16 = vadd.f32 %v1645_v11, %v3894_v26  ;;  %v1647_v19 = vpop.f32.mrb[39].mxu0  ;;  %2298 = vst [vmem:[%s4131_s3 + $0x80] sm:$0xff] %v2594_v53  ;;  %v1508_v24 = vadd.f32 %v3870_v54, %v1435_v37  ;;  %v1439_v27 = vadd.f32 %v1438_v21, %v3912_v3 }
 0x16a   :  { %v1987_v38 = vmax.f32 %v2687_v7, 0.0  ;;  %v2689_v23 = vadd.f32 %v1647_v19, %v3894_v26  ;;  %v2004_v28 = vmax.f32 %v1506_v15, 0.0  ;;  %v1510_v30 = vadd.f32 %v3872_v55, %v1437_v18 }
 0x16b   :  { %v1996_v47 = vmax.f32 %v2688_v16, 0.0  ;;  %v2005_v49 = vmax.f32 %v1508_v24, 0.0  ;;  %v1512_v31 = vadd.f32 %v3874_v56, %v1439_v27 }
 0x16c   :  { %v2590_v48 = vpack.c.bf16 %v1987_v38, %v1986_v14  ;;  %v1997_v10 = vmax.f32 %v2689_v23, 0.0  ;;  %v2014_v39 = vmax.f32 %v1510_v30, 0.0 }
 0x16d   :  { %v2599_v17 = vpack.c.bf16 %v2005_v49, %v2004_v28  ;;  %v2015_v33 = vmax.f32 %v1512_v31, 0.0  ;;  %v1442_v61 = vpop.f32.mrb[28].mxu1 }
 0x16e   :  { %2294 = vst [vmem:[%s4131_s3 + $0x60] sm:$0xff] %v2590_v48  ;;  %v2595_v54 = vpack.c.bf16 %v1997_v10, %v1996_v47  ;;  %v1651_v40 = vpop.f32.mrb[40].mxu0  ;;  %v1443_v34 = vadd.f32 %v1442_v61, %v3928_v22  ;;  %v1444_v35 = vpop.f32.mrb[29].mxu1 }
 0x16f   :  { %v2690_v2 = vadd.f32 %v1651_v40, %v3910_v58  ;;  %v1653_v55 = vpop.f32.mrb[41].mxu0  ;;  %2303 = vst [vmem:[%s4131_s3 + $0xa8] sm:$0xff] %v2599_v17  ;;  %v2604_v56 = vpack.c.bf16 %v2015_v33, %v2014_v39  ;;  %v1445_v32 = vadd.f32 %v1444_v35, %v3928_v22  ;;  %v1446_v46 = vpop.f32.mrb[30].mxu1 }
 0x170   :  { %2299 = vst [vmem:[%s4131_s3 + $0x88] sm:$0xff] %v2595_v54  ;;  %v2691_v8 = vadd.f32 %v1653_v55, %v3910_v58  ;;  %v1655_v41 = vpop.f32.mrb[42].mxu0  ;;  %v1516_v13 = vadd.f32 %v3880_v59, %v1443_v34  ;;  %v1447_v42 = vadd.f32 %v1446_v46, %v3930_v29  ;;  %v1448_v43 = vpop.f32.mrb[31].mxu1 }
 0x171   :  { %v2006_v50 = vmax.f32 %v2690_v2, 0.0  ;;  %v2692_v60 = vadd.f32 %v1655_v41, %v3912_v3  ;;  %v1657_v62 = vpop.f32.mrb[43].mxu0  ;;  %2308 = vst [vmem:[%s4131_s3 + $0xd0] sm:$0xff] %v2604_v56  ;;  %v1518_v51 = vadd.f32 %v3883_v63, %v1445_v32  ;;  %v1449_v44 = vadd.f32 %v1448_v43, %v3930_v29 }
 0x172   :  { %v2007_v0 = vmax.f32 %v2691_v8, 0.0  ;;  %v2693_v5 = vadd.f32 %v1657_v62, %v3912_v3  ;;  %v2024_v6 = vmax.f32 %v1516_v13, 0.0  ;;  %v1520_v59 = vadd.f32 %v3886_v4, %v1447_v42 }
 0x173   :  { %v2016_v45 = vmax.f32 %v2692_v60, 0.0  ;;  %v2025_v52 = vmax.f32 %v1518_v51, 0.0  ;;  %v1522_v53 = vadd.f32 %v3889_v9, %v1449_v44 }
 0x174   :  { %v2600_v20 = vpack.c.bf16 %v2007_v0, %v2006_v50  ;;  %v2017_v25 = vmax.f32 %v2693_v5, 0.0  ;;  %v2034_v7 = vmax.f32 %v1520_v59, 0.0 }
 0x175   :  { %v2609_v37 = vpack.c.bf16 %v2025_v52, %v2024_v6  ;;  %v2035_v11 = vmax.f32 %v1522_v53, 0.0 }
 0x176   :  { %2304 = vst [vmem:[%s4131_s3 + $0xb0] sm:$0xff] %v2600_v20  ;;  %v2605_v63 = vpack.c.bf16 %v2017_v25, %v2016_v45  ;;  %v1661_v12 = vpop.f32.mrb[44].mxu0 }
 0x177   :  { %v2694_v14 = vadd.f32 %v1661_v12, %v3928_v22  ;;  %v1663_v15 = vpop.f32.mrb[45].mxu0  ;;  %2313 = vst [vmem:[%s4131_s3 + $0xf8] sm:$0xff] %v2609_v37  ;;  %v2614_v4 = vpack.c.bf16 %v2035_v11, %v2034_v7 }
 0x178   :  { %2309 = vst [vmem:[%s4131_s3 + $0xd8] sm:$0xff] %v2605_v63  ;;  %v2695_v9 = vadd.f32 %v1663_v15, %v3928_v22  ;;  %v1665_v16 = vpop.f32.mrb[46].mxu0 }
 0x179   :  { %v2026_v18 = vmax.f32 %v2694_v14, 0.0  ;;  %v2696_v19 = vadd.f32 %v1665_v16, %v3930_v29  ;;  %v1667_v21 = vpop.f32.mrb[47].mxu0  ;;  %2318 = vst [vmem:[%s4131_s3 + $0x120] sm:$0xff] %v2614_v4 }
 0x17a   :  { %v2027_v38 = vmax.f32 %v2695_v9, 0.0  ;;  %v2697_v24 = vadd.f32 %v1667_v21, %v3930_v29 }
 0x17b   :  { %v2036_v23 = vmax.f32 %v2696_v19, 0.0 }
 0x17c   :  { %v2610_v27 = vpack.c.bf16 %v2027_v38, %v2026_v18  ;;  %v2037_v28 = vmax.f32 %v2697_v24, 0.0 }
 0x17e   :  { %2314 = vst [vmem:[%s4131_s3 + $0x100] sm:$0xff] %v2610_v27  ;;  %v2615_v47 = vpack.c.bf16 %v2037_v28, %v2036_v23 }
 0x180   :  { %2319 = vst [vmem:[%s4131_s3 + $0x128] sm:$0xff] %v2615_v47 }
 0x1b5   :  { %v1777_v30 = vpop.f32.mrb[32].mxu1 }
 0x1b6   :  { %v2698_v48 = vadd.f32 %v1777_v30, %v3868_v1  ;;  %v1779_v49 = vpop.f32.mrb[33].mxu1 }
 0x1b7   :  { %v2699_v10 = vadd.f32 %v1779_v49, %v3868_v1  ;;  %v1781_v31 = vpop.f32.mrb[34].mxu1 }
 0x1b8   :  { %v1968_v39 = vmax.f32 %v2698_v48, 0.0  ;;  %v2700_v17 = vadd.f32 %v1781_v31, %v3876_v36  ;;  %v1783_v54 = vpop.f32.mrb[35].mxu1 }
 0x1b9   :  { %v1969_v33 = vmax.f32 %v2699_v10, 0.0  ;;  %v2701_v40 = vadd.f32 %v1783_v54, %v3876_v36 }
 0x1ba   :  { %v1978_v61 = vmax.f32 %v2700_v17, 0.0 }
 0x1bb   :  { %v2581_v2 = vpack.c.bf16 %v1969_v33, %v1968_v39  ;;  %v1979_v34 = vmax.f32 %v2701_v40, 0.0 }
 0x1bd   :  { %2285 = vst [vmem:[%s4131_s3 + $0x18] sm:$0xff] %v2581_v2  ;;  %v2586_v55 = vpack.c.bf16 %v1979_v34, %v1978_v61  ;;  %v1787_v56 = vpop.f32.mrb[36].mxu1 }
 0x1be   :  { %v1923_v35 = vpop.f32.mrb[48].mxu0  ;;  %v2702_v41 = vadd.f32 %v1787_v56, %v3878_v57  ;;  %v1789_v46 = vpop.f32.mrb[37].mxu1 }
 0x1bf   :  { %v2714_v8 = vadd.f32 %v1923_v35, %v3868_v1  ;;  %v1925_v32 = vpop.f32.mrb[49].mxu0  ;;  %2290 = vst [vmem:[%s4131_s3 + $0x40] sm:$0xff] %v2586_v55  ;;  %v2703_v60 = vadd.f32 %v1789_v46, %v3878_v57  ;;  %v1791_v42 = vpop.f32.mrb[38].mxu1 }
 0x1c0   :  { %v2715_v50 = vadd.f32 %v1925_v32, %v3868_v1  ;;  %v1927_v13 = vpop.f32.mrb[50].mxu0  ;;  %v1988_v43 = vmax.f32 %v2702_v41, 0.0  ;;  %v2704_v5 = vadd.f32 %v1791_v42, %v3894_v26  ;;  %v1793_v44 = vpop.f32.mrb[39].mxu1 }
 0x1c1   :  { %v1970_v62 = vmax.f32 %v2714_v8, 0.0  ;;  %v2716_v0 = vadd.f32 %v1927_v13, %v3876_v36  ;;  %v1929_v51 = vpop.f32.mrb[51].mxu0  ;;  %v1989_v45 = vmax.f32 %v2703_v60, 0.0  ;;  %v2705_v20 = vadd.f32 %v1793_v44, %v3894_v26 }
 0x1c2   :  { %v1971_v6 = vmax.f32 %v2715_v50, 0.0  ;;  %v2717_v59 = vadd.f32 %v1929_v51, %v3876_v36  ;;  %v1998_v1 = vmax.f32 %v2704_v5, 0.0 }
 0x1c3   :  { %v1980_v52 = vmax.f32 %v2716_v0, 0.0  ;;  %v2591_v53 = vpack.c.bf16 %v1989_v45, %v1988_v43  ;;  %v1999_v37 = vmax.f32 %v2705_v20, 0.0 }
 0x1c4   :  { %v2582_v25 = vpack.c.bf16 %v1971_v6, %v1970_v62  ;;  %v1981_v7 = vmax.f32 %v2717_v59, 0.0 }
 0x1c5   :  { %2295 = vst [vmem:[%s4131_s3 + $0x68] sm:$0xff] %v2591_v53  ;;  %v2596_v11 = vpack.c.bf16 %v1999_v37, %v1998_v1  ;;  %v1797_v36 = vpop.f32.mrb[40].mxu1 }
 0x1c6   :  { %2286 = vst [vmem:[%s4131_s3 + $0x20] sm:$0xff] %v2582_v25  ;;  %v2587_v63 = vpack.c.bf16 %v1981_v7, %v1980_v52  ;;  %v1933_v12 = vpop.f32.mrb[52].mxu0  ;;  %v2706_v4 = vadd.f32 %v1797_v36, %v3910_v58  ;;  %v1799_v9 = vpop.f32.mrb[41].mxu1 }
 0x1c7   :  { %v2718_v14 = vadd.f32 %v1933_v12, %v3878_v57  ;;  %v1935_v15 = vpop.f32.mrb[53].mxu0  ;;  %2300 = vst [vmem:[%s4131_s3 + $0x90] sm:$0xff] %v2596_v11  ;;  %v2707_v19 = vadd.f32 %v1799_v9, %v3910_v58  ;;  %v1801_v21 = vpop.f32.mrb[42].mxu1 }
 0x1c8   :  { %2291 = vst [vmem:[%s4131_s3 + $0x48] sm:$0xff] %v2587_v63  ;;  %v2719_v16 = vadd.f32 %v1935_v15, %v3878_v57  ;;  %v1937_v18 = vpop.f32.mrb[54].mxu0  ;;  %v2008_v24 = vmax.f32 %v2706_v4, 0.0  ;;  %v2708_v28 = vadd.f32 %v1801_v21, %v3912_v3  ;;  %v1803_v47 = vpop.f32.mrb[43].mxu1 }
 0x1c9   :  { %v1990_v38 = vmax.f32 %v2718_v14, 0.0  ;;  %v2720_v23 = vadd.f32 %v1937_v18, %v3894_v26  ;;  %v1939_v27 = vpop.f32.mrb[55].mxu0  ;;  %v2009_v48 = vmax.f32 %v2707_v19, 0.0  ;;  %v2709_v10 = vadd.f32 %v1803_v47, %v3912_v3 }
 0x1ca   :  { %v1991_v30 = vmax.f32 %v2719_v16, 0.0  ;;  %v2721_v49 = vadd.f32 %v1939_v27, %v3894_v26  ;;  %v2018_v57 = vmax.f32 %v2708_v28, 0.0 }
 0x1cb   :  { %v2000_v31 = vmax.f32 %v2720_v23, 0.0  ;;  %v2601_v17 = vpack.c.bf16 %v2009_v48, %v2008_v24  ;;  %v2019_v33 = vmax.f32 %v2709_v10, 0.0 }
 0x1cc   :  { %v2592_v39 = vpack.c.bf16 %v1991_v30, %v1990_v38  ;;  %v2001_v54 = vmax.f32 %v2721_v49, 0.0 }
 0x1cd   :  { %2305 = vst [vmem:[%s4131_s3 + $0xb8] sm:$0xff] %v2601_v17  ;;  %v2606_v61 = vpack.c.bf16 %v2019_v33, %v2018_v57  ;;  %v1807_v26 = vpop.f32.mrb[44].mxu1 }
 0x1ce   :  { %2296 = vst [vmem:[%s4131_s3 + $0x70] sm:$0xff] %v2592_v39  ;;  %v2597_v40 = vpack.c.bf16 %v2001_v54, %v2000_v31  ;;  %v1943_v2 = vpop.f32.mrb[56].mxu0  ;;  %v2710_v35 = vadd.f32 %v1807_v26, %v3928_v22  ;;  %v1809_v56 = vpop.f32.mrb[45].mxu1 }
 0x1cf   :  { %v2722_v34 = vadd.f32 %v1943_v2, %v3910_v58  ;;  %v1945_v55 = vpop.f32.mrb[57].mxu0  ;;  %2310 = vst [vmem:[%s4131_s3 + $0xe0] sm:$0xff] %v2606_v61  ;;  %v2711_v41 = vadd.f32 %v1809_v56, %v3928_v22  ;;  %v1811_v46 = vpop.f32.mrb[46].mxu1 }
 0x1d0   :  { %2301 = vst [vmem:[%s4131_s3 + $0x98] sm:$0xff] %v2597_v40  ;;  %v2723_v8 = vadd.f32 %v1945_v55, %v3910_v58  ;;  %v1947_v32 = vpop.f32.mrb[58].mxu0  ;;  %v2028_v13 = vmax.f32 %v2710_v35, 0.0  ;;  %v2712_v62 = vadd.f32 %v1811_v46, %v3930_v29  ;;  %v1813_v43 = vpop.f32.mrb[47].mxu1 }
 0x1d1   :  { %v2010_v50 = vmax.f32 %v2722_v34, 0.0  ;;  %v2724_v60 = vadd.f32 %v1947_v32, %v3912_v3  ;;  %v1949_v42 = vpop.f32.mrb[59].mxu0  ;;  %v2029_v51 = vmax.f32 %v2711_v41, 0.0  ;;  %v2713_v44 = vadd.f32 %v1813_v43, %v3930_v29 }
 0x1d2   :  { %v2011_v0 = vmax.f32 %v2723_v8, 0.0  ;;  %v2725_v5 = vadd.f32 %v1949_v42, %v3912_v3  ;;  %v2038_v58 = vmax.f32 %v2712_v62, 0.0 }
 0x1d3   :  { %v2020_v6 = vmax.f32 %v2724_v60, 0.0  ;;  %v2611_v59 = vpack.c.bf16 %v2029_v51, %v2028_v13  ;;  %v2039_v52 = vmax.f32 %v2713_v44, 0.0 }
 0x1d4   :  { %v2602_v45 = vpack.c.bf16 %v2011_v0, %v2010_v50  ;;  %v2021_v20 = vmax.f32 %v2725_v5, 0.0 }
 0x1d5   :  { %2315 = vst [vmem:[%s4131_s3 + $0x108] sm:$0xff] %v2611_v59  ;;  %v2616_v25 = vpack.c.bf16 %v2039_v52, %v2038_v58 }
 0x1d6   :  { %2306 = vst [vmem:[%s4131_s3 + $0xc0] sm:$0xff] %v2602_v45  ;;  %v2607_v1 = vpack.c.bf16 %v2021_v20, %v2020_v6  ;;  %v1953_v53 = vpop.f32.mrb[60].mxu0 }
 0x1d7   :  { %v2726_v3 = vadd.f32 %v1953_v53, %v3928_v22  ;;  %v1955_v7 = vpop.f32.mrb[61].mxu0  ;;  %2320 = vst [vmem:[%s4131_s3 + $0x130] sm:$0xff] %v2616_v25 }
 0x1d8   :  { %2311 = vst [vmem:[%s4131_s3 + $0xe8] sm:$0xff] %v2607_v1  ;;  %v2727_v37 = vadd.f32 %v1955_v7, %v3928_v22  ;;  %v1957_v63 = vpop.f32.mrb[62].mxu0 }
 0x1d9   :  { %v2030_v11 = vmax.f32 %v2726_v3, 0.0  ;;  %v2728_v12 = vadd.f32 %v1957_v63, %v3930_v29  ;;  %v1959_v36 = vpop.f32.mrb[63].mxu0 }
 0x1da   :  { %v2031_v14 = vmax.f32 %v2727_v37, 0.0  ;;  %v2729_v15 = vadd.f32 %v1959_v36, %v3930_v29 }
 0x1db   :  { %v2040_v4 = vmax.f32 %v2728_v12, 0.0 }
 0x1dc   :  { %v2612_v9 = vpack.c.bf16 %v2031_v14, %v2030_v11  ;;  %v2041_v16 = vmax.f32 %v2729_v15, 0.0 }
 0x1de   :  { %2316 = vst [vmem:[%s4131_s3 + $0x110] sm:$0xff] %v2612_v9  ;;  %v2617_v18 = vpack.c.bf16 %v2041_v16, %v2040_v4 }
 0x1e0   :  { %2321 = vst [vmem:[%s4131_s3 + $0x138] sm:$0xff] %v2617_v18 }

// kernel: cnn_forward.6
= control target key start
LH: loop header
LB: loop body
LE: loop exit
PB: predicated region body
PF: predicated region fallthrough
CT: control target
= control target key end

     0   :  { %v1595_v1 = vmov 0   ;;  %vm821_vm0 = vcmask 523264   ;;  %s2050_s1 = inlined_call_operand.vmem [shape: bf16[576,384], index: 1, kind: input, shape index: {}]   ;;  %s2051_s0 = inlined_call_operand.vmem [shape: bf16[32,576], index: 0, kind: input, shape index: {}]   ;;  %s2052_s2 = inlined_call_operand.vmem [shape: f32[32,1], index: 2, kind: input, shape index: {}]   ;;  %s2053_s3 = inlined_call_operand.vmem [shape: bf16[32,384], index: 3, kind: output, shape index: {}]  }
   0x1   :  { %v1437_v0 = vld [vmem:[%s2050_s1 + $0x4] ss:$12 sps:$4 sm:$0xff]   ;;  %966 = vmatprep.mubr.bf16.mxu1 %v1595_v1  ;;  %1435 = vset.pattern.permute.xlu0 %v1595_v1  ;;  %v1441_v3 = vld [vmem:[%s2050_s1] ss:$12 sps:$4 sm:$0xff]   ;;  %v1443_v5 = vld [vmem:[%s2050_s1 + $0x1c] ss:$12 sps:$4 sm:$0xff]  }
   0x2   :  { %v1439_v2 = vld [vmem:[%s2050_s1 + $0x304] ss:$12 sps:$4 sm:$0xff]   ;;  %1436 = vset.pattern.permute.xlu1 %v1595_v1  ;;  %828 = vmatprep.subr.bf16.mxu0 %v1437_v0  ;;  %v1442_v4 = vld [vmem:[%s2050_s1 + $0x300] ss:$12 sps:$4 sm:$0xff]   ;;  %v1445_v6 = vld [vmem:[%s2050_s1 + $0x31c] ss:$12 sps:$4 sm:$0xff]  }
   0x3   :  { %934 = vmatprep.subr.bf16.mxu1 %v1439_v2  ;;  %829 = vmatpush1.bf16.msra.mxu0 %v1441_v3  ;;  %v1447_v7 = vld [vmem:[%s2050_s1 + $0x18] ss:$12 sps:$4 sm:$0xff]   ;;  %v1449_v9 = vld [vmem:[%s2050_s1 + $0x34] ss:$12 sps:$4 sm:$0xff]   ;;  %v1453_v11 = vld [vmem:[%s2050_s1 + $0x30] ss:$12 sps:$4 sm:$0xff]  }
   0x4   :  { %935 = vmatpush1.bf16.msra.mxu1 %v1442_v4  ;;  %830 = vmatprep.subr.bf16.mxu0 %v1443_v5  ;;  %v1448_v8 = vld [vmem:[%s2050_s1 + $0x318] ss:$12 sps:$4 sm:$0xff]   ;;  %v1451_v10 = vld [vmem:[%s2050_s1 + $0x334] ss:$12 sps:$4 sm:$0xff]   ;;  %v1454_v12 = vld [vmem:[%s2050_s1 + $0x330] ss:$12 sps:$4 sm:$0xff]  }
   0x5   :  { %936 = vmatprep.subr.bf16.mxu1 %v1445_v6  ;;  %v1455_v13 = vld [vmem:[%s2050_s1 + $0x4c] ss:$12 sps:$4 sm:$0xff]   ;;  %v1459_v15 = vld [vmem:[%s2050_s1 + $0x48] ss:$12 sps:$4 sm:$0xff]   ;;  %v1461_v17 = vld [vmem:[%s2050_s1 + $0x64] ss:$12 sps:$4 sm:$0xff]  }
   0x6   :  { %v1457_v14 = vld [vmem:[%s2050_s1 + $0x34c] ss:$12 sps:$4 sm:$0xff]   ;;  %v1460_v16 = vld [vmem:[%s2050_s1 + $0x348] ss:$12 sps:$4 sm:$0xff]   ;;  %v1676_v20 = vld [vmem:[%s2051_s0 + $0x10] ss:$20 sps:$4 sm:$0xff]  }
   0x7   :  { %831 = vmatpush1.bf16.msra.mxu0 %v1447_v7  ;;  %v1463_v18 = vld [vmem:[%s2050_s1 + $0xc8] ss:$12 sps:$4 sm:$0xff]   ;;  %v1464_v19 = vld [vmem:[%s2050_s1 + $0x60] ss:$12 sps:$4 sm:$0xff]   ;;  %v1470_v24 = vld [vmem:[%s2050_s1 + $0x78] ss:$12 sps:$4 sm:$0xff]  }
   0x8   :  { %937 = vmatpush1.bf16.msra.mxu1 %v1448_v8  ;;  %832 = vmatprep.subr.bf16.mxu0 %v1449_v9  ;;  %v1466_v21 = vld [vmem:[%s2050_s1 + $0x8] ss:$12 sps:$4 sm:$0xff]   ;;  %v1469_v23 = vld [vmem:[%s2050_s1 + $0xe0] ss:$12 sps:$4 sm:$0xff]   ;;  %v1474_v27 = vld [vmem:[%s2050_s1 + $0xf8] ss:$12 sps:$4 sm:$0xff]  }
   0x9   :  { %938 = vmatprep.subr.bf16.mxu1 %v1451_v10  ;;  %v1467_v22 = vld [vmem:[%s2050_s1 + $0x7c] ss:$12 sps:$4 sm:$0xff]   ;;  %v1471_v25 = vld [vmem:[%s2050_s1 + $0x20] ss:$12 sps:$4 sm:$0xff]   ;;  %v1476_v29 = vld [vmem:[%s2050_s1 + $0x38] ss:$12 sps:$4 sm:$0xff]  }
   0xa   :  { %v1472_v26 = vld [vmem:[%s2050_s1 + $0x94] ss:$12 sps:$4 sm:$0xff]   ;;  %v1475_v28 = vld [vmem:[%s2050_s1 + $0x90] ss:$12 sps:$4 sm:$0xff]   ;;  %v1477_v30 = vld [vmem:[%s2050_s1 + $0xac] ss:$12 sps:$4 sm:$0xff]  }
   0xb   :  { %833 = vmatpush1.bf16.msra.mxu0 %v1453_v11  ;;  %v1479_v31 = vld [vmem:[%s2050_s1 + $0x110] ss:$12 sps:$4 sm:$0xff]   ;;  %v1480_v32 = vld [vmem:[%s2050_s1 + $0xa8] ss:$12 sps:$4 sm:$0xff]   ;;  %v1485_v36 = vld [vmem:[%s2050_s1 + $0xc0] ss:$12 sps:$4 sm:$0xff]  }
   0xc   :  { %939 = vmatpush1.bf16.msra.mxu1 %v1454_v12  ;;  %834 = vmatprep.subr.bf16.mxu0 %v1455_v13  ;;  %v1481_v33 = vld [vmem:[%s2050_s1 + $0x50] ss:$12 sps:$4 sm:$0xff]   ;;  %v1484_v35 = vld [vmem:[%s2050_s1 + $0x128] ss:$12 sps:$4 sm:$0xff]   ;;  %v1489_v39 = vld [vmem:[%s2050_s1 + $0x140] ss:$12 sps:$4 sm:$0xff]  }
   0xd   :  { %940 = vmatprep.subr.bf16.mxu1 %v1457_v14  ;;  %v1482_v34 = vld [vmem:[%s2050_s1 + $0xc4] ss:$12 sps:$4 sm:$0xff]   ;;  %v1486_v37 = vld [vmem:[%s2050_s1 + $0x68] ss:$12 sps:$4 sm:$0xff]   ;;  %v1743_v41 = vld [vmem:[%s2051_s0 + $0x38] ss:$20 sps:$4 sm:$0xff]  }
   0xe   :  { %v1487_v38 = vld [vmem:[%s2050_s1 + $0xdc] ss:$12 sps:$4 sm:$0xff]   ;;  %v1490_v40 = vld [vmem:[%s2050_s1 + $0xd8] ss:$12 sps:$4 sm:$0xff]   ;;  %v1491_v42 = vld [vmem:[%s2050_s1 + $0x80] ss:$12 sps:$4 sm:$0xff]  }
   0xf   :  { %835 = vmatpush1.bf16.msra.mxu0 %v1459_v15  ;;  %v1492_v43 = vld [vmem:[%s2050_s1 + $0xf4] ss:$12 sps:$4 sm:$0xff]   ;;  %v1494_v44 = vld [vmem:[%s2050_s1 + $0x158] ss:$12 sps:$4 sm:$0xff]   ;;  %v1495_v45 = vld [vmem:[%s2050_s1 + $0xf0] ss:$12 sps:$4 sm:$0xff]  }
  0x10   :  { %941 = vmatpush1.bf16.msra.mxu1 %v1460_v16  ;;  %836 = vmatprep.subr.bf16.mxu0 %v1461_v17  ;;  %v1497_v46 = vld [vmem:[%s2050_s1 + $0x98] ss:$12 sps:$4 sm:$0xff]   ;;  %v1500_v48 = vld [vmem:[%s2050_s1 + $0x170] ss:$12 sps:$4 sm:$0xff]   ;;  %v1501_v50 = vld [vmem:[%s2050_s1 + $0x108] ss:$12 sps:$4 sm:$0xff]  }
  0x11   :  { %1336 = vmatprep.subr.bf16.mxu1 %v1463_v18  ;;  %v1498_v47 = vld [vmem:[%s2050_s1 + $0x10c] ss:$12 sps:$4 sm:$0xff]   ;;  %v1502_v51 = vld [vmem:[%s2050_s1 + $0xb0] ss:$12 sps:$4 sm:$0xff]   ;;  %v1508_v53 = vld [vmem:[%s2050_s1 + $0x248] ss:$12 sps:$4 sm:$0xff]  }
  0x12   :  { %v1507_v49 = vld [vmem:[%s2051_s0 + $0x4] ss:$20 sps:$4 sm:$0xff]   ;;  %v1505_v54 = vld [vmem:[%s2051_s0] ss:$20 sps:$4 sm:$0xff]   ;;  %v1511_v57 = vld [vmem:[%s2050_s1 + $0x13c] ss:$12 sps:$4 sm:$0xff]  }
  0x13   :  { %1316 = vmatmul.mubr.msk.bf16.vlgmr.msra.gmra.mrb[0].mxu1 %vm821_vm0, %v1676_v20  ;;  %837 = vmatpush1.bf16.msra.mxu0 %v1464_v19  ;;  %v1503_v52 = vld [vmem:[%s2050_s1 + $0x124] ss:$12 sps:$4 sm:$0xff]   ;;  %v1509_v55 = vld [vmem:[%s2050_s1 + $0x120] ss:$12 sps:$4 sm:$0xff]   ;;  %v1510_v56 = vld [vmem:[%s2050_s1 + $0x188] ss:$12 sps:$4 sm:$0xff]  }
  0x14   :  { %1337 = vmatpush3.bf16.msra.mxu1 %v1466_v21  ;;  %838 = vmatprep.subr.bf16.mxu0 %v1467_v22  ;;  %v1513_v58 = vld [vmem:[%s2050_s1 + $0x260] ss:$12 sps:$4 sm:$0xff]   ;;  %v1514_v59 = vld [vmem:[%s2050_s1 + $0x138] ss:$12 sps:$4 sm:$0xff]   ;;  %v1519_v63 = vld [vmem:[%s2050_s1 + $0x150] ss:$12 sps:$4 sm:$0xff]  }
  0x15   :  { %1338 = vmatprep.subr.bf16.mxu1 %v1469_v23  ;;  %976 = vmatprep.mubr.bf16.mxu1 %v1595_v1  ;;  %v1515_v60 = vld [vmem:[%s2050_s1 + $0x1a0] ss:$12 sps:$4 sm:$0xff]   ;;  %v1518_v62 = vld [vmem:[%s2050_s1 + $0x278] ss:$12 sps:$4 sm:$0xff]   ;;  %v1523_v2 = vld [vmem:[%s2050_s1 + $0x290] ss:$12 sps:$4 sm:$0xff]  }
  0x16   :  { %860 = vmatprep.mubr.bf16.mxu0 %v1507_v49  ;;  %v1516_v61 = vld [vmem:[%s2050_s1 + $0x154] ss:$12 sps:$4 sm:$0xff]   ;;  %v1520_v0 = vld [vmem:[%s2050_s1 + $0x1b8] ss:$12 sps:$4 sm:$0xff]   ;;  %v1525_v4 = vld [vmem:[%s2050_s1 + $0x1d0] ss:$12 sps:$4 sm:$0xff]  }
  0x17   :  { %839 = vmatpush1.bf16.msra.mxu0 %v1470_v24  ;;  %v1521_v1 = vld [vmem:[%s2050_s1 + $0x16c] ss:$12 sps:$4 sm:$0xff]   ;;  %v1524_v3 = vld [vmem:[%s2050_s1 + $0x168] ss:$12 sps:$4 sm:$0xff]   ;;  %v1528_v5 = vld [vmem:[%s2050_s1 + $0x184] ss:$12 sps:$4 sm:$0xff]  }
  0x18   :  { %1339 = vmatpush3.bf16.msra.mxu1 %v1471_v25  ;;  %840 = vmatprep.subr.bf16.mxu0 %v1472_v26  ;;  %v1529_v6 = vld [vmem:[%s2050_s1 + $0x2a8] ss:$12 sps:$4 sm:$0xff]   ;;  %v1536_v7 = vld [vmem:[%s2051_s0 + $0x2c] ss:$20 sps:$4 sm:$0xff]   ;;  %v1531_v13 = vld [vmem:[%s2050_s1 + $0x198] ss:$12 sps:$4 sm:$0xff]  }
  0x19   :  { %1340 = vmatprep.subr.bf16.mxu1 %v1474_v27  ;;  %v1526_v8 = vld [vmem:[%s2050_s1 + $0x180] ss:$12 sps:$4 sm:$0xff]   ;;  %v1530_v9 = vld [vmem:[%s2050_s1 + $0x1e8] ss:$12 sps:$4 sm:$0xff]   ;;  %v1542_v16 = vld [vmem:[%s2050_s1 + $0x2d8] ss:$12 sps:$4 sm:$0xff]  }
  0x1a   :  { %v1541_v10 = vld [vmem:[%s2051_s0 + $0x28] ss:$20 sps:$4 sm:$0xff]   ;;  %v1534_v12 = vld [vmem:[%s2050_s1 + $0x2c0] ss:$12 sps:$4 sm:$0xff]   ;;  %v1543_v19 = vld [vmem:[%s2050_s1 + $0x218] ss:$12 sps:$4 sm:$0xff]  }
  0x1b   :  { %841 = vmatpush1.bf16.msra.mxu0 %v1475_v28  ;;  %1317 = vmatmul.mubr.msk.bf16.gmra.mrb[4].mxu1 %vm821_vm0, %v1743_v41  ;;  %v1533_v11 = vld [vmem:[%s2050_s1 + $0x19c] ss:$12 sps:$4 sm:$0xff]   ;;  %v1535_v14 = vld [vmem:[%s2050_s1 + $0x200] ss:$12 sps:$4 sm:$0xff]   ;;  %v1554_v25 = vld [vmem:[%s2050_s1 + $0x1e4] ss:$12 sps:$4 sm:$0xff]  }
  0x1c   :  { %1341 = vmatpush3.bf16.msra.mxu1 %v1476_v29  ;;  %842 = vmatprep.subr.bf16.mxu0 %v1477_v30  ;;  %v1540_v15 = vld [vmem:[%s2050_s1 + $0x1b4] ss:$12 sps:$4 sm:$0xff]   ;;  %v1538_v18 = vld [vmem:[%s2050_s1 + $0x1b0] ss:$12 sps:$4 sm:$0xff]   ;;  %v1546_v21 = vld [vmem:[%s2050_s1 + $0x1cc] ss:$12 sps:$4 sm:$0xff]  }
  0x1d   :  { %1342 = vmatprep.subr.bf16.mxu1 %v1479_v31  ;;  %1019 = vmatprep.mubr.bf16.mxu1 %v1507_v49  ;;  %v1551_v17 = vld [vmem:[%s2051_s0 + $0xc] ss:$20 sps:$4 sm:$0xff]   ;;  %v1547_v22 = vld [vmem:[%s2050_s1 + $0x2f0] ss:$12 sps:$4 sm:$0xff]   ;;  %v1544_v23 = vld [vmem:[%s2050_s1 + $0x1c8] ss:$12 sps:$4 sm:$0xff]  }
  0x1e   :  { %v1548_v24 = vld [vmem:[%s2050_s1 + $0x230] ss:$12 sps:$4 sm:$0xff]   ;;  %v1555_v26 = vld [vmem:[%s2050_s1 + $0x308] ss:$12 sps:$4 sm:$0xff]   ;;  %v1552_v28 = vld [vmem:[%s2050_s1 + $0x1e0] ss:$12 sps:$4 sm:$0xff]  }
  0x1f   :  { %843 = vmatpush1.bf16.msra.mxu0 %v1480_v32  ;;  %v1894_v27 = vld [vmem:[%s2051_s0 + $0x8] ss:$20 sps:$4 sm:$0xff]   ;;  %v1559_v30 = vld [vmem:[%s2050_s1 + $0x320] ss:$12 sps:$4 sm:$0xff]   ;;  %v1556_v32 = vld [vmem:[%s2050_s1 + $0x1f8] ss:$12 sps:$4 sm:$0xff]  }
  0x20   :  { %1343 = vmatpush3.bf16.msra.mxu1 %v1481_v33  ;;  %844 = vmatprep.subr.bf16.mxu0 %v1482_v34  ;;  %v1558_v29 = vld [vmem:[%s2050_s1 + $0x1fc] ss:$12 sps:$4 sm:$0xff]   ;;  %v1564_v33 = vld [vmem:[%s2050_s1 + $0x214] ss:$12 sps:$4 sm:$0xff]   ;;  %v1566_v34 = vld [vmem:[%s2050_s1 + $0x338] ss:$12 sps:$4 sm:$0xff]  }
  0x21   :  { %1344 = vmatprep.subr.bf16.mxu1 %v1484_v35  ;;  %v1908_v31 = vld [vmem:[%s2051_s0 + $0x34] ss:$20 sps:$4 sm:$0xff]   ;;  %v1565_v35 = vld [vmem:[%s2051_s0 + $0x30] ss:$20 sps:$4 sm:$0xff]  }
  0x22   :  { %v1577_v49 = vld [vmem:[%s2050_s1 + $0x270] ss:$12 sps:$4 sm:$0xff]  }
  0x23   :  { %845 = vmatpush1.bf16.msra.mxu0 %v1485_v36  ;;  %v1562_v36 = vld [vmem:[%s2050_s1 + $0x210] ss:$12 sps:$4 sm:$0xff]  }
  0x24   :  { %1345 = vmatpush3.bf16.msra.mxu1 %v1486_v37  ;;  %846 = vmatprep.subr.bf16.mxu0 %v1487_v38  ;;  %v1569_v37 = vld [vmem:[%s2050_s1 + $0x22c] ss:$12 sps:$4 sm:$0xff]   ;;  %v1570_v38 = vld [vmem:[%s2050_s1 + $0x350] ss:$12 sps:$4 sm:$0xff]  }
  0x25   :  { %1346 = vmatprep.subr.bf16.mxu1 %v1489_v39  ;;  %v171_v39 = vld [vmem:[%s2052_s2] sm:$0xff] }
  0x26   :  { %177 = vperm.xlu0 %1435, %v171_v39  }
  0x27   :  { %847 = vmatpush1.bf16.msra.mxu0 %v1490_v40  ;;  %v1567_v40 = vld [vmem:[%s2050_s1 + $0x228] ss:$12 sps:$4 sm:$0xff]  }
  0x28   :  { %1347 = vmatpush3.bf16.msra.mxu1 %v1491_v42  ;;  %848 = vmatprep.subr.bf16.mxu0 %v1492_v43  ;;  %v173_v42 = vld [vmem:[%s2052_s2 + $0x10] sm:$0xff] }
  0x29   :  { %1348 = vmatprep.subr.bf16.mxu1 %v1494_v44  ;;  %v1573_v43 = vld [vmem:[%s2050_s1 + $0x244] ss:$12 sps:$4 sm:$0xff]   ;;  %v172_v44 = vld [vmem:[%s2052_s2 + $0x8] sm:$0xff]  ;;  %187 = vperm.xlu1 %1436, %v173_v42  }
  0x2a   :  { %182 = vperm.xlu0 %1435, %v172_v44  }
  0x2b   :  { %849 = vmatpush1.bf16.msra.mxu0 %v1495_v45  ;;  %v1571_v45 = vld [vmem:[%s2050_s1 + $0x240] ss:$12 sps:$4 sm:$0xff]  }
  0x2c   :  { %1349 = vmatpush3.bf16.msra.mxu1 %v1497_v46  ;;  %850 = vmatprep.subr.bf16.mxu0 %v1498_v47  ;;  %v174_v46 = vld [vmem:[%s2052_s2 + $0x18] sm:$0xff] }
  0x2d   :  { %1350 = vmatprep.subr.bf16.mxu1 %v1500_v48  ;;  %192 = vperm.xlu1 %1436, %v174_v46   ;;  %v1574_v47 = vld [vmem:[%s2050_s1 + $0x258] ss:$12 sps:$4 sm:$0xff]   ;;  %v1579_v48 = vld [vmem:[%s2050_s1 + $0x274] ss:$12 sps:$4 sm:$0xff]  }
  0x2f   :  { %851 = vmatpush1.bf16.msra.mxu0 %v1501_v50  ;;  %v1580_v50 = vld [vmem:[%s2050_s1 + $0x288] ss:$12 sps:$4 sm:$0xff]  }
  0x30   :  { %1351 = vmatpush3.bf16.msra.mxu1 %v1502_v51  ;;  %852 = vmatprep.subr.bf16.mxu0 %v1503_v52  ;;  %v1585_v51 = vld [vmem:[%s2050_s1 + $0x2a4] ss:$12 sps:$4 sm:$0xff]   ;;  %v1583_v52 = vld [vmem:[%s2050_s1 + $0x2a0] ss:$12 sps:$4 sm:$0xff]  }
  0x31   :  { %1364 = vmatprep.subr.bf16.mxu1 %v1508_v53  ;;  %v1588_v53 = vld [vmem:[%s2050_s1 + $0x2bc] ss:$12 sps:$4 sm:$0xff]  }
  0x33   :  { %1020 = vmatmul.mubr.bf16.vlgmr.msra.gmra.mrb[8].mxu1 %v1505_v54  ;;  %853 = vmatpush1.bf16.msra.mxu0 %v1509_v55  ;;  %v1591_v55 = vld [vmem:[%s2050_s1 + $0x2d4] ss:$12 sps:$4 sm:$0xff]  }
  0x34   :  { %1365 = vmatpush3.bf16.msra.mxu1 %v1510_v56  ;;  %854 = vmatprep.subr.bf16.mxu0 %v1511_v57  ;;  %v1589_v56 = vld [vmem:[%s2050_s1 + $0x2d0] ss:$12 sps:$4 sm:$0xff]   ;;  %v1594_v57 = vld [vmem:[%s2050_s1 + $0x2ec] ss:$12 sps:$4 sm:$0xff]  }
  0x35   :  { %1366 = vmatprep.subr.bf16.mxu1 %v1513_v58  ;;  %1027 = vmatprep.mubr.bf16.mxu1 %v1536_v7  ;;  %v1592_v58 = vld [vmem:[%s2050_s1 + $0x2e8] ss:$12 sps:$4 sm:$0xff]  }
  0x37   :  { %855 = vmatpush1.bf16.msra.mxu0 %v1514_v59 }
  0x38   :  { %1367 = vmatpush3.bf16.msra.mxu1 %v1515_v60  ;;  %856 = vmatprep.subr.bf16.mxu0 %v1516_v61 }
  0x39   :  { %1368 = vmatprep.subr.bf16.mxu1 %v1518_v62 }
  0x3b   :  { %857 = vmatpush1.bf16.msra.mxu0 %v1519_v63  ;;  %1028 = vmatmul.mubr.bf16.gmra.mrb[12].mxu1 %v1541_v10 }
  0x3c   :  { %1369 = vmatpush3.bf16.msra.mxu1 %v1520_v0  ;;  %858 = vmatprep.subr.bf16.mxu0 %v1521_v1 }
  0x3d   :  { %1370 = vmatprep.subr.bf16.mxu1 %v1523_v2  ;;  %1068 = vmatprep.mubr.bf16.mxu1 %v1551_v17 }
  0x3f   :  { %859 = vmatpush1.bf16.msra.mxu0 %v1524_v3 }
  0x40   :  { %1371 = vmatpush3.bf16.msra.mxu1 %v1525_v4  ;;  %881 = vmatprep.subr.bf16.mxu0 %v1528_v5 }
  0x41   :  { %1372 = vmatprep.subr.bf16.mxu1 %v1529_v6 }
  0x42   :  { %861 = vmatmul.mubr.bf16.vlgmr.msra.gmra.mrb[0].mxu0 %v1505_v54  ;;  %v1586_v54 = vld [vmem:[%s2050_s1 + $0x2b8] ss:$12 sps:$4 sm:$0xff]  }
  0x43   :  { %882 = vmatpush1.bf16.msra.mxu0 %v1526_v8  ;;  %870 = vmatprep.mubr.bf16.mxu0 %v1536_v7 }
  0x44   :  { %1373 = vmatpush3.bf16.msra.mxu1 %v1530_v9  ;;  %883 = vmatprep.subr.bf16.mxu0 %v1533_v11 }
  0x45   :  { %1374 = vmatprep.subr.bf16.mxu1 %v1534_v12 }
  0x47   :  { %884 = vmatpush1.bf16.msra.mxu0 %v1531_v13 }
  0x48   :  { %1375 = vmatpush3.bf16.msra.mxu1 %v1535_v14  ;;  %885 = vmatprep.subr.bf16.mxu0 %v1540_v15 }
  0x49   :  { %1376 = vmatprep.subr.bf16.mxu1 %v1542_v16 }
  0x4a   :  { %871 = vmatmul.mubr.bf16.gmra.mrb[4].mxu0 %v1541_v10 }
  0x4b   :  { %886 = vmatpush1.bf16.msra.mxu0 %v1538_v18  ;;  %913 = vmatprep.mubr.bf16.mxu0 %v1551_v17 }
  0x4c   :  { %1377 = vmatpush3.bf16.msra.mxu1 %v1543_v19  ;;  %887 = vmatprep.subr.bf16.mxu0 %v1546_v21 }
  0x4d   :  { %1378 = vmatprep.subr.bf16.mxu1 %v1547_v22 }
  0x4f   :  { %888 = vmatpush1.bf16.msra.mxu0 %v1544_v23 }
  0x50   :  { %1379 = vmatpush3.bf16.msra.mxu1 %v1548_v24  ;;  %889 = vmatprep.subr.bf16.mxu0 %v1554_v25 }
  0x51   :  { %1398 = vmatprep.subr.bf16.mxu1 %v1555_v26 }
  0x53   :  { %1069 = vmatmul.mubr.bf16.vlgmr.msra.gmra.mrb[16].mxu1 %v1894_v27  ;;  %890 = vmatpush1.bf16.msra.mxu0 %v1552_v28 }
  0x54   :  { %1399 = vmatpush3.bf16.msra.mxu1 %v1555_v26  ;;  %891 = vmatprep.subr.bf16.mxu0 %v1558_v29 }
  0x55   :  { %1400 = vmatprep.subr.bf16.mxu1 %v1559_v30  ;;  %1076 = vmatprep.mubr.bf16.mxu1 %v1908_v31 }
  0x57   :  { %892 = vmatpush1.bf16.msra.mxu0 %v1556_v32 }
  0x58   :  { %1401 = vmatpush3.bf16.msra.mxu1 %v1559_v30  ;;  %893 = vmatprep.subr.bf16.mxu0 %v1564_v33 }
  0x59   :  { %1402 = vmatprep.subr.bf16.mxu1 %v1566_v34 }
  0x5b   :  { %1077 = vmatmul.mubr.bf16.gmra.mrb[20].mxu1 %v1565_v35  ;;  %894 = vmatpush1.bf16.msra.mxu0 %v1562_v36 }
  0x5c   :  { %1403 = vmatpush3.bf16.msra.mxu1 %v1566_v34  ;;  %895 = vmatprep.subr.bf16.mxu0 %v1569_v37 }
  0x5d   :  { %1404 = vmatprep.subr.bf16.mxu1 %v1570_v38  ;;  %1406 = vmatprep.mubr.msk.bf16.mxu1 %vm821_vm0, %v1676_v20  ;;  %v1576_v20 = vld [vmem:[%s2050_s1 + $0x25c] ss:$12 sps:$4 sm:$0xff]  }
  0x5f   :  { %896 = vmatpush1.bf16.msra.mxu0 %v1567_v40 }
  0x60   :  { %1405 = vmatpush3.bf16.msra.mxu1 %v1570_v38  ;;  %897 = vmatprep.subr.bf16.mxu0 %v1573_v43 }
  0x63   :  { %1407 = vmatmul.mubr.msk.bf16.vlgmr.msra.gmra.mrb[24].mxu1 %vm821_vm0, %v1743_v41  ;;  %898 = vmatpush1.bf16.msra.mxu0 %v1571_v45  ;;  %v1582_v41 = vld [vmem:[%s2050_s1 + $0x28c] ss:$12 sps:$4 sm:$0xff]  }
  0x64   :  { %899 = vmatprep.subr.bf16.mxu0 %v1576_v20 }
  0x67   :  { %900 = vmatpush1.bf16.msra.mxu0 %v1574_v47 }
  0x68   :  { %901 = vmatprep.subr.bf16.mxu0 %v1579_v48 }
  0x6b   :  { %902 = vmatpush1.bf16.msra.mxu0 %v1577_v49 }
  0x6c   :  { %903 = vmatprep.subr.bf16.mxu0 %v1582_v41 }
  0x6f   :  { %904 = vmatpush1.bf16.msra.mxu0 %v1580_v50 }
  0x70   :  { %905 = vmatprep.subr.bf16.mxu0 %v1585_v51 }
  0x73   :  { %906 = vmatpush1.bf16.msra.mxu0 %v1583_v52 }
  0x74   :  { %907 = vmatprep.subr.bf16.mxu0 %v1588_v53 }
  0x77   :  { %908 = vmatpush1.bf16.msra.mxu0 %v1586_v54 }
  0x78   :  { %909 = vmatprep.subr.bf16.mxu0 %v1591_v55 }
  0x7b   :  { %910 = vmatpush1.bf16.msra.mxu0 %v1589_v56 }
  0x7c   :  { %911 = vmatprep.subr.bf16.mxu0 %v1594_v57 }
  0x7f   :  { %912 = vmatpush1.bf16.msra.mxu0 %v1592_v58 }
  0x82   :  { %914 = vmatmul.mubr.bf16.vlgmr.msra.gmra.mrb[0].mxu0 %v1894_v27 }
  0x83   :  { %923 = vmatprep.mubr.bf16.mxu0 %v1908_v31 }
  0x8a   :  { %924 = vmatmul.mubr.bf16.gmra.mrb[4].mxu0 %v1565_v35 }
  0xa5   :  { %v178_v15 = vpop.permute.xlu0 %177 }
  0xa8   :  { %v188_v21 = vpop.permute.xlu1 %187 }
  0xa9   :  { %v183_v16 = vpop.permute.xlu0 %182 }
  0xac   :  { %v193_v29 = vpop.permute.xlu1 %192 }
  0xe6   :  { %v2002_v59 = vpop.f32.mrb[0].mxu1 }
  0xe7   :  { %v2004_v60 = vpop.f32.mrb[1].mxu1 }
  0xe8   :  { %v2006_v61 = vpop.f32.mrb[2].mxu1 }
  0xe9   :  { %v2008_v62 = vpop.f32.mrb[3].mxu1 }
  0xee   :  { %v2010_v63 = vpop.f32.mrb[4].mxu1 }
  0xef   :  { %v2012_v0 = vpop.f32.mrb[5].mxu1 }
  0xf0   :  { %v2014_v1 = vpop.f32.mrb[6].mxu1 }
  0xf1   :  { %v2016_v2 = vpop.f32.mrb[7].mxu1 }
 0x106   :  { %v1352_v3 = vpop.f32.mrb[8].mxu1 }
 0x107   :  { %v1353_v4 = vpop.f32.mrb[9].mxu1 }
 0x108   :  { %v1354_v5 = vadd.f32 %v1353_v4, %v1352_v3  ;;  %v1355_v6 = vpop.f32.mrb[10].mxu1 }
 0x109   :  { %v1356_v7 = vpop.f32.mrb[11].mxu1 }
 0x10a   :  { %v1357_v8 = vadd.f32 %v1356_v7, %v1355_v6  ;;  %v1022_v17 = vadd.f32 %v1354_v5, %v178_v15 }
 0x10c   :  { %v1025_v24 = vadd.f32 %v1357_v8, %v183_v16 }
 0x10e   :  { %v1358_v9 = vpop.f32.mrb[12].mxu1 }
 0x10f   :  { %v1359_v10 = vpop.f32.mrb[13].mxu1 }
 0x110   :  { %v1360_v11 = vadd.f32 %v1359_v10, %v1358_v9  ;;  %v1361_v12 = vpop.f32.mrb[14].mxu1 }
 0x111   :  { %v1362_v13 = vpop.f32.mrb[15].mxu1 }
 0x112   :  { %v1363_v14 = vadd.f32 %v1362_v13, %v1361_v12  ;;  %v1030_v31 = vadd.f32 %v1360_v11, %v188_v21 }
 0x114   :  { %v1033_v35 = vadd.f32 %v1363_v14, %v193_v29 }
 0x126   :  { %v1380_v18 = vpop.f32.mrb[16].mxu1 }
 0x127   :  { %v1381_v19 = vpop.f32.mrb[17].mxu1 }
 0x128   :  { %v1382_v22 = vadd.f32 %v1381_v19, %v1380_v18  ;;  %v1383_v23 = vpop.f32.mrb[18].mxu1 }
 0x129   :  { %v1384_v25 = vpop.f32.mrb[19].mxu1 }
 0x12a   :  { %v1385_v26 = vadd.f32 %v1384_v25, %v1383_v23  ;;  %v1071_v27 = vadd.f32 %v1382_v22, %v1022_v17 }
 0x12c   :  { %v1074_v28 = vadd.f32 %v1385_v26, %v1025_v24 }
 0x12e   :  { %v1386_v30 = vpop.f32.mrb[20].mxu1 }
 0x12f   :  { %v1387_v32 = vpop.f32.mrb[21].mxu1 }
 0x130   :  { %v1388_v33 = vadd.f32 %v1387_v32, %v1386_v30  ;;  %v1389_v34 = vpop.f32.mrb[22].mxu1 }
 0x131   :  { %v1390_v36 = vpop.f32.mrb[23].mxu1 }
 0x132   :  { %v1391_v37 = vadd.f32 %v1390_v36, %v1389_v34  ;;  %v1079_v38 = vadd.f32 %v1388_v33, %v1030_v31 }
 0x134   :  { %v1082_v39 = vadd.f32 %v1391_v37, %v1033_v35 }
 0x136   :  { %v1408_v40 = vpop.f32.mrb[24].mxu1 }
 0x137   :  { %v1119_v42 = vpop.f32.mrb[25].mxu1  ;;  %v1128_v43 = vadd.f32 %v1408_v40, %v1079_v38 }
 0x138   :  { %v1120_v44 = vadd.f32 %v1119_v42, %v1071_v27  ;;  %v1409_v45 = vpop.f32.mrb[26].mxu1 }
 0x139   :  { %v1122_v46 = vpop.f32.mrb[27].mxu1  ;;  %v1142_v20 = vmax.f32 %v1128_v43, 0.0  ;;  %v1131_v47 = vadd.f32 %v1409_v45, %v1082_v39 }
 0x13a   :  { %v1136_v48 = vmax.f32 %v1120_v44, 0.0  ;;  %v1123_v49 = vadd.f32 %v1122_v46, %v1074_v28 }
 0x13b   :  { %v1333_v41 = vpack.c.bf16 %v1142_v20, %v1142_v20  ;;  %v1145_v50 = vmax.f32 %v1131_v47, 0.0 }
 0x13c   :  { %v1329_v51 = vpack.c.bf16 %v1136_v48, %v1136_v48  ;;  %v1139_v52 = vmax.f32 %v1123_v49, 0.0 }
 0x13d   :  { %1191 = vst [vmem:[%s2053_s3 + $0x20] sm:$0xf] %v1333_v41  ;;  %v1335_v53 = vpack.c.bf16 %v1145_v50, %v1145_v50 }
 0x13e   :  { %1187 = vst [vmem:[%s2053_s3 + $0x8] sm:$0xf] %v1329_v51  ;;  %v1331_v54 = vpack.c.bf16 %v1139_v52, %v1139_v52 }
 0x13f   :  { %1193 = vst [vmem:[%s2053_s3 + $0x2c] sm:$0xf] %v1335_v53 }
 0x140   :  { %1189 = vst [vmem:[%s2053_s3 + $0x14] sm:$0xf] %v1331_v54 }
 0x155   :  { %v915_v55 = vpop.f32.mrb[0].mxu0 }
 0x156   :  { %v1410_v56 = vadd.f32 %v915_v55, %v178_v15  ;;  %v917_v57 = vpop.f32.mrb[1].mxu0 }
 0x157   :  { %v1412_v58 = vadd.f32 %v917_v57, %v178_v15  ;;  %v919_v3 = vpop.f32.mrb[2].mxu0 }
 0x158   :  { %v1411_v4 = vadd.f32 %v1410_v56, %v2002_v59  ;;  %v1414_v5 = vadd.f32 %v919_v3, %v183_v16  ;;  %v921_v6 = vpop.f32.mrb[3].mxu0 }
 0x159   :  { %v1413_v7 = vadd.f32 %v1412_v58, %v2004_v60  ;;  %v1416_v8 = vadd.f32 %v921_v6, %v183_v16 }
 0x15a   :  { %v1134_v9 = vmax.f32 %v1411_v4, 0.0  ;;  %v1415_v10 = vadd.f32 %v1414_v5, %v2006_v61 }
 0x15b   :  { %v1135_v11 = vmax.f32 %v1413_v7, 0.0  ;;  %v1417_v12 = vadd.f32 %v1416_v8, %v2008_v62 }
 0x15c   :  { %v1137_v13 = vmax.f32 %v1415_v10, 0.0 }
 0x15d   :  { %v1328_v14 = vpack.c.bf16 %v1135_v11, %v1134_v9  ;;  %v1138_v17 = vmax.f32 %v1417_v12, 0.0  ;;  %v925_v18 = vpop.f32.mrb[4].mxu0 }
 0x15e   :  { %v1418_v19 = vadd.f32 %v925_v18, %v188_v21  ;;  %v927_v15 = vpop.f32.mrb[5].mxu0 }
 0x15f   :  { %1186 = vst [vmem:[%s2053_s3] sm:$0xff] %v1328_v14  ;;  %v1330_v59 = vpack.c.bf16 %v1138_v17, %v1137_v13  ;;  %v1420_v22 = vadd.f32 %v927_v15, %v188_v21  ;;  %v929_v60 = vpop.f32.mrb[6].mxu0 }
 0x160   :  { %v1419_v16 = vadd.f32 %v1418_v19, %v2010_v63  ;;  %v1422_v23 = vadd.f32 %v929_v60, %v193_v29  ;;  %v931_v61 = vpop.f32.mrb[7].mxu0 }
 0x161   :  { %1188 = vst [vmem:[%s2053_s3 + $0xc] sm:$0xff] %v1330_v59  ;;  %v1421_v62 = vadd.f32 %v1420_v22, %v2012_v0  ;;  %v1424_v24 = vadd.f32 %v931_v61, %v193_v29 }
 0x162   :  { %v1140_v25 = vmax.f32 %v1419_v16, 0.0  ;;  %v1423_v26 = vadd.f32 %v1422_v23, %v2014_v1 }
 0x163   :  { %v1141_v27 = vmax.f32 %v1421_v62, 0.0  ;;  %v1425_v28 = vadd.f32 %v1424_v24, %v2016_v2 }
 0x164   :  { %v1143_v30 = vmax.f32 %v1423_v26, 0.0 }
 0x165   :  { %v1332_v21 = vpack.c.bf16 %v1141_v27, %v1140_v25  ;;  %v1144_v31 = vmax.f32 %v1425_v28, 0.0 }
 0x167   :  { %1190 = vst [vmem:[%s2053_s3 + $0x18] sm:$0xff] %v1332_v21  ;;  %v1334_v63 = vpack.c.bf16 %v1144_v31, %v1143_v30 }
 0x169   :  { %1192 = vst [vmem:[%s2053_s3 + $0x24] sm:$0xff] %v1334_v63 }

// kernel: cnn_forward.7
= control target key start
LH: loop header
LB: loop body
LE: loop exit
PB: predicated region body
PF: predicated region fallthrough
CT: control target
= control target key end

     0   :  { %v1186_v32 = vlaneseq  ;;  %v11922_v33 = vmov 1966171168   ;;  %s16050_s0 = inlined_call_operand.vmem [shape: bf16[2,1152], index: 0, kind: input, shape index: {}]   ;;  %s16051_s1 = inlined_call_operand.vmem [shape: bf16[1152,2048], index: 1, kind: input, shape index: {}]   ;;  %s16052_s2 = inlined_call_operand.vmem [shape: f32[1,2048], index: 2, kind: input, shape index: {}]   ;;  %s16053_s3 = inlined_call_operand.vmem [shape: bf16[2048,10], index: 3, kind: input, shape index: {}]   ;;  %s16054_s4 = inlined_call_operand.vmem [shape: f32[1,10], index: 4, kind: input, shape index: {}]   ;;  %s16055_s5 = inlined_call_operand.hbm [shape: f32[2,10], index: 5, kind: output, shape index: {}]  }
   0x1   :  { %v30_v0 = vld [vmem:[%s16051_s1] sm:$0xff]  ;;  %v31_v2 = vld [vmem:[%s16051_s1 + $0x8] sm:$0xff]  ;;  %v1270_v34 = vunpack.c.l.s4 %v11922_v33 }
   0x2   :  { %v38_v1 = vld [vmem:[%s16051_s1 + $0x40] sm:$0xff]  ;;  %v39_v4 = vld [vmem:[%s16051_s1 + $0x48] sm:$0xff]  ;;  %v12022_v43 = vshrl.u32 %v1186_v32, 7 }
   0x3   :  { %v10160_v3 = vcombine.high %v30_v0, %v38_v1  ;;  %v10159_v5 = vcombine.low %v30_v0, %v38_v1  ;;  %v46_v6 = vld [vmem:[%s16051_s1 + $0x80] sm:$0xff]  ;;  %v10162_v8 = vcombine.high %v31_v2, %v39_v4  ;;  %v10161_v9 = vcombine.low %v31_v2, %v39_v4  ;;  %v47_v11 = vld [vmem:[%s16051_s1 + $0x88] sm:$0xff] }
   0x4   :  { %v54_v7 = vld [vmem:[%s16051_s1 + $0xc0] sm:$0xff]  ;;  %v55_v12 = vld [vmem:[%s16051_s1 + $0xc8] sm:$0xff]  ;;  %v1271_v44 = vunpack.c.0.s8 %v1270_v34 }
   0x5   :  { %v10176_v10 = vcombine.high %v46_v6, %v54_v7  ;;  %v62_v13 = vld [vmem:[%s16051_s1 + $0x100] sm:$0xff]  ;;  %7100 = vmatprep.subr.bf16.mxu0 %v10160_v3  ;;  %v10178_v14 = vcombine.high %v47_v11, %v55_v12  ;;  %v63_v16 = vld [vmem:[%s16051_s1 + $0x108] sm:$0xff]  ;;  %7305 = vmatprep.subr.bf16.mxu1 %v10162_v8  ;;  %v10175_v18 = vcombine.low %v46_v6, %v54_v7 }
   0x6   :  { %v70_v15 = vld [vmem:[%s16051_s1 + $0x140] sm:$0xff]  ;;  %v71_v17 = vld [vmem:[%s16051_s1 + $0x148] sm:$0xff]  ;;  %7101 = vmatpush1.bf16.msra.mxu0 %v10159_v5  ;;  %7306 = vmatpush1.bf16.msra.mxu1 %v10161_v9  ;;  %v10177_v19 = vcombine.low %v47_v11, %v55_v12  ;;  %v12037_v53 = vsub.s32 %v1271_v44, %v12022_v43 }
   0x7   :  { %7102 = vmatprep.subr.bf16.mxu0 %v10176_v10  ;;  %v10192_v20 = vcombine.high %v62_v13, %v70_v15  ;;  %7307 = vmatprep.subr.bf16.mxu1 %v10178_v14  ;;  %v10194_v21 = vcombine.high %v63_v16, %v71_v17  ;;  %v78_v22 = vld [vmem:[%s16051_s1 + $0x180] sm:$0xff]  ;;  %v79_v24 = vld [vmem:[%s16051_s1 + $0x188] sm:$0xff]  ;;  %v10191_v26 = vcombine.low %v62_v13, %v70_v15 }
   0x8   :  { %v86_v23 = vld [vmem:[%s16051_s1 + $0x1c0] sm:$0xff]  ;;  %v87_v25 = vld [vmem:[%s16051_s1 + $0x1c8] sm:$0xff]  ;;  %v10193_v27 = vcombine.low %v63_v16, %v71_v17 }
   0x9   :  { %v10208_v28 = vcombine.high %v78_v22, %v86_v23  ;;  %v10210_v29 = vcombine.high %v79_v24, %v87_v25  ;;  %v94_v30 = vld [vmem:[%s16051_s1 + $0x200] sm:$0xff]  ;;  %v95_v35 = vld [vmem:[%s16051_s1 + $0x208] sm:$0xff]  ;;  %v10207_v37 = vcombine.low %v78_v22, %v86_v23  ;;  %v10209_v38 = vcombine.low %v79_v24, %v87_v25 }
   0xa   :  { %7103 = vmatpush1.bf16.msra.mxu0 %v10175_v18  ;;  %7308 = vmatpush1.bf16.msra.mxu1 %v10177_v19  ;;  %v102_v31 = vld [vmem:[%s16051_s1 + $0x240] sm:$0xff]  ;;  %v103_v36 = vld [vmem:[%s16051_s1 + $0x248] sm:$0xff] }
   0xb   :  { %7104 = vmatprep.subr.bf16.mxu0 %v10192_v20  ;;  %7309 = vmatprep.subr.bf16.mxu1 %v10194_v21  ;;  %v10224_v39 = vcombine.high %v94_v30, %v102_v31  ;;  %v10226_v40 = vcombine.high %v95_v35, %v103_v36  ;;  %v110_v41 = vld [vmem:[%s16051_s1 + $0x280] sm:$0xff]  ;;  %v111_v45 = vld [vmem:[%s16051_s1 + $0x288] sm:$0xff]  ;;  %v10223_v47 = vcombine.low %v94_v30, %v102_v31 }
   0xc   :  { %v118_v42 = vld [vmem:[%s16051_s1 + $0x2c0] sm:$0xff]  ;;  %v119_v46 = vld [vmem:[%s16051_s1 + $0x2c8] sm:$0xff]  ;;  %v10225_v48 = vcombine.low %v95_v35, %v103_v36 }
   0xd   :  { %v10240_v49 = vcombine.high %v110_v41, %v118_v42  ;;  %v10242_v50 = vcombine.high %v111_v45, %v119_v46  ;;  %v126_v51 = vld [vmem:[%s16051_s1 + $0x300] sm:$0xff]  ;;  %v127_v54 = vld [vmem:[%s16051_s1 + $0x308] sm:$0xff]  ;;  %v10239_v56 = vcombine.low %v110_v41, %v118_v42  ;;  %v10241_v57 = vcombine.low %v111_v45, %v119_v46 }
   0xe   :  { %7105 = vmatpush1.bf16.msra.mxu0 %v10191_v26  ;;  %7310 = vmatpush1.bf16.msra.mxu1 %v10193_v27  ;;  %v134_v52 = vld [vmem:[%s16051_s1 + $0x340] sm:$0xff]  ;;  %v135_v55 = vld [vmem:[%s16051_s1 + $0x348] sm:$0xff] }
   0xf   :  { %7106 = vmatprep.subr.bf16.mxu0 %v10208_v28  ;;  %7311 = vmatprep.subr.bf16.mxu1 %v10210_v29  ;;  %v10256_v58 = vcombine.high %v126_v51, %v134_v52  ;;  %v12048_v59 = vld [vmem:[%s16050_s0] sm:$0xff]  ;;  %v10258_v60 = vcombine.high %v127_v54, %v135_v55  ;;  %v143_v0 = vld [vmem:[%s16051_s1 + $0x388] sm:$0xff]  ;;  %v10255_v2 = vcombine.low %v126_v51, %v134_v52 }
  0x10   :  { %v142_v61 = vld [vmem:[%s16051_s1 + $0x380] sm:$0xff]  ;;  %v12058_v63 = vrot.slane %v12048_v59, %v12037_v53  ;;  %v151_v1 = vld [vmem:[%s16051_s1 + $0x3c8] sm:$0xff]  ;;  %v10257_v4 = vcombine.low %v127_v54, %v135_v55 }
  0x11   :  { %v150_v62 = vld [vmem:[%s16051_s1 + $0x3c0] sm:$0xff]  ;;  %v10274_v6 = vcombine.high %v143_v0, %v151_v1  ;;  %v159_v10 = vld [vmem:[%s16051_s1 + $0x408] sm:$0xff]  ;;  %v10273_v13 = vcombine.low %v143_v0, %v151_v1 }
  0x12   :  { %7107 = vmatpush1.bf16.msra.mxu0 %v10207_v37  ;;  %7312 = vmatpush1.bf16.msra.mxu1 %v10209_v38  ;;  %v1283_v3 = vcombine.high %v12058_v63, %v12058_v63  ;;  %v10272_v5 = vcombine.high %v142_v61, %v150_v62  ;;  %v158_v7 = vld [vmem:[%s16051_s1 + $0x400] sm:$0xff]  ;;  %v167_v11 = vld [vmem:[%s16051_s1 + $0x448] sm:$0xff]  ;;  %v10271_v12 = vcombine.low %v142_v61, %v150_v62 }
  0x13   :  { %7108 = vmatprep.subr.bf16.mxu0 %v10224_v39  ;;  %7313 = vmatprep.subr.bf16.mxu1 %v10226_v40  ;;  %v166_v8 = vld [vmem:[%s16051_s1 + $0x440] sm:$0xff]  ;;  %v10290_v15 = vcombine.high %v159_v10, %v167_v11  ;;  %v175_v18 = vld [vmem:[%s16051_s1 + $0x488] sm:$0xff]  ;;  %v10289_v21 = vcombine.low %v159_v10, %v167_v11 }
  0x14   :  { %v12075_v9 = vrot.slane %v1283_v3, %v12037_v53  ;;  %v10288_v14 = vcombine.high %v158_v7, %v166_v8  ;;  %v174_v16 = vld [vmem:[%s16051_s1 + $0x480] sm:$0xff]  ;;  %v183_v19 = vld [vmem:[%s16051_s1 + $0x4c8] sm:$0xff]  ;;  %v10287_v20 = vcombine.low %v158_v7, %v166_v8 }
  0x15   :  { %v182_v17 = vld [vmem:[%s16051_s1 + $0x4c0] sm:$0xff]  ;;  %v10306_v23 = vcombine.high %v175_v18, %v183_v19  ;;  %v191_v26 = vld [vmem:[%s16051_s1 + $0x508] sm:$0xff]  ;;  %v10305_v29 = vcombine.low %v175_v18, %v183_v19 }
  0x16   :  { %7109 = vmatpush1.bf16.msra.mxu0 %v10223_v47  ;;  %7314 = vmatpush1.bf16.msra.mxu1 %v10225_v48  ;;  %v10304_v22 = vcombine.high %v174_v16, %v182_v17  ;;  %v190_v24 = vld [vmem:[%s16051_s1 + $0x500] sm:$0xff]  ;;  %v199_v27 = vld [vmem:[%s16051_s1 + $0x548] sm:$0xff]  ;;  %v10303_v28 = vcombine.low %v174_v16, %v182_v17 }
  0x17   :  { %7110 = vmatprep.subr.bf16.mxu0 %v10240_v49  ;;  %7315 = vmatprep.subr.bf16.mxu1 %v10242_v50  ;;  %v198_v25 = vld [vmem:[%s16051_s1 + $0x540] sm:$0xff]  ;;  %v10322_v31 = vcombine.high %v191_v26, %v199_v27  ;;  %v207_v34 = vld [vmem:[%s16051_s1 + $0x588] sm:$0xff]  ;;  %v10321_v37 = vcombine.low %v191_v26, %v199_v27 }
  0x18   :  { %7132 = vmatprep.mubr.bf16.mxu0 %v12075_v9  ;;  %7337 = vmatprep.mubr.bf16.mxu1 %v12075_v9  ;;  %v10320_v30 = vcombine.high %v190_v24, %v198_v25  ;;  %v206_v32 = vld [vmem:[%s16051_s1 + $0x580] sm:$0xff]  ;;  %v215_v35 = vld [vmem:[%s16051_s1 + $0x5c8] sm:$0xff]  ;;  %v10319_v36 = vcombine.low %v190_v24, %v198_v25 }
  0x19   :  { %v214_v33 = vld [vmem:[%s16051_s1 + $0x5c0] sm:$0xff]  ;;  %v10338_v39 = vcombine.high %v207_v34, %v215_v35  ;;  %v223_v42 = vld [vmem:[%s16051_s1 + $0x608] sm:$0xff]  ;;  %v10337_v46 = vcombine.low %v207_v34, %v215_v35 }
  0x1a   :  { %7111 = vmatpush1.bf16.msra.mxu0 %v10239_v56  ;;  %7316 = vmatpush1.bf16.msra.mxu1 %v10241_v57  ;;  %v10336_v38 = vcombine.high %v206_v32, %v214_v33  ;;  %v222_v40 = vld [vmem:[%s16051_s1 + $0x600] sm:$0xff]  ;;  %v231_v44 = vld [vmem:[%s16051_s1 + $0x648] sm:$0xff]  ;;  %v10335_v45 = vcombine.low %v206_v32, %v214_v33  ;;  %v12211_v33 = vcombine.high %v12075_v9, %v12075_v9 }
  0x1b   :  { %7112 = vmatprep.subr.bf16.mxu0 %v10256_v58  ;;  %7317 = vmatprep.subr.bf16.mxu1 %v10258_v60  ;;  %v230_v41 = vld [vmem:[%s16051_s1 + $0x640] sm:$0xff]  ;;  %v10354_v48 = vcombine.high %v223_v42, %v231_v44  ;;  %v239_v51 = vld [vmem:[%s16051_s1 + $0x688] sm:$0xff]  ;;  %v10353_v55 = vcombine.low %v223_v42, %v231_v44 }
  0x1c   :  { %v10352_v47 = vcombine.high %v222_v40, %v230_v41  ;;  %v238_v49 = vld [vmem:[%s16051_s1 + $0x680] sm:$0xff]  ;;  %v247_v52 = vld [vmem:[%s16051_s1 + $0x6c8] sm:$0xff]  ;;  %v10351_v54 = vcombine.low %v222_v40, %v230_v41 }
  0x1d   :  { %v246_v50 = vld [vmem:[%s16051_s1 + $0x6c0] sm:$0xff]  ;;  %v10370_v57 = vcombine.high %v239_v51, %v247_v52  ;;  %v255_v61 = vld [vmem:[%s16051_s1 + $0x708] sm:$0xff]  ;;  %v10369_v1 = vcombine.low %v239_v51, %v247_v52 }
  0x1e   :  { %7113 = vmatpush1.bf16.msra.mxu0 %v10255_v2  ;;  %7318 = vmatpush1.bf16.msra.mxu1 %v10257_v4  ;;  %v10368_v56 = vcombine.high %v238_v49, %v246_v50  ;;  %v254_v58 = vld [vmem:[%s16051_s1 + $0x700] sm:$0xff]  ;;  %v263_v62 = vld [vmem:[%s16051_s1 + $0x748] sm:$0xff]  ;;  %v10367_v0 = vcombine.low %v238_v49, %v246_v50 }
  0x1f   :  { %7114 = vmatprep.subr.bf16.mxu0 %v10272_v5  ;;  %7319 = vmatprep.subr.bf16.mxu1 %v10274_v6  ;;  %v262_v60 = vld [vmem:[%s16051_s1 + $0x740] sm:$0xff]  ;;  %v10386_v3 = vcombine.high %v255_v61, %v263_v62  ;;  %v271_v6 = vld [vmem:[%s16051_s1 + $0x788] sm:$0xff]  ;;  %v10385_v10 = vcombine.low %v255_v61, %v263_v62 }
  0x20   :  { %v10384_v2 = vcombine.high %v254_v58, %v262_v60  ;;  %v270_v4 = vld [vmem:[%s16051_s1 + $0x780] sm:$0xff]  ;;  %v279_v7 = vld [vmem:[%s16051_s1 + $0x7c8] sm:$0xff]  ;;  %v10383_v8 = vcombine.low %v254_v58, %v262_v60 }
  0x21   :  { %v278_v5 = vld [vmem:[%s16051_s1 + $0x7c0] sm:$0xff]  ;;  %v295_v16 = vld [vmem:[%s16051_s1 + $0x848] sm:$0xff]  ;;  %v10401_v18 = vcombine.low %v271_v6, %v279_v7 }
  0x22   :  { %7115 = vmatpush1.bf16.msra.mxu0 %v10271_v12  ;;  %7320 = vmatpush1.bf16.msra.mxu1 %v10273_v13  ;;  %v10400_v11 = vcombine.high %v270_v4, %v278_v5  ;;  %v10402_v12 = vcombine.high %v271_v6, %v279_v7  ;;  %v286_v13 = vld [vmem:[%s16051_s1 + $0x800] sm:$0xff]  ;;  %v10399_v17 = vcombine.low %v270_v4, %v278_v5  ;;  %v303_v24 = vld [vmem:[%s16051_s1 + $0x888] sm:$0xff] }
  0x23   :  { %7116 = vmatprep.subr.bf16.mxu0 %v10288_v14  ;;  %7321 = vmatprep.subr.bf16.mxu1 %v10290_v15  ;;  %v294_v14 = vld [vmem:[%s16051_s1 + $0x840] sm:$0xff]  ;;  %v287_v15 = vld [vmem:[%s16051_s1 + $0x808] sm:$0xff] }
  0x24   :  { %v10416_v19 = vcombine.high %v286_v13, %v294_v14  ;;  %v311_v25 = vld [vmem:[%s16051_s1 + $0x8c8] sm:$0xff]  ;;  %v10415_v26 = vcombine.low %v286_v13, %v294_v14  ;;  %v10417_v27 = vcombine.low %v287_v15, %v295_v16 }
  0x25   :  { %v327_v32 = vld [vmem:[%s16051_s1 + $0x948] sm:$0xff]  ;;  %v10433_v35 = vcombine.low %v303_v24, %v311_v25 }
  0x26   :  { %7117 = vmatpush1.bf16.msra.mxu0 %v10287_v20  ;;  %7322 = vmatpush1.bf16.msra.mxu1 %v10289_v21  ;;  %v10418_v20 = vcombine.high %v287_v15, %v295_v16  ;;  %v302_v21 = vld [vmem:[%s16051_s1 + $0x880] sm:$0xff]  ;;  %v343_v41 = vld [vmem:[%s16051_s1 + $0x9c8] sm:$0xff] }
  0x27   :  { %7118 = vmatprep.subr.bf16.mxu0 %v10304_v22  ;;  %7323 = vmatprep.subr.bf16.mxu1 %v10306_v23  ;;  %v310_v22 = vld [vmem:[%s16051_s1 + $0x8c0] sm:$0xff]  ;;  %v12189_v23 = vrot.slane %v12058_v63, %v12037_v53  ;;  %v359_v50 = vld [vmem:[%s16051_s1 + $0xa48] sm:$0xff] }
  0x28   :  { %v326_v63 = vld [vmem:[%s16051_s1 + $0x940] sm:$0xff]  ;;  %v10431_v34 = vcombine.low %v302_v21, %v310_v22  ;;  %v375_v60 = vld [vmem:[%s16051_s1 + $0xac8] sm:$0xff] }
  0x29   :  { %v391_v5 = vld [vmem:[%s16051_s1 + $0xb48] sm:$0xff] }
  0x2a   :  { %7119 = vmatpush1.bf16.msra.mxu0 %v10303_v28  ;;  %7324 = vmatpush1.bf16.msra.mxu1 %v10305_v29  ;;  %v10432_v28 = vcombine.high %v302_v21, %v310_v22  ;;  %v318_v29 = vld [vmem:[%s16051_s1 + $0x900] sm:$0xff]  ;;  %v407_v14 = vld [vmem:[%s16051_s1 + $0xbc8] sm:$0xff] }
  0x2b   :  { %7120 = vmatprep.subr.bf16.mxu0 %v10320_v30  ;;  %7325 = vmatprep.subr.bf16.mxu1 %v10322_v31  ;;  %v319_v30 = vld [vmem:[%s16051_s1 + $0x908] sm:$0xff]  ;;  %v10434_v31 = vcombine.high %v303_v24, %v311_v25  ;;  %v10447_v42 = vcombine.low %v318_v29, %v326_v63 }
  0x2c   :  { %v10450_v40 = vcombine.high %v319_v30, %v327_v32  ;;  %v10449_v44 = vcombine.low %v319_v30, %v327_v32  ;;  %v423_v22 = vld [vmem:[%s16051_s1 + $0xc48] sm:$0xff] }
  0x2d   :  { %v439_v30 = vld [vmem:[%s16051_s1 + $0xcc8] sm:$0xff] }
  0x2e   :  { %7121 = vmatpush1.bf16.msra.mxu0 %v10319_v36  ;;  %7326 = vmatpush1.bf16.msra.mxu1 %v10321_v37  ;;  %v10448_v36 = vcombine.high %v318_v29, %v326_v63  ;;  %v334_v37 = vld [vmem:[%s16051_s1 + $0x980] sm:$0xff]  ;;  %v431_v29 = vld [vmem:[%s16051_s1 + $0xc88] sm:$0xff] }
  0x2f   :  { %7122 = vmatprep.subr.bf16.mxu0 %v10336_v38  ;;  %7327 = vmatprep.subr.bf16.mxu1 %v10338_v39  ;;  %v342_v38 = vld [vmem:[%s16051_s1 + $0x9c0] sm:$0xff]  ;;  %v335_v39 = vld [vmem:[%s16051_s1 + $0x988] sm:$0xff] }
  0x30   :  { %v10466_v49 = vcombine.high %v335_v39, %v343_v41  ;;  %v10463_v51 = vcombine.low %v334_v37, %v342_v38  ;;  %v10465_v52 = vcombine.low %v335_v39, %v343_v41  ;;  %v455_v39 = vld [vmem:[%s16051_s1 + $0xd48] sm:$0xff]  ;;  %v10561_v41 = vcombine.low %v431_v29, %v439_v30 }
  0x32   :  { %7123 = vmatpush1.bf16.msra.mxu0 %v10335_v45  ;;  %7328 = vmatpush1.bf16.msra.mxu1 %v10337_v46  ;;  %v10464_v45 = vcombine.high %v334_v37, %v342_v38  ;;  %v350_v46 = vld [vmem:[%s16051_s1 + $0xa00] sm:$0xff]  ;;  %v447_v37 = vld [vmem:[%s16051_s1 + $0xd08] sm:$0xff]  ;;  %v10562_v38 = vcombine.high %v431_v29, %v439_v30 }
  0x33   :  { %7124 = vmatprep.subr.bf16.mxu0 %v10352_v47  ;;  %7329 = vmatprep.subr.bf16.mxu1 %v10354_v48  ;;  %v358_v47 = vld [vmem:[%s16051_s1 + $0xa40] sm:$0xff]  ;;  %v351_v48 = vld [vmem:[%s16051_s1 + $0xa08] sm:$0xff] }
  0x34   :  { %v10482_v58 = vcombine.high %v351_v48, %v359_v50  ;;  %v10479_v61 = vcombine.low %v350_v46, %v358_v47  ;;  %v10481_v62 = vcombine.low %v351_v48, %v359_v50  ;;  %v471_v48 = vld [vmem:[%s16051_s1 + $0xdc8] sm:$0xff]  ;;  %v10577_v50 = vcombine.low %v447_v37, %v455_v39 }
  0x35   :  { %v551_v29 = vld [vmem:[%s16051_s1 + $0x1048] sm:$0xff] }
  0x36   :  { %7125 = vmatpush1.bf16.msra.mxu0 %v10351_v54  ;;  %7330 = vmatpush1.bf16.msra.mxu1 %v10353_v55  ;;  %v10480_v54 = vcombine.high %v350_v46, %v358_v47  ;;  %v366_v55 = vld [vmem:[%s16051_s1 + $0xa80] sm:$0xff]  ;;  %v463_v46 = vld [vmem:[%s16051_s1 + $0xd88] sm:$0xff]  ;;  %v10578_v47 = vcombine.high %v447_v37, %v455_v39 }
  0x37   :  { %7126 = vmatprep.subr.bf16.mxu0 %v10368_v56  ;;  %7331 = vmatprep.subr.bf16.mxu1 %v10370_v57  ;;  %v374_v56 = vld [vmem:[%s16051_s1 + $0xac0] sm:$0xff]  ;;  %v367_v57 = vld [vmem:[%s16051_s1 + $0xa88] sm:$0xff] }
  0x38   :  { %v10498_v4 = vcombine.high %v367_v57, %v375_v60  ;;  %v10495_v6 = vcombine.low %v366_v55, %v374_v56  ;;  %v10497_v7 = vcombine.low %v367_v57, %v375_v60  ;;  %v487_v57 = vld [vmem:[%s16051_s1 + $0xe48] sm:$0xff]  ;;  %v10593_v60 = vcombine.low %v463_v46, %v471_v48 }
  0x3a   :  { %7127 = vmatpush1.bf16.msra.mxu0 %v10367_v0  ;;  %7332 = vmatpush1.bf16.msra.mxu1 %v10369_v1  ;;  %v10496_v0 = vcombine.high %v366_v55, %v374_v56  ;;  %v382_v1 = vld [vmem:[%s16051_s1 + $0xb00] sm:$0xff]  ;;  %v479_v55 = vld [vmem:[%s16051_s1 + $0xe08] sm:$0xff]  ;;  %v10594_v56 = vcombine.high %v463_v46, %v471_v48 }
  0x3b   :  { %7128 = vmatprep.subr.bf16.mxu0 %v10384_v2  ;;  %7333 = vmatprep.subr.bf16.mxu1 %v10386_v3  ;;  %v390_v2 = vld [vmem:[%s16051_s1 + $0xb40] sm:$0xff]  ;;  %v383_v3 = vld [vmem:[%s16051_s1 + $0xb08] sm:$0xff] }
  0x3c   :  { %v10514_v13 = vcombine.high %v383_v3, %v391_v5  ;;  %v10511_v15 = vcombine.low %v382_v1, %v390_v2  ;;  %v10513_v16 = vcombine.low %v383_v3, %v391_v5  ;;  %v503_v3 = vld [vmem:[%s16051_s1 + $0xec8] sm:$0xff]  ;;  %v10609_v5 = vcombine.low %v479_v55, %v487_v57  ;;  %v582_v46 = vld [vmem:[%s16051_s1 + $0x1140] sm:$0xff] }
  0x3e   :  { %7129 = vmatpush1.bf16.msra.mxu0 %v10383_v8  ;;  %7334 = vmatpush1.bf16.msra.mxu1 %v10385_v10  ;;  %v10512_v8 = vcombine.high %v382_v1, %v390_v2  ;;  %v398_v10 = vld [vmem:[%s16051_s1 + $0xb80] sm:$0xff]  ;;  %v495_v1 = vld [vmem:[%s16051_s1 + $0xe88] sm:$0xff]  ;;  %v10610_v2 = vcombine.high %v479_v55, %v487_v57 }
  0x3f   :  { %7130 = vmatprep.subr.bf16.mxu0 %v10400_v11  ;;  %7335 = vmatprep.subr.bf16.mxu1 %v10402_v12  ;;  %v406_v11 = vld [vmem:[%s16051_s1 + $0xbc0] sm:$0xff]  ;;  %v399_v12 = vld [vmem:[%s16051_s1 + $0xb88] sm:$0xff] }
  0x40   :  { %v10530_v21 = vcombine.high %v399_v12, %v407_v14  ;;  %v10527_v24 = vcombine.low %v398_v10, %v406_v11  ;;  %v10529_v25 = vcombine.low %v399_v12, %v407_v14  ;;  %v519_v12 = vld [vmem:[%s16051_s1 + $0xf48] sm:$0xff]  ;;  %v10625_v14 = vcombine.low %v495_v1, %v503_v3  ;;  %v590_v55 = vld [vmem:[%s16051_s1 + $0x1180] sm:$0xff] }
  0x41   :  { %v591_v57 = vld [vmem:[%s16051_s1 + $0x1188] sm:$0xff] }
  0x42   :  { %7131 = vmatpush1.bf16.msra.mxu0 %v10399_v17  ;;  %7336 = vmatpush1.bf16.msra.mxu1 %v10401_v18  ;;  %v10528_v17 = vcombine.high %v398_v10, %v406_v11  ;;  %v414_v18 = vld [vmem:[%s16051_s1 + $0xc00] sm:$0xff]  ;;  %v511_v10 = vld [vmem:[%s16051_s1 + $0xf08] sm:$0xff]  ;;  %v10626_v11 = vcombine.high %v495_v1, %v503_v3 }
  0x43   :  { %7141 = vmatprep.subr.bf16.mxu0 %v10416_v19  ;;  %7346 = vmatprep.subr.bf16.mxu1 %v10418_v20  ;;  %v422_v19 = vld [vmem:[%s16051_s1 + $0xc40] sm:$0xff]  ;;  %v415_v20 = vld [vmem:[%s16051_s1 + $0xc08] sm:$0xff] }
  0x44   :  { %v10546_v63 = vcombine.high %v415_v20, %v423_v22  ;;  %v10545_v32 = vcombine.low %v415_v20, %v423_v22  ;;  %v535_v20 = vld [vmem:[%s16051_s1 + $0xfc8] sm:$0xff]  ;;  %v606_v1 = vld [vmem:[%s16051_s1 + $0x1200] sm:$0xff] }
  0x45   :  { %7133 = vmatmul.mubr.bf16.vlgmr.msra.gmra.mrb[0].mxu0 %v12189_v23  ;;  %7338 = vmatmul.mubr.bf16.vlgmr.msra.gmra.mrb[0].mxu1 %v12189_v23  ;;  %v607_v3 = vld [vmem:[%s16051_s1 + $0x1208] sm:$0xff] }
  0x46   :  { %7142 = vmatpush1.bf16.msra.mxu0 %v10415_v26  ;;  %7347 = vmatpush1.bf16.msra.mxu1 %v10417_v27  ;;  %v10544_v26 = vcombine.high %v414_v18, %v422_v19  ;;  %v430_v27 = vld [vmem:[%s16051_s1 + $0xc80] sm:$0xff] }
  0x47   :  { %7143 = vmatprep.subr.bf16.mxu0 %v10432_v28  ;;  %7348 = vmatprep.subr.bf16.mxu1 %v10434_v31  ;;  %v438_v28 = vld [vmem:[%s16051_s1 + $0xcc0] sm:$0xff]  ;;  %v10543_v31 = vcombine.low %v414_v18, %v422_v19  ;;  %v527_v18 = vld [vmem:[%s16051_s1 + $0xf88] sm:$0xff]  ;;  %v10642_v19 = vcombine.high %v511_v10, %v519_v12 }
  0x48   :  { %7173 = vmatprep.mubr.bf16.mxu0 %v12211_v33  ;;  %7378 = vmatprep.mubr.bf16.mxu1 %v12211_v33 }
  0x4a   :  { %7144 = vmatpush1.bf16.msra.mxu0 %v10431_v34  ;;  %7349 = vmatpush1.bf16.msra.mxu1 %v10433_v35  ;;  %v10560_v34 = vcombine.high %v430_v27, %v438_v28  ;;  %v446_v35 = vld [vmem:[%s16051_s1 + $0xd00] sm:$0xff] }
  0x4b   :  { %7145 = vmatprep.subr.bf16.mxu0 %v10448_v36  ;;  %7350 = vmatprep.subr.bf16.mxu1 %v10450_v40  ;;  %v454_v36 = vld [vmem:[%s16051_s1 + $0xd40] sm:$0xff]  ;;  %v10559_v40 = vcombine.low %v430_v27, %v438_v28  ;;  %v543_v28 = vld [vmem:[%s16051_s1 + $0x1008] sm:$0xff] }
  0x4c   :  { %v550_v27 = vld [vmem:[%s16051_s1 + $0x1040] sm:$0xff]  ;;  %v10674_v37 = vcombine.high %v543_v28, %v551_v29 }
  0x4e   :  { %7146 = vmatpush1.bf16.msra.mxu0 %v10447_v42  ;;  %7351 = vmatpush1.bf16.msra.mxu1 %v10449_v44  ;;  %v10576_v42 = vcombine.high %v446_v35, %v454_v36  ;;  %v462_v44 = vld [vmem:[%s16051_s1 + $0xd80] sm:$0xff] }
  0x4f   :  { %7147 = vmatprep.subr.bf16.mxu0 %v10464_v45  ;;  %7352 = vmatprep.subr.bf16.mxu1 %v10466_v49  ;;  %v470_v45 = vld [vmem:[%s16051_s1 + $0xdc0] sm:$0xff]  ;;  %v10575_v49 = vcombine.low %v446_v35, %v454_v36  ;;  %v559_v36 = vld [vmem:[%s16051_s1 + $0x1088] sm:$0xff] }
  0x50   :  { %v566_v35 = vld [vmem:[%s16051_s1 + $0x10c0] sm:$0xff] }
  0x52   :  { %7148 = vmatpush1.bf16.msra.mxu0 %v10463_v51  ;;  %7353 = vmatpush1.bf16.msra.mxu1 %v10465_v52  ;;  %v10592_v51 = vcombine.high %v462_v44, %v470_v45  ;;  %v478_v52 = vld [vmem:[%s16051_s1 + $0xe00] sm:$0xff] }
  0x53   :  { %7149 = vmatprep.subr.bf16.mxu0 %v10480_v54  ;;  %7354 = vmatprep.subr.bf16.mxu1 %v10482_v58  ;;  %v486_v54 = vld [vmem:[%s16051_s1 + $0xe40] sm:$0xff]  ;;  %v10591_v58 = vcombine.low %v462_v44, %v470_v45 }
  0x54   :  { %v574_v45 = vld [vmem:[%s16051_s1 + $0x1100] sm:$0xff] }
  0x56   :  { %7150 = vmatpush1.bf16.msra.mxu0 %v10479_v61  ;;  %7355 = vmatpush1.bf16.msra.mxu1 %v10481_v62  ;;  %v10608_v61 = vcombine.high %v478_v52, %v486_v54  ;;  %v494_v62 = vld [vmem:[%s16051_s1 + $0xe80] sm:$0xff] }
  0x57   :  { %7151 = vmatprep.subr.bf16.mxu0 %v10496_v0  ;;  %7356 = vmatprep.subr.bf16.mxu1 %v10498_v4  ;;  %v502_v0 = vld [vmem:[%s16051_s1 + $0xec0] sm:$0xff]  ;;  %v10607_v4 = vcombine.low %v478_v52, %v486_v54  ;;  %v10704_v54 = vcombine.high %v574_v45, %v582_v46 }
  0x5a   :  { %7152 = vmatpush1.bf16.msra.mxu0 %v10495_v6  ;;  %7357 = vmatpush1.bf16.msra.mxu1 %v10497_v7  ;;  %v10624_v6 = vcombine.high %v494_v62, %v502_v0  ;;  %v510_v7 = vld [vmem:[%s16051_s1 + $0xf00] sm:$0xff] }
  0x5b   :  { %7153 = vmatprep.subr.bf16.mxu0 %v10512_v8  ;;  %7358 = vmatprep.subr.bf16.mxu1 %v10514_v13  ;;  %v518_v8 = vld [vmem:[%s16051_s1 + $0xf40] sm:$0xff]  ;;  %v10623_v13 = vcombine.low %v494_v62, %v502_v0 }
  0x5c   :  { %v10639_v22 = vcombine.low %v510_v7, %v518_v8 }
  0x5e   :  { %7154 = vmatpush1.bf16.msra.mxu0 %v10511_v15  ;;  %7359 = vmatpush1.bf16.msra.mxu1 %v10513_v16  ;;  %v10640_v15 = vcombine.high %v510_v7, %v518_v8  ;;  %v526_v16 = vld [vmem:[%s16051_s1 + $0xf80] sm:$0xff] }
  0x5f   :  { %7155 = vmatprep.subr.bf16.mxu0 %v10528_v17  ;;  %7360 = vmatprep.subr.bf16.mxu1 %v10530_v21  ;;  %v534_v17 = vld [vmem:[%s16051_s1 + $0xfc0] sm:$0xff]  ;;  %v1268_v21 = vcombine.high %v12048_v59, %v12048_v59  ;;  %v10658_v59 = vcombine.high %v527_v18, %v535_v20 }
  0x60   :  { %v10655_v30 = vcombine.low %v526_v16, %v534_v17 }
  0x62   :  { %7156 = vmatpush1.bf16.msra.mxu0 %v10527_v24  ;;  %7361 = vmatpush1.bf16.msra.mxu1 %v10529_v25  ;;  %v10641_v24 = vcombine.low %v511_v10, %v519_v12  ;;  %v10656_v25 = vcombine.high %v526_v16, %v534_v17  ;;  %v622_v10 = vld [vmem:[%s16051_s1 + $0x1280] sm:$0xff]  ;;  %v623_v12 = vld [vmem:[%s16051_s1 + $0x1288] sm:$0xff] }
  0x63   :  { %7157 = vmatprep.subr.bf16.mxu0 %v10544_v26  ;;  %7362 = vmatprep.subr.bf16.mxu1 %v10546_v63  ;;  %v542_v26 = vld [vmem:[%s16051_s1 + $0x1000] sm:$0xff]  ;;  %v12388_v63 = vrot.slane %v1268_v21, %v12037_v53 }
  0x65   :  { %v1284_v39 = vcombine.high %v12388_v63, %v12388_v63 }
  0x66   :  { %7158 = vmatpush1.bf16.msra.mxu0 %v10543_v31  ;;  %7363 = vmatpush1.bf16.msra.mxu1 %v10545_v32  ;;  %v10657_v31 = vcombine.low %v527_v18, %v535_v20  ;;  %v10672_v32 = vcombine.high %v542_v26, %v550_v27  ;;  %v638_v18 = vld [vmem:[%s16051_s1 + $0x1300] sm:$0xff]  ;;  %v639_v20 = vld [vmem:[%s16051_s1 + $0x1308] sm:$0xff] }
  0x67   :  { %7159 = vmatprep.subr.bf16.mxu0 %v10560_v34  ;;  %7364 = vmatprep.subr.bf16.mxu1 %v10562_v38  ;;  %v558_v34 = vld [vmem:[%s16051_s1 + $0x1080] sm:$0xff]  ;;  %v567_v38 = vld [vmem:[%s16051_s1 + $0x10c8] sm:$0xff] }
  0x68   :  { %v10688_v44 = vcombine.high %v558_v34, %v566_v35  ;;  %v10690_v48 = vcombine.high %v559_v36, %v567_v38  ;;  %v10689_v52 = vcombine.low %v559_v36, %v567_v38  ;;  %v678_v36 = vld [vmem:[%s16051_s1 + $0x1440] sm:$0xff] }
  0x6a   :  { %7160 = vmatpush1.bf16.msra.mxu0 %v10559_v40  ;;  %7365 = vmatpush1.bf16.msra.mxu1 %v10561_v41  ;;  %v12406_v40 = vcombine.high %v12189_v23, %v12189_v23  ;;  %v10671_v41 = vcombine.low %v542_v26, %v550_v27  ;;  %v654_v27 = vld [vmem:[%s16051_s1 + $0x1380] sm:$0xff] }
  0x6b   :  { %7161 = vmatprep.subr.bf16.mxu0 %v10576_v42  ;;  %7366 = vmatprep.subr.bf16.mxu1 %v10578_v47  ;;  %v10673_v42 = vcombine.low %v543_v28, %v551_v29  ;;  %v575_v47 = vld [vmem:[%s16051_s1 + $0x1108] sm:$0xff]  ;;  %v662_v28 = vld [vmem:[%s16051_s1 + $0x13c0] sm:$0xff] }
  0x6e   :  { %7162 = vmatpush1.bf16.msra.mxu0 %v10575_v49  ;;  %7367 = vmatpush1.bf16.msra.mxu1 %v10577_v50  ;;  %v583_v49 = vld [vmem:[%s16051_s1 + $0x1148] sm:$0xff]  ;;  %v12421_v50 = vrot.slane %v1284_v39, %v12037_v53 }
  0x6f   :  { %7163 = vmatprep.subr.bf16.mxu0 %v10592_v51  ;;  %7368 = vmatprep.subr.bf16.mxu1 %v10594_v56  ;;  %v10687_v51 = vcombine.low %v558_v34, %v566_v35  ;;  %v598_v56 = vld [vmem:[%s16051_s1 + $0x11c0] sm:$0xff]  ;;  %v10705_v62 = vcombine.low %v575_v47, %v583_v49  ;;  %v10784_v34 = vcombine.high %v654_v27, %v662_v28  ;;  %v679_v39 = vld [vmem:[%s16051_s1 + $0x1448] sm:$0xff] }
  0x70   :  { %v10720_v0 = vcombine.high %v590_v55, %v598_v56  ;;  %v670_v35 = vld [vmem:[%s16051_s1 + $0x1400] sm:$0xff] }
  0x72   :  { %7164 = vmatpush1.bf16.msra.mxu0 %v10591_v58  ;;  %7369 = vmatpush1.bf16.msra.mxu1 %v10593_v60  ;;  %v10706_v58 = vcombine.high %v575_v47, %v583_v49  ;;  %v599_v60 = vld [vmem:[%s16051_s1 + $0x11c8] sm:$0xff] }
  0x73   :  { %7165 = vmatprep.subr.bf16.mxu0 %v10608_v61  ;;  %7370 = vmatprep.subr.bf16.mxu1 %v10610_v2  ;;  %v10703_v61 = vcombine.low %v574_v45, %v582_v46  ;;  %v614_v2 = vld [vmem:[%s16051_s1 + $0x1240] sm:$0xff]  ;;  %v10721_v7 = vcombine.low %v591_v57, %v599_v60  ;;  %v687_v47 = vld [vmem:[%s16051_s1 + $0x1488] sm:$0xff] }
  0x74   :  { %v10736_v8 = vcombine.high %v606_v1, %v614_v2  ;;  %v686_v45 = vld [vmem:[%s16051_s1 + $0x1480] sm:$0xff]  ;;  %v695_v49 = vld [vmem:[%s16051_s1 + $0x14c8] sm:$0xff] }
  0x75   :  { %v694_v46 = vld [vmem:[%s16051_s1 + $0x14c0] sm:$0xff] }
  0x76   :  { %7166 = vmatpush1.bf16.msra.mxu0 %v10607_v4  ;;  %7371 = vmatpush1.bf16.msra.mxu1 %v10609_v5  ;;  %v10722_v4 = vcombine.high %v591_v57, %v599_v60  ;;  %v615_v5 = vld [vmem:[%s16051_s1 + $0x1248] sm:$0xff]  ;;  %v710_v57 = vld [vmem:[%s16051_s1 + $0x1540] sm:$0xff] }
  0x77   :  { %7167 = vmatprep.subr.bf16.mxu0 %v10624_v6  ;;  %7372 = vmatprep.subr.bf16.mxu1 %v10626_v11  ;;  %v10719_v6 = vcombine.low %v590_v55, %v598_v56  ;;  %v630_v11 = vld [vmem:[%s16051_s1 + $0x12c0] sm:$0xff]  ;;  %v10737_v16 = vcombine.low %v607_v3, %v615_v5  ;;  %v10818_v56 = vcombine.high %v687_v47, %v695_v49  ;;  %v711_v60 = vld [vmem:[%s16051_s1 + $0x1548] sm:$0xff] }
  0x78   :  { %v10752_v17 = vcombine.high %v622_v10, %v630_v11  ;;  %v702_v55 = vld [vmem:[%s16051_s1 + $0x1500] sm:$0xff] }
  0x7a   :  { %7168 = vmatpush1.bf16.msra.mxu0 %v10623_v13  ;;  %7373 = vmatpush1.bf16.msra.mxu1 %v10625_v14  ;;  %v10738_v13 = vcombine.high %v607_v3, %v615_v5  ;;  %v631_v14 = vld [vmem:[%s16051_s1 + $0x12c8] sm:$0xff] }
  0x7b   :  { %7169 = vmatprep.subr.bf16.mxu0 %v10640_v15  ;;  %7374 = vmatprep.subr.bf16.mxu1 %v10642_v19  ;;  %v10735_v15 = vcombine.low %v606_v1, %v614_v2  ;;  %v646_v19 = vld [vmem:[%s16051_s1 + $0x1340] sm:$0xff]  ;;  %v10754_v21 = vcombine.high %v623_v12, %v631_v14  ;;  %v719_v3 = vld [vmem:[%s16051_s1 + $0x1588] sm:$0xff] }
  0x7c   :  { %v10768_v26 = vcombine.high %v638_v18, %v646_v19  ;;  %v718_v1 = vld [vmem:[%s16051_s1 + $0x1580] sm:$0xff]  ;;  %v727_v5 = vld [vmem:[%s16051_s1 + $0x15c8] sm:$0xff] }
  0x7d   :  { %v726_v2 = vld [vmem:[%s16051_s1 + $0x15c0] sm:$0xff] }
  0x7e   :  { %7170 = vmatpush1.bf16.msra.mxu0 %v10639_v22  ;;  %7375 = vmatpush1.bf16.msra.mxu1 %v10641_v24  ;;  %v647_v22 = vld [vmem:[%s16051_s1 + $0x1348] sm:$0xff]  ;;  %v10751_v24 = vcombine.low %v622_v10, %v630_v11  ;;  %v734_v10 = vld [vmem:[%s16051_s1 + $0x1600] sm:$0xff] }
  0x7f   :  { %7171 = vmatprep.subr.bf16.mxu0 %v10656_v25  ;;  %7376 = vmatprep.subr.bf16.mxu1 %v10658_v59  ;;  %v10753_v25 = vcombine.low %v623_v12, %v631_v14  ;;  %v655_v59 = vld [vmem:[%s16051_s1 + $0x1388] sm:$0xff]  ;;  %v10770_v29 = vcombine.high %v639_v20, %v647_v22  ;;  %v742_v11 = vld [vmem:[%s16051_s1 + $0x1640] sm:$0xff] }
  0x80   :  { %v735_v12 = vld [vmem:[%s16051_s1 + $0x1608] sm:$0xff] }
  0x81   :  { %v743_v14 = vld [vmem:[%s16051_s1 + $0x1648] sm:$0xff] }
  0x82   :  { %7172 = vmatpush1.bf16.msra.mxu0 %v10655_v30  ;;  %7377 = vmatpush1.bf16.msra.mxu1 %v10657_v31  ;;  %v663_v30 = vld [vmem:[%s16051_s1 + $0x13c8] sm:$0xff]  ;;  %v10767_v31 = vcombine.low %v638_v18, %v646_v19  ;;  %v750_v18 = vld [vmem:[%s16051_s1 + $0x1680] sm:$0xff] }
  0x83   :  { %7182 = vmatprep.subr.bf16.mxu0 %v10672_v32  ;;  %7387 = vmatprep.subr.bf16.mxu1 %v10674_v37  ;;  %v10769_v32 = vcombine.low %v639_v20, %v647_v22  ;;  %v671_v37 = vld [vmem:[%s16051_s1 + $0x1408] sm:$0xff]  ;;  %v10786_v38 = vcombine.high %v655_v59, %v663_v30  ;;  %v758_v19 = vld [vmem:[%s16051_s1 + $0x16c0] sm:$0xff] }
  0x84   :  { %v751_v20 = vld [vmem:[%s16051_s1 + $0x1688] sm:$0xff] }
  0x85   :  { %7174 = vmatmul.mubr.bf16.vlgmr.msra.gmra.mrb[0].mxu0 %v12406_v40  ;;  %7379 = vmatmul.mubr.bf16.vlgmr.msra.gmra.mrb[0].mxu1 %v12406_v40  ;;  %v759_v22 = vld [vmem:[%s16051_s1 + $0x16c8] sm:$0xff] }
  0x86   :  { %7183 = vmatpush1.bf16.msra.mxu0 %v10671_v41  ;;  %7388 = vmatpush1.bf16.msra.mxu1 %v10673_v42  ;;  %v10783_v41 = vcombine.low %v654_v27, %v662_v28  ;;  %v10785_v42 = vcombine.low %v655_v59, %v663_v30  ;;  %v766_v27 = vld [vmem:[%s16051_s1 + $0x1700] sm:$0xff]  ;;  %v767_v59 = vld [vmem:[%s16051_s1 + $0x1708] sm:$0xff] }
  0x87   :  { %7184 = vmatprep.subr.bf16.mxu0 %v10688_v44  ;;  %7389 = vmatprep.subr.bf16.mxu1 %v10690_v48  ;;  %v10800_v44 = vcombine.high %v670_v35, %v678_v36  ;;  %v10802_v48 = vcombine.high %v671_v37, %v679_v39  ;;  %v774_v28 = vld [vmem:[%s16051_s1 + $0x1740] sm:$0xff]  ;;  %v775_v30 = vld [vmem:[%s16051_s1 + $0x1748] sm:$0xff] }
  0x88   :  { %7214 = vmatprep.mubr.bf16.mxu0 %v12421_v50  ;;  %7419 = vmatprep.mubr.bf16.mxu1 %v12421_v50 }
  0x8a   :  { %7185 = vmatpush1.bf16.msra.mxu0 %v10687_v51  ;;  %7390 = vmatpush1.bf16.msra.mxu1 %v10689_v52  ;;  %v10799_v51 = vcombine.low %v670_v35, %v678_v36  ;;  %v10801_v52 = vcombine.low %v671_v37, %v679_v39  ;;  %v782_v35 = vld [vmem:[%s16051_s1 + $0x1780] sm:$0xff]  ;;  %v783_v37 = vld [vmem:[%s16051_s1 + $0x1788] sm:$0xff] }
  0x8b   :  { %7186 = vmatprep.subr.bf16.mxu0 %v10704_v54  ;;  %7391 = vmatprep.subr.bf16.mxu1 %v10706_v58  ;;  %v10816_v54 = vcombine.high %v686_v45, %v694_v46  ;;  %v703_v58 = vld [vmem:[%s16051_s1 + $0x1508] sm:$0xff]  ;;  %v790_v36 = vld [vmem:[%s16051_s1 + $0x17c0] sm:$0xff] }
  0x8c   :  { %v791_v39 = vld [vmem:[%s16051_s1 + $0x17c8] sm:$0xff] }
  0x8e   :  { %7187 = vmatpush1.bf16.msra.mxu0 %v10703_v61  ;;  %7392 = vmatpush1.bf16.msra.mxu1 %v10705_v62  ;;  %v10815_v61 = vcombine.low %v686_v45, %v694_v46  ;;  %v10817_v62 = vcombine.low %v687_v47, %v695_v49  ;;  %v798_v45 = vld [vmem:[%s16051_s1 + $0x1800] sm:$0xff]  ;;  %v799_v47 = vld [vmem:[%s16051_s1 + $0x1808] sm:$0xff] }
  0x8f   :  { %7188 = vmatprep.subr.bf16.mxu0 %v10720_v0  ;;  %7393 = vmatprep.subr.bf16.mxu1 %v10722_v4  ;;  %v10832_v0 = vcombine.high %v702_v55, %v710_v57  ;;  %v10834_v4 = vcombine.high %v703_v58, %v711_v60  ;;  %v806_v46 = vld [vmem:[%s16051_s1 + $0x1840] sm:$0xff]  ;;  %v807_v49 = vld [vmem:[%s16051_s1 + $0x1848] sm:$0xff] }
  0x92   :  { %7189 = vmatpush1.bf16.msra.mxu0 %v10719_v6  ;;  %7394 = vmatpush1.bf16.msra.mxu1 %v10721_v7  ;;  %v10831_v6 = vcombine.low %v702_v55, %v710_v57  ;;  %v10833_v7 = vcombine.low %v703_v58, %v711_v60  ;;  %v814_v55 = vld [vmem:[%s16051_s1 + $0x1880] sm:$0xff]  ;;  %v815_v57 = vld [vmem:[%s16051_s1 + $0x1888] sm:$0xff]  ;;  %v10930_v58 = vcombine.high %v799_v47, %v807_v49 }
  0x93   :  { %7190 = vmatprep.subr.bf16.mxu0 %v10736_v8  ;;  %7395 = vmatprep.subr.bf16.mxu1 %v10738_v13  ;;  %v10848_v8 = vcombine.high %v718_v1, %v726_v2  ;;  %v10850_v13 = vcombine.high %v719_v3, %v727_v5  ;;  %v823_v60 = vld [vmem:[%s16051_s1 + $0x18c8] sm:$0xff] }
  0x96   :  { %7191 = vmatpush1.bf16.msra.mxu0 %v10735_v15  ;;  %7396 = vmatpush1.bf16.msra.mxu1 %v10737_v16  ;;  %v10847_v15 = vcombine.low %v718_v1, %v726_v2  ;;  %v10849_v16 = vcombine.low %v719_v3, %v727_v5  ;;  %v10946_v2 = vcombine.high %v815_v57, %v823_v60  ;;  %v830_v3 = vld [vmem:[%s16051_s1 + $0x1900] sm:$0xff] }
  0x97   :  { %7192 = vmatprep.subr.bf16.mxu0 %v10752_v17  ;;  %7397 = vmatprep.subr.bf16.mxu1 %v10754_v21  ;;  %v10864_v17 = vcombine.high %v734_v10, %v742_v11  ;;  %v10866_v21 = vcombine.high %v735_v12, %v743_v14 }
  0x9a   :  { %7193 = vmatpush1.bf16.msra.mxu0 %v10751_v24  ;;  %7398 = vmatpush1.bf16.msra.mxu1 %v10753_v25  ;;  %v10863_v24 = vcombine.low %v734_v10, %v742_v11  ;;  %v10865_v25 = vcombine.low %v735_v12, %v743_v14 }
  0x9b   :  { %7194 = vmatprep.subr.bf16.mxu0 %v10768_v26  ;;  %7399 = vmatprep.subr.bf16.mxu1 %v10770_v29  ;;  %v10880_v26 = vcombine.high %v750_v18, %v758_v19  ;;  %v10882_v29 = vcombine.high %v751_v20, %v759_v22 }
  0x9e   :  { %7195 = vmatpush1.bf16.msra.mxu0 %v10767_v31  ;;  %7400 = vmatpush1.bf16.msra.mxu1 %v10769_v32  ;;  %v10879_v31 = vcombine.low %v750_v18, %v758_v19  ;;  %v10881_v32 = vcombine.low %v751_v20, %v759_v22 }
  0x9f   :  { %7196 = vmatprep.subr.bf16.mxu0 %v10784_v34  ;;  %7401 = vmatprep.subr.bf16.mxu1 %v10786_v38  ;;  %v10896_v34 = vcombine.high %v766_v27, %v774_v28  ;;  %v10898_v38 = vcombine.high %v767_v59, %v775_v30 }
  0xa2   :  { %7197 = vmatpush1.bf16.msra.mxu0 %v10783_v41  ;;  %7402 = vmatpush1.bf16.msra.mxu1 %v10785_v42  ;;  %v10895_v41 = vcombine.low %v766_v27, %v774_v28  ;;  %v10897_v42 = vcombine.low %v767_v59, %v775_v30 }
  0xa3   :  { %7198 = vmatprep.subr.bf16.mxu0 %v10800_v44  ;;  %7403 = vmatprep.subr.bf16.mxu1 %v10802_v48  ;;  %v10912_v44 = vcombine.high %v782_v35, %v790_v36  ;;  %v10914_v48 = vcombine.high %v783_v37, %v791_v39 }
  0xa6   :  { %7199 = vmatpush1.bf16.msra.mxu0 %v10799_v51  ;;  %7404 = vmatpush1.bf16.msra.mxu1 %v10801_v52  ;;  %v10911_v51 = vcombine.low %v782_v35, %v790_v36  ;;  %v10913_v52 = vcombine.low %v783_v37, %v791_v39 }
  0xa7   :  { %7200 = vmatprep.subr.bf16.mxu0 %v10816_v54  ;;  %7405 = vmatprep.subr.bf16.mxu1 %v10818_v56  ;;  %v10928_v54 = vcombine.high %v798_v45, %v806_v46  ;;  %v822_v56 = vld [vmem:[%s16051_s1 + $0x18c0] sm:$0xff] }
  0xa8   :  { %v10944_v1 = vcombine.high %v814_v55, %v822_v56 }
  0xaa   :  { %7201 = vmatpush1.bf16.msra.mxu0 %v10815_v61  ;;  %7406 = vmatpush1.bf16.msra.mxu1 %v10817_v62  ;;  %v12609_v61 = vrot.slane %v12388_v63, %v12037_v53  ;;  %v10927_v62 = vcombine.low %v798_v45, %v806_v46  ;;  %v12619_v63 = vcombine.high %v12421_v50, %v12421_v50 }
  0xab   :  { %7202 = vmatprep.subr.bf16.mxu0 %v10832_v0  ;;  %7407 = vmatprep.subr.bf16.mxu1 %v10834_v4  ;;  %v10929_v0 = vcombine.low %v799_v47, %v807_v49  ;;  %v838_v4 = vld [vmem:[%s16051_s1 + $0x1940] sm:$0xff] }
  0xae   :  { %7203 = vmatpush1.bf16.msra.mxu0 %v10831_v6  ;;  %7408 = vmatpush1.bf16.msra.mxu1 %v10833_v7 }
  0xaf   :  { %7204 = vmatprep.subr.bf16.mxu0 %v10848_v8  ;;  %7409 = vmatprep.subr.bf16.mxu1 %v10850_v13 }
  0xb2   :  { %7205 = vmatpush1.bf16.msra.mxu0 %v10847_v15  ;;  %7410 = vmatpush1.bf16.msra.mxu1 %v10849_v16 }
  0xb3   :  { %7206 = vmatprep.subr.bf16.mxu0 %v10864_v17  ;;  %7411 = vmatprep.subr.bf16.mxu1 %v10866_v21 }
  0xb6   :  { %7207 = vmatpush1.bf16.msra.mxu0 %v10863_v24  ;;  %7412 = vmatpush1.bf16.msra.mxu1 %v10865_v25 }
  0xb7   :  { %7208 = vmatprep.subr.bf16.mxu0 %v10880_v26  ;;  %7413 = vmatprep.subr.bf16.mxu1 %v10882_v29 }
  0xba   :  { %7209 = vmatpush1.bf16.msra.mxu0 %v10879_v31  ;;  %7414 = vmatpush1.bf16.msra.mxu1 %v10881_v32 }
  0xbb   :  { %7210 = vmatprep.subr.bf16.mxu0 %v10896_v34  ;;  %7415 = vmatprep.subr.bf16.mxu1 %v10898_v38 }
  0xbe   :  { %7211 = vmatpush1.bf16.msra.mxu0 %v10895_v41  ;;  %7416 = vmatpush1.bf16.msra.mxu1 %v10897_v42 }
  0xbf   :  { %7212 = vmatprep.subr.bf16.mxu0 %v10912_v44  ;;  %7417 = vmatprep.subr.bf16.mxu1 %v10914_v48 }
  0xc2   :  { %7213 = vmatpush1.bf16.msra.mxu0 %v10911_v51  ;;  %7418 = vmatpush1.bf16.msra.mxu1 %v10913_v52 }
  0xc3   :  { %7223 = vmatprep.subr.bf16.mxu0 %v10928_v54  ;;  %7428 = vmatprep.subr.bf16.mxu1 %v10930_v58 }
  0xc4   :  { %10 = vsyncpa [#allocation4], 0  ;;  %v831_v5 = vld [vmem:[%s16051_s1 + $0x1908] sm:$0xff]  ;;  %v10943_v7 = vcombine.low %v814_v55, %v822_v56  ;;  %v10945_v8 = vcombine.low %v815_v57, %v823_v60  ;;  %v10960_v10 = vcombine.high %v830_v3, %v838_v4  ;;  %v846_v12 = vld [vmem:[%s16051_s1 + $0x1980] sm:$0xff]  ;;  %v10959_v16 = vcombine.low %v830_v3, %v838_v4  ;;  %s11925_s27 = smov [#allocation3]  }
  0xc5   :  { %7215 = vmatmul.mubr.bf16.vlgmr.msra.gmra.mrb[0].mxu0 %v12609_v61  ;;  %v839_v6 = vld [vmem:[%s16051_s1 + $0x1948] sm:$0xff]  ;;  %7420 = vmatmul.mubr.bf16.vlgmr.msra.gmra.mrb[0].mxu1 %v12609_v61  ;;  %v854_v13 = vld [vmem:[%s16051_s1 + $0x19c0] sm:$0xff]  ;;  %vm26_vm0 = vcmask 74752   ;;  %s10150_s28 = sshll.u32 %s11925_s27, 4  ;;  %s10151_s28 = int_to_ptr.vmem [resolvable:$true] %s10150_s28 }
  0xc6   :  { %7224 = vmatpush1.bf16.msra.mxu0 %v10927_v62  ;;  %7429 = vmatpush1.bf16.msra.mxu1 %v10929_v0  ;;  %v10962_v11 = vcombine.high %v831_v5, %v839_v6  ;;  %v847_v14 = vld [vmem:[%s16051_s1 + $0x1988] sm:$0xff]  ;;  %v10961_v17 = vcombine.low %v831_v5, %v839_v6  ;;  %v10976_v18 = vcombine.high %v846_v12, %v854_v13  ;;  %v862_v20 = vld [vmem:[%s16051_s1 + $0x1a00] sm:$0xff]  ;;  %p11903_p1 = scmp.lt.s32.totalorder %s10151_s28, %s10151_s28 }
  0xc7   :  { %7225 = vmatprep.subr.bf16.mxu0 %v10944_v1  ;;  %7430 = vmatprep.subr.bf16.mxu1 %v10946_v2  ;;  %v855_v15 = vld [vmem:[%s16051_s1 + $0x19c8] sm:$0xff]  ;;  %v870_v21 = vld [vmem:[%s16051_s1 + $0x1a40] sm:$0xff]  ;;  %v10975_v25 = vcombine.low %v846_v12, %v854_v13 }
  0xc8   :  { %7255 = vmatprep.mubr.bf16.mxu0 %v12619_v63  ;;  %7460 = vmatprep.mubr.bf16.mxu1 %v12619_v63  ;;  %v10978_v19 = vcombine.high %v847_v14, %v855_v15  ;;  %v863_v22 = vld [vmem:[%s16051_s1 + $0x1a08] sm:$0xff]  ;;  %v10977_v26 = vcombine.low %v847_v14, %v855_v15  ;;  %v10992_v27 = vcombine.high %v862_v20, %v870_v21  ;;  %v878_v59 = vld [vmem:[%s16051_s1 + $0x1a80] sm:$0xff] }
  0xc9   :  { %v871_v24 = vld [vmem:[%s16051_s1 + $0x1a48] sm:$0xff]  ;;  %v886_v29 = vld [vmem:[%s16051_s1 + $0x1ac0] sm:$0xff]  ;;  %v10991_v32 = vcombine.low %v862_v20, %v870_v21 }
  0xca   :  { %7226 = vmatpush1.bf16.msra.mxu0 %v10943_v7  ;;  %7431 = vmatpush1.bf16.msra.mxu1 %v10945_v8  ;;  %v10994_v28 = vcombine.high %v863_v22, %v871_v24  ;;  %v879_v30 = vld [vmem:[%s16051_s1 + $0x1a88] sm:$0xff]  ;;  %v10993_v34 = vcombine.low %v863_v22, %v871_v24  ;;  %v11008_v35 = vcombine.high %v878_v59, %v886_v29  ;;  %v894_v37 = vld [vmem:[%s16051_s1 + $0x1b00] sm:$0xff] }
  0xcb   :  { %7227 = vmatprep.subr.bf16.mxu0 %v10960_v10  ;;  %7432 = vmatprep.subr.bf16.mxu1 %v10962_v11  ;;  %v887_v31 = vld [vmem:[%s16051_s1 + $0x1ac8] sm:$0xff]  ;;  %v902_v38 = vld [vmem:[%s16051_s1 + $0x1b40] sm:$0xff]  ;;  %v11007_v42 = vcombine.low %v878_v59, %v886_v29 }
  0xcc   :  { %v11010_v36 = vcombine.high %v879_v30, %v887_v31  ;;  %v895_v39 = vld [vmem:[%s16051_s1 + $0x1b08] sm:$0xff]  ;;  %v11009_v44 = vcombine.low %v879_v30, %v887_v31  ;;  %v11024_v45 = vcombine.high %v894_v37, %v902_v38  ;;  %v910_v47 = vld [vmem:[%s16051_s1 + $0x1b80] sm:$0xff]  ;;  %v11023_v52 = vcombine.low %v894_v37, %v902_v38 }
  0xcd   :  { %v903_v41 = vld [vmem:[%s16051_s1 + $0x1b48] sm:$0xff]  ;;  %v918_v48 = vld [vmem:[%s16051_s1 + $0x1bc0] sm:$0xff] }
  0xce   :  { %7228 = vmatpush1.bf16.msra.mxu0 %v10959_v16  ;;  %7433 = vmatpush1.bf16.msra.mxu1 %v10961_v17  ;;  %v11026_v46 = vcombine.high %v895_v39, %v903_v41  ;;  %v911_v49 = vld [vmem:[%s16051_s1 + $0x1b88] sm:$0xff]  ;;  %v11025_v54 = vcombine.low %v895_v39, %v903_v41  ;;  %v11040_v55 = vcombine.high %v910_v47, %v918_v48  ;;  %v926_v57 = vld [vmem:[%s16051_s1 + $0x1c00] sm:$0xff] }
  0xcf   :  { %7229 = vmatprep.subr.bf16.mxu0 %v10976_v18  ;;  %7434 = vmatprep.subr.bf16.mxu1 %v10978_v19  ;;  %v919_v51 = vld [vmem:[%s16051_s1 + $0x1bc8] sm:$0xff]  ;;  %v934_v58 = vld [vmem:[%s16051_s1 + $0x1c40] sm:$0xff]  ;;  %v11039_v0 = vcombine.low %v910_v47, %v918_v48 }
  0xd0   :  { %v11042_v56 = vcombine.high %v911_v49, %v919_v51  ;;  %v927_v60 = vld [vmem:[%s16051_s1 + $0x1c08] sm:$0xff]  ;;  %v11041_v1 = vcombine.low %v911_v49, %v919_v51  ;;  %v11056_v2 = vcombine.high %v926_v57, %v934_v58  ;;  %v942_v4 = vld [vmem:[%s16051_s1 + $0x1c80] sm:$0xff]  ;;  %v11055_v8 = vcombine.low %v926_v57, %v934_v58 }
  0xd1   :  { %v935_v62 = vld [vmem:[%s16051_s1 + $0x1c48] sm:$0xff]  ;;  %v950_v5 = vld [vmem:[%s16051_s1 + $0x1cc0] sm:$0xff] }
  0xd2   :  { %7230 = vmatpush1.bf16.msra.mxu0 %v10975_v25  ;;  %7435 = vmatpush1.bf16.msra.mxu1 %v10977_v26  ;;  %v11058_v3 = vcombine.high %v927_v60, %v935_v62  ;;  %v943_v6 = vld [vmem:[%s16051_s1 + $0x1c88] sm:$0xff]  ;;  %v11057_v10 = vcombine.low %v927_v60, %v935_v62  ;;  %v11072_v11 = vcombine.high %v942_v4, %v950_v5  ;;  %v958_v13 = vld [vmem:[%s16051_s1 + $0x1d00] sm:$0xff] }
  0xd3   :  { %7231 = vmatprep.subr.bf16.mxu0 %v10992_v27  ;;  %7436 = vmatprep.subr.bf16.mxu1 %v10994_v28  ;;  %v951_v7 = vld [vmem:[%s16051_s1 + $0x1cc8] sm:$0xff]  ;;  %v966_v14 = vld [vmem:[%s16051_s1 + $0x1d40] sm:$0xff]  ;;  %v11071_v17 = vcombine.low %v942_v4, %v950_v5 }
  0xd4   :  { %v11074_v12 = vcombine.high %v943_v6, %v951_v7  ;;  %v959_v15 = vld [vmem:[%s16051_s1 + $0x1d08] sm:$0xff]  ;;  %v11073_v18 = vcombine.low %v943_v6, %v951_v7  ;;  %v11088_v19 = vcombine.high %v958_v13, %v966_v14  ;;  %v974_v21 = vld [vmem:[%s16051_s1 + $0x1d80] sm:$0xff]  ;;  %v11087_v26 = vcombine.low %v958_v13, %v966_v14 }
  0xd5   :  { %v967_v16 = vld [vmem:[%s16051_s1 + $0x1d48] sm:$0xff]  ;;  %v982_v22 = vld [vmem:[%s16051_s1 + $0x1dc0] sm:$0xff] }
  0xd6   :  { %7232 = vmatpush1.bf16.msra.mxu0 %v10991_v32  ;;  %7437 = vmatpush1.bf16.msra.mxu1 %v10993_v34  ;;  %v11090_v20 = vcombine.high %v959_v15, %v967_v16  ;;  %v975_v24 = vld [vmem:[%s16051_s1 + $0x1d88] sm:$0xff]  ;;  %v11089_v27 = vcombine.low %v959_v15, %v967_v16  ;;  %v11104_v28 = vcombine.high %v974_v21, %v982_v22  ;;  %v990_v29 = vld [vmem:[%s16051_s1 + $0x1e00] sm:$0xff] }
  0xd7   :  { %7233 = vmatprep.subr.bf16.mxu0 %v11008_v35  ;;  %7438 = vmatprep.subr.bf16.mxu1 %v11010_v36  ;;  %v983_v25 = vld [vmem:[%s16051_s1 + $0x1dc8] sm:$0xff]  ;;  %v998_v30 = vld [vmem:[%s16051_s1 + $0x1e40] sm:$0xff]  ;;  %v11103_v34 = vcombine.low %v974_v21, %v982_v22  ;;  %v12807_v16 = vcombine.high %v12609_v61, %v12609_v61 }
  0xd8   :  { %v11106_v59 = vcombine.high %v975_v24, %v983_v25  ;;  %v991_v31 = vld [vmem:[%s16051_s1 + $0x1e08] sm:$0xff]  ;;  %v11105_v35 = vcombine.low %v975_v24, %v983_v25  ;;  %v11120_v36 = vcombine.high %v990_v29, %v998_v30  ;;  %v1006_v38 = vld [vmem:[%s16051_s1 + $0x1e80] sm:$0xff] }
  0xd9   :  { %v999_v32 = vld [vmem:[%s16051_s1 + $0x1e48] sm:$0xff]  ;;  %v1014_v39 = vld [vmem:[%s16051_s1 + $0x1ec0] sm:$0xff] }
  0xda   :  { %7234 = vmatpush1.bf16.msra.mxu0 %v11007_v42  ;;  %7439 = vmatpush1.bf16.msra.mxu1 %v11009_v44  ;;  %v11122_v37 = vcombine.high %v991_v31, %v999_v32  ;;  %v1007_v41 = vld [vmem:[%s16051_s1 + $0x1e88] sm:$0xff]  ;;  %v11119_v44 = vcombine.low %v990_v29, %v998_v30  ;;  %v1022_v48 = vld [vmem:[%s16051_s1 + $0x1f00] sm:$0xff] }
  0xdb   :  { %7235 = vmatprep.subr.bf16.mxu0 %v11024_v45  ;;  %7440 = vmatprep.subr.bf16.mxu1 %v11026_v46  ;;  %v1015_v42 = vld [vmem:[%s16051_s1 + $0x1ec8] sm:$0xff]  ;;  %v11121_v45 = vcombine.low %v991_v31, %v999_v32  ;;  %v11136_v46 = vcombine.high %v1006_v38, %v1014_v39  ;;  %v1030_v49 = vld [vmem:[%s16051_s1 + $0x1f40] sm:$0xff] }
  0xdc   :  { %v11138_v47 = vcombine.high %v1007_v41, %v1015_v42  ;;  %v1023_v51 = vld [vmem:[%s16051_s1 + $0x1f08] sm:$0xff]  ;;  %v1038_v58 = vld [vmem:[%s16051_s1 + $0x1f80] sm:$0xff] }
  0xdd   :  { %v1046_v60 = vld [vmem:[%s16051_s1 + $0x1fc0] sm:$0xff]  ;;  %v1039_v62 = vld [vmem:[%s16051_s1 + $0x1f88] sm:$0xff] }
  0xde   :  { %7236 = vmatpush1.bf16.msra.mxu0 %v11023_v52  ;;  %7441 = vmatpush1.bf16.msra.mxu1 %v11025_v54  ;;  %v1031_v52 = vld [vmem:[%s16051_s1 + $0x1f48] sm:$0xff]  ;;  %v11135_v54 = vcombine.low %v1006_v38, %v1014_v39  ;;  %v1054_v5 = vld [vmem:[%s16051_s1 + $0x2000] sm:$0xff] }
  0xdf   :  { %7237 = vmatprep.subr.bf16.mxu0 %v11040_v55  ;;  %7442 = vmatprep.subr.bf16.mxu1 %v11042_v56  ;;  %v11137_v55 = vcombine.low %v1007_v41, %v1015_v42  ;;  %v11152_v56 = vcombine.high %v1022_v48, %v1030_v49  ;;  %v11154_v57 = vcombine.high %v1023_v51, %v1031_v52  ;;  %v1062_v6 = vld [vmem:[%s16051_s1 + $0x2040] sm:$0xff]  ;;  %v1055_v7 = vld [vmem:[%s16051_s1 + $0x2008] sm:$0xff] }
  0xe0   :  { %v1070_v14 = vld [vmem:[%s16051_s1 + $0x2080] sm:$0xff] }
  0xe1   :  { %v1078_v15 = vld [vmem:[%s16051_s1 + $0x20c0] sm:$0xff] }
  0xe2   :  { %7238 = vmatpush1.bf16.msra.mxu0 %v11039_v0  ;;  %7443 = vmatpush1.bf16.msra.mxu1 %v11041_v1  ;;  %v1047_v0 = vld [vmem:[%s16051_s1 + $0x1fc8] sm:$0xff]  ;;  %v11151_v1 = vcombine.low %v1022_v48, %v1030_v49  ;;  %v11200_v21 = vcombine.high %v1070_v14, %v1078_v15  ;;  %v1086_v24 = vld [vmem:[%s16051_s1 + $0x2100] sm:$0xff] }
  0xe3   :  { %7239 = vmatprep.subr.bf16.mxu0 %v11056_v2  ;;  %7444 = vmatprep.subr.bf16.mxu1 %v11058_v3  ;;  %v11153_v2 = vcombine.low %v1023_v51, %v1031_v52  ;;  %v11168_v3 = vcombine.high %v1038_v58, %v1046_v60  ;;  %v11170_v4 = vcombine.high %v1039_v62, %v1047_v0  ;;  %v1094_v25 = vld [vmem:[%s16051_s1 + $0x2140] sm:$0xff] }
  0xe4   :  { %v11216_v29 = vcombine.high %v1086_v24, %v1094_v25  ;;  %v1102_v31 = vld [vmem:[%s16051_s1 + $0x2180] sm:$0xff] }
  0xe5   :  { %v1110_v32 = vld [vmem:[%s16051_s1 + $0x21c0] sm:$0xff] }
  0xe6   :  { %7240 = vmatpush1.bf16.msra.mxu0 %v11055_v8  ;;  %7445 = vmatpush1.bf16.msra.mxu1 %v11057_v10  ;;  %v1063_v8 = vld [vmem:[%s16051_s1 + $0x2048] sm:$0xff]  ;;  %v11167_v10 = vcombine.low %v1038_v58, %v1046_v60  ;;  %v11232_v39 = vcombine.high %v1102_v31, %v1110_v32  ;;  %v1118_v42 = vld [vmem:[%s16051_s1 + $0x2200] sm:$0xff] }
  0xe7   :  { %7241 = vmatprep.subr.bf16.mxu0 %v11072_v11  ;;  %7446 = vmatprep.subr.bf16.mxu1 %v11074_v12  ;;  %v11169_v11 = vcombine.low %v1039_v62, %v1047_v0  ;;  %v11184_v12 = vcombine.high %v1054_v5, %v1062_v6  ;;  %v11186_v13 = vcombine.high %v1055_v7, %v1063_v8  ;;  %v1134_v52 = vld [vmem:[%s16051_s1 + $0x2280] sm:$0xff] }
  0xe8   :  { %v1150_v0 = vld [vmem:[%s16051_s1 + $0x2300] sm:$0xff] }
  0xea   :  { %7242 = vmatpush1.bf16.msra.mxu0 %v11071_v17  ;;  %7447 = vmatpush1.bf16.msra.mxu1 %v11073_v18  ;;  %v1071_v17 = vld [vmem:[%s16051_s1 + $0x2088] sm:$0xff] }
  0xeb   :  { %7243 = vmatprep.subr.bf16.mxu0 %v11088_v19  ;;  %7448 = vmatprep.subr.bf16.mxu1 %v11090_v20  ;;  %v1079_v18 = vld [vmem:[%s16051_s1 + $0x20c8] sm:$0xff]  ;;  %v11183_v19 = vcombine.low %v1054_v5, %v1062_v6  ;;  %v11185_v20 = vcombine.low %v1055_v7, %v1063_v8  ;;  %v1166_v8 = vld [vmem:[%s16051_s1 + $0x2380] sm:$0xff] }
  0xec   :  { %v11202_v22 = vcombine.high %v1071_v17, %v1079_v18 }
  0xee   :  { %7244 = vmatpush1.bf16.msra.mxu0 %v11087_v26  ;;  %7449 = vmatpush1.bf16.msra.mxu1 %v11089_v27  ;;  %v1087_v26 = vld [vmem:[%s16051_s1 + $0x2108] sm:$0xff] }
  0xef   :  { %7245 = vmatprep.subr.bf16.mxu0 %v11104_v28  ;;  %7450 = vmatprep.subr.bf16.mxu1 %v11106_v59  ;;  %v1095_v27 = vld [vmem:[%s16051_s1 + $0x2148] sm:$0xff]  ;;  %v11199_v28 = vcombine.low %v1070_v14, %v1078_v15  ;;  %v11201_v59 = vcombine.low %v1071_v17, %v1079_v18  ;;  %v32_v18 = vld [vmem:[%s16051_s1 + $0x10] sm:$0xff] }
  0xf0   :  { %v11218_v30 = vcombine.high %v1087_v26, %v1095_v27  ;;  %v11217_v38 = vcombine.low %v1087_v26, %v1095_v27 }
  0xf2   :  { %7246 = vmatpush1.bf16.msra.mxu0 %v11103_v34  ;;  %7451 = vmatpush1.bf16.msra.mxu1 %v11105_v35  ;;  %v11923_v34 = vmov 0   ;;  %v1103_v35 = vld [vmem:[%s16051_s1 + $0x2188] sm:$0xff] }
  0xf3   :  { %7247 = vmatprep.subr.bf16.mxu0 %v11120_v36  ;;  %7452 = vmatprep.subr.bf16.mxu1 %v11122_v37  ;;  %v1111_v36 = vld [vmem:[%s16051_s1 + $0x21c8] sm:$0xff]  ;;  %v11215_v37 = vcombine.low %v1086_v24, %v1094_v25 }
  0xf4   :  { %v11234_v41 = vcombine.high %v1103_v35, %v1111_v36  ;;  %v11233_v48 = vcombine.low %v1103_v35, %v1111_v36  ;;  %v10158_v24 = vld.sshfl [vmem:[%s16050_s0 + $0x8] sm:$0x1 pattern:$0x75316420] }
  0xf6   :  { %7248 = vmatpush1.bf16.msra.mxu0 %v11119_v44  ;;  %7453 = vmatpush1.bf16.msra.mxu1 %v11121_v45  ;;  %v1126_v44 = vld [vmem:[%s16051_s1 + $0x2240] sm:$0xff]  ;;  %v1119_v45 = vld [vmem:[%s16051_s1 + $0x2208] sm:$0xff] }
  0xf7   :  { %7249 = vmatprep.subr.bf16.mxu0 %v11136_v46  ;;  %7454 = vmatprep.subr.bf16.mxu1 %v11138_v47  ;;  %v1127_v46 = vld [vmem:[%s16051_s1 + $0x2248] sm:$0xff]  ;;  %v11231_v47 = vcombine.low %v1102_v31, %v1110_v32  ;;  %v11248_v49 = vcombine.high %v1118_v42, %v1126_v44  ;;  %v57_v31 = vld [vmem:[%s16051_s1 + $0xd8] sm:$0xff] }
  0xf8   :  { %v11250_v51 = vcombine.high %v1119_v45, %v1127_v46  ;;  %v11249_v58 = vcombine.low %v1119_v45, %v1127_v46 }
  0xfa   :  { %7250 = vmatpush1.bf16.msra.mxu0 %v11135_v54  ;;  %7455 = vmatpush1.bf16.msra.mxu1 %v11137_v55  ;;  %v1142_v54 = vld [vmem:[%s16051_s1 + $0x22c0] sm:$0xff]  ;;  %v1135_v55 = vld [vmem:[%s16051_s1 + $0x2288] sm:$0xff] }
  0xfb   :  { %7251 = vmatprep.subr.bf16.mxu0 %v11152_v56  ;;  %7456 = vmatprep.subr.bf16.mxu1 %v11154_v57  ;;  %v1143_v56 = vld [vmem:[%s16051_s1 + $0x22c8] sm:$0xff]  ;;  %v11247_v57 = vcombine.low %v1118_v42, %v1126_v44  ;;  %v11264_v60 = vcombine.high %v1134_v52, %v1142_v54 }
  0xfc   :  { %v11266_v62 = vcombine.high %v1135_v55, %v1143_v56  ;;  %v11265_v5 = vcombine.low %v1135_v55, %v1143_v56 }
  0xfe   :  { %7252 = vmatpush1.bf16.msra.mxu0 %v11151_v1  ;;  %7457 = vmatpush1.bf16.msra.mxu1 %v11153_v2  ;;  %v1158_v1 = vld [vmem:[%s16051_s1 + $0x2340] sm:$0xff]  ;;  %v1151_v2 = vld [vmem:[%s16051_s1 + $0x2308] sm:$0xff] }
  0xff   :  { %7253 = vmatprep.subr.bf16.mxu0 %v11168_v3  ;;  %7458 = vmatprep.subr.bf16.mxu1 %v11170_v4  ;;  %v1159_v3 = vld [vmem:[%s16051_s1 + $0x2348] sm:$0xff]  ;;  %v11263_v4 = vcombine.low %v1134_v52, %v1142_v54  ;;  %v11280_v6 = vcombine.high %v1150_v0, %v1158_v1 }
 0x100   :  { %v11282_v7 = vcombine.high %v1151_v2, %v1159_v3  ;;  %v11281_v14 = vcombine.low %v1151_v2, %v1159_v3 }
 0x102   :  { %7254 = vmatpush1.bf16.msra.mxu0 %v11167_v10  ;;  %7459 = vmatpush1.bf16.msra.mxu1 %v11169_v11  ;;  %v1174_v10 = vld [vmem:[%s16051_s1 + $0x23c0] sm:$0xff]  ;;  %v1167_v11 = vld [vmem:[%s16051_s1 + $0x2388] sm:$0xff] }
 0x103   :  { %7264 = vmatprep.subr.bf16.mxu0 %v11184_v12  ;;  %7469 = vmatprep.subr.bf16.mxu1 %v11186_v13  ;;  %v1175_v12 = vld [vmem:[%s16051_s1 + $0x23c8] sm:$0xff]  ;;  %v11279_v13 = vcombine.low %v1150_v0, %v1158_v1  ;;  %v11296_v15 = vcombine.high %v1166_v8, %v1174_v10 }
 0x104   :  { %v11298_v17 = vcombine.high %v1167_v11, %v1175_v12  ;;  %v11297_v25 = vcombine.low %v1167_v11, %v1175_v12 }
 0x105   :  { %7256 = vmatmul.mubr.bf16.vlgmr.msra.gmra.mrb[0].mxu0 %v12807_v16  ;;  %7461 = vmatmul.mubr.bf16.vlgmr.msra.gmra.mrb[0].mxu1 %v12807_v16 }
 0x106   :  { %7265 = vmatpush1.bf16.msra.mxu0 %v11183_v19  ;;  %7470 = vmatpush1.bf16.msra.mxu1 %v11185_v20  ;;  %v40_v19 = vld [vmem:[%s16051_s1 + $0x50] sm:$0xff]  ;;  %v33_v20 = vld [vmem:[%s16051_s1 + $0x18] sm:$0xff] }
 0x107   :  { %7266 = vmatprep.subr.bf16.mxu0 %v11200_v21  ;;  %7471 = vmatprep.subr.bf16.mxu1 %v11202_v22  ;;  %v41_v21 = vld [vmem:[%s16051_s1 + $0x58] sm:$0xff]  ;;  %v11295_v22 = vcombine.low %v1166_v8, %v1174_v10  ;;  %v10164_v26 = vcombine.high %v32_v18, %v40_v19  ;;  %v10163_v32 = vcombine.low %v32_v18, %v40_v19 }
 0x108   :  { %7296 = vmatprep.mubr.bf16.mxu0 %v11923_v34  ;;  %7501 = vmatprep.mubr.bf16.mxu1 %v11923_v34  ;;  %v10166_v27 = vcombine.high %v33_v20, %v41_v21  ;;  %v10165_v35 = vcombine.low %v33_v20, %v41_v21 }
 0x10a   :  { %7267 = vmatpush1.bf16.msra.mxu0 %v11199_v28  ;;  %7472 = vmatpush1.bf16.msra.mxu1 %v11201_v59  ;;  %v48_v28 = vld [vmem:[%s16051_s1 + $0x90] sm:$0xff] }
 0x10b   :  { %7268 = vmatprep.subr.bf16.mxu0 %v11216_v29  ;;  %7473 = vmatprep.subr.bf16.mxu1 %v11218_v30  ;;  %v56_v59 = vld [vmem:[%s16051_s1 + $0xd0] sm:$0xff]  ;;  %v12913_v29 = vrot.slane %v10158_v24, %v12037_v53  ;;  %v49_v30 = vld [vmem:[%s16051_s1 + $0x98] sm:$0xff] }
 0x10c   :  { %v10180_v36 = vcombine.high %v48_v28, %v56_v59  ;;  %v64_v53 = vld [vmem:[%s16051_s1 + $0x110] sm:$0xff]  ;;  %v10179_v42 = vcombine.low %v48_v28, %v56_v59  ;;  %v10181_v44 = vcombine.low %v49_v30, %v57_v31 }
 0x10d   :  { %v152_v24 = vld [vmem:[%s16051_s1 + $0x3d0] sm:$0xff] }
 0x10e   :  { %7269 = vmatpush1.bf16.msra.mxu0 %v11215_v37  ;;  %7474 = vmatpush1.bf16.msra.mxu1 %v11217_v38  ;;  %v10182_v37 = vcombine.high %v49_v30, %v57_v31  ;;  %v72_v38 = vld [vmem:[%s16051_s1 + $0x150] sm:$0xff] }
 0x10f   :  { %7270 = vmatprep.subr.bf16.mxu0 %v11232_v39  ;;  %7475 = vmatprep.subr.bf16.mxu1 %v11234_v41  ;;  %v65_v39 = vld [vmem:[%s16051_s1 + $0x118] sm:$0xff]  ;;  %v10196_v45 = vcombine.high %v64_v53, %v72_v38  ;;  %v10195_v52 = vcombine.low %v64_v53, %v72_v38  ;;  %v160_v31 = vld [vmem:[%s16051_s1 + $0x410] sm:$0xff] }
 0x110   :  { %v73_v41 = vld [vmem:[%s16051_s1 + $0x158] sm:$0xff] }
 0x111   :  { %v10198_v46 = vcombine.high %v65_v39, %v73_v41  ;;  %v10197_v54 = vcombine.low %v65_v39, %v73_v41  ;;  %v176_v41 = vld [vmem:[%s16051_s1 + $0x490] sm:$0xff] }
 0x112   :  { %7271 = vmatpush1.bf16.msra.mxu0 %v11231_v47  ;;  %7476 = vmatpush1.bf16.msra.mxu1 %v11233_v48  ;;  %v80_v47 = vld [vmem:[%s16051_s1 + $0x190] sm:$0xff] }
 0x113   :  { %7272 = vmatprep.subr.bf16.mxu0 %v11248_v49  ;;  %7477 = vmatprep.subr.bf16.mxu1 %v11250_v51  ;;  %v88_v48 = vld [vmem:[%s16051_s1 + $0x1d0] sm:$0xff]  ;;  %v81_v49 = vld [vmem:[%s16051_s1 + $0x198] sm:$0xff] }
 0x114   :  { %v89_v51 = vld [vmem:[%s16051_s1 + $0x1d8] sm:$0xff]  ;;  %v10212_v55 = vcombine.high %v80_v47, %v88_v48  ;;  %v10211_v0 = vcombine.low %v80_v47, %v88_v48 }
 0x115   :  { %v10214_v56 = vcombine.high %v81_v49, %v89_v51  ;;  %v10213_v1 = vcombine.low %v81_v49, %v89_v51  ;;  %v192_v51 = vld [vmem:[%s16051_s1 + $0x510] sm:$0xff] }
 0x116   :  { %7273 = vmatpush1.bf16.msra.mxu0 %v11247_v57  ;;  %7478 = vmatpush1.bf16.msra.mxu1 %v11249_v58  ;;  %v96_v57 = vld [vmem:[%s16051_s1 + $0x210] sm:$0xff] }
 0x117   :  { %7274 = vmatprep.subr.bf16.mxu0 %v11264_v60  ;;  %7479 = vmatprep.subr.bf16.mxu1 %v11266_v62  ;;  %v104_v58 = vld [vmem:[%s16051_s1 + $0x250] sm:$0xff]  ;;  %v97_v60 = vld [vmem:[%s16051_s1 + $0x218] sm:$0xff] }
 0x118   :  { %v105_v62 = vld [vmem:[%s16051_s1 + $0x258] sm:$0xff]  ;;  %v10228_v2 = vcombine.high %v96_v57, %v104_v58  ;;  %v10227_v8 = vcombine.low %v96_v57, %v104_v58 }
 0x119   :  { %v10230_v3 = vcombine.high %v97_v60, %v105_v62  ;;  %v10229_v10 = vcombine.low %v97_v60, %v105_v62  ;;  %v208_v62 = vld [vmem:[%s16051_s1 + $0x590] sm:$0xff] }
 0x11a   :  { %7275 = vmatpush1.bf16.msra.mxu0 %v11263_v4  ;;  %7480 = vmatpush1.bf16.msra.mxu1 %v11265_v5  ;;  %v112_v4 = vld [vmem:[%s16051_s1 + $0x290] sm:$0xff] }
 0x11b   :  { %7276 = vmatprep.subr.bf16.mxu0 %v11280_v6  ;;  %7481 = vmatprep.subr.bf16.mxu1 %v11282_v7  ;;  %v120_v5 = vld [vmem:[%s16051_s1 + $0x2d0] sm:$0xff]  ;;  %v113_v6 = vld [vmem:[%s16051_s1 + $0x298] sm:$0xff] }
 0x11c   :  { %v121_v7 = vld [vmem:[%s16051_s1 + $0x2d8] sm:$0xff]  ;;  %v10244_v11 = vcombine.high %v112_v4, %v120_v5  ;;  %v10243_v18 = vcombine.low %v112_v4, %v120_v5 }
 0x11d   :  { %v10246_v12 = vcombine.high %v113_v6, %v121_v7  ;;  %v10245_v19 = vcombine.low %v113_v6, %v121_v7  ;;  %v224_v7 = vld [vmem:[%s16051_s1 + $0x610] sm:$0xff] }
 0x11e   :  { %7277 = vmatpush1.bf16.msra.mxu0 %v11279_v13  ;;  %7482 = vmatpush1.bf16.msra.mxu1 %v11281_v14  ;;  %v128_v13 = vld [vmem:[%s16051_s1 + $0x310] sm:$0xff] }
 0x11f   :  { %7278 = vmatprep.subr.bf16.mxu0 %v11296_v15  ;;  %7483 = vmatprep.subr.bf16.mxu1 %v11298_v17  ;;  %v136_v14 = vld [vmem:[%s16051_s1 + $0x350] sm:$0xff]  ;;  %v129_v15 = vld [vmem:[%s16051_s1 + $0x318] sm:$0xff] }
 0x120   :  { %v137_v17 = vld [vmem:[%s16051_s1 + $0x358] sm:$0xff]  ;;  %v10260_v20 = vcombine.high %v128_v13, %v136_v14 }
 0x121   :  { %v10262_v21 = vcombine.high %v129_v15, %v137_v17  ;;  %v10261_v28 = vcombine.low %v129_v15, %v137_v17  ;;  %v240_v17 = vld [vmem:[%s16051_s1 + $0x690] sm:$0xff] }
 0x122   :  { %7279 = vmatpush1.bf16.msra.mxu0 %v11295_v22  ;;  %7484 = vmatpush1.bf16.msra.mxu1 %v11297_v25  ;;  %v144_v22 = vld [vmem:[%s16051_s1 + $0x390] sm:$0xff]  ;;  %v145_v25 = vld [vmem:[%s16051_s1 + $0x398] sm:$0xff] }
 0x123   :  { %7510 = vmatprep.subr.bf16.mxu0 %v10164_v26  ;;  %7715 = vmatprep.subr.bf16.mxu1 %v10166_v27  ;;  %v153_v26 = vld [vmem:[%s16051_s1 + $0x3d8] sm:$0xff]  ;;  %v10259_v27 = vcombine.low %v128_v13, %v136_v14  ;;  %v10276_v59 = vcombine.high %v144_v22, %v152_v24 }
 0x124   :  { %v10278_v30 = vcombine.high %v145_v25, %v153_v26  ;;  %v10277_v53 = vcombine.low %v145_v25, %v153_v26  ;;  %v256_v26 = vld [vmem:[%s16051_s1 + $0x710] sm:$0xff] }
 0x125   :  { %7297 = vmatmul.mubr.bf16.vlgmr.msra.gmra.mrb[0].mxu0 %v12913_v29  ;;  %7502 = vmatmul.mubr.bf16.vlgmr.msra.gmra.mrb[0].mxu1 %v12913_v29 }
 0x126   :  { %7511 = vmatpush1.bf16.msra.mxu0 %v10163_v32  ;;  %7716 = vmatpush1.bf16.msra.mxu1 %v10165_v35  ;;  %v168_v32 = vld [vmem:[%s16051_s1 + $0x450] sm:$0xff]  ;;  %v161_v35 = vld [vmem:[%s16051_s1 + $0x418] sm:$0xff] }
 0x127   :  { %7512 = vmatprep.subr.bf16.mxu0 %v10180_v36  ;;  %7717 = vmatprep.subr.bf16.mxu1 %v10182_v37  ;;  %v169_v36 = vld [vmem:[%s16051_s1 + $0x458] sm:$0xff]  ;;  %v10275_v37 = vcombine.low %v144_v22, %v152_v24  ;;  %v10292_v38 = vcombine.high %v160_v31, %v168_v32 }
 0x128   :  { %7542 = vmatprep.mubr.bf16.mxu0 %v12075_v9  ;;  %7747 = vmatprep.mubr.bf16.mxu1 %v12075_v9  ;;  %v10294_v39 = vcombine.high %v161_v35, %v169_v36  ;;  %v10293_v47 = vcombine.low %v161_v35, %v169_v36  ;;  %v272_v36 = vld [vmem:[%s16051_s1 + $0x790] sm:$0xff] }
 0x12a   :  { %7513 = vmatpush1.bf16.msra.mxu0 %v10179_v42  ;;  %7718 = vmatpush1.bf16.msra.mxu1 %v10181_v44  ;;  %v184_v42 = vld [vmem:[%s16051_s1 + $0x4d0] sm:$0xff]  ;;  %v177_v44 = vld [vmem:[%s16051_s1 + $0x498] sm:$0xff] }
 0x12b   :  { %7514 = vmatprep.subr.bf16.mxu0 %v10196_v45  ;;  %7719 = vmatprep.subr.bf16.mxu1 %v10198_v46  ;;  %v185_v45 = vld [vmem:[%s16051_s1 + $0x4d8] sm:$0xff]  ;;  %v10291_v46 = vcombine.low %v160_v31, %v168_v32  ;;  %v10308_v48 = vcombine.high %v176_v41, %v184_v42 }
 0x12c   :  { %v10310_v49 = vcombine.high %v177_v44, %v185_v45  ;;  %v10309_v57 = vcombine.low %v177_v44, %v185_v45  ;;  %v288_v45 = vld [vmem:[%s16051_s1 + $0x810] sm:$0xff] }
 0x12e   :  { %7515 = vmatpush1.bf16.msra.mxu0 %v10195_v52  ;;  %7720 = vmatpush1.bf16.msra.mxu1 %v10197_v54  ;;  %v200_v52 = vld [vmem:[%s16051_s1 + $0x550] sm:$0xff]  ;;  %v193_v54 = vld [vmem:[%s16051_s1 + $0x518] sm:$0xff] }
 0x12f   :  { %7516 = vmatprep.subr.bf16.mxu0 %v10212_v55  ;;  %7721 = vmatprep.subr.bf16.mxu1 %v10214_v56  ;;  %v201_v55 = vld [vmem:[%s16051_s1 + $0x558] sm:$0xff]  ;;  %v10307_v56 = vcombine.low %v176_v41, %v184_v42  ;;  %v10324_v58 = vcombine.high %v192_v51, %v200_v52 }
 0x130   :  { %v10326_v60 = vcombine.high %v193_v54, %v201_v55  ;;  %v10325_v4 = vcombine.low %v193_v54, %v201_v55  ;;  %v304_v55 = vld [vmem:[%s16051_s1 + $0x890] sm:$0xff] }
 0x132   :  { %7517 = vmatpush1.bf16.msra.mxu0 %v10211_v0  ;;  %7722 = vmatpush1.bf16.msra.mxu1 %v10213_v1  ;;  %v216_v0 = vld [vmem:[%s16051_s1 + $0x5d0] sm:$0xff]  ;;  %v209_v1 = vld [vmem:[%s16051_s1 + $0x598] sm:$0xff] }
 0x133   :  { %7518 = vmatprep.subr.bf16.mxu0 %v10228_v2  ;;  %7723 = vmatprep.subr.bf16.mxu1 %v10230_v3  ;;  %v217_v2 = vld [vmem:[%s16051_s1 + $0x5d8] sm:$0xff]  ;;  %v10323_v3 = vcombine.low %v192_v51, %v200_v52  ;;  %v10340_v5 = vcombine.high %v208_v62, %v216_v0 }
 0x134   :  { %v10342_v6 = vcombine.high %v209_v1, %v217_v2  ;;  %v10341_v13 = vcombine.low %v209_v1, %v217_v2  ;;  %v320_v2 = vld [vmem:[%s16051_s1 + $0x910] sm:$0xff] }
 0x136   :  { %7519 = vmatpush1.bf16.msra.mxu0 %v10227_v8  ;;  %7724 = vmatpush1.bf16.msra.mxu1 %v10229_v10  ;;  %v232_v8 = vld [vmem:[%s16051_s1 + $0x650] sm:$0xff]  ;;  %v225_v10 = vld [vmem:[%s16051_s1 + $0x618] sm:$0xff] }
 0x137   :  { %7520 = vmatprep.subr.bf16.mxu0 %v10244_v11  ;;  %7725 = vmatprep.subr.bf16.mxu1 %v10246_v12  ;;  %v233_v11 = vld [vmem:[%s16051_s1 + $0x658] sm:$0xff]  ;;  %v10339_v12 = vcombine.low %v208_v62, %v216_v0  ;;  %v10356_v14 = vcombine.high %v224_v7, %v232_v8 }
 0x138   :  { %v10358_v15 = vcombine.high %v225_v10, %v233_v11  ;;  %v10357_v22 = vcombine.low %v225_v10, %v233_v11  ;;  %v336_v11 = vld [vmem:[%s16051_s1 + $0x990] sm:$0xff] }
 0x13a   :  { %7521 = vmatpush1.bf16.msra.mxu0 %v10243_v18  ;;  %7726 = vmatpush1.bf16.msra.mxu1 %v10245_v19  ;;  %v248_v18 = vld [vmem:[%s16051_s1 + $0x6d0] sm:$0xff]  ;;  %v241_v19 = vld [vmem:[%s16051_s1 + $0x698] sm:$0xff] }
 0x13b   :  { %7522 = vmatprep.subr.bf16.mxu0 %v10260_v20  ;;  %7727 = vmatprep.subr.bf16.mxu1 %v10262_v21  ;;  %v249_v20 = vld [vmem:[%s16051_s1 + $0x6d8] sm:$0xff]  ;;  %v10355_v21 = vcombine.low %v224_v7, %v232_v8  ;;  %v10372_v24 = vcombine.high %v240_v17, %v248_v18 }
 0x13c   :  { %v10374_v25 = vcombine.high %v241_v19, %v249_v20  ;;  %v10373_v31 = vcombine.low %v241_v19, %v249_v20  ;;  %v352_v20 = vld [vmem:[%s16051_s1 + $0xa10] sm:$0xff] }
 0x13e   :  { %7523 = vmatpush1.bf16.msra.mxu0 %v10259_v27  ;;  %7728 = vmatpush1.bf16.msra.mxu1 %v10261_v28  ;;  %v264_v27 = vld [vmem:[%s16051_s1 + $0x750] sm:$0xff]  ;;  %v257_v28 = vld [vmem:[%s16051_s1 + $0x718] sm:$0xff] }
 0x13f   :  { %7524 = vmatprep.subr.bf16.mxu0 %v10276_v59  ;;  %7729 = vmatprep.subr.bf16.mxu1 %v10278_v30  ;;  %v265_v59 = vld [vmem:[%s16051_s1 + $0x758] sm:$0xff]  ;;  %v10371_v30 = vcombine.low %v240_v17, %v248_v18  ;;  %v10388_v32 = vcombine.high %v256_v26, %v264_v27 }
 0x140   :  { %v10390_v35 = vcombine.high %v257_v28, %v265_v59  ;;  %v10389_v41 = vcombine.low %v257_v28, %v265_v59  ;;  %v368_v59 = vld [vmem:[%s16051_s1 + $0xa90] sm:$0xff] }
 0x142   :  { %7525 = vmatpush1.bf16.msra.mxu0 %v10275_v37  ;;  %7730 = vmatpush1.bf16.msra.mxu1 %v10277_v53  ;;  %v280_v37 = vld [vmem:[%s16051_s1 + $0x7d0] sm:$0xff]  ;;  %v273_v53 = vld [vmem:[%s16051_s1 + $0x798] sm:$0xff] }
 0x143   :  { %7526 = vmatprep.subr.bf16.mxu0 %v10292_v38  ;;  %7731 = vmatprep.subr.bf16.mxu1 %v10294_v39  ;;  %v281_v38 = vld [vmem:[%s16051_s1 + $0x7d8] sm:$0xff]  ;;  %v10387_v39 = vcombine.low %v256_v26, %v264_v27  ;;  %v10404_v42 = vcombine.high %v272_v36, %v280_v37 }
 0x144   :  { %v10406_v44 = vcombine.high %v273_v53, %v281_v38  ;;  %v10405_v51 = vcombine.low %v273_v53, %v281_v38  ;;  %v384_v38 = vld [vmem:[%s16051_s1 + $0xb10] sm:$0xff] }
 0x146   :  { %7527 = vmatpush1.bf16.msra.mxu0 %v10291_v46  ;;  %7732 = vmatpush1.bf16.msra.mxu1 %v10293_v47  ;;  %v296_v46 = vld [vmem:[%s16051_s1 + $0x850] sm:$0xff]  ;;  %v289_v47 = vld [vmem:[%s16051_s1 + $0x818] sm:$0xff] }
 0x147   :  { %7528 = vmatprep.subr.bf16.mxu0 %v10308_v48  ;;  %7733 = vmatprep.subr.bf16.mxu1 %v10310_v49  ;;  %v297_v48 = vld [vmem:[%s16051_s1 + $0x858] sm:$0xff]  ;;  %v10403_v49 = vcombine.low %v272_v36, %v280_v37  ;;  %v10420_v52 = vcombine.high %v288_v45, %v296_v46 }
 0x148   :  { %v10422_v54 = vcombine.high %v289_v47, %v297_v48  ;;  %v10421_v62 = vcombine.low %v289_v47, %v297_v48  ;;  %v400_v48 = vld [vmem:[%s16051_s1 + $0xb90] sm:$0xff] }
 0x14a   :  { %7529 = vmatpush1.bf16.msra.mxu0 %v10307_v56  ;;  %7734 = vmatpush1.bf16.msra.mxu1 %v10309_v57  ;;  %v312_v56 = vld [vmem:[%s16051_s1 + $0x8d0] sm:$0xff]  ;;  %v305_v57 = vld [vmem:[%s16051_s1 + $0x898] sm:$0xff] }
 0x14b   :  { %7530 = vmatprep.subr.bf16.mxu0 %v10324_v58  ;;  %7735 = vmatprep.subr.bf16.mxu1 %v10326_v60  ;;  %v313_v58 = vld [vmem:[%s16051_s1 + $0x8d8] sm:$0xff]  ;;  %v10419_v60 = vcombine.low %v288_v45, %v296_v46  ;;  %v10436_v0 = vcombine.high %v304_v55, %v312_v56 }
 0x14c   :  { %v10438_v1 = vcombine.high %v305_v57, %v313_v58  ;;  %v10437_v7 = vcombine.low %v305_v57, %v313_v58  ;;  %v416_v58 = vld [vmem:[%s16051_s1 + $0xc10] sm:$0xff] }
 0x14e   :  { %7531 = vmatpush1.bf16.msra.mxu0 %v10323_v3  ;;  %7736 = vmatpush1.bf16.msra.mxu1 %v10325_v4  ;;  %v328_v3 = vld [vmem:[%s16051_s1 + $0x950] sm:$0xff]  ;;  %v321_v4 = vld [vmem:[%s16051_s1 + $0x918] sm:$0xff] }
 0x14f   :  { %7532 = vmatprep.subr.bf16.mxu0 %v10340_v5  ;;  %7737 = vmatprep.subr.bf16.mxu1 %v10342_v6  ;;  %v329_v5 = vld [vmem:[%s16051_s1 + $0x958] sm:$0xff]  ;;  %v10435_v6 = vcombine.low %v304_v55, %v312_v56  ;;  %v10452_v8 = vcombine.high %v320_v2, %v328_v3 }
 0x150   :  { %v10454_v10 = vcombine.high %v321_v4, %v329_v5  ;;  %v10453_v17 = vcombine.low %v321_v4, %v329_v5  ;;  %v432_v5 = vld [vmem:[%s16051_s1 + $0xc90] sm:$0xff] }
 0x152   :  { %7533 = vmatpush1.bf16.msra.mxu0 %v10339_v12  ;;  %7738 = vmatpush1.bf16.msra.mxu1 %v10341_v13  ;;  %v344_v12 = vld [vmem:[%s16051_s1 + $0x9d0] sm:$0xff]  ;;  %v337_v13 = vld [vmem:[%s16051_s1 + $0x998] sm:$0xff] }
 0x153   :  { %7534 = vmatprep.subr.bf16.mxu0 %v10356_v14  ;;  %7739 = vmatprep.subr.bf16.mxu1 %v10358_v15  ;;  %v345_v14 = vld [vmem:[%s16051_s1 + $0x9d8] sm:$0xff]  ;;  %v10451_v15 = vcombine.low %v320_v2, %v328_v3  ;;  %v10468_v18 = vcombine.high %v336_v11, %v344_v12 }
 0x154   :  { %v10470_v19 = vcombine.high %v337_v13, %v345_v14  ;;  %v10469_v26 = vcombine.low %v337_v13, %v345_v14  ;;  %v448_v14 = vld [vmem:[%s16051_s1 + $0xd10] sm:$0xff] }
 0x156   :  { %7535 = vmatpush1.bf16.msra.mxu0 %v10355_v21  ;;  %7740 = vmatpush1.bf16.msra.mxu1 %v10357_v22  ;;  %v360_v21 = vld [vmem:[%s16051_s1 + $0xa50] sm:$0xff]  ;;  %v353_v22 = vld [vmem:[%s16051_s1 + $0xa18] sm:$0xff] }
 0x157   :  { %7536 = vmatprep.subr.bf16.mxu0 %v10372_v24  ;;  %7741 = vmatprep.subr.bf16.mxu1 %v10374_v25  ;;  %v361_v24 = vld [vmem:[%s16051_s1 + $0xa58] sm:$0xff]  ;;  %v10467_v25 = vcombine.low %v336_v11, %v344_v12  ;;  %v10484_v27 = vcombine.high %v352_v20, %v360_v21 }
 0x158   :  { %v10486_v28 = vcombine.high %v353_v22, %v361_v24  ;;  %v10485_v36 = vcombine.low %v353_v22, %v361_v24  ;;  %v464_v24 = vld [vmem:[%s16051_s1 + $0xd90] sm:$0xff] }
 0x15a   :  { %7537 = vmatpush1.bf16.msra.mxu0 %v10371_v30  ;;  %7742 = vmatpush1.bf16.msra.mxu1 %v10373_v31  ;;  %v376_v30 = vld [vmem:[%s16051_s1 + $0xad0] sm:$0xff]  ;;  %v369_v31 = vld [vmem:[%s16051_s1 + $0xa98] sm:$0xff] }
 0x15b   :  { %7538 = vmatprep.subr.bf16.mxu0 %v10388_v32  ;;  %7743 = vmatprep.subr.bf16.mxu1 %v10390_v35  ;;  %v377_v32 = vld [vmem:[%s16051_s1 + $0xad8] sm:$0xff]  ;;  %v10483_v35 = vcombine.low %v352_v20, %v360_v21  ;;  %v10500_v37 = vcombine.high %v368_v59, %v376_v30 }
 0x15c   :  { %v10502_v53 = vcombine.high %v369_v31, %v377_v32  ;;  %v10501_v45 = vcombine.low %v369_v31, %v377_v32  ;;  %v480_v32 = vld [vmem:[%s16051_s1 + $0xe10] sm:$0xff] }
 0x15e   :  { %7539 = vmatpush1.bf16.msra.mxu0 %v10387_v39  ;;  %7744 = vmatpush1.bf16.msra.mxu1 %v10389_v41  ;;  %v392_v39 = vld [vmem:[%s16051_s1 + $0xb50] sm:$0xff]  ;;  %v385_v41 = vld [vmem:[%s16051_s1 + $0xb18] sm:$0xff] }
 0x15f   :  { %7540 = vmatprep.subr.bf16.mxu0 %v10404_v42  ;;  %7745 = vmatprep.subr.bf16.mxu1 %v10406_v44  ;;  %v393_v42 = vld [vmem:[%s16051_s1 + $0xb58] sm:$0xff]  ;;  %v10499_v44 = vcombine.low %v368_v59, %v376_v30  ;;  %v10516_v46 = vcombine.high %v384_v38, %v392_v39 }
 0x160   :  { %v10518_v47 = vcombine.high %v385_v41, %v393_v42  ;;  %v10517_v55 = vcombine.low %v385_v41, %v393_v42  ;;  %v496_v42 = vld [vmem:[%s16051_s1 + $0xe90] sm:$0xff] }
 0x162   :  { %7541 = vmatpush1.bf16.msra.mxu0 %v10403_v49  ;;  %7746 = vmatpush1.bf16.msra.mxu1 %v10405_v51  ;;  %v408_v49 = vld [vmem:[%s16051_s1 + $0xbd0] sm:$0xff]  ;;  %v401_v51 = vld [vmem:[%s16051_s1 + $0xb98] sm:$0xff] }
 0x163   :  { %7551 = vmatprep.subr.bf16.mxu0 %v10420_v52  ;;  %7756 = vmatprep.subr.bf16.mxu1 %v10422_v54  ;;  %v409_v52 = vld [vmem:[%s16051_s1 + $0xbd8] sm:$0xff]  ;;  %v10515_v54 = vcombine.low %v384_v38, %v392_v39  ;;  %v10532_v56 = vcombine.high %v400_v48, %v408_v49 }
 0x164   :  { %v10534_v57 = vcombine.high %v401_v51, %v409_v52  ;;  %v10533_v2 = vcombine.low %v401_v51, %v409_v52  ;;  %v512_v52 = vld [vmem:[%s16051_s1 + $0xf10] sm:$0xff] }
 0x165   :  { %7543 = vmatmul.mubr.bf16.vlgmr.msra.gmra.mrb[4].mxu0 %v12189_v23  ;;  %7748 = vmatmul.mubr.bf16.vlgmr.msra.gmra.mrb[4].mxu1 %v12189_v23 }
 0x166   :  { %7552 = vmatpush1.bf16.msra.mxu0 %v10419_v60  ;;  %7757 = vmatpush1.bf16.msra.mxu1 %v10421_v62  ;;  %v424_v60 = vld [vmem:[%s16051_s1 + $0xc50] sm:$0xff]  ;;  %v417_v62 = vld [vmem:[%s16051_s1 + $0xc18] sm:$0xff] }
 0x167   :  { %7553 = vmatprep.subr.bf16.mxu0 %v10436_v0  ;;  %7758 = vmatprep.subr.bf16.mxu1 %v10438_v1  ;;  %v425_v0 = vld [vmem:[%s16051_s1 + $0xc58] sm:$0xff]  ;;  %v10531_v1 = vcombine.low %v400_v48, %v408_v49  ;;  %v10548_v3 = vcombine.high %v416_v58, %v424_v60 }
 0x168   :  { %7583 = vmatprep.mubr.bf16.mxu0 %v12211_v33  ;;  %7788 = vmatprep.mubr.bf16.mxu1 %v12211_v33  ;;  %v10550_v4 = vcombine.high %v417_v62, %v425_v0  ;;  %v10549_v11 = vcombine.low %v417_v62, %v425_v0  ;;  %v528_v0 = vld [vmem:[%s16051_s1 + $0xf90] sm:$0xff] }
 0x16a   :  { %7554 = vmatpush1.bf16.msra.mxu0 %v10435_v6  ;;  %7759 = vmatpush1.bf16.msra.mxu1 %v10437_v7  ;;  %v440_v6 = vld [vmem:[%s16051_s1 + $0xcd0] sm:$0xff]  ;;  %v433_v7 = vld [vmem:[%s16051_s1 + $0xc98] sm:$0xff] }
 0x16b   :  { %7555 = vmatprep.subr.bf16.mxu0 %v10452_v8  ;;  %7760 = vmatprep.subr.bf16.mxu1 %v10454_v10  ;;  %v441_v8 = vld [vmem:[%s16051_s1 + $0xcd8] sm:$0xff]  ;;  %v10547_v10 = vcombine.low %v416_v58, %v424_v60  ;;  %v10564_v12 = vcombine.high %v432_v5, %v440_v6 }
 0x16c   :  { %v10566_v13 = vcombine.high %v433_v7, %v441_v8  ;;  %v10565_v20 = vcombine.low %v433_v7, %v441_v8  ;;  %v544_v8 = vld [vmem:[%s16051_s1 + $0x1010] sm:$0xff] }
 0x16e   :  { %7556 = vmatpush1.bf16.msra.mxu0 %v10451_v15  ;;  %7761 = vmatpush1.bf16.msra.mxu1 %v10453_v17  ;;  %v456_v15 = vld [vmem:[%s16051_s1 + $0xd50] sm:$0xff]  ;;  %v449_v17 = vld [vmem:[%s16051_s1 + $0xd18] sm:$0xff] }
 0x16f   :  { %7557 = vmatprep.subr.bf16.mxu0 %v10468_v18  ;;  %7762 = vmatprep.subr.bf16.mxu1 %v10470_v19  ;;  %v457_v18 = vld [vmem:[%s16051_s1 + $0xd58] sm:$0xff]  ;;  %v10563_v19 = vcombine.low %v432_v5, %v440_v6  ;;  %v10580_v21 = vcombine.high %v448_v14, %v456_v15 }
 0x170   :  { %v10582_v22 = vcombine.high %v449_v17, %v457_v18  ;;  %v10581_v59 = vcombine.low %v449_v17, %v457_v18  ;;  %v560_v18 = vld [vmem:[%s16051_s1 + $0x1090] sm:$0xff] }
 0x172   :  { %7558 = vmatpush1.bf16.msra.mxu0 %v10467_v25  ;;  %7763 = vmatpush1.bf16.msra.mxu1 %v10469_v26  ;;  %v472_v25 = vld [vmem:[%s16051_s1 + $0xdd0] sm:$0xff]  ;;  %v465_v26 = vld [vmem:[%s16051_s1 + $0xd98] sm:$0xff] }
 0x173   :  { %7559 = vmatprep.subr.bf16.mxu0 %v10484_v27  ;;  %7764 = vmatprep.subr.bf16.mxu1 %v10486_v28  ;;  %v473_v27 = vld [vmem:[%s16051_s1 + $0xdd8] sm:$0xff]  ;;  %v10579_v28 = vcombine.low %v448_v14, %v456_v15  ;;  %v10596_v30 = vcombine.high %v464_v24, %v472_v25 }
 0x174   :  { %v10598_v31 = vcombine.high %v465_v26, %v473_v27  ;;  %v10597_v38 = vcombine.low %v465_v26, %v473_v27  ;;  %v576_v27 = vld [vmem:[%s16051_s1 + $0x1110] sm:$0xff] }
 0x176   :  { %7560 = vmatpush1.bf16.msra.mxu0 %v10483_v35  ;;  %7765 = vmatpush1.bf16.msra.mxu1 %v10485_v36  ;;  %v488_v35 = vld [vmem:[%s16051_s1 + $0xe50] sm:$0xff]  ;;  %v481_v36 = vld [vmem:[%s16051_s1 + $0xe18] sm:$0xff] }
 0x177   :  { %7561 = vmatprep.subr.bf16.mxu0 %v10500_v37  ;;  %7766 = vmatprep.subr.bf16.mxu1 %v10502_v53  ;;  %v489_v37 = vld [vmem:[%s16051_s1 + $0xe58] sm:$0xff]  ;;  %v10595_v53 = vcombine.low %v464_v24, %v472_v25  ;;  %v10612_v39 = vcombine.high %v480_v32, %v488_v35 }
 0x178   :  { %v10614_v41 = vcombine.high %v481_v36, %v489_v37  ;;  %v10613_v48 = vcombine.low %v481_v36, %v489_v37  ;;  %v592_v37 = vld [vmem:[%s16051_s1 + $0x1190] sm:$0xff] }
 0x17a   :  { %7562 = vmatpush1.bf16.msra.mxu0 %v10499_v44  ;;  %7767 = vmatpush1.bf16.msra.mxu1 %v10501_v45  ;;  %v504_v44 = vld [vmem:[%s16051_s1 + $0xed0] sm:$0xff]  ;;  %v497_v45 = vld [vmem:[%s16051_s1 + $0xe98] sm:$0xff] }
 0x17b   :  { %7563 = vmatprep.subr.bf16.mxu0 %v10516_v46  ;;  %7768 = vmatprep.subr.bf16.mxu1 %v10518_v47  ;;  %v505_v46 = vld [vmem:[%s16051_s1 + $0xed8] sm:$0xff]  ;;  %v10611_v47 = vcombine.low %v480_v32, %v488_v35  ;;  %v10628_v49 = vcombine.high %v496_v42, %v504_v44 }
 0x17c   :  { %v10630_v51 = vcombine.high %v497_v45, %v505_v46  ;;  %v10629_v58 = vcombine.low %v497_v45, %v505_v46  ;;  %v608_v46 = vld [vmem:[%s16051_s1 + $0x1210] sm:$0xff] }
 0x17e   :  { %7564 = vmatpush1.bf16.msra.mxu0 %v10515_v54  ;;  %7769 = vmatpush1.bf16.msra.mxu1 %v10517_v55  ;;  %v520_v54 = vld [vmem:[%s16051_s1 + $0xf50] sm:$0xff]  ;;  %v513_v55 = vld [vmem:[%s16051_s1 + $0xf18] sm:$0xff] }
 0x17f   :  { %7565 = vmatprep.subr.bf16.mxu0 %v10532_v56  ;;  %7770 = vmatprep.subr.bf16.mxu1 %v10534_v57  ;;  %v521_v56 = vld [vmem:[%s16051_s1 + $0xf58] sm:$0xff]  ;;  %v10627_v57 = vcombine.low %v496_v42, %v504_v44  ;;  %v10644_v60 = vcombine.high %v512_v52, %v520_v54 }
 0x180   :  { %v10646_v62 = vcombine.high %v513_v55, %v521_v56  ;;  %v10645_v5 = vcombine.low %v513_v55, %v521_v56  ;;  %v624_v56 = vld [vmem:[%s16051_s1 + $0x1290] sm:$0xff] }
 0x182   :  { %7566 = vmatpush1.bf16.msra.mxu0 %v10531_v1  ;;  %7771 = vmatpush1.bf16.msra.mxu1 %v10533_v2  ;;  %v536_v1 = vld [vmem:[%s16051_s1 + $0xfd0] sm:$0xff]  ;;  %v529_v2 = vld [vmem:[%s16051_s1 + $0xf98] sm:$0xff] }
 0x183   :  { %7567 = vmatprep.subr.bf16.mxu0 %v10548_v3  ;;  %7772 = vmatprep.subr.bf16.mxu1 %v10550_v4  ;;  %v537_v3 = vld [vmem:[%s16051_s1 + $0xfd8] sm:$0xff]  ;;  %v10643_v4 = vcombine.low %v512_v52, %v520_v54  ;;  %v10660_v6 = vcombine.high %v528_v0, %v536_v1 }
 0x184   :  { %v10662_v7 = vcombine.high %v529_v2, %v537_v3  ;;  %v10661_v14 = vcombine.low %v529_v2, %v537_v3  ;;  %v640_v3 = vld [vmem:[%s16051_s1 + $0x1310] sm:$0xff] }
 0x186   :  { %7568 = vmatpush1.bf16.msra.mxu0 %v10547_v10  ;;  %7773 = vmatpush1.bf16.msra.mxu1 %v10549_v11  ;;  %v552_v10 = vld [vmem:[%s16051_s1 + $0x1050] sm:$0xff]  ;;  %v545_v11 = vld [vmem:[%s16051_s1 + $0x1018] sm:$0xff] }
 0x187   :  { %7569 = vmatprep.subr.bf16.mxu0 %v10564_v12  ;;  %7774 = vmatprep.subr.bf16.mxu1 %v10566_v13  ;;  %v553_v12 = vld [vmem:[%s16051_s1 + $0x1058] sm:$0xff]  ;;  %v10659_v13 = vcombine.low %v528_v0, %v536_v1  ;;  %v10676_v15 = vcombine.high %v544_v8, %v552_v10 }
 0x188   :  { %v10678_v17 = vcombine.high %v545_v11, %v553_v12  ;;  %v10677_v24 = vcombine.low %v545_v11, %v553_v12  ;;  %v656_v12 = vld [vmem:[%s16051_s1 + $0x1390] sm:$0xff] }
 0x18a   :  { %7570 = vmatpush1.bf16.msra.mxu0 %v10563_v19  ;;  %7775 = vmatpush1.bf16.msra.mxu1 %v10565_v20  ;;  %v568_v19 = vld [vmem:[%s16051_s1 + $0x10d0] sm:$0xff]  ;;  %v561_v20 = vld [vmem:[%s16051_s1 + $0x1098] sm:$0xff] }
 0x18b   :  { %7571 = vmatprep.subr.bf16.mxu0 %v10580_v21  ;;  %7776 = vmatprep.subr.bf16.mxu1 %v10582_v22  ;;  %v569_v21 = vld [vmem:[%s16051_s1 + $0x10d8] sm:$0xff]  ;;  %v10675_v22 = vcombine.low %v544_v8, %v552_v10  ;;  %v10692_v25 = vcombine.high %v560_v18, %v568_v19 }
 0x18c   :  { %v10694_v26 = vcombine.high %v561_v20, %v569_v21  ;;  %v10693_v32 = vcombine.low %v561_v20, %v569_v21  ;;  %v672_v21 = vld [vmem:[%s16051_s1 + $0x1410] sm:$0xff] }
 0x18e   :  { %7572 = vmatpush1.bf16.msra.mxu0 %v10579_v28  ;;  %7777 = vmatpush1.bf16.msra.mxu1 %v10581_v59  ;;  %v584_v28 = vld [vmem:[%s16051_s1 + $0x1150] sm:$0xff]  ;;  %v577_v59 = vld [vmem:[%s16051_s1 + $0x1118] sm:$0xff] }
 0x18f   :  { %7573 = vmatprep.subr.bf16.mxu0 %v10596_v30  ;;  %7778 = vmatprep.subr.bf16.mxu1 %v10598_v31  ;;  %v585_v30 = vld [vmem:[%s16051_s1 + $0x1158] sm:$0xff]  ;;  %v10691_v31 = vcombine.low %v560_v18, %v568_v19  ;;  %v10708_v35 = vcombine.high %v576_v27, %v584_v28 }
 0x190   :  { %v10710_v36 = vcombine.high %v577_v59, %v585_v30  ;;  %v10709_v42 = vcombine.low %v577_v59, %v585_v30  ;;  %v688_v30 = vld [vmem:[%s16051_s1 + $0x1490] sm:$0xff] }
 0x192   :  { %7574 = vmatpush1.bf16.msra.mxu0 %v10595_v53  ;;  %7779 = vmatpush1.bf16.msra.mxu1 %v10597_v38  ;;  %v600_v53 = vld [vmem:[%s16051_s1 + $0x11d0] sm:$0xff]  ;;  %v593_v38 = vld [vmem:[%s16051_s1 + $0x1198] sm:$0xff] }
 0x193   :  { %7575 = vmatprep.subr.bf16.mxu0 %v10612_v39  ;;  %7780 = vmatprep.subr.bf16.mxu1 %v10614_v41  ;;  %v601_v39 = vld [vmem:[%s16051_s1 + $0x11d8] sm:$0xff]  ;;  %v10707_v41 = vcombine.low %v576_v27, %v584_v28  ;;  %v10724_v44 = vcombine.high %v592_v37, %v600_v53 }
 0x194   :  { %v10726_v45 = vcombine.high %v593_v38, %v601_v39  ;;  %v10725_v52 = vcombine.low %v593_v38, %v601_v39  ;;  %v704_v39 = vld [vmem:[%s16051_s1 + $0x1510] sm:$0xff] }
 0x196   :  { %7576 = vmatpush1.bf16.msra.mxu0 %v10611_v47  ;;  %7781 = vmatpush1.bf16.msra.mxu1 %v10613_v48  ;;  %v616_v47 = vld [vmem:[%s16051_s1 + $0x1250] sm:$0xff]  ;;  %v609_v48 = vld [vmem:[%s16051_s1 + $0x1218] sm:$0xff] }
 0x197   :  { %7577 = vmatprep.subr.bf16.mxu0 %v10628_v49  ;;  %7782 = vmatprep.subr.bf16.mxu1 %v10630_v51  ;;  %v617_v49 = vld [vmem:[%s16051_s1 + $0x1258] sm:$0xff]  ;;  %v10723_v51 = vcombine.low %v592_v37, %v600_v53  ;;  %v10740_v54 = vcombine.high %v608_v46, %v616_v47 }
 0x198   :  { %v10742_v55 = vcombine.high %v609_v48, %v617_v49  ;;  %v10741_v0 = vcombine.low %v609_v48, %v617_v49  ;;  %v720_v49 = vld [vmem:[%s16051_s1 + $0x1590] sm:$0xff] }
 0x19a   :  { %7578 = vmatpush1.bf16.msra.mxu0 %v10627_v57  ;;  %7783 = vmatpush1.bf16.msra.mxu1 %v10629_v58  ;;  %v632_v57 = vld [vmem:[%s16051_s1 + $0x12d0] sm:$0xff]  ;;  %v625_v58 = vld [vmem:[%s16051_s1 + $0x1298] sm:$0xff] }
 0x19b   :  { %7579 = vmatprep.subr.bf16.mxu0 %v10644_v60  ;;  %7784 = vmatprep.subr.bf16.mxu1 %v10646_v62  ;;  %v633_v60 = vld [vmem:[%s16051_s1 + $0x12d8] sm:$0xff]  ;;  %v10739_v62 = vcombine.low %v608_v46, %v616_v47  ;;  %v10756_v1 = vcombine.high %v624_v56, %v632_v57 }
 0x19c   :  { %v10758_v2 = vcombine.high %v625_v58, %v633_v60  ;;  %v10757_v8 = vcombine.low %v625_v58, %v633_v60  ;;  %v736_v60 = vld [vmem:[%s16051_s1 + $0x1610] sm:$0xff] }
 0x19e   :  { %7580 = vmatpush1.bf16.msra.mxu0 %v10643_v4  ;;  %7785 = vmatpush1.bf16.msra.mxu1 %v10645_v5  ;;  %v648_v4 = vld [vmem:[%s16051_s1 + $0x1350] sm:$0xff]  ;;  %v641_v5 = vld [vmem:[%s16051_s1 + $0x1318] sm:$0xff] }
 0x19f   :  { %7581 = vmatprep.subr.bf16.mxu0 %v10660_v6  ;;  %7786 = vmatprep.subr.bf16.mxu1 %v10662_v7  ;;  %v649_v6 = vld [vmem:[%s16051_s1 + $0x1358] sm:$0xff]  ;;  %v10755_v7 = vcombine.low %v624_v56, %v632_v57  ;;  %v10772_v10 = vcombine.high %v640_v3, %v648_v4 }
 0x1a0   :  { %v10774_v11 = vcombine.high %v641_v5, %v649_v6  ;;  %v10773_v18 = vcombine.low %v641_v5, %v649_v6  ;;  %v752_v6 = vld [vmem:[%s16051_s1 + $0x1690] sm:$0xff] }
 0x1a2   :  { %7582 = vmatpush1.bf16.msra.mxu0 %v10659_v13  ;;  %7787 = vmatpush1.bf16.msra.mxu1 %v10661_v14  ;;  %v664_v13 = vld [vmem:[%s16051_s1 + $0x13d0] sm:$0xff]  ;;  %v657_v14 = vld [vmem:[%s16051_s1 + $0x1398] sm:$0xff] }
 0x1a3   :  { %7592 = vmatprep.subr.bf16.mxu0 %v10676_v15  ;;  %7797 = vmatprep.subr.bf16.mxu1 %v10678_v17  ;;  %v665_v15 = vld [vmem:[%s16051_s1 + $0x13d8] sm:$0xff]  ;;  %v10771_v17 = vcombine.low %v640_v3, %v648_v4  ;;  %v10788_v19 = vcombine.high %v656_v12, %v664_v13 }
 0x1a4   :  { %v10790_v20 = vcombine.high %v657_v14, %v665_v15  ;;  %v10789_v27 = vcombine.low %v657_v14, %v665_v15  ;;  %v768_v15 = vld [vmem:[%s16051_s1 + $0x1710] sm:$0xff] }
 0x1a5   :  { %7584 = vmatmul.mubr.bf16.vlgmr.msra.gmra.mrb[4].mxu0 %v12406_v40  ;;  %7789 = vmatmul.mubr.bf16.vlgmr.msra.gmra.mrb[4].mxu1 %v12406_v40 }
 0x1a6   :  { %7593 = vmatpush1.bf16.msra.mxu0 %v10675_v22  ;;  %7798 = vmatpush1.bf16.msra.mxu1 %v10677_v24  ;;  %v680_v22 = vld [vmem:[%s16051_s1 + $0x1450] sm:$0xff]  ;;  %v673_v24 = vld [vmem:[%s16051_s1 + $0x1418] sm:$0xff] }
 0x1a7   :  { %7594 = vmatprep.subr.bf16.mxu0 %v10692_v25  ;;  %7799 = vmatprep.subr.bf16.mxu1 %v10694_v26  ;;  %v681_v25 = vld [vmem:[%s16051_s1 + $0x1458] sm:$0xff]  ;;  %v10787_v26 = vcombine.low %v656_v12, %v664_v13  ;;  %v10804_v28 = vcombine.high %v672_v21, %v680_v22 }
 0x1a8   :  { %7624 = vmatprep.mubr.bf16.mxu0 %v12421_v50  ;;  %7829 = vmatprep.mubr.bf16.mxu1 %v12421_v50  ;;  %v10806_v59 = vcombine.high %v673_v24, %v681_v25  ;;  %v10805_v37 = vcombine.low %v673_v24, %v681_v25  ;;  %v784_v25 = vld [vmem:[%s16051_s1 + $0x1790] sm:$0xff] }
 0x1aa   :  { %7595 = vmatpush1.bf16.msra.mxu0 %v10691_v31  ;;  %7800 = vmatpush1.bf16.msra.mxu1 %v10693_v32  ;;  %v696_v31 = vld [vmem:[%s16051_s1 + $0x14d0] sm:$0xff]  ;;  %v689_v32 = vld [vmem:[%s16051_s1 + $0x1498] sm:$0xff] }
 0x1ab   :  { %7596 = vmatprep.subr.bf16.mxu0 %v10708_v35  ;;  %7801 = vmatprep.subr.bf16.mxu1 %v10710_v36  ;;  %v697_v35 = vld [vmem:[%s16051_s1 + $0x14d8] sm:$0xff]  ;;  %v10803_v36 = vcombine.low %v672_v21, %v680_v22  ;;  %v10820_v53 = vcombine.high %v688_v30, %v696_v31 }
 0x1ac   :  { %v10822_v38 = vcombine.high %v689_v32, %v697_v35  ;;  %v10821_v46 = vcombine.low %v689_v32, %v697_v35  ;;  %v800_v35 = vld [vmem:[%s16051_s1 + $0x1810] sm:$0xff] }
 0x1ae   :  { %7597 = vmatpush1.bf16.msra.mxu0 %v10707_v41  ;;  %7802 = vmatpush1.bf16.msra.mxu1 %v10709_v42  ;;  %v712_v41 = vld [vmem:[%s16051_s1 + $0x1550] sm:$0xff]  ;;  %v705_v42 = vld [vmem:[%s16051_s1 + $0x1518] sm:$0xff] }
 0x1af   :  { %7598 = vmatprep.subr.bf16.mxu0 %v10724_v44  ;;  %7803 = vmatprep.subr.bf16.mxu1 %v10726_v45  ;;  %v713_v44 = vld [vmem:[%s16051_s1 + $0x1558] sm:$0xff]  ;;  %v10819_v45 = vcombine.low %v688_v30, %v696_v31  ;;  %v10836_v47 = vcombine.high %v704_v39, %v712_v41 }
 0x1b0   :  { %v10838_v48 = vcombine.high %v705_v42, %v713_v44  ;;  %v10837_v56 = vcombine.low %v705_v42, %v713_v44  ;;  %v816_v44 = vld [vmem:[%s16051_s1 + $0x1890] sm:$0xff] }
 0x1b2   :  { %7599 = vmatpush1.bf16.msra.mxu0 %v10723_v51  ;;  %7804 = vmatpush1.bf16.msra.mxu1 %v10725_v52  ;;  %v728_v51 = vld [vmem:[%s16051_s1 + $0x15d0] sm:$0xff]  ;;  %v721_v52 = vld [vmem:[%s16051_s1 + $0x1598] sm:$0xff] }
 0x1b3   :  { %7600 = vmatprep.subr.bf16.mxu0 %v10740_v54  ;;  %7805 = vmatprep.subr.bf16.mxu1 %v10742_v55  ;;  %v729_v54 = vld [vmem:[%s16051_s1 + $0x15d8] sm:$0xff]  ;;  %v10835_v55 = vcombine.low %v704_v39, %v712_v41  ;;  %v10852_v57 = vcombine.high %v720_v49, %v728_v51 }
 0x1b4   :  { %v10854_v58 = vcombine.high %v721_v52, %v729_v54  ;;  %v10853_v3 = vcombine.low %v721_v52, %v729_v54  ;;  %v832_v54 = vld [vmem:[%s16051_s1 + $0x1910] sm:$0xff] }
 0x1b6   :  { %7601 = vmatpush1.bf16.msra.mxu0 %v10739_v62  ;;  %7806 = vmatpush1.bf16.msra.mxu1 %v10741_v0  ;;  %v744_v62 = vld [vmem:[%s16051_s1 + $0x1650] sm:$0xff]  ;;  %v737_v0 = vld [vmem:[%s16051_s1 + $0x1618] sm:$0xff] }
 0x1b7   :  { %7602 = vmatprep.subr.bf16.mxu0 %v10756_v1  ;;  %7807 = vmatprep.subr.bf16.mxu1 %v10758_v2  ;;  %v745_v1 = vld [vmem:[%s16051_s1 + $0x1658] sm:$0xff]  ;;  %v10851_v2 = vcombine.low %v720_v49, %v728_v51  ;;  %v10868_v4 = vcombine.high %v736_v60, %v744_v62 }
 0x1b8   :  { %v10870_v5 = vcombine.high %v737_v0, %v745_v1  ;;  %v10869_v12 = vcombine.low %v737_v0, %v745_v1  ;;  %v848_v1 = vld [vmem:[%s16051_s1 + $0x1990] sm:$0xff] }
 0x1ba   :  { %7603 = vmatpush1.bf16.msra.mxu0 %v10755_v7  ;;  %7808 = vmatpush1.bf16.msra.mxu1 %v10757_v8  ;;  %v760_v7 = vld [vmem:[%s16051_s1 + $0x16d0] sm:$0xff]  ;;  %v753_v8 = vld [vmem:[%s16051_s1 + $0x1698] sm:$0xff] }
 0x1bb   :  { %7604 = vmatprep.subr.bf16.mxu0 %v10772_v10  ;;  %7809 = vmatprep.subr.bf16.mxu1 %v10774_v11  ;;  %v761_v10 = vld [vmem:[%s16051_s1 + $0x16d8] sm:$0xff]  ;;  %v10867_v11 = vcombine.low %v736_v60, %v744_v62  ;;  %v10884_v13 = vcombine.high %v752_v6, %v760_v7 }
 0x1bc   :  { %v10886_v14 = vcombine.high %v753_v8, %v761_v10  ;;  %v10885_v21 = vcombine.low %v753_v8, %v761_v10  ;;  %v864_v10 = vld [vmem:[%s16051_s1 + $0x1a10] sm:$0xff] }
 0x1be   :  { %7605 = vmatpush1.bf16.msra.mxu0 %v10771_v17  ;;  %7810 = vmatpush1.bf16.msra.mxu1 %v10773_v18  ;;  %v776_v17 = vld [vmem:[%s16051_s1 + $0x1750] sm:$0xff]  ;;  %v769_v18 = vld [vmem:[%s16051_s1 + $0x1718] sm:$0xff] }
 0x1bf   :  { %7606 = vmatprep.subr.bf16.mxu0 %v10788_v19  ;;  %7811 = vmatprep.subr.bf16.mxu1 %v10790_v20  ;;  %v777_v19 = vld [vmem:[%s16051_s1 + $0x1758] sm:$0xff]  ;;  %v10883_v20 = vcombine.low %v752_v6, %v760_v7  ;;  %v10900_v22 = vcombine.high %v768_v15, %v776_v17 }
 0x1c0   :  { %v10902_v24 = vcombine.high %v769_v18, %v777_v19  ;;  %v10901_v30 = vcombine.low %v769_v18, %v777_v19  ;;  %v880_v19 = vld [vmem:[%s16051_s1 + $0x1a90] sm:$0xff] }
 0x1c2   :  { %7607 = vmatpush1.bf16.msra.mxu0 %v10787_v26  ;;  %7812 = vmatpush1.bf16.msra.mxu1 %v10789_v27  ;;  %v792_v26 = vld [vmem:[%s16051_s1 + $0x17d0] sm:$0xff]  ;;  %v785_v27 = vld [vmem:[%s16051_s1 + $0x1798] sm:$0xff] }
 0x1c3   :  { %7608 = vmatprep.subr.bf16.mxu0 %v10804_v28  ;;  %7813 = vmatprep.subr.bf16.mxu1 %v10806_v59  ;;  %v793_v28 = vld [vmem:[%s16051_s1 + $0x17d8] sm:$0xff]  ;;  %v10899_v59 = vcombine.low %v768_v15, %v776_v17  ;;  %v10916_v31 = vcombine.high %v784_v25, %v792_v26 }
 0x1c4   :  { %v10918_v32 = vcombine.high %v785_v27, %v793_v28  ;;  %v10917_v39 = vcombine.low %v785_v27, %v793_v28  ;;  %v896_v28 = vld [vmem:[%s16051_s1 + $0x1b10] sm:$0xff] }
 0x1c6   :  { %7609 = vmatpush1.bf16.msra.mxu0 %v10803_v36  ;;  %7814 = vmatpush1.bf16.msra.mxu1 %v10805_v37  ;;  %v808_v36 = vld [vmem:[%s16051_s1 + $0x1850] sm:$0xff]  ;;  %v801_v37 = vld [vmem:[%s16051_s1 + $0x1818] sm:$0xff] }
 0x1c7   :  { %7610 = vmatprep.subr.bf16.mxu0 %v10820_v53  ;;  %7815 = vmatprep.subr.bf16.mxu1 %v10822_v38  ;;  %v809_v53 = vld [vmem:[%s16051_s1 + $0x1858] sm:$0xff]  ;;  %v10915_v38 = vcombine.low %v784_v25, %v792_v26  ;;  %v10932_v41 = vcombine.high %v800_v35, %v808_v36 }
 0x1c8   :  { %v10934_v42 = vcombine.high %v801_v37, %v809_v53  ;;  %v10933_v49 = vcombine.low %v801_v37, %v809_v53 }
 0x1ca   :  { %7611 = vmatpush1.bf16.msra.mxu0 %v10819_v45  ;;  %7816 = vmatpush1.bf16.msra.mxu1 %v10821_v46  ;;  %v824_v45 = vld [vmem:[%s16051_s1 + $0x18d0] sm:$0xff]  ;;  %v817_v46 = vld [vmem:[%s16051_s1 + $0x1898] sm:$0xff] }
 0x1cb   :  { %7612 = vmatprep.subr.bf16.mxu0 %v10836_v47  ;;  %7817 = vmatprep.subr.bf16.mxu1 %v10838_v48  ;;  %v825_v47 = vld [vmem:[%s16051_s1 + $0x18d8] sm:$0xff]  ;;  %v10931_v48 = vcombine.low %v800_v35, %v808_v36  ;;  %v10948_v51 = vcombine.high %v816_v44, %v824_v45 }
 0x1cc   :  { %v10950_v52 = vcombine.high %v817_v46, %v825_v47  ;;  %v10949_v60 = vcombine.low %v817_v46, %v825_v47 }
 0x1ce   :  { %7613 = vmatpush1.bf16.msra.mxu0 %v10835_v55  ;;  %7818 = vmatpush1.bf16.msra.mxu1 %v10837_v56  ;;  %v840_v55 = vld [vmem:[%s16051_s1 + $0x1950] sm:$0xff]  ;;  %v833_v56 = vld [vmem:[%s16051_s1 + $0x1918] sm:$0xff] }
 0x1cf   :  { %7614 = vmatprep.subr.bf16.mxu0 %v10852_v57  ;;  %7819 = vmatprep.subr.bf16.mxu1 %v10854_v58  ;;  %v841_v57 = vld [vmem:[%s16051_s1 + $0x1958] sm:$0xff]  ;;  %v10947_v58 = vcombine.low %v816_v44, %v824_v45  ;;  %v10964_v62 = vcombine.high %v832_v54, %v840_v55 }
 0x1d0   :  { %v10966_v0 = vcombine.high %v833_v56, %v841_v57  ;;  %v10965_v6 = vcombine.low %v833_v56, %v841_v57  ;;  %v913_v44 = vld [vmem:[%s16051_s1 + $0x1b98] sm:$0xff]  ;;  %v928_v57 = vld [vmem:[%s16051_s1 + $0x1c10] sm:$0xff] }
 0x1d1   :  { %v921_v45 = vld [vmem:[%s16051_s1 + $0x1bd8] sm:$0xff] }
 0x1d2   :  { %7615 = vmatpush1.bf16.msra.mxu0 %v10851_v2  ;;  %7820 = vmatpush1.bf16.msra.mxu1 %v10853_v3  ;;  %v856_v2 = vld [vmem:[%s16051_s1 + $0x19d0] sm:$0xff]  ;;  %v849_v3 = vld [vmem:[%s16051_s1 + $0x1998] sm:$0xff]  ;;  %v11046_v56 = vcombine.high %v913_v44, %v921_v45 }
 0x1d3   :  { %7616 = vmatprep.subr.bf16.mxu0 %v10868_v4  ;;  %7821 = vmatprep.subr.bf16.mxu1 %v10870_v5  ;;  %v857_v4 = vld [vmem:[%s16051_s1 + $0x19d8] sm:$0xff]  ;;  %v10963_v5 = vcombine.low %v832_v54, %v840_v55  ;;  %v10980_v7 = vcombine.high %v848_v1, %v856_v2 }
 0x1d4   :  { %v10982_v8 = vcombine.high %v849_v3, %v857_v4  ;;  %v10981_v15 = vcombine.low %v849_v3, %v857_v4  ;;  %v944_v4 = vld [vmem:[%s16051_s1 + $0x1c90] sm:$0xff] }
 0x1d6   :  { %7617 = vmatpush1.bf16.msra.mxu0 %v10867_v11  ;;  %7822 = vmatpush1.bf16.msra.mxu1 %v10869_v12  ;;  %v872_v11 = vld [vmem:[%s16051_s1 + $0x1a50] sm:$0xff]  ;;  %v865_v12 = vld [vmem:[%s16051_s1 + $0x1a18] sm:$0xff] }
 0x1d7   :  { %7618 = vmatprep.subr.bf16.mxu0 %v10884_v13  ;;  %7823 = vmatprep.subr.bf16.mxu1 %v10886_v14  ;;  %v873_v13 = vld [vmem:[%s16051_s1 + $0x1a58] sm:$0xff]  ;;  %v10979_v14 = vcombine.low %v848_v1, %v856_v2  ;;  %v10996_v17 = vcombine.high %v864_v10, %v872_v11  ;;  %v11045_v1 = vcombine.low %v913_v44, %v921_v45  ;;  %v1008_v45 = vld [vmem:[%s16051_s1 + $0x1e90] sm:$0xff] }
 0x1d8   :  { %v10998_v18 = vcombine.high %v865_v12, %v873_v13  ;;  %v10997_v25 = vcombine.low %v865_v12, %v873_v13  ;;  %v960_v13 = vld [vmem:[%s16051_s1 + $0x1d10] sm:$0xff] }
 0x1da   :  { %7619 = vmatpush1.bf16.msra.mxu0 %v10883_v20  ;;  %7824 = vmatpush1.bf16.msra.mxu1 %v10885_v21  ;;  %v888_v20 = vld [vmem:[%s16051_s1 + $0x1ad0] sm:$0xff]  ;;  %v881_v21 = vld [vmem:[%s16051_s1 + $0x1a98] sm:$0xff] }
 0x1db   :  { %7620 = vmatprep.subr.bf16.mxu0 %v10900_v22  ;;  %7825 = vmatprep.subr.bf16.mxu1 %v10902_v24  ;;  %v889_v22 = vld [vmem:[%s16051_s1 + $0x1ad8] sm:$0xff]  ;;  %v10995_v24 = vcombine.low %v864_v10, %v872_v11  ;;  %v11012_v26 = vcombine.high %v880_v19, %v888_v20 }
 0x1dc   :  { %v11014_v27 = vcombine.high %v881_v21, %v889_v22  ;;  %v11013_v35 = vcombine.low %v881_v21, %v889_v22  ;;  %v976_v22 = vld [vmem:[%s16051_s1 + $0x1d90] sm:$0xff] }
 0x1de   :  { %7621 = vmatpush1.bf16.msra.mxu0 %v10899_v59  ;;  %7826 = vmatpush1.bf16.msra.mxu1 %v10901_v30  ;;  %v904_v59 = vld [vmem:[%s16051_s1 + $0x1b50] sm:$0xff]  ;;  %v897_v30 = vld [vmem:[%s16051_s1 + $0x1b18] sm:$0xff] }
 0x1df   :  { %7622 = vmatprep.subr.bf16.mxu0 %v10916_v31  ;;  %7827 = vmatprep.subr.bf16.mxu1 %v10918_v32  ;;  %v905_v31 = vld [vmem:[%s16051_s1 + $0x1b58] sm:$0xff]  ;;  %v11011_v32 = vcombine.low %v880_v19, %v888_v20  ;;  %v11028_v36 = vcombine.high %v896_v28, %v904_v59 }
 0x1e0   :  { %v11030_v53 = vcombine.high %v897_v30, %v905_v31 }
 0x1e2   :  { %7623 = vmatpush1.bf16.msra.mxu0 %v10915_v38  ;;  %7828 = vmatpush1.bf16.msra.mxu1 %v10917_v39  ;;  %v912_v38 = vld [vmem:[%s16051_s1 + $0x1b90] sm:$0xff] }
 0x1e3   :  { %7633 = vmatprep.subr.bf16.mxu0 %v10932_v41  ;;  %7838 = vmatprep.subr.bf16.mxu1 %v10934_v42  ;;  %v920_v39 = vld [vmem:[%s16051_s1 + $0x1bd0] sm:$0xff] }
 0x1e4   :  { %v11044_v54 = vcombine.high %v912_v38, %v920_v39 }
 0x1e5   :  { %7625 = vmatmul.mubr.bf16.vlgmr.msra.gmra.mrb[4].mxu0 %v12609_v61  ;;  %7830 = vmatmul.mubr.bf16.vlgmr.msra.gmra.mrb[4].mxu1 %v12609_v61 }
 0x1e6   :  { %7634 = vmatpush1.bf16.msra.mxu0 %v10931_v48  ;;  %7839 = vmatpush1.bf16.msra.mxu1 %v10933_v49  ;;  %v11027_v48 = vcombine.low %v896_v28, %v904_v59 }
 0x1e7   :  { %7635 = vmatprep.subr.bf16.mxu0 %v10948_v51  ;;  %7840 = vmatprep.subr.bf16.mxu1 %v10950_v52  ;;  %v11029_v52 = vcombine.low %v897_v30, %v905_v31  ;;  %v992_v31 = vld [vmem:[%s16051_s1 + $0x1e10] sm:$0xff] }
 0x1e8   :  { %7665 = vmatprep.mubr.bf16.mxu0 %v12619_v63  ;;  %7870 = vmatprep.mubr.bf16.mxu1 %v12619_v63 }
 0x1ea   :  { %7636 = vmatpush1.bf16.msra.mxu0 %v10947_v58  ;;  %7841 = vmatpush1.bf16.msra.mxu1 %v10949_v60  ;;  %v936_v58 = vld [vmem:[%s16051_s1 + $0x1c50] sm:$0xff]  ;;  %v929_v60 = vld [vmem:[%s16051_s1 + $0x1c18] sm:$0xff] }
 0x1eb   :  { %7637 = vmatprep.subr.bf16.mxu0 %v10964_v62  ;;  %7842 = vmatprep.subr.bf16.mxu1 %v10966_v0  ;;  %v937_v62 = vld [vmem:[%s16051_s1 + $0x1c58] sm:$0xff]  ;;  %v11043_v0 = vcombine.low %v912_v38, %v920_v39  ;;  %v11060_v2 = vcombine.high %v928_v57, %v936_v58 }
 0x1ec   :  { %v11062_v3 = vcombine.high %v929_v60, %v937_v62  ;;  %v11061_v10 = vcombine.low %v929_v60, %v937_v62  ;;  %v1033_v60 = vld [vmem:[%s16051_s1 + $0x1f58] sm:$0xff] }
 0x1ee   :  { %7638 = vmatpush1.bf16.msra.mxu0 %v10963_v5  ;;  %7843 = vmatpush1.bf16.msra.mxu1 %v10965_v6  ;;  %v952_v5 = vld [vmem:[%s16051_s1 + $0x1cd0] sm:$0xff]  ;;  %v945_v6 = vld [vmem:[%s16051_s1 + $0x1c98] sm:$0xff] }
 0x1ef   :  { %7639 = vmatprep.subr.bf16.mxu0 %v10980_v7  ;;  %7844 = vmatprep.subr.bf16.mxu1 %v10982_v8  ;;  %v953_v7 = vld [vmem:[%s16051_s1 + $0x1cd8] sm:$0xff]  ;;  %v11059_v8 = vcombine.low %v928_v57, %v936_v58  ;;  %v11076_v11 = vcombine.high %v944_v4, %v952_v5  ;;  %v1032_v57 = vld [vmem:[%s16051_s1 + $0x1f50] sm:$0xff] }
 0x1f0   :  { %v11078_v12 = vcombine.high %v945_v6, %v953_v7  ;;  %v11077_v19 = vcombine.low %v945_v6, %v953_v7  ;;  %v1025_v58 = vld [vmem:[%s16051_s1 + $0x1f18] sm:$0xff] }
 0x1f1   :  { %v1049_v6 = vld [vmem:[%s16051_s1 + $0x1fd8] sm:$0xff] }
 0x1f2   :  { %7640 = vmatpush1.bf16.msra.mxu0 %v10979_v14  ;;  %7845 = vmatpush1.bf16.msra.mxu1 %v10981_v15  ;;  %v968_v14 = vld [vmem:[%s16051_s1 + $0x1d50] sm:$0xff]  ;;  %v961_v15 = vld [vmem:[%s16051_s1 + $0x1d18] sm:$0xff] }
 0x1f3   :  { %7641 = vmatprep.subr.bf16.mxu0 %v10996_v17  ;;  %7846 = vmatprep.subr.bf16.mxu1 %v10998_v18  ;;  %v969_v17 = vld [vmem:[%s16051_s1 + $0x1d58] sm:$0xff]  ;;  %v11075_v18 = vcombine.low %v944_v4, %v952_v5  ;;  %v11092_v20 = vcombine.high %v960_v13, %v968_v14  ;;  %v1048_v4 = vld [vmem:[%s16051_s1 + $0x1fd0] sm:$0xff] }
 0x1f4   :  { %v11094_v21 = vcombine.high %v961_v15, %v969_v17  ;;  %v11093_v28 = vcombine.low %v961_v15, %v969_v17  ;;  %v1041_v5 = vld [vmem:[%s16051_s1 + $0x1f98] sm:$0xff] }
 0x1f5   :  { %v1065_v15 = vld [vmem:[%s16051_s1 + $0x2058] sm:$0xff] }
 0x1f6   :  { %7642 = vmatpush1.bf16.msra.mxu0 %v10995_v24  ;;  %7847 = vmatpush1.bf16.msra.mxu1 %v10997_v25  ;;  %v984_v24 = vld [vmem:[%s16051_s1 + $0x1dd0] sm:$0xff]  ;;  %v977_v25 = vld [vmem:[%s16051_s1 + $0x1d98] sm:$0xff] }
 0x1f7   :  { %7643 = vmatprep.subr.bf16.mxu0 %v11012_v26  ;;  %7848 = vmatprep.subr.bf16.mxu1 %v11014_v27  ;;  %v985_v26 = vld [vmem:[%s16051_s1 + $0x1dd8] sm:$0xff]  ;;  %v11091_v27 = vcombine.low %v960_v13, %v968_v14  ;;  %v11108_v59 = vcombine.high %v976_v22, %v984_v24  ;;  %v1064_v13 = vld [vmem:[%s16051_s1 + $0x2050] sm:$0xff] }
 0x1f8   :  { %v13573_v37 = vpop.f32.mrb[0].mxu0  ;;  %v13581_v41 = vpop.f32.mrb[0].mxu1  ;;  %v11110_v30 = vcombine.high %v977_v25, %v985_v26  ;;  %v11109_v38 = vcombine.low %v977_v25, %v985_v26  ;;  %v1057_v14 = vld [vmem:[%s16051_s1 + $0x2018] sm:$0xff] }
 0x1f9   :  { %v13583_v42 = vpop.f32.mrb[1].mxu0  ;;  %v13591_v46 = vpop.f32.mrb[1].mxu1  ;;  %v1081_v25 = vld [vmem:[%s16051_s1 + $0x20d8] sm:$0xff] }
 0x1fa   :  { %v7302_v47 = vpop.f32.mrb[2].mxu0  ;;  %7644 = vmatpush1.bf16.msra.mxu0 %v11011_v32  ;;  %v7507_v49 = vpop.f32.mrb[2].mxu1  ;;  %7849 = vmatpush1.bf16.msra.mxu1 %v11013_v35  ;;  %v1000_v32 = vld [vmem:[%s16051_s1 + $0x1e50] sm:$0xff]  ;;  %v993_v35 = vld [vmem:[%s16051_s1 + $0x1e18] sm:$0xff] }
 0x1fb   :  { %v7303_v51 = vpop.f32.mrb[3].mxu0  ;;  %7645 = vmatprep.subr.bf16.mxu0 %v11028_v36  ;;  %v7508_v55 = vpop.f32.mrb[3].mxu1  ;;  %7850 = vmatprep.subr.bf16.mxu1 %v11030_v53  ;;  %v1001_v36 = vld [vmem:[%s16051_s1 + $0x1e58] sm:$0xff]  ;;  %v11107_v53 = vcombine.low %v976_v22, %v984_v24  ;;  %v11124_v39 = vcombine.high %v992_v31, %v1000_v32  ;;  %v1016_v47 = vld [vmem:[%s16051_s1 + $0x1ed0] sm:$0xff] }
 0x1fc   :  { %v11126_v44 = vcombine.high %v993_v35, %v1001_v36  ;;  %v1017_v49 = vld [vmem:[%s16051_s1 + $0x1ed8] sm:$0xff]  ;;  %v11123_v51 = vcombine.low %v992_v31, %v1000_v32  ;;  %v11139_v62 = vcombine.low %v1008_v45, %v1016_v47  ;;  %v1080_v22 = vld [vmem:[%s16051_s1 + $0x20d0] sm:$0xff] }
 0x1fd   :  { %v1073_v24 = vld [vmem:[%s16051_s1 + $0x2098] sm:$0xff]  ;;  %v1096_v31 = vld [vmem:[%s16051_s1 + $0x2150] sm:$0xff] }
 0x1fe   :  { %7646 = vmatpush1.bf16.msra.mxu0 %v11027_v48  ;;  %7851 = vmatpush1.bf16.msra.mxu1 %v11029_v52  ;;  %v1009_v48 = vld [vmem:[%s16051_s1 + $0x1e98] sm:$0xff]  ;;  %v11125_v52 = vcombine.low %v993_v35, %v1001_v36 }
 0x1ff   :  { %7647 = vmatprep.subr.bf16.mxu0 %v11044_v54  ;;  %7852 = vmatprep.subr.bf16.mxu1 %v11046_v56  ;;  %v11140_v54 = vcombine.high %v1008_v45, %v1016_v47  ;;  %v11142_v55 = vcombine.high %v1009_v48, %v1017_v49  ;;  %v1024_v56 = vld [vmem:[%s16051_s1 + $0x1f10] sm:$0xff]  ;;  %v1089_v32 = vld [vmem:[%s16051_s1 + $0x2118] sm:$0xff] }
 0x200   :  { %v11155_v7 = vcombine.low %v1024_v56, %v1032_v57  ;;  %v1097_v35 = vld [vmem:[%s16051_s1 + $0x2158] sm:$0xff]  ;;  %v1112_v45 = vld [vmem:[%s16051_s1 + $0x21d0] sm:$0xff] }
 0x201   :  { %v1105_v47 = vld [vmem:[%s16051_s1 + $0x2198] sm:$0xff] }
 0x202   :  { %7648 = vmatpush1.bf16.msra.mxu0 %v11043_v0  ;;  %7853 = vmatpush1.bf16.msra.mxu1 %v11045_v1  ;;  %v11141_v0 = vcombine.low %v1009_v48, %v1017_v49  ;;  %v11156_v1 = vcombine.high %v1024_v56, %v1032_v57  ;;  %v1113_v48 = vld [vmem:[%s16051_s1 + $0x21d8] sm:$0xff]  ;;  %v1128_v56 = vld [vmem:[%s16051_s1 + $0x2250] sm:$0xff] }
 0x203   :  { %7649 = vmatprep.subr.bf16.mxu0 %v11060_v2  ;;  %7854 = vmatprep.subr.bf16.mxu1 %v11062_v3  ;;  %v11158_v2 = vcombine.high %v1025_v58, %v1033_v60  ;;  %v1040_v3 = vld [vmem:[%s16051_s1 + $0x1f90] sm:$0xff]  ;;  %v1121_v57 = vld [vmem:[%s16051_s1 + $0x2218] sm:$0xff] }
 0x204   :  { %v11171_v17 = vcombine.low %v1040_v3, %v1048_v4 }
 0x206   :  { %7650 = vmatpush1.bf16.msra.mxu0 %v11059_v8  ;;  %7855 = vmatpush1.bf16.msra.mxu1 %v11061_v10  ;;  %v11157_v8 = vcombine.low %v1025_v58, %v1033_v60  ;;  %v11172_v10 = vcombine.high %v1040_v3, %v1048_v4  ;;  %v1129_v58 = vld [vmem:[%s16051_s1 + $0x2258] sm:$0xff]  ;;  %v1144_v3 = vld [vmem:[%s16051_s1 + $0x22d0] sm:$0xff] }
 0x207   :  { %7651 = vmatprep.subr.bf16.mxu0 %v11076_v11  ;;  %7856 = vmatprep.subr.bf16.mxu1 %v11078_v12  ;;  %v11174_v11 = vcombine.high %v1041_v5, %v1049_v6  ;;  %v1056_v12 = vld [vmem:[%s16051_s1 + $0x2010] sm:$0xff]  ;;  %v1137_v4 = vld [vmem:[%s16051_s1 + $0x2298] sm:$0xff] }
 0x208   :  { %v11187_v26 = vcombine.low %v1056_v12, %v1064_v13 }
 0x20a   :  { %7652 = vmatpush1.bf16.msra.mxu0 %v11075_v18  ;;  %7857 = vmatpush1.bf16.msra.mxu1 %v11077_v19  ;;  %v11173_v18 = vcombine.low %v1041_v5, %v1049_v6  ;;  %v11188_v19 = vcombine.high %v1056_v12, %v1064_v13  ;;  %v1145_v5 = vld [vmem:[%s16051_s1 + $0x22d8] sm:$0xff]  ;;  %v1160_v12 = vld [vmem:[%s16051_s1 + $0x2350] sm:$0xff] }
 0x20b   :  { %7653 = vmatprep.subr.bf16.mxu0 %v11092_v20  ;;  %7858 = vmatprep.subr.bf16.mxu1 %v11094_v21  ;;  %v11190_v20 = vcombine.high %v1057_v14, %v1065_v15  ;;  %v1072_v21 = vld [vmem:[%s16051_s1 + $0x2090] sm:$0xff]  ;;  %v1153_v13 = vld [vmem:[%s16051_s1 + $0x2318] sm:$0xff] }
 0x20c   :  { %v11203_v36 = vcombine.low %v1072_v21, %v1080_v22 }
 0x20e   :  { %7654 = vmatpush1.bf16.msra.mxu0 %v11091_v27  ;;  %7859 = vmatpush1.bf16.msra.mxu1 %v11093_v28  ;;  %v11189_v27 = vcombine.low %v1057_v14, %v1065_v15  ;;  %v11204_v28 = vcombine.high %v1072_v21, %v1080_v22  ;;  %v1161_v14 = vld [vmem:[%s16051_s1 + $0x2358] sm:$0xff]  ;;  %v1176_v21 = vld [vmem:[%s16051_s1 + $0x23d0] sm:$0xff] }
 0x20f   :  { %7655 = vmatprep.subr.bf16.mxu0 %v11108_v59  ;;  %7860 = vmatprep.subr.bf16.mxu1 %v11110_v30  ;;  %v11206_v59 = vcombine.high %v1073_v24, %v1081_v25  ;;  %v1088_v30 = vld [vmem:[%s16051_s1 + $0x2110] sm:$0xff]  ;;  %v1169_v22 = vld [vmem:[%s16051_s1 + $0x2398] sm:$0xff] }
 0x210   :  { %v11219_v49 = vcombine.low %v1088_v30, %v1096_v31 }
 0x212   :  { %7656 = vmatpush1.bf16.msra.mxu0 %v11107_v53  ;;  %7861 = vmatpush1.bf16.msra.mxu1 %v11109_v38  ;;  %v11205_v53 = vcombine.low %v1073_v24, %v1081_v25  ;;  %v11220_v38 = vcombine.high %v1088_v30, %v1096_v31  ;;  %v1177_v24 = vld [vmem:[%s16051_s1 + $0x23d8] sm:$0xff]  ;;  %v42_v30 = vld [vmem:[%s16051_s1 + $0x60] sm:$0xff]  ;;  %v35_v31 = vld [vmem:[%s16051_s1 + $0x28] sm:$0xff] }
 0x213   :  { %7657 = vmatprep.subr.bf16.mxu0 %v11124_v39  ;;  %7862 = vmatprep.subr.bf16.mxu1 %v11126_v44  ;;  %v11222_v39 = vcombine.high %v1089_v32, %v1097_v35  ;;  %v1104_v44 = vld [vmem:[%s16051_s1 + $0x2190] sm:$0xff] }
 0x214   :  { %v11235_v60 = vcombine.low %v1104_v44, %v1112_v45 }
 0x216   :  { %7658 = vmatpush1.bf16.msra.mxu0 %v11123_v51  ;;  %7863 = vmatpush1.bf16.msra.mxu1 %v11125_v52  ;;  %v11221_v51 = vcombine.low %v1089_v32, %v1097_v35  ;;  %v11236_v52 = vcombine.high %v1104_v44, %v1112_v45  ;;  %v43_v32 = vld [vmem:[%s16051_s1 + $0x68] sm:$0xff]  ;;  %v58_v44 = vld [vmem:[%s16051_s1 + $0xe0] sm:$0xff] }
 0x217   :  { %7659 = vmatprep.subr.bf16.mxu0 %v11140_v54  ;;  %7864 = vmatprep.subr.bf16.mxu1 %v11142_v55  ;;  %v11238_v54 = vcombine.high %v1105_v47, %v1113_v48  ;;  %v1120_v55 = vld [vmem:[%s16051_s1 + $0x2210] sm:$0xff]  ;;  %v51_v45 = vld [vmem:[%s16051_s1 + $0xa8] sm:$0xff] }
 0x218   :  { %v11251_v6 = vcombine.low %v1120_v55, %v1128_v56 }
 0x21a   :  { %7660 = vmatpush1.bf16.msra.mxu0 %v11139_v62  ;;  %7865 = vmatpush1.bf16.msra.mxu1 %v11141_v0  ;;  %v11237_v62 = vcombine.low %v1105_v47, %v1113_v48  ;;  %v11252_v0 = vcombine.high %v1120_v55, %v1128_v56  ;;  %v59_v47 = vld [vmem:[%s16051_s1 + $0xe8] sm:$0xff]  ;;  %v74_v55 = vld [vmem:[%s16051_s1 + $0x160] sm:$0xff] }
 0x21b   :  { %7661 = vmatprep.subr.bf16.mxu0 %v11156_v1  ;;  %7866 = vmatprep.subr.bf16.mxu1 %v11158_v2  ;;  %v11254_v1 = vcombine.high %v1121_v57, %v1129_v58  ;;  %v1136_v2 = vld [vmem:[%s16051_s1 + $0x2290] sm:$0xff]  ;;  %v67_v56 = vld [vmem:[%s16051_s1 + $0x128] sm:$0xff] }
 0x21c   :  { %v11267_v15 = vcombine.low %v1136_v2, %v1144_v3 }
 0x21e   :  { %7662 = vmatpush1.bf16.msra.mxu0 %v11155_v7  ;;  %7867 = vmatpush1.bf16.msra.mxu1 %v11157_v8  ;;  %v11253_v7 = vcombine.low %v1121_v57, %v1129_v58  ;;  %v11268_v8 = vcombine.high %v1136_v2, %v1144_v3  ;;  %v75_v57 = vld [vmem:[%s16051_s1 + $0x168] sm:$0xff]  ;;  %v90_v2 = vld [vmem:[%s16051_s1 + $0x1e0] sm:$0xff] }
 0x21f   :  { %7663 = vmatprep.subr.bf16.mxu0 %v11172_v10  ;;  %7868 = vmatprep.subr.bf16.mxu1 %v11174_v11  ;;  %v11270_v10 = vcombine.high %v1137_v4, %v1145_v5  ;;  %v1152_v11 = vld [vmem:[%s16051_s1 + $0x2310] sm:$0xff]  ;;  %v83_v3 = vld [vmem:[%s16051_s1 + $0x1a8] sm:$0xff] }
 0x220   :  { %v11283_v25 = vcombine.low %v1152_v11, %v1160_v12 }
 0x222   :  { %7664 = vmatpush1.bf16.msra.mxu0 %v11171_v17  ;;  %7869 = vmatpush1.bf16.msra.mxu1 %v11173_v18  ;;  %v11269_v17 = vcombine.low %v1137_v4, %v1145_v5  ;;  %v11284_v18 = vcombine.high %v1152_v11, %v1160_v12  ;;  %v91_v4 = vld [vmem:[%s16051_s1 + $0x1e8] sm:$0xff]  ;;  %v106_v11 = vld [vmem:[%s16051_s1 + $0x260] sm:$0xff] }
 0x223   :  { %7674 = vmatprep.subr.bf16.mxu0 %v11188_v19  ;;  %7879 = vmatprep.subr.bf16.mxu1 %v11190_v20  ;;  %v11286_v19 = vcombine.high %v1153_v13, %v1161_v14  ;;  %v1168_v20 = vld [vmem:[%s16051_s1 + $0x2390] sm:$0xff]  ;;  %v99_v12 = vld [vmem:[%s16051_s1 + $0x228] sm:$0xff] }
 0x224   :  { %v11299_v35 = vcombine.low %v1168_v20, %v1176_v21 }
 0x225   :  { %7666 = vmatmul.mubr.bf16.vlgmr.msra.gmra.mrb[4].mxu0 %v12807_v16  ;;  %7871 = vmatmul.mubr.bf16.vlgmr.msra.gmra.mrb[4].mxu1 %v12807_v16 }
 0x226   :  { %7675 = vmatpush1.bf16.msra.mxu0 %v11187_v26  ;;  %7880 = vmatpush1.bf16.msra.mxu1 %v11189_v27  ;;  %v11285_v26 = vcombine.low %v1153_v13, %v1161_v14  ;;  %v11300_v27 = vcombine.high %v1168_v20, %v1176_v21  ;;  %v107_v13 = vld [vmem:[%s16051_s1 + $0x268] sm:$0xff]  ;;  %v122_v20 = vld [vmem:[%s16051_s1 + $0x2e0] sm:$0xff] }
 0x227   :  { %7676 = vmatprep.subr.bf16.mxu0 %v11204_v28  ;;  %7881 = vmatprep.subr.bf16.mxu1 %v11206_v59  ;;  %v11302_v28 = vcombine.high %v1169_v22, %v1177_v24  ;;  %v34_v59 = vld [vmem:[%s16051_s1 + $0x20] sm:$0xff]  ;;  %v115_v21 = vld [vmem:[%s16051_s1 + $0x2a8] sm:$0xff] }
 0x228   :  { %7706 = vmatprep.mubr.bf16.mxu0 %v11923_v34  ;;  %7911 = vmatprep.mubr.bf16.mxu1 %v11923_v34  ;;  %v10167_v48 = vcombine.low %v34_v59, %v42_v30 }
 0x22a   :  { %7677 = vmatpush1.bf16.msra.mxu0 %v11203_v36  ;;  %7882 = vmatpush1.bf16.msra.mxu1 %v11205_v53  ;;  %v11301_v36 = vcombine.low %v1169_v22, %v1177_v24  ;;  %v10168_v53 = vcombine.high %v34_v59, %v42_v30  ;;  %v123_v22 = vld [vmem:[%s16051_s1 + $0x2e8] sm:$0xff]  ;;  %v138_v59 = vld [vmem:[%s16051_s1 + $0x360] sm:$0xff] }
 0x22b   :  { %7678 = vmatprep.subr.bf16.mxu0 %v11220_v38  ;;  %7883 = vmatprep.subr.bf16.mxu1 %v11222_v39  ;;  %v10170_v38 = vcombine.high %v35_v31, %v43_v32  ;;  %v50_v39 = vld [vmem:[%s16051_s1 + $0xa0] sm:$0xff]  ;;  %v131_v30 = vld [vmem:[%s16051_s1 + $0x328] sm:$0xff] }
 0x22c   :  { %v10183_v58 = vcombine.low %v50_v39, %v58_v44 }
 0x22e   :  { %7679 = vmatpush1.bf16.msra.mxu0 %v11219_v49  ;;  %7884 = vmatpush1.bf16.msra.mxu1 %v11221_v51  ;;  %v10169_v49 = vcombine.low %v35_v31, %v43_v32  ;;  %v10184_v51 = vcombine.high %v50_v39, %v58_v44  ;;  %v139_v31 = vld [vmem:[%s16051_s1 + $0x368] sm:$0xff]  ;;  %v154_v39 = vld [vmem:[%s16051_s1 + $0x3e0] sm:$0xff] }
 0x22f   :  { %7680 = vmatprep.subr.bf16.mxu0 %v11236_v52  ;;  %7885 = vmatprep.subr.bf16.mxu1 %v11238_v54  ;;  %v10186_v52 = vcombine.high %v51_v45, %v59_v47  ;;  %v66_v54 = vld [vmem:[%s16051_s1 + $0x120] sm:$0xff]  ;;  %v147_v44 = vld [vmem:[%s16051_s1 + $0x3a8] sm:$0xff] }
 0x230   :  { %v10199_v5 = vcombine.low %v66_v54, %v74_v55 }
 0x232   :  { %7681 = vmatpush1.bf16.msra.mxu0 %v11235_v60  ;;  %7886 = vmatpush1.bf16.msra.mxu1 %v11237_v62  ;;  %v10185_v60 = vcombine.low %v51_v45, %v59_v47  ;;  %v10200_v62 = vcombine.high %v66_v54, %v74_v55  ;;  %v155_v45 = vld [vmem:[%s16051_s1 + $0x3e8] sm:$0xff]  ;;  %v170_v54 = vld [vmem:[%s16051_s1 + $0x460] sm:$0xff] }
 0x233   :  { %7682 = vmatprep.subr.bf16.mxu0 %v11252_v0  ;;  %7887 = vmatprep.subr.bf16.mxu1 %v11254_v1  ;;  %v10202_v0 = vcombine.high %v67_v56, %v75_v57  ;;  %v82_v1 = vld [vmem:[%s16051_s1 + $0x1a0] sm:$0xff]  ;;  %v163_v55 = vld [vmem:[%s16051_s1 + $0x428] sm:$0xff] }
 0x234   :  { %v10215_v14 = vcombine.low %v82_v1, %v90_v2 }
 0x236   :  { %7683 = vmatpush1.bf16.msra.mxu0 %v11251_v6  ;;  %7888 = vmatpush1.bf16.msra.mxu1 %v11253_v7  ;;  %v10201_v6 = vcombine.low %v67_v56, %v75_v57  ;;  %v10216_v7 = vcombine.high %v82_v1, %v90_v2  ;;  %v171_v56 = vld [vmem:[%s16051_s1 + $0x468] sm:$0xff]  ;;  %v186_v1 = vld [vmem:[%s16051_s1 + $0x4e0] sm:$0xff] }
 0x237   :  { %7684 = vmatprep.subr.bf16.mxu0 %v11268_v8  ;;  %7889 = vmatprep.subr.bf16.mxu1 %v11270_v10  ;;  %v10218_v8 = vcombine.high %v83_v3, %v91_v4  ;;  %v98_v10 = vld [vmem:[%s16051_s1 + $0x220] sm:$0xff]  ;;  %v179_v2 = vld [vmem:[%s16051_s1 + $0x4a8] sm:$0xff] }
 0x238   :  { %v10231_v24 = vcombine.low %v98_v10, %v106_v11 }
 0x23a   :  { %7685 = vmatpush1.bf16.msra.mxu0 %v11267_v15  ;;  %7890 = vmatpush1.bf16.msra.mxu1 %v11269_v17  ;;  %v10217_v15 = vcombine.low %v83_v3, %v91_v4  ;;  %v10232_v17 = vcombine.high %v98_v10, %v106_v11  ;;  %v187_v3 = vld [vmem:[%s16051_s1 + $0x4e8] sm:$0xff]  ;;  %v202_v10 = vld [vmem:[%s16051_s1 + $0x560] sm:$0xff] }
 0x23b   :  { %7686 = vmatprep.subr.bf16.mxu0 %v11284_v18  ;;  %7891 = vmatprep.subr.bf16.mxu1 %v11286_v19  ;;  %v10234_v18 = vcombine.high %v99_v12, %v107_v13  ;;  %v114_v19 = vld [vmem:[%s16051_s1 + $0x2a0] sm:$0xff]  ;;  %v195_v11 = vld [vmem:[%s16051_s1 + $0x528] sm:$0xff] }
 0x23c   :  { %v10247_v32 = vcombine.low %v114_v19, %v122_v20 }
 0x23e   :  { %7687 = vmatpush1.bf16.msra.mxu0 %v11283_v25  ;;  %7892 = vmatpush1.bf16.msra.mxu1 %v11285_v26  ;;  %v10233_v25 = vcombine.low %v99_v12, %v107_v13  ;;  %v10248_v26 = vcombine.high %v114_v19, %v122_v20  ;;  %v203_v12 = vld [vmem:[%s16051_s1 + $0x568] sm:$0xff]  ;;  %v218_v19 = vld [vmem:[%s16051_s1 + $0x5e0] sm:$0xff] }
 0x23f   :  { %7688 = vmatprep.subr.bf16.mxu0 %v11300_v27  ;;  %7893 = vmatprep.subr.bf16.mxu1 %v11302_v28  ;;  %v10250_v27 = vcombine.high %v115_v21, %v123_v22  ;;  %v130_v28 = vld [vmem:[%s16051_s1 + $0x320] sm:$0xff]  ;;  %v211_v20 = vld [vmem:[%s16051_s1 + $0x5a8] sm:$0xff] }
 0x240   :  { %v10263_v47 = vcombine.low %v130_v28, %v138_v59 }
 0x242   :  { %7689 = vmatpush1.bf16.msra.mxu0 %v11299_v35  ;;  %7894 = vmatpush1.bf16.msra.mxu1 %v11301_v36  ;;  %v10249_v35 = vcombine.low %v115_v21, %v123_v22  ;;  %v10264_v36 = vcombine.high %v130_v28, %v138_v59  ;;  %v219_v21 = vld [vmem:[%s16051_s1 + $0x5e8] sm:$0xff]  ;;  %v234_v28 = vld [vmem:[%s16051_s1 + $0x660] sm:$0xff] }
 0x243   :  { %7920 = vmatprep.subr.bf16.mxu0 %v10168_v53  ;;  %8125 = vmatprep.subr.bf16.mxu1 %v10170_v38  ;;  %v10266_v53 = vcombine.high %v131_v30, %v139_v31  ;;  %v146_v38 = vld [vmem:[%s16051_s1 + $0x3a0] sm:$0xff]  ;;  %v227_v59 = vld [vmem:[%s16051_s1 + $0x628] sm:$0xff] }
 0x244   :  { %v10279_v57 = vcombine.low %v146_v38, %v154_v39 }
 0x245   :  { %7707 = vmatmul.mubr.bf16.vlgmr.msra.gmra.mrb[4].mxu0 %v12913_v29  ;;  %7912 = vmatmul.mubr.bf16.vlgmr.msra.gmra.mrb[4].mxu1 %v12913_v29 }
 0x246   :  { %7921 = vmatpush1.bf16.msra.mxu0 %v10167_v48  ;;  %8126 = vmatpush1.bf16.msra.mxu1 %v10169_v49  ;;  %v10265_v48 = vcombine.low %v131_v30, %v139_v31  ;;  %v10280_v49 = vcombine.high %v146_v38, %v154_v39  ;;  %v235_v30 = vld [vmem:[%s16051_s1 + $0x668] sm:$0xff]  ;;  %v250_v38 = vld [vmem:[%s16051_s1 + $0x6e0] sm:$0xff] }
 0x247   :  { %7922 = vmatprep.subr.bf16.mxu0 %v10184_v51  ;;  %8127 = vmatprep.subr.bf16.mxu1 %v10186_v52  ;;  %v10282_v51 = vcombine.high %v147_v44, %v155_v45  ;;  %v162_v52 = vld [vmem:[%s16051_s1 + $0x420] sm:$0xff]  ;;  %v243_v39 = vld [vmem:[%s16051_s1 + $0x6a8] sm:$0xff] }
 0x248   :  { %7952 = vmatprep.mubr.bf16.mxu0 %v12075_v9  ;;  %8157 = vmatprep.mubr.bf16.mxu1 %v12075_v9  ;;  %v10295_v4 = vcombine.low %v162_v52, %v170_v54 }
 0x24a   :  { %7923 = vmatpush1.bf16.msra.mxu0 %v10183_v58  ;;  %8128 = vmatpush1.bf16.msra.mxu1 %v10185_v60  ;;  %v10281_v58 = vcombine.low %v147_v44, %v155_v45  ;;  %v10296_v60 = vcombine.high %v162_v52, %v170_v54  ;;  %v251_v44 = vld [vmem:[%s16051_s1 + $0x6e8] sm:$0xff]  ;;  %v266_v52 = vld [vmem:[%s16051_s1 + $0x760] sm:$0xff] }
 0x24b   :  { %7924 = vmatprep.subr.bf16.mxu0 %v10200_v62  ;;  %8129 = vmatprep.subr.bf16.mxu1 %v10202_v0  ;;  %v10298_v62 = vcombine.high %v163_v55, %v171_v56  ;;  %v178_v0 = vld [vmem:[%s16051_s1 + $0x4a0] sm:$0xff]  ;;  %v259_v54 = vld [vmem:[%s16051_s1 + $0x728] sm:$0xff] }
 0x24c   :  { %v10311_v13 = vcombine.low %v178_v0, %v186_v1 }
 0x24e   :  { %7925 = vmatpush1.bf16.msra.mxu0 %v10199_v5  ;;  %8130 = vmatpush1.bf16.msra.mxu1 %v10201_v6  ;;  %v10297_v5 = vcombine.low %v163_v55, %v171_v56  ;;  %v10312_v6 = vcombine.high %v178_v0, %v186_v1  ;;  %v267_v55 = vld [vmem:[%s16051_s1 + $0x768] sm:$0xff]  ;;  %v282_v0 = vld [vmem:[%s16051_s1 + $0x7e0] sm:$0xff] }
 0x24f   :  { %7926 = vmatprep.subr.bf16.mxu0 %v10216_v7  ;;  %8131 = vmatprep.subr.bf16.mxu1 %v10218_v8  ;;  %v10314_v7 = vcombine.high %v179_v2, %v187_v3  ;;  %v194_v8 = vld [vmem:[%s16051_s1 + $0x520] sm:$0xff]  ;;  %v275_v1 = vld [vmem:[%s16051_s1 + $0x7a8] sm:$0xff] }
 0x250   :  { %v10327_v22 = vcombine.low %v194_v8, %v202_v10 }
 0x252   :  { %7927 = vmatpush1.bf16.msra.mxu0 %v10215_v14  ;;  %8132 = vmatpush1.bf16.msra.mxu1 %v10217_v15  ;;  %v10313_v14 = vcombine.low %v179_v2, %v187_v3  ;;  %v10328_v15 = vcombine.high %v194_v8, %v202_v10  ;;  %v283_v2 = vld [vmem:[%s16051_s1 + $0x7e8] sm:$0xff]  ;;  %v298_v8 = vld [vmem:[%s16051_s1 + $0x860] sm:$0xff] }
 0x253   :  { %7928 = vmatprep.subr.bf16.mxu0 %v10232_v17  ;;  %8133 = vmatprep.subr.bf16.mxu1 %v10234_v18  ;;  %v10330_v17 = vcombine.high %v195_v11, %v203_v12  ;;  %v210_v18 = vld [vmem:[%s16051_s1 + $0x5a0] sm:$0xff]  ;;  %v291_v10 = vld [vmem:[%s16051_s1 + $0x828] sm:$0xff] }
 0x254   :  { %v10343_v31 = vcombine.low %v210_v18, %v218_v19 }
 0x256   :  { %7929 = vmatpush1.bf16.msra.mxu0 %v10231_v24  ;;  %8134 = vmatpush1.bf16.msra.mxu1 %v10233_v25  ;;  %v10329_v24 = vcombine.low %v195_v11, %v203_v12  ;;  %v10344_v25 = vcombine.high %v210_v18, %v218_v19  ;;  %v299_v11 = vld [vmem:[%s16051_s1 + $0x868] sm:$0xff]  ;;  %v314_v18 = vld [vmem:[%s16051_s1 + $0x8e0] sm:$0xff] }
 0x257   :  { %7930 = vmatprep.subr.bf16.mxu0 %v10248_v26  ;;  %8135 = vmatprep.subr.bf16.mxu1 %v10250_v27  ;;  %v10346_v26 = vcombine.high %v211_v20, %v219_v21  ;;  %v226_v27 = vld [vmem:[%s16051_s1 + $0x620] sm:$0xff]  ;;  %v307_v19 = vld [vmem:[%s16051_s1 + $0x8a8] sm:$0xff] }
 0x258   :  { %v10359_v45 = vcombine.low %v226_v27, %v234_v28 }
 0x25a   :  { %7931 = vmatpush1.bf16.msra.mxu0 %v10247_v32  ;;  %8136 = vmatpush1.bf16.msra.mxu1 %v10249_v35  ;;  %v10345_v32 = vcombine.low %v211_v20, %v219_v21  ;;  %v10360_v35 = vcombine.high %v226_v27, %v234_v28  ;;  %v315_v20 = vld [vmem:[%s16051_s1 + $0x8e8] sm:$0xff]  ;;  %v330_v27 = vld [vmem:[%s16051_s1 + $0x960] sm:$0xff] }
 0x25b   :  { %7932 = vmatprep.subr.bf16.mxu0 %v10264_v36  ;;  %8137 = vmatprep.subr.bf16.mxu1 %v10266_v53  ;;  %v10362_v36 = vcombine.high %v227_v59, %v235_v30  ;;  %v242_v53 = vld [vmem:[%s16051_s1 + $0x6a0] sm:$0xff]  ;;  %v323_v28 = vld [vmem:[%s16051_s1 + $0x928] sm:$0xff] }
 0x25c   :  { %v10375_v56 = vcombine.low %v242_v53, %v250_v38 }
 0x25e   :  { %7933 = vmatpush1.bf16.msra.mxu0 %v10263_v47  ;;  %8138 = vmatpush1.bf16.msra.mxu1 %v10265_v48  ;;  %v10361_v47 = vcombine.low %v227_v59, %v235_v30  ;;  %v10376_v48 = vcombine.high %v242_v53, %v250_v38  ;;  %v331_v59 = vld [vmem:[%s16051_s1 + $0x968] sm:$0xff]  ;;  %v346_v53 = vld [vmem:[%s16051_s1 + $0x9e0] sm:$0xff] }
 0x25f   :  { %7934 = vmatprep.subr.bf16.mxu0 %v10280_v49  ;;  %8139 = vmatprep.subr.bf16.mxu1 %v10282_v51  ;;  %v10378_v49 = vcombine.high %v243_v39, %v251_v44  ;;  %v258_v51 = vld [vmem:[%s16051_s1 + $0x720] sm:$0xff]  ;;  %v339_v38 = vld [vmem:[%s16051_s1 + $0x9a8] sm:$0xff] }
 0x260   :  { %v10391_v3 = vcombine.low %v258_v51, %v266_v52 }
 0x262   :  { %7935 = vmatpush1.bf16.msra.mxu0 %v10279_v57  ;;  %8140 = vmatpush1.bf16.msra.mxu1 %v10281_v58  ;;  %v10377_v57 = vcombine.low %v243_v39, %v251_v44  ;;  %v10392_v58 = vcombine.high %v258_v51, %v266_v52  ;;  %v347_v39 = vld [vmem:[%s16051_s1 + $0x9e8] sm:$0xff]  ;;  %v362_v51 = vld [vmem:[%s16051_s1 + $0xa60] sm:$0xff] }
 0x263   :  { %7936 = vmatprep.subr.bf16.mxu0 %v10296_v60  ;;  %8141 = vmatprep.subr.bf16.mxu1 %v10298_v62  ;;  %v10394_v60 = vcombine.high %v259_v54, %v267_v55  ;;  %v274_v62 = vld [vmem:[%s16051_s1 + $0x7a0] sm:$0xff]  ;;  %v355_v52 = vld [vmem:[%s16051_s1 + $0xa28] sm:$0xff] }
 0x264   :  { %v10407_v12 = vcombine.low %v274_v62, %v282_v0 }
 0x266   :  { %7937 = vmatpush1.bf16.msra.mxu0 %v10295_v4  ;;  %8142 = vmatpush1.bf16.msra.mxu1 %v10297_v5  ;;  %v10393_v4 = vcombine.low %v259_v54, %v267_v55  ;;  %v10408_v5 = vcombine.high %v274_v62, %v282_v0  ;;  %v363_v54 = vld [vmem:[%s16051_s1 + $0xa68] sm:$0xff]  ;;  %v378_v62 = vld [vmem:[%s16051_s1 + $0xae0] sm:$0xff] }
 0x267   :  { %7938 = vmatprep.subr.bf16.mxu0 %v10312_v6  ;;  %8143 = vmatprep.subr.bf16.mxu1 %v10314_v7  ;;  %v10410_v6 = vcombine.high %v275_v1, %v283_v2  ;;  %v290_v7 = vld [vmem:[%s16051_s1 + $0x820] sm:$0xff]  ;;  %v371_v0 = vld [vmem:[%s16051_s1 + $0xaa8] sm:$0xff] }
 0x268   :  { %v10423_v21 = vcombine.low %v290_v7, %v298_v8 }
 0x26a   :  { %7939 = vmatpush1.bf16.msra.mxu0 %v10311_v13  ;;  %8144 = vmatpush1.bf16.msra.mxu1 %v10313_v14  ;;  %v10409_v13 = vcombine.low %v275_v1, %v283_v2  ;;  %v10424_v14 = vcombine.high %v290_v7, %v298_v8  ;;  %v379_v1 = vld [vmem:[%s16051_s1 + $0xae8] sm:$0xff]  ;;  %v394_v7 = vld [vmem:[%s16051_s1 + $0xb60] sm:$0xff] }
 0x26b   :  { %7940 = vmatprep.subr.bf16.mxu0 %v10328_v15  ;;  %8145 = vmatprep.subr.bf16.mxu1 %v10330_v17  ;;  %v10426_v15 = vcombine.high %v291_v10, %v299_v11  ;;  %v306_v17 = vld [vmem:[%s16051_s1 + $0x8a0] sm:$0xff]  ;;  %v387_v8 = vld [vmem:[%s16051_s1 + $0xb28] sm:$0xff] }
 0x26c   :  { %v10439_v30 = vcombine.low %v306_v17, %v314_v18 }
 0x26e   :  { %7941 = vmatpush1.bf16.msra.mxu0 %v10327_v22  ;;  %8146 = vmatpush1.bf16.msra.mxu1 %v10329_v24  ;;  %v10425_v22 = vcombine.low %v291_v10, %v299_v11  ;;  %v10440_v24 = vcombine.high %v306_v17, %v314_v18  ;;  %v395_v10 = vld [vmem:[%s16051_s1 + $0xb68] sm:$0xff]  ;;  %v410_v17 = vld [vmem:[%s16051_s1 + $0xbe0] sm:$0xff] }
 0x26f   :  { %7942 = vmatprep.subr.bf16.mxu0 %v10344_v25  ;;  %8147 = vmatprep.subr.bf16.mxu1 %v10346_v26  ;;  %v10442_v25 = vcombine.high %v307_v19, %v315_v20  ;;  %v322_v26 = vld [vmem:[%s16051_s1 + $0x920] sm:$0xff]  ;;  %v403_v18 = vld [vmem:[%s16051_s1 + $0xba8] sm:$0xff] }
 0x270   :  { %v10455_v44 = vcombine.low %v322_v26, %v330_v27 }
 0x272   :  { %7943 = vmatpush1.bf16.msra.mxu0 %v10343_v31  ;;  %8148 = vmatpush1.bf16.msra.mxu1 %v10345_v32  ;;  %v10441_v31 = vcombine.low %v307_v19, %v315_v20  ;;  %v10456_v32 = vcombine.high %v322_v26, %v330_v27  ;;  %v411_v19 = vld [vmem:[%s16051_s1 + $0xbe8] sm:$0xff]  ;;  %v426_v26 = vld [vmem:[%s16051_s1 + $0xc60] sm:$0xff] }
 0x273   :  { %7944 = vmatprep.subr.bf16.mxu0 %v10360_v35  ;;  %8149 = vmatprep.subr.bf16.mxu1 %v10362_v36  ;;  %v10458_v35 = vcombine.high %v323_v28, %v331_v59  ;;  %v338_v36 = vld [vmem:[%s16051_s1 + $0x9a0] sm:$0xff]  ;;  %v419_v27 = vld [vmem:[%s16051_s1 + $0xc28] sm:$0xff] }
 0x274   :  { %v10471_v55 = vcombine.low %v338_v36, %v346_v53 }
 0x276   :  { %7945 = vmatpush1.bf16.msra.mxu0 %v10359_v45  ;;  %8150 = vmatpush1.bf16.msra.mxu1 %v10361_v47  ;;  %v10457_v45 = vcombine.low %v323_v28, %v331_v59  ;;  %v10472_v47 = vcombine.high %v338_v36, %v346_v53  ;;  %v427_v28 = vld [vmem:[%s16051_s1 + $0xc68] sm:$0xff]  ;;  %v442_v36 = vld [vmem:[%s16051_s1 + $0xce0] sm:$0xff] }
 0x277   :  { %7946 = vmatprep.subr.bf16.mxu0 %v10376_v48  ;;  %8151 = vmatprep.subr.bf16.mxu1 %v10378_v49  ;;  %v10474_v48 = vcombine.high %v339_v38, %v347_v39  ;;  %v354_v49 = vld [vmem:[%s16051_s1 + $0xa20] sm:$0xff]  ;;  %v435_v53 = vld [vmem:[%s16051_s1 + $0xca8] sm:$0xff] }
 0x278   :  { %v10487_v2 = vcombine.low %v354_v49, %v362_v51 }
 0x27a   :  { %7947 = vmatpush1.bf16.msra.mxu0 %v10375_v56  ;;  %8152 = vmatpush1.bf16.msra.mxu1 %v10377_v57  ;;  %v10473_v56 = vcombine.low %v339_v38, %v347_v39  ;;  %v10488_v57 = vcombine.high %v354_v49, %v362_v51  ;;  %v443_v38 = vld [vmem:[%s16051_s1 + $0xce8] sm:$0xff]  ;;  %v458_v49 = vld [vmem:[%s16051_s1 + $0xd60] sm:$0xff] }
 0x27b   :  { %7948 = vmatprep.subr.bf16.mxu0 %v10392_v58  ;;  %8153 = vmatprep.subr.bf16.mxu1 %v10394_v60  ;;  %v10490_v58 = vcombine.high %v355_v52, %v363_v54  ;;  %v370_v60 = vld [vmem:[%s16051_s1 + $0xaa0] sm:$0xff]  ;;  %v451_v51 = vld [vmem:[%s16051_s1 + $0xd28] sm:$0xff] }
 0x27c   :  { %v10503_v11 = vcombine.low %v370_v60, %v378_v62 }
 0x27e   :  { %7949 = vmatpush1.bf16.msra.mxu0 %v10391_v3  ;;  %8154 = vmatpush1.bf16.msra.mxu1 %v10393_v4  ;;  %v10489_v3 = vcombine.low %v355_v52, %v363_v54  ;;  %v10504_v4 = vcombine.high %v370_v60, %v378_v62  ;;  %v459_v52 = vld [vmem:[%s16051_s1 + $0xd68] sm:$0xff]  ;;  %v474_v60 = vld [vmem:[%s16051_s1 + $0xde0] sm:$0xff] }
 0x27f   :  { %7950 = vmatprep.subr.bf16.mxu0 %v10408_v5  ;;  %8155 = vmatprep.subr.bf16.mxu1 %v10410_v6  ;;  %v10506_v5 = vcombine.high %v371_v0, %v379_v1  ;;  %v386_v6 = vld [vmem:[%s16051_s1 + $0xb20] sm:$0xff]  ;;  %v467_v62 = vld [vmem:[%s16051_s1 + $0xda8] sm:$0xff] }
 0x280   :  { %v10519_v20 = vcombine.low %v386_v6, %v394_v7 }
 0x282   :  { %7951 = vmatpush1.bf16.msra.mxu0 %v10407_v12  ;;  %8156 = vmatpush1.bf16.msra.mxu1 %v10409_v13  ;;  %v10505_v12 = vcombine.low %v371_v0, %v379_v1  ;;  %v10520_v13 = vcombine.high %v386_v6, %v394_v7  ;;  %v475_v0 = vld [vmem:[%s16051_s1 + $0xde8] sm:$0xff]  ;;  %v490_v6 = vld [vmem:[%s16051_s1 + $0xe60] sm:$0xff] }
 0x283   :  { %7961 = vmatprep.subr.bf16.mxu0 %v10424_v14  ;;  %8166 = vmatprep.subr.bf16.mxu1 %v10426_v15  ;;  %v10522_v14 = vcombine.high %v387_v8, %v395_v10  ;;  %v402_v15 = vld [vmem:[%s16051_s1 + $0xba0] sm:$0xff]  ;;  %v483_v7 = vld [vmem:[%s16051_s1 + $0xe28] sm:$0xff] }
 0x284   :  { %v10535_v59 = vcombine.low %v402_v15, %v410_v17 }
 0x285   :  { %7953 = vmatmul.mubr.bf16.vlgmr.msra.gmra.mrb[8].mxu0 %v12189_v23  ;;  %8158 = vmatmul.mubr.bf16.vlgmr.msra.gmra.mrb[8].mxu1 %v12189_v23 }
 0x286   :  { %7962 = vmatpush1.bf16.msra.mxu0 %v10423_v21  ;;  %8167 = vmatpush1.bf16.msra.mxu1 %v10425_v22  ;;  %v10521_v21 = vcombine.low %v387_v8, %v395_v10  ;;  %v10536_v22 = vcombine.high %v402_v15, %v410_v17  ;;  %v491_v8 = vld [vmem:[%s16051_s1 + $0xe68] sm:$0xff]  ;;  %v506_v15 = vld [vmem:[%s16051_s1 + $0xee0] sm:$0xff] }
 0x287   :  { %7963 = vmatprep.subr.bf16.mxu0 %v10440_v24  ;;  %8168 = vmatprep.subr.bf16.mxu1 %v10442_v25  ;;  %v10538_v24 = vcombine.high %v403_v18, %v411_v19  ;;  %v418_v25 = vld [vmem:[%s16051_s1 + $0xc20] sm:$0xff]  ;;  %v499_v17 = vld [vmem:[%s16051_s1 + $0xea8] sm:$0xff] }
 0x288   :  { %7993 = vmatprep.mubr.bf16.mxu0 %v12211_v33  ;;  %8198 = vmatprep.mubr.bf16.mxu1 %v12211_v33  ;;  %v10551_v39 = vcombine.low %v418_v25, %v426_v26 }
 0x28a   :  { %7964 = vmatpush1.bf16.msra.mxu0 %v10439_v30  ;;  %8169 = vmatpush1.bf16.msra.mxu1 %v10441_v31  ;;  %v10537_v30 = vcombine.low %v403_v18, %v411_v19  ;;  %v10552_v31 = vcombine.high %v418_v25, %v426_v26  ;;  %v507_v18 = vld [vmem:[%s16051_s1 + $0xee8] sm:$0xff]  ;;  %v522_v25 = vld [vmem:[%s16051_s1 + $0xf60] sm:$0xff] }
 0x28b   :  { %7965 = vmatprep.subr.bf16.mxu0 %v10456_v32  ;;  %8170 = vmatprep.subr.bf16.mxu1 %v10458_v35  ;;  %v10554_v32 = vcombine.high %v419_v27, %v427_v28  ;;  %v434_v35 = vld [vmem:[%s16051_s1 + $0xca0] sm:$0xff]  ;;  %v515_v26 = vld [vmem:[%s16051_s1 + $0xf28] sm:$0xff] }
 0x28c   :  { %v10567_v54 = vcombine.low %v434_v35, %v442_v36 }
 0x28e   :  { %7966 = vmatpush1.bf16.msra.mxu0 %v10455_v44  ;;  %8171 = vmatpush1.bf16.msra.mxu1 %v10457_v45  ;;  %v10553_v44 = vcombine.low %v419_v27, %v427_v28  ;;  %v10568_v45 = vcombine.high %v434_v35, %v442_v36  ;;  %v523_v27 = vld [vmem:[%s16051_s1 + $0xf68] sm:$0xff]  ;;  %v538_v35 = vld [vmem:[%s16051_s1 + $0xfe0] sm:$0xff] }
 0x28f   :  { %7967 = vmatprep.subr.bf16.mxu0 %v10472_v47  ;;  %8172 = vmatprep.subr.bf16.mxu1 %v10474_v48  ;;  %v10570_v47 = vcombine.high %v435_v53, %v443_v38  ;;  %v450_v48 = vld [vmem:[%s16051_s1 + $0xd20] sm:$0xff]  ;;  %v531_v36 = vld [vmem:[%s16051_s1 + $0xfa8] sm:$0xff] }
 0x290   :  { %v10583_v1 = vcombine.low %v450_v48, %v458_v49 }
 0x292   :  { %7968 = vmatpush1.bf16.msra.mxu0 %v10471_v55  ;;  %8173 = vmatpush1.bf16.msra.mxu1 %v10473_v56  ;;  %v10569_v55 = vcombine.low %v435_v53, %v443_v38  ;;  %v10584_v56 = vcombine.high %v450_v48, %v458_v49  ;;  %v539_v53 = vld [vmem:[%s16051_s1 + $0xfe8] sm:$0xff]  ;;  %v554_v48 = vld [vmem:[%s16051_s1 + $0x1060] sm:$0xff] }
 0x293   :  { %7969 = vmatprep.subr.bf16.mxu0 %v10488_v57  ;;  %8174 = vmatprep.subr.bf16.mxu1 %v10490_v58  ;;  %v10586_v57 = vcombine.high %v451_v51, %v459_v52  ;;  %v466_v58 = vld [vmem:[%s16051_s1 + $0xda0] sm:$0xff]  ;;  %v547_v49 = vld [vmem:[%s16051_s1 + $0x1028] sm:$0xff] }
 0x294   :  { %v10599_v10 = vcombine.low %v466_v58, %v474_v60 }
 0x296   :  { %7970 = vmatpush1.bf16.msra.mxu0 %v10487_v2  ;;  %8175 = vmatpush1.bf16.msra.mxu1 %v10489_v3  ;;  %v10585_v2 = vcombine.low %v451_v51, %v459_v52  ;;  %v10600_v3 = vcombine.high %v466_v58, %v474_v60  ;;  %v555_v51 = vld [vmem:[%s16051_s1 + $0x1068] sm:$0xff]  ;;  %v570_v58 = vld [vmem:[%s16051_s1 + $0x10e0] sm:$0xff] }
 0x297   :  { %7971 = vmatprep.subr.bf16.mxu0 %v10504_v4  ;;  %8176 = vmatprep.subr.bf16.mxu1 %v10506_v5  ;;  %v10602_v4 = vcombine.high %v467_v62, %v475_v0  ;;  %v482_v5 = vld [vmem:[%s16051_s1 + $0xe20] sm:$0xff]  ;;  %v563_v60 = vld [vmem:[%s16051_s1 + $0x10a8] sm:$0xff] }
 0x298   :  { %v10615_v19 = vcombine.low %v482_v5, %v490_v6 }
 0x29a   :  { %7972 = vmatpush1.bf16.msra.mxu0 %v10503_v11  ;;  %8177 = vmatpush1.bf16.msra.mxu1 %v10505_v12  ;;  %v10601_v11 = vcombine.low %v467_v62, %v475_v0  ;;  %v10616_v12 = vcombine.high %v482_v5, %v490_v6  ;;  %v571_v62 = vld [vmem:[%s16051_s1 + $0x10e8] sm:$0xff]  ;;  %v586_v5 = vld [vmem:[%s16051_s1 + $0x1160] sm:$0xff] }
 0x29b   :  { %7973 = vmatprep.subr.bf16.mxu0 %v10520_v13  ;;  %8178 = vmatprep.subr.bf16.mxu1 %v10522_v14  ;;  %v10618_v13 = vcombine.high %v483_v7, %v491_v8  ;;  %v498_v14 = vld [vmem:[%s16051_s1 + $0xea0] sm:$0xff]  ;;  %v579_v6 = vld [vmem:[%s16051_s1 + $0x1128] sm:$0xff] }
 0x29c   :  { %v10631_v28 = vcombine.low %v498_v14, %v506_v15 }
 0x29e   :  { %7974 = vmatpush1.bf16.msra.mxu0 %v10519_v20  ;;  %8179 = vmatpush1.bf16.msra.mxu1 %v10521_v21  ;;  %v10617_v20 = vcombine.low %v483_v7, %v491_v8  ;;  %v10632_v21 = vcombine.high %v498_v14, %v506_v15  ;;  %v587_v7 = vld [vmem:[%s16051_s1 + $0x1168] sm:$0xff]  ;;  %v602_v14 = vld [vmem:[%s16051_s1 + $0x11e0] sm:$0xff] }
 0x29f   :  { %7975 = vmatprep.subr.bf16.mxu0 %v10536_v22  ;;  %8180 = vmatprep.subr.bf16.mxu1 %v10538_v24  ;;  %v10634_v22 = vcombine.high %v499_v17, %v507_v18  ;;  %v514_v24 = vld [vmem:[%s16051_s1 + $0xf20] sm:$0xff]  ;;  %v595_v15 = vld [vmem:[%s16051_s1 + $0x11a8] sm:$0xff] }
 0x2a0   :  { %v10647_v38 = vcombine.low %v514_v24, %v522_v25 }
 0x2a2   :  { %7976 = vmatpush1.bf16.msra.mxu0 %v10535_v59  ;;  %8181 = vmatpush1.bf16.msra.mxu1 %v10537_v30  ;;  %v10633_v59 = vcombine.low %v499_v17, %v507_v18  ;;  %v10648_v30 = vcombine.high %v514_v24, %v522_v25  ;;  %v603_v17 = vld [vmem:[%s16051_s1 + $0x11e8] sm:$0xff]  ;;  %v618_v24 = vld [vmem:[%s16051_s1 + $0x1260] sm:$0xff] }
 0x2a3   :  { %7977 = vmatprep.subr.bf16.mxu0 %v10552_v31  ;;  %8182 = vmatprep.subr.bf16.mxu1 %v10554_v32  ;;  %v10650_v31 = vcombine.high %v515_v26, %v523_v27  ;;  %v530_v32 = vld [vmem:[%s16051_s1 + $0xfa0] sm:$0xff]  ;;  %v611_v25 = vld [vmem:[%s16051_s1 + $0x1228] sm:$0xff] }
 0x2a4   :  { %v10663_v52 = vcombine.low %v530_v32, %v538_v35 }
 0x2a6   :  { %7978 = vmatpush1.bf16.msra.mxu0 %v10551_v39  ;;  %8183 = vmatpush1.bf16.msra.mxu1 %v10553_v44  ;;  %v10649_v39 = vcombine.low %v515_v26, %v523_v27  ;;  %v10664_v44 = vcombine.high %v530_v32, %v538_v35  ;;  %v619_v26 = vld [vmem:[%s16051_s1 + $0x1268] sm:$0xff]  ;;  %v634_v32 = vld [vmem:[%s16051_s1 + $0x12e0] sm:$0xff] }
 0x2a7   :  { %7979 = vmatprep.subr.bf16.mxu0 %v10568_v45  ;;  %8184 = vmatprep.subr.bf16.mxu1 %v10570_v47  ;;  %v10666_v45 = vcombine.high %v531_v36, %v539_v53  ;;  %v546_v47 = vld [vmem:[%s16051_s1 + $0x1020] sm:$0xff]  ;;  %v627_v35 = vld [vmem:[%s16051_s1 + $0x12a8] sm:$0xff] }
 0x2a8   :  { %v10679_v0 = vcombine.low %v546_v47, %v554_v48 }
 0x2aa   :  { %7980 = vmatpush1.bf16.msra.mxu0 %v10567_v54  ;;  %8185 = vmatpush1.bf16.msra.mxu1 %v10569_v55  ;;  %v10665_v54 = vcombine.low %v531_v36, %v539_v53  ;;  %v10680_v55 = vcombine.high %v546_v47, %v554_v48  ;;  %v635_v36 = vld [vmem:[%s16051_s1 + $0x12e8] sm:$0xff]  ;;  %v650_v47 = vld [vmem:[%s16051_s1 + $0x1360] sm:$0xff] }
 0x2ab   :  { %7981 = vmatprep.subr.bf16.mxu0 %v10584_v56  ;;  %8186 = vmatprep.subr.bf16.mxu1 %v10586_v57  ;;  %v10682_v56 = vcombine.high %v547_v49, %v555_v51  ;;  %v562_v57 = vld [vmem:[%s16051_s1 + $0x10a0] sm:$0xff]  ;;  %v643_v48 = vld [vmem:[%s16051_s1 + $0x1328] sm:$0xff] }
 0x2ac   :  { %v10695_v8 = vcombine.low %v562_v57, %v570_v58 }
 0x2ae   :  { %7982 = vmatpush1.bf16.msra.mxu0 %v10583_v1  ;;  %8187 = vmatpush1.bf16.msra.mxu1 %v10585_v2  ;;  %v10681_v1 = vcombine.low %v547_v49, %v555_v51  ;;  %v10696_v2 = vcombine.high %v562_v57, %v570_v58  ;;  %v651_v49 = vld [vmem:[%s16051_s1 + $0x1368] sm:$0xff]  ;;  %v666_v57 = vld [vmem:[%s16051_s1 + $0x13e0] sm:$0xff] }
 0x2af   :  { %7983 = vmatprep.subr.bf16.mxu0 %v10600_v3  ;;  %8188 = vmatprep.subr.bf16.mxu1 %v10602_v4  ;;  %v10698_v3 = vcombine.high %v563_v60, %v571_v62  ;;  %v578_v4 = vld [vmem:[%s16051_s1 + $0x1120] sm:$0xff]  ;;  %v659_v58 = vld [vmem:[%s16051_s1 + $0x13a8] sm:$0xff] }
 0x2b0   :  { %v10711_v18 = vcombine.low %v578_v4, %v586_v5 }
 0x2b2   :  { %7984 = vmatpush1.bf16.msra.mxu0 %v10599_v10  ;;  %8189 = vmatpush1.bf16.msra.mxu1 %v10601_v11  ;;  %v10697_v10 = vcombine.low %v563_v60, %v571_v62  ;;  %v10712_v11 = vcombine.high %v578_v4, %v586_v5  ;;  %v667_v60 = vld [vmem:[%s16051_s1 + $0x13e8] sm:$0xff]  ;;  %v682_v4 = vld [vmem:[%s16051_s1 + $0x1460] sm:$0xff] }
 0x2b3   :  { %7985 = vmatprep.subr.bf16.mxu0 %v10616_v12  ;;  %8190 = vmatprep.subr.bf16.mxu1 %v10618_v13  ;;  %v10714_v12 = vcombine.high %v579_v6, %v587_v7  ;;  %v594_v13 = vld [vmem:[%s16051_s1 + $0x11a0] sm:$0xff]  ;;  %v675_v5 = vld [vmem:[%s16051_s1 + $0x1428] sm:$0xff] }
 0x2b4   :  { %v10727_v27 = vcombine.low %v594_v13, %v602_v14 }
 0x2b6   :  { %7986 = vmatpush1.bf16.msra.mxu0 %v10615_v19  ;;  %8191 = vmatpush1.bf16.msra.mxu1 %v10617_v20  ;;  %v10713_v19 = vcombine.low %v579_v6, %v587_v7  ;;  %v10728_v20 = vcombine.high %v594_v13, %v602_v14  ;;  %v683_v6 = vld [vmem:[%s16051_s1 + $0x1468] sm:$0xff]  ;;  %v698_v13 = vld [vmem:[%s16051_s1 + $0x14e0] sm:$0xff] }
 0x2b7   :  { %7987 = vmatprep.subr.bf16.mxu0 %v10632_v21  ;;  %8192 = vmatprep.subr.bf16.mxu1 %v10634_v22  ;;  %v10730_v21 = vcombine.high %v595_v15, %v603_v17  ;;  %v610_v22 = vld [vmem:[%s16051_s1 + $0x1220] sm:$0xff]  ;;  %v691_v14 = vld [vmem:[%s16051_s1 + $0x14a8] sm:$0xff] }
 0x2b8   :  { %v10743_v53 = vcombine.low %v610_v22, %v618_v24 }
 0x2ba   :  { %7988 = vmatpush1.bf16.msra.mxu0 %v10631_v28  ;;  %8193 = vmatpush1.bf16.msra.mxu1 %v10633_v59  ;;  %v10729_v28 = vcombine.low %v595_v15, %v603_v17  ;;  %v10744_v59 = vcombine.high %v610_v22, %v618_v24  ;;  %v699_v15 = vld [vmem:[%s16051_s1 + $0x14e8] sm:$0xff]  ;;  %v714_v22 = vld [vmem:[%s16051_s1 + $0x1560] sm:$0xff] }
 0x2bb   :  { %7989 = vmatprep.subr.bf16.mxu0 %v10648_v30  ;;  %8194 = vmatprep.subr.bf16.mxu1 %v10650_v31  ;;  %v10746_v30 = vcombine.high %v611_v25, %v619_v26  ;;  %v626_v31 = vld [vmem:[%s16051_s1 + $0x12a0] sm:$0xff]  ;;  %v707_v24 = vld [vmem:[%s16051_s1 + $0x1528] sm:$0xff] }
 0x2bc   :  { %v10759_v51 = vcombine.low %v626_v31, %v634_v32 }
 0x2be   :  { %7990 = vmatpush1.bf16.msra.mxu0 %v10647_v38  ;;  %8195 = vmatpush1.bf16.msra.mxu1 %v10649_v39  ;;  %v10745_v38 = vcombine.low %v611_v25, %v619_v26  ;;  %v10760_v39 = vcombine.high %v626_v31, %v634_v32  ;;  %v715_v25 = vld [vmem:[%s16051_s1 + $0x1568] sm:$0xff]  ;;  %v730_v31 = vld [vmem:[%s16051_s1 + $0x15e0] sm:$0xff] }
 0x2bf   :  { %7991 = vmatprep.subr.bf16.mxu0 %v10664_v44  ;;  %8196 = vmatprep.subr.bf16.mxu1 %v10666_v45  ;;  %v10762_v44 = vcombine.high %v627_v35, %v635_v36  ;;  %v642_v45 = vld [vmem:[%s16051_s1 + $0x1320] sm:$0xff]  ;;  %v723_v32 = vld [vmem:[%s16051_s1 + $0x15a8] sm:$0xff] }
 0x2c0   :  { %v10775_v62 = vcombine.low %v642_v45, %v650_v47 }
 0x2c2   :  { %7992 = vmatpush1.bf16.msra.mxu0 %v10663_v52  ;;  %8197 = vmatpush1.bf16.msra.mxu1 %v10665_v54  ;;  %v10761_v52 = vcombine.low %v627_v35, %v635_v36  ;;  %v10776_v54 = vcombine.high %v642_v45, %v650_v47  ;;  %v731_v35 = vld [vmem:[%s16051_s1 + $0x15e8] sm:$0xff]  ;;  %v746_v45 = vld [vmem:[%s16051_s1 + $0x1660] sm:$0xff] }
 0x2c3   :  { %8002 = vmatprep.subr.bf16.mxu0 %v10680_v55  ;;  %8207 = vmatprep.subr.bf16.mxu1 %v10682_v56  ;;  %v10778_v55 = vcombine.high %v643_v48, %v651_v49  ;;  %v658_v56 = vld [vmem:[%s16051_s1 + $0x13a0] sm:$0xff]  ;;  %v739_v47 = vld [vmem:[%s16051_s1 + $0x1628] sm:$0xff] }
 0x2c4   :  { %v10791_v7 = vcombine.low %v658_v56, %v666_v57 }
 0x2c5   :  { %7994 = vmatmul.mubr.bf16.vlgmr.msra.gmra.mrb[8].mxu0 %v12406_v40  ;;  %8199 = vmatmul.mubr.bf16.vlgmr.msra.gmra.mrb[8].mxu1 %v12406_v40 }
 0x2c6   :  { %8003 = vmatpush1.bf16.msra.mxu0 %v10679_v0  ;;  %8208 = vmatpush1.bf16.msra.mxu1 %v10681_v1  ;;  %v10777_v0 = vcombine.low %v643_v48, %v651_v49  ;;  %v10792_v1 = vcombine.high %v658_v56, %v666_v57  ;;  %v747_v48 = vld [vmem:[%s16051_s1 + $0x1668] sm:$0xff]  ;;  %v762_v56 = vld [vmem:[%s16051_s1 + $0x16e0] sm:$0xff] }
 0x2c7   :  { %8004 = vmatprep.subr.bf16.mxu0 %v10696_v2  ;;  %8209 = vmatprep.subr.bf16.mxu1 %v10698_v3  ;;  %v10794_v2 = vcombine.high %v659_v58, %v667_v60  ;;  %v674_v3 = vld [vmem:[%s16051_s1 + $0x1420] sm:$0xff]  ;;  %v755_v57 = vld [vmem:[%s16051_s1 + $0x16a8] sm:$0xff] }
 0x2c8   :  { %8034 = vmatprep.mubr.bf16.mxu0 %v12421_v50  ;;  %8239 = vmatprep.mubr.bf16.mxu1 %v12421_v50  ;;  %v10807_v17 = vcombine.low %v674_v3, %v682_v4 }
 0x2ca   :  { %8005 = vmatpush1.bf16.msra.mxu0 %v10695_v8  ;;  %8210 = vmatpush1.bf16.msra.mxu1 %v10697_v10  ;;  %v10793_v8 = vcombine.low %v659_v58, %v667_v60  ;;  %v10808_v10 = vcombine.high %v674_v3, %v682_v4  ;;  %v763_v58 = vld [vmem:[%s16051_s1 + $0x16e8] sm:$0xff]  ;;  %v778_v3 = vld [vmem:[%s16051_s1 + $0x1760] sm:$0xff] }
 0x2cb   :  { %8006 = vmatprep.subr.bf16.mxu0 %v10712_v11  ;;  %8211 = vmatprep.subr.bf16.mxu1 %v10714_v12  ;;  %v10810_v11 = vcombine.high %v675_v5, %v683_v6  ;;  %v690_v12 = vld [vmem:[%s16051_s1 + $0x14a0] sm:$0xff]  ;;  %v771_v4 = vld [vmem:[%s16051_s1 + $0x1728] sm:$0xff] }
 0x2cc   :  { %v10823_v26 = vcombine.low %v690_v12, %v698_v13 }
 0x2ce   :  { %8007 = vmatpush1.bf16.msra.mxu0 %v10711_v18  ;;  %8212 = vmatpush1.bf16.msra.mxu1 %v10713_v19  ;;  %v10809_v18 = vcombine.low %v675_v5, %v683_v6  ;;  %v10824_v19 = vcombine.high %v690_v12, %v698_v13  ;;  %v779_v5 = vld [vmem:[%s16051_s1 + $0x1768] sm:$0xff]  ;;  %v794_v12 = vld [vmem:[%s16051_s1 + $0x17e0] sm:$0xff] }
 0x2cf   :  { %8008 = vmatprep.subr.bf16.mxu0 %v10728_v20  ;;  %8213 = vmatprep.subr.bf16.mxu1 %v10730_v21  ;;  %v10826_v20 = vcombine.high %v691_v14, %v699_v15  ;;  %v706_v21 = vld [vmem:[%s16051_s1 + $0x1520] sm:$0xff]  ;;  %v787_v13 = vld [vmem:[%s16051_s1 + $0x17a8] sm:$0xff] }
 0x2d0   :  { %v10839_v36 = vcombine.low %v706_v21, %v714_v22 }
 0x2d2   :  { %8009 = vmatpush1.bf16.msra.mxu0 %v10727_v27  ;;  %8214 = vmatpush1.bf16.msra.mxu1 %v10729_v28  ;;  %v10825_v27 = vcombine.low %v691_v14, %v699_v15  ;;  %v10840_v28 = vcombine.high %v706_v21, %v714_v22  ;;  %v795_v14 = vld [vmem:[%s16051_s1 + $0x17e8] sm:$0xff]  ;;  %v810_v21 = vld [vmem:[%s16051_s1 + $0x1860] sm:$0xff] }
 0x2d3   :  { %8010 = vmatprep.subr.bf16.mxu0 %v10744_v59  ;;  %8215 = vmatprep.subr.bf16.mxu1 %v10746_v30  ;;  %v10842_v59 = vcombine.high %v707_v24, %v715_v25  ;;  %v722_v30 = vld [vmem:[%s16051_s1 + $0x15a0] sm:$0xff]  ;;  %v803_v22 = vld [vmem:[%s16051_s1 + $0x1828] sm:$0xff] }
 0x2d4   :  { %v10855_v49 = vcombine.low %v722_v30, %v730_v31 }
 0x2d6   :  { %8011 = vmatpush1.bf16.msra.mxu0 %v10743_v53  ;;  %8216 = vmatpush1.bf16.msra.mxu1 %v10745_v38  ;;  %v10841_v53 = vcombine.low %v707_v24, %v715_v25  ;;  %v10856_v38 = vcombine.high %v722_v30, %v730_v31  ;;  %v811_v24 = vld [vmem:[%s16051_s1 + $0x1868] sm:$0xff]  ;;  %v826_v30 = vld [vmem:[%s16051_s1 + $0x18e0] sm:$0xff] }
 0x2d7   :  { %8012 = vmatprep.subr.bf16.mxu0 %v10760_v39  ;;  %8217 = vmatprep.subr.bf16.mxu1 %v10762_v44  ;;  %v10858_v39 = vcombine.high %v723_v32, %v731_v35  ;;  %v738_v44 = vld [vmem:[%s16051_s1 + $0x1620] sm:$0xff]  ;;  %v819_v31 = vld [vmem:[%s16051_s1 + $0x18a8] sm:$0xff] }
 0x2d8   :  { %v10871_v60 = vcombine.low %v738_v44, %v746_v45 }
 0x2da   :  { %8013 = vmatpush1.bf16.msra.mxu0 %v10759_v51  ;;  %8218 = vmatpush1.bf16.msra.mxu1 %v10761_v52  ;;  %v10857_v51 = vcombine.low %v723_v32, %v731_v35  ;;  %v10872_v52 = vcombine.high %v738_v44, %v746_v45  ;;  %v827_v32 = vld [vmem:[%s16051_s1 + $0x18e8] sm:$0xff]  ;;  %v842_v44 = vld [vmem:[%s16051_s1 + $0x1960] sm:$0xff] }
 0x2db   :  { %8014 = vmatprep.subr.bf16.mxu0 %v10776_v54  ;;  %8219 = vmatprep.subr.bf16.mxu1 %v10778_v55  ;;  %v10874_v54 = vcombine.high %v739_v47, %v747_v48  ;;  %v754_v55 = vld [vmem:[%s16051_s1 + $0x16a0] sm:$0xff]  ;;  %v835_v45 = vld [vmem:[%s16051_s1 + $0x1928] sm:$0xff] }
 0x2dc   :  { %v10887_v6 = vcombine.low %v754_v55, %v762_v56 }
 0x2de   :  { %8015 = vmatpush1.bf16.msra.mxu0 %v10775_v62  ;;  %8220 = vmatpush1.bf16.msra.mxu1 %v10777_v0  ;;  %v10873_v62 = vcombine.low %v739_v47, %v747_v48  ;;  %v10888_v0 = vcombine.high %v754_v55, %v762_v56  ;;  %v843_v47 = vld [vmem:[%s16051_s1 + $0x1968] sm:$0xff]  ;;  %v858_v55 = vld [vmem:[%s16051_s1 + $0x19e0] sm:$0xff] }
 0x2df   :  { %8016 = vmatprep.subr.bf16.mxu0 %v10792_v1  ;;  %8221 = vmatprep.subr.bf16.mxu1 %v10794_v2  ;;  %v10890_v1 = vcombine.high %v755_v57, %v763_v58  ;;  %v770_v2 = vld [vmem:[%s16051_s1 + $0x1720] sm:$0xff]  ;;  %v851_v56 = vld [vmem:[%s16051_s1 + $0x19a8] sm:$0xff] }
 0x2e0   :  { %v10903_v15 = vcombine.low %v770_v2, %v778_v3 }
 0x2e2   :  { %8017 = vmatpush1.bf16.msra.mxu0 %v10791_v7  ;;  %8222 = vmatpush1.bf16.msra.mxu1 %v10793_v8  ;;  %v10889_v7 = vcombine.low %v755_v57, %v763_v58  ;;  %v10904_v8 = vcombine.high %v770_v2, %v778_v3  ;;  %v859_v57 = vld [vmem:[%s16051_s1 + $0x19e8] sm:$0xff]  ;;  %v874_v2 = vld [vmem:[%s16051_s1 + $0x1a60] sm:$0xff] }
 0x2e3   :  { %8018 = vmatprep.subr.bf16.mxu0 %v10808_v10  ;;  %8223 = vmatprep.subr.bf16.mxu1 %v10810_v11  ;;  %v10906_v10 = vcombine.high %v771_v4, %v779_v5  ;;  %v786_v11 = vld [vmem:[%s16051_s1 + $0x17a0] sm:$0xff]  ;;  %v867_v3 = vld [vmem:[%s16051_s1 + $0x1a28] sm:$0xff] }
 0x2e4   :  { %v10919_v25 = vcombine.low %v786_v11, %v794_v12 }
 0x2e6   :  { %8019 = vmatpush1.bf16.msra.mxu0 %v10807_v17  ;;  %8224 = vmatpush1.bf16.msra.mxu1 %v10809_v18  ;;  %v10905_v17 = vcombine.low %v771_v4, %v779_v5  ;;  %v10920_v18 = vcombine.high %v786_v11, %v794_v12  ;;  %v875_v4 = vld [vmem:[%s16051_s1 + $0x1a68] sm:$0xff]  ;;  %v890_v11 = vld [vmem:[%s16051_s1 + $0x1ae0] sm:$0xff] }
 0x2e7   :  { %8020 = vmatprep.subr.bf16.mxu0 %v10824_v19  ;;  %8225 = vmatprep.subr.bf16.mxu1 %v10826_v20  ;;  %v10922_v19 = vcombine.high %v787_v13, %v795_v14  ;;  %v802_v20 = vld [vmem:[%s16051_s1 + $0x1820] sm:$0xff]  ;;  %v883_v12 = vld [vmem:[%s16051_s1 + $0x1aa8] sm:$0xff] }
 0x2e8   :  { %v10935_v35 = vcombine.low %v802_v20, %v810_v21 }
 0x2ea   :  { %8021 = vmatpush1.bf16.msra.mxu0 %v10823_v26  ;;  %8226 = vmatpush1.bf16.msra.mxu1 %v10825_v27  ;;  %v10921_v26 = vcombine.low %v787_v13, %v795_v14  ;;  %v10936_v27 = vcombine.high %v802_v20, %v810_v21  ;;  %v891_v13 = vld [vmem:[%s16051_s1 + $0x1ae8] sm:$0xff]  ;;  %v906_v20 = vld [vmem:[%s16051_s1 + $0x1b60] sm:$0xff] }
 0x2eb   :  { %8022 = vmatprep.subr.bf16.mxu0 %v10840_v28  ;;  %8227 = vmatprep.subr.bf16.mxu1 %v10842_v59  ;;  %v10938_v28 = vcombine.high %v803_v22, %v811_v24  ;;  %v818_v59 = vld [vmem:[%s16051_s1 + $0x18a0] sm:$0xff]  ;;  %v899_v21 = vld [vmem:[%s16051_s1 + $0x1b28] sm:$0xff] }
 0x2ec   :  { %v10951_v48 = vcombine.low %v818_v59, %v826_v30 }
 0x2ee   :  { %8023 = vmatpush1.bf16.msra.mxu0 %v10839_v36  ;;  %8228 = vmatpush1.bf16.msra.mxu1 %v10841_v53  ;;  %v10937_v36 = vcombine.low %v803_v22, %v811_v24  ;;  %v10952_v53 = vcombine.high %v818_v59, %v826_v30  ;;  %v907_v22 = vld [vmem:[%s16051_s1 + $0x1b68] sm:$0xff]  ;;  %v914_v59 = vld [vmem:[%s16051_s1 + $0x1ba0] sm:$0xff] }
 0x2ef   :  { %8024 = vmatprep.subr.bf16.mxu0 %v10856_v38  ;;  %8229 = vmatprep.subr.bf16.mxu1 %v10858_v39  ;;  %v10954_v38 = vcombine.high %v819_v31, %v827_v32  ;;  %v834_v39 = vld [vmem:[%s16051_s1 + $0x1920] sm:$0xff] }
 0x2f0   :  { %v10967_v58 = vcombine.low %v834_v39, %v842_v44  ;;  %v922_v30 = vld [vmem:[%s16051_s1 + $0x1be0] sm:$0xff] }
 0x2f2   :  { %8025 = vmatpush1.bf16.msra.mxu0 %v10855_v49  ;;  %8230 = vmatpush1.bf16.msra.mxu1 %v10857_v51  ;;  %v10953_v49 = vcombine.low %v819_v31, %v827_v32  ;;  %v10968_v51 = vcombine.high %v834_v39, %v842_v44 }
 0x2f3   :  { %8026 = vmatprep.subr.bf16.mxu0 %v10872_v52  ;;  %8231 = vmatprep.subr.bf16.mxu1 %v10874_v54  ;;  %v10970_v52 = vcombine.high %v835_v45, %v843_v47  ;;  %v850_v54 = vld [vmem:[%s16051_s1 + $0x19a0] sm:$0xff] }
 0x2f4   :  { %v10983_v5 = vcombine.low %v850_v54, %v858_v55 }
 0x2f6   :  { %8027 = vmatpush1.bf16.msra.mxu0 %v10871_v60  ;;  %8232 = vmatpush1.bf16.msra.mxu1 %v10873_v62  ;;  %v10969_v60 = vcombine.low %v835_v45, %v843_v47  ;;  %v10984_v62 = vcombine.high %v850_v54, %v858_v55  ;;  %v11033_v47 = vcombine.low %v899_v21, %v907_v22  ;;  %v938_v54 = vld [vmem:[%s16051_s1 + $0x1c60] sm:$0xff]  ;;  %v931_v55 = vld [vmem:[%s16051_s1 + $0x1c28] sm:$0xff] }
 0x2f7   :  { %8028 = vmatprep.subr.bf16.mxu0 %v10888_v0  ;;  %8233 = vmatprep.subr.bf16.mxu1 %v10890_v1  ;;  %v10986_v0 = vcombine.high %v851_v56, %v859_v57  ;;  %v866_v1 = vld [vmem:[%s16051_s1 + $0x1a20] sm:$0xff] }
 0x2f8   :  { %v10999_v14 = vcombine.low %v866_v1, %v874_v2 }
 0x2fa   :  { %8029 = vmatpush1.bf16.msra.mxu0 %v10887_v6  ;;  %8234 = vmatpush1.bf16.msra.mxu1 %v10889_v7  ;;  %v10985_v6 = vcombine.low %v851_v56, %v859_v57  ;;  %v11000_v7 = vcombine.high %v866_v1, %v874_v2  ;;  %v939_v56 = vld [vmem:[%s16051_s1 + $0x1c68] sm:$0xff]  ;;  %v11047_v57 = vcombine.low %v914_v59, %v922_v30  ;;  %v954_v1 = vld [vmem:[%s16051_s1 + $0x1ce0] sm:$0xff] }
 0x2fb   :  { %8030 = vmatprep.subr.bf16.mxu0 %v10904_v8  ;;  %8235 = vmatprep.subr.bf16.mxu1 %v10906_v10  ;;  %v11002_v8 = vcombine.high %v867_v3, %v875_v4  ;;  %v882_v10 = vld [vmem:[%s16051_s1 + $0x1aa0] sm:$0xff]  ;;  %v947_v2 = vld [vmem:[%s16051_s1 + $0x1ca8] sm:$0xff] }
 0x2fc   :  { %v11015_v24 = vcombine.low %v882_v10, %v890_v11 }
 0x2fe   :  { %8031 = vmatpush1.bf16.msra.mxu0 %v10903_v15  ;;  %8236 = vmatpush1.bf16.msra.mxu1 %v10905_v17  ;;  %v11001_v15 = vcombine.low %v867_v3, %v875_v4  ;;  %v11016_v17 = vcombine.high %v882_v10, %v890_v11  ;;  %v955_v3 = vld [vmem:[%s16051_s1 + $0x1ce8] sm:$0xff]  ;;  %v970_v10 = vld [vmem:[%s16051_s1 + $0x1d60] sm:$0xff] }
 0x2ff   :  { %8032 = vmatprep.subr.bf16.mxu0 %v10920_v18  ;;  %8237 = vmatprep.subr.bf16.mxu1 %v10922_v19  ;;  %v11018_v18 = vcombine.high %v883_v12, %v891_v13  ;;  %v898_v19 = vld [vmem:[%s16051_s1 + $0x1b20] sm:$0xff]  ;;  %v963_v11 = vld [vmem:[%s16051_s1 + $0x1d28] sm:$0xff] }
 0x300   :  { %v11031_v39 = vcombine.low %v898_v19, %v906_v20 }
 0x302   :  { %8033 = vmatpush1.bf16.msra.mxu0 %v10919_v25  ;;  %8238 = vmatpush1.bf16.msra.mxu1 %v10921_v26  ;;  %v11017_v25 = vcombine.low %v883_v12, %v891_v13  ;;  %v11032_v26 = vcombine.high %v898_v19, %v906_v20  ;;  %v971_v12 = vld [vmem:[%s16051_s1 + $0x1d68] sm:$0xff]  ;;  %v986_v19 = vld [vmem:[%s16051_s1 + $0x1de0] sm:$0xff] }
 0x303   :  { %8043 = vmatprep.subr.bf16.mxu0 %v10936_v27  ;;  %8248 = vmatprep.subr.bf16.mxu1 %v10938_v28  ;;  %v11034_v28 = vcombine.high %v899_v21, %v907_v22  ;;  %v979_v20 = vld [vmem:[%s16051_s1 + $0x1da8] sm:$0xff] }
 0x304   :  { %v987_v21 = vld [vmem:[%s16051_s1 + $0x1de8] sm:$0xff] }
 0x305   :  { %8035 = vmatmul.mubr.bf16.vlgmr.msra.gmra.mrb[8].mxu0 %v12609_v61  ;;  %8240 = vmatmul.mubr.bf16.vlgmr.msra.gmra.mrb[8].mxu1 %v12609_v61 }
 0x306   :  { %8044 = vmatpush1.bf16.msra.mxu0 %v10935_v35  ;;  %8249 = vmatpush1.bf16.msra.mxu1 %v10937_v36  ;;  %v915_v35 = vld [vmem:[%s16051_s1 + $0x1ba8] sm:$0xff] }
 0x307   :  { %8045 = vmatprep.subr.bf16.mxu0 %v10952_v53  ;;  %8250 = vmatprep.subr.bf16.mxu1 %v10954_v38  ;;  %v923_v36 = vld [vmem:[%s16051_s1 + $0x1be8] sm:$0xff] }
 0x308   :  { %8075 = vmatprep.mubr.bf16.mxu0 %v12619_v63  ;;  %8280 = vmatprep.mubr.bf16.mxu1 %v12619_v63 }
 0x30a   :  { %8046 = vmatpush1.bf16.msra.mxu0 %v10951_v48  ;;  %8251 = vmatpush1.bf16.msra.mxu1 %v10953_v49  ;;  %v11048_v48 = vcombine.high %v914_v59, %v922_v30  ;;  %v1002_v59 = vld [vmem:[%s16051_s1 + $0x1e60] sm:$0xff]  ;;  %v995_v30 = vld [vmem:[%s16051_s1 + $0x1e28] sm:$0xff] }
 0x30b   :  { %8047 = vmatprep.subr.bf16.mxu0 %v10968_v51  ;;  %8252 = vmatprep.subr.bf16.mxu1 %v10970_v52  ;;  %v11050_v51 = vcombine.high %v915_v35, %v923_v36  ;;  %v930_v52 = vld [vmem:[%s16051_s1 + $0x1c20] sm:$0xff] }
 0x30c   :  { %v11063_v4 = vcombine.low %v930_v52, %v938_v54 }
 0x30e   :  { %8048 = vmatpush1.bf16.msra.mxu0 %v10967_v58  ;;  %8253 = vmatpush1.bf16.msra.mxu1 %v10969_v60  ;;  %v11049_v58 = vcombine.low %v915_v35, %v923_v36  ;;  %v11064_v60 = vcombine.high %v930_v52, %v938_v54  ;;  %v1003_v35 = vld [vmem:[%s16051_s1 + $0x1e68] sm:$0xff] }
 0x30f   :  { %8049 = vmatprep.subr.bf16.mxu0 %v10984_v62  ;;  %8254 = vmatprep.subr.bf16.mxu1 %v10986_v0  ;;  %v11066_v62 = vcombine.high %v931_v55, %v939_v56  ;;  %v946_v0 = vld [vmem:[%s16051_s1 + $0x1ca0] sm:$0xff]  ;;  %v11129_v52 = vcombine.low %v995_v30, %v1003_v35 }
 0x310   :  { %v11079_v13 = vcombine.low %v946_v0, %v954_v1 }
 0x312   :  { %8050 = vmatpush1.bf16.msra.mxu0 %v10983_v5  ;;  %8255 = vmatpush1.bf16.msra.mxu1 %v10985_v6  ;;  %v11065_v5 = vcombine.low %v931_v55, %v939_v56  ;;  %v11080_v6 = vcombine.high %v946_v0, %v954_v1  ;;  %v1026_v56 = vld [vmem:[%s16051_s1 + $0x1f20] sm:$0xff] }
 0x313   :  { %8051 = vmatprep.subr.bf16.mxu0 %v11000_v7  ;;  %8256 = vmatprep.subr.bf16.mxu1 %v11002_v8  ;;  %v11082_v7 = vcombine.high %v947_v2, %v955_v3  ;;  %v962_v8 = vld [vmem:[%s16051_s1 + $0x1d20] sm:$0xff] }
 0x314   :  { %v11095_v22 = vcombine.low %v962_v8, %v970_v10 }
 0x316   :  { %8052 = vmatpush1.bf16.msra.mxu0 %v10999_v14  ;;  %8257 = vmatpush1.bf16.msra.mxu1 %v11001_v15  ;;  %v11081_v14 = vcombine.low %v947_v2, %v955_v3  ;;  %v11096_v15 = vcombine.high %v962_v8, %v970_v10  ;;  %v1042_v3 = vld [vmem:[%s16051_s1 + $0x1fa0] sm:$0xff] }
 0x317   :  { %8053 = vmatprep.subr.bf16.mxu0 %v11016_v17  ;;  %8258 = vmatprep.subr.bf16.mxu1 %v11018_v18  ;;  %v11098_v17 = vcombine.high %v963_v11, %v971_v12  ;;  %v978_v18 = vld [vmem:[%s16051_s1 + $0x1da0] sm:$0xff] }
 0x318   :  { %v14465_v27 = vpop.f32.mrb[4].mxu0  ;;  %v14473_v31 = vpop.f32.mrb[4].mxu1  ;;  %v11111_v36 = vcombine.low %v978_v18, %v986_v19 }
 0x319   :  { %v14475_v32 = vpop.f32.mrb[5].mxu0  ;;  %v14483_v53 = vpop.f32.mrb[5].mxu1 }
 0x31a   :  { %v7712_v38 = vpop.f32.mrb[6].mxu0  ;;  %8054 = vmatpush1.bf16.msra.mxu0 %v11015_v24  ;;  %v7917_v44 = vpop.f32.mrb[6].mxu1  ;;  %8259 = vmatpush1.bf16.msra.mxu1 %v11017_v25  ;;  %v11097_v24 = vcombine.low %v963_v11, %v971_v12  ;;  %v11112_v25 = vcombine.high %v978_v18, %v986_v19  ;;  %v1058_v12 = vld [vmem:[%s16051_s1 + $0x2020] sm:$0xff] }
 0x31b   :  { %v7713_v45 = vpop.f32.mrb[7].mxu0  ;;  %8055 = vmatprep.subr.bf16.mxu0 %v11032_v26  ;;  %v7918_v49 = vpop.f32.mrb[7].mxu1  ;;  %8260 = vmatprep.subr.bf16.mxu1 %v11034_v28  ;;  %v11114_v26 = vcombine.high %v979_v20, %v987_v21  ;;  %v994_v28 = vld [vmem:[%s16051_s1 + $0x1e20] sm:$0xff]  ;;  %v11113_v38 = vcombine.low %v979_v20, %v987_v21  ;;  %v11130_v44 = vcombine.high %v995_v30, %v1003_v35 }
 0x31c   :  { %v1010_v45 = vld [vmem:[%s16051_s1 + $0x1ea0] sm:$0xff]  ;;  %v1019_v49 = vld [vmem:[%s16051_s1 + $0x1ee8] sm:$0xff] }
 0x31d   :  { %v1074_v21 = vld [vmem:[%s16051_s1 + $0x20a0] sm:$0xff] }
 0x31e   :  { %8056 = vmatpush1.bf16.msra.mxu0 %v11031_v39  ;;  %8261 = vmatpush1.bf16.msra.mxu1 %v11033_v47  ;;  %v11128_v39 = vcombine.high %v994_v28, %v1002_v59  ;;  %v1018_v47 = vld [vmem:[%s16051_s1 + $0x1ee0] sm:$0xff] }
 0x31f   :  { %8057 = vmatprep.subr.bf16.mxu0 %v11048_v48  ;;  %8262 = vmatprep.subr.bf16.mxu1 %v11050_v51  ;;  %v1011_v48 = vld [vmem:[%s16051_s1 + $0x1ea8] sm:$0xff]  ;;  %v11127_v51 = vcombine.low %v994_v28, %v1002_v59  ;;  %v11144_v54 = vcombine.high %v1010_v45, %v1018_v47  ;;  %v1090_v35 = vld [vmem:[%s16051_s1 + $0x2120] sm:$0xff] }
 0x320   :  { %v11146_v55 = vcombine.high %v1011_v48, %v1019_v49  ;;  %v11145_v0 = vcombine.low %v1011_v48, %v1019_v49  ;;  %v1106_v49 = vld [vmem:[%s16051_s1 + $0x21a0] sm:$0xff] }
 0x322   :  { %8058 = vmatpush1.bf16.msra.mxu0 %v11047_v57  ;;  %8263 = vmatpush1.bf16.msra.mxu1 %v11049_v58  ;;  %v1034_v57 = vld [vmem:[%s16051_s1 + $0x1f60] sm:$0xff]  ;;  %v1027_v58 = vld [vmem:[%s16051_s1 + $0x1f28] sm:$0xff] }
 0x323   :  { %8059 = vmatprep.subr.bf16.mxu0 %v11064_v60  ;;  %8264 = vmatprep.subr.bf16.mxu1 %v11066_v62  ;;  %v1035_v60 = vld [vmem:[%s16051_s1 + $0x1f68] sm:$0xff]  ;;  %v11143_v62 = vcombine.low %v1010_v45, %v1018_v47  ;;  %v11160_v1 = vcombine.high %v1026_v56, %v1034_v57 }
 0x324   :  { %v11162_v2 = vcombine.high %v1027_v58, %v1035_v60  ;;  %v11161_v8 = vcombine.low %v1027_v58, %v1035_v60  ;;  %v1122_v60 = vld [vmem:[%s16051_s1 + $0x2220] sm:$0xff] }
 0x326   :  { %8060 = vmatpush1.bf16.msra.mxu0 %v11063_v4  ;;  %8265 = vmatpush1.bf16.msra.mxu1 %v11065_v5  ;;  %v1050_v4 = vld [vmem:[%s16051_s1 + $0x1fe0] sm:$0xff]  ;;  %v1043_v5 = vld [vmem:[%s16051_s1 + $0x1fa8] sm:$0xff] }
 0x327   :  { %8061 = vmatprep.subr.bf16.mxu0 %v11080_v6  ;;  %8266 = vmatprep.subr.bf16.mxu1 %v11082_v7  ;;  %v1051_v6 = vld [vmem:[%s16051_s1 + $0x1fe8] sm:$0xff]  ;;  %v11159_v7 = vcombine.low %v1026_v56, %v1034_v57  ;;  %v11176_v10 = vcombine.high %v1042_v3, %v1050_v4 }
 0x328   :  { %v11178_v11 = vcombine.high %v1043_v5, %v1051_v6  ;;  %v11177_v18 = vcombine.low %v1043_v5, %v1051_v6  ;;  %v1138_v6 = vld [vmem:[%s16051_s1 + $0x22a0] sm:$0xff] }
 0x32a   :  { %8062 = vmatpush1.bf16.msra.mxu0 %v11079_v13  ;;  %8267 = vmatpush1.bf16.msra.mxu1 %v11081_v14  ;;  %v1066_v13 = vld [vmem:[%s16051_s1 + $0x2060] sm:$0xff]  ;;  %v1059_v14 = vld [vmem:[%s16051_s1 + $0x2028] sm:$0xff] }
 0x32b   :  { %8063 = vmatprep.subr.bf16.mxu0 %v11096_v15  ;;  %8268 = vmatprep.subr.bf16.mxu1 %v11098_v17  ;;  %v1067_v15 = vld [vmem:[%s16051_s1 + $0x2068] sm:$0xff]  ;;  %v11175_v17 = vcombine.low %v1042_v3, %v1050_v4  ;;  %v11192_v19 = vcombine.high %v1058_v12, %v1066_v13 }
 0x32c   :  { %v11194_v20 = vcombine.high %v1059_v14, %v1067_v15  ;;  %v11193_v28 = vcombine.low %v1059_v14, %v1067_v15  ;;  %v1154_v15 = vld [vmem:[%s16051_s1 + $0x2320] sm:$0xff] }
 0x32e   :  { %8064 = vmatpush1.bf16.msra.mxu0 %v11095_v22  ;;  %8269 = vmatpush1.bf16.msra.mxu1 %v11097_v24  ;;  %v1082_v22 = vld [vmem:[%s16051_s1 + $0x20e0] sm:$0xff]  ;;  %v1075_v24 = vld [vmem:[%s16051_s1 + $0x20a8] sm:$0xff] }
 0x32f   :  { %8065 = vmatprep.subr.bf16.mxu0 %v11112_v25  ;;  %8270 = vmatprep.subr.bf16.mxu1 %v11114_v26  ;;  %v1083_v25 = vld [vmem:[%s16051_s1 + $0x20e8] sm:$0xff]  ;;  %v11191_v26 = vcombine.low %v1058_v12, %v1066_v13  ;;  %v11208_v59 = vcombine.high %v1074_v21, %v1082_v22 }
 0x330   :  { %v11210_v30 = vcombine.high %v1075_v24, %v1083_v25  ;;  %v11209_v45 = vcombine.low %v1075_v24, %v1083_v25  ;;  %v1170_v25 = vld [vmem:[%s16051_s1 + $0x23a0] sm:$0xff] }
 0x332   :  { %8066 = vmatpush1.bf16.msra.mxu0 %v11111_v36  ;;  %8271 = vmatpush1.bf16.msra.mxu1 %v11113_v38  ;;  %v1098_v36 = vld [vmem:[%s16051_s1 + $0x2160] sm:$0xff]  ;;  %v1091_v38 = vld [vmem:[%s16051_s1 + $0x2128] sm:$0xff] }
 0x333   :  { %8067 = vmatprep.subr.bf16.mxu0 %v11128_v39  ;;  %8272 = vmatprep.subr.bf16.mxu1 %v11130_v44  ;;  %v1099_v39 = vld [vmem:[%s16051_s1 + $0x2168] sm:$0xff]  ;;  %v11207_v44 = vcombine.low %v1074_v21, %v1082_v22  ;;  %v11224_v47 = vcombine.high %v1090_v35, %v1098_v36 }
 0x334   :  { %v11226_v48 = vcombine.high %v1091_v38, %v1099_v39  ;;  %v11225_v56 = vcombine.low %v1091_v38, %v1099_v39  ;;  %v36_v39 = vld [vmem:[%s16051_s1 + $0x30] sm:$0xff] }
 0x336   :  { %8068 = vmatpush1.bf16.msra.mxu0 %v11127_v51  ;;  %8273 = vmatpush1.bf16.msra.mxu1 %v11129_v52  ;;  %v1114_v51 = vld [vmem:[%s16051_s1 + $0x21e0] sm:$0xff]  ;;  %v1107_v52 = vld [vmem:[%s16051_s1 + $0x21a8] sm:$0xff] }
 0x337   :  { %8069 = vmatprep.subr.bf16.mxu0 %v11144_v54  ;;  %8274 = vmatprep.subr.bf16.mxu1 %v11146_v55  ;;  %v1115_v54 = vld [vmem:[%s16051_s1 + $0x21e8] sm:$0xff]  ;;  %v11223_v55 = vcombine.low %v1090_v35, %v1098_v36  ;;  %v11240_v57 = vcombine.high %v1106_v49, %v1114_v51 }
 0x338   :  { %v11242_v58 = vcombine.high %v1107_v52, %v1115_v54  ;;  %v11241_v3 = vcombine.low %v1107_v52, %v1115_v54  ;;  %v52_v54 = vld [vmem:[%s16051_s1 + $0xb0] sm:$0xff] }
 0x33a   :  { %8070 = vmatpush1.bf16.msra.mxu0 %v11143_v62  ;;  %8275 = vmatpush1.bf16.msra.mxu1 %v11145_v0  ;;  %v1130_v62 = vld [vmem:[%s16051_s1 + $0x2260] sm:$0xff]  ;;  %v1123_v0 = vld [vmem:[%s16051_s1 + $0x2228] sm:$0xff] }
 0x33b   :  { %8071 = vmatprep.subr.bf16.mxu0 %v11160_v1  ;;  %8276 = vmatprep.subr.bf16.mxu1 %v11162_v2  ;;  %v1131_v1 = vld [vmem:[%s16051_s1 + $0x2268] sm:$0xff]  ;;  %v11239_v2 = vcombine.low %v1106_v49, %v1114_v51  ;;  %v11256_v4 = vcombine.high %v1122_v60, %v1130_v62 }
 0x33c   :  { %v11258_v5 = vcombine.high %v1123_v0, %v1131_v1  ;;  %v11257_v12 = vcombine.low %v1123_v0, %v1131_v1  ;;  %v68_v1 = vld [vmem:[%s16051_s1 + $0x130] sm:$0xff] }
 0x33e   :  { %8072 = vmatpush1.bf16.msra.mxu0 %v11159_v7  ;;  %8277 = vmatpush1.bf16.msra.mxu1 %v11161_v8  ;;  %v1146_v7 = vld [vmem:[%s16051_s1 + $0x22e0] sm:$0xff]  ;;  %v1139_v8 = vld [vmem:[%s16051_s1 + $0x22a8] sm:$0xff] }
 0x33f   :  { %8073 = vmatprep.subr.bf16.mxu0 %v11176_v10  ;;  %8278 = vmatprep.subr.bf16.mxu1 %v11178_v11  ;;  %v1147_v10 = vld [vmem:[%s16051_s1 + $0x22e8] sm:$0xff]  ;;  %v11255_v11 = vcombine.low %v1122_v60, %v1130_v62  ;;  %v11272_v13 = vcombine.high %v1138_v6, %v1146_v7 }
 0x340   :  { %v11274_v14 = vcombine.high %v1139_v8, %v1147_v10  ;;  %v11273_v21 = vcombine.low %v1139_v8, %v1147_v10  ;;  %v84_v10 = vld [vmem:[%s16051_s1 + $0x1b0] sm:$0xff] }
 0x342   :  { %8074 = vmatpush1.bf16.msra.mxu0 %v11175_v17  ;;  %8279 = vmatpush1.bf16.msra.mxu1 %v11177_v18  ;;  %v1162_v17 = vld [vmem:[%s16051_s1 + $0x2360] sm:$0xff]  ;;  %v1155_v18 = vld [vmem:[%s16051_s1 + $0x2328] sm:$0xff] }
 0x343   :  { %8084 = vmatprep.subr.bf16.mxu0 %v11192_v19  ;;  %8289 = vmatprep.subr.bf16.mxu1 %v11194_v20  ;;  %v1163_v19 = vld [vmem:[%s16051_s1 + $0x2368] sm:$0xff]  ;;  %v11271_v20 = vcombine.low %v1138_v6, %v1146_v7  ;;  %v11288_v22 = vcombine.high %v1154_v15, %v1162_v17 }
 0x344   :  { %v11290_v24 = vcombine.high %v1155_v18, %v1163_v19  ;;  %v11289_v35 = vcombine.low %v1155_v18, %v1163_v19  ;;  %v100_v19 = vld [vmem:[%s16051_s1 + $0x230] sm:$0xff] }
 0x345   :  { %8076 = vmatmul.mubr.bf16.vlgmr.msra.gmra.mrb[8].mxu0 %v12807_v16  ;;  %8281 = vmatmul.mubr.bf16.vlgmr.msra.gmra.mrb[8].mxu1 %v12807_v16 }
 0x346   :  { %8085 = vmatpush1.bf16.msra.mxu0 %v11191_v26  ;;  %8290 = vmatpush1.bf16.msra.mxu1 %v11193_v28  ;;  %v1178_v26 = vld [vmem:[%s16051_s1 + $0x23e0] sm:$0xff]  ;;  %v1171_v28 = vld [vmem:[%s16051_s1 + $0x23a8] sm:$0xff] }
 0x347   :  { %8086 = vmatprep.subr.bf16.mxu0 %v11208_v59  ;;  %8291 = vmatprep.subr.bf16.mxu1 %v11210_v30  ;;  %v1179_v59 = vld [vmem:[%s16051_s1 + $0x23e8] sm:$0xff]  ;;  %v11287_v30 = vcombine.low %v1154_v15, %v1162_v17  ;;  %v11304_v36 = vcombine.high %v1170_v25, %v1178_v26 }
 0x348   :  { %8116 = vmatprep.mubr.bf16.mxu0 %v11923_v34  ;;  %8321 = vmatprep.mubr.bf16.mxu1 %v11923_v34  ;;  %v11306_v38 = vcombine.high %v1171_v28, %v1179_v59  ;;  %v11305_v49 = vcombine.low %v1171_v28, %v1179_v59  ;;  %v116_v28 = vld [vmem:[%s16051_s1 + $0x2b0] sm:$0xff] }
 0x349   :  { %v124_v59 = vld [vmem:[%s16051_s1 + $0x2f0] sm:$0xff] }
 0x34a   :  { %8087 = vmatpush1.bf16.msra.mxu0 %v11207_v44  ;;  %8292 = vmatpush1.bf16.msra.mxu1 %v11209_v45  ;;  %v44_v44 = vld [vmem:[%s16051_s1 + $0x70] sm:$0xff]  ;;  %v37_v45 = vld [vmem:[%s16051_s1 + $0x38] sm:$0xff] }
 0x34b   :  { %8088 = vmatprep.subr.bf16.mxu0 %v11224_v47  ;;  %8293 = vmatprep.subr.bf16.mxu1 %v11226_v48  ;;  %v45_v47 = vld [vmem:[%s16051_s1 + $0x78] sm:$0xff]  ;;  %v11303_v48 = vcombine.low %v1170_v25, %v1178_v26  ;;  %v10172_v51 = vcombine.high %v36_v39, %v44_v44 }
 0x34c   :  { %v10174_v52 = vcombine.high %v37_v45, %v45_v47  ;;  %v10173_v60 = vcombine.low %v37_v45, %v45_v47  ;;  %v132_v45 = vld [vmem:[%s16051_s1 + $0x330] sm:$0xff] }
 0x34d   :  { %v140_v47 = vld [vmem:[%s16051_s1 + $0x370] sm:$0xff] }
 0x34e   :  { %8089 = vmatpush1.bf16.msra.mxu0 %v11223_v55  ;;  %8294 = vmatpush1.bf16.msra.mxu1 %v11225_v56  ;;  %v60_v55 = vld [vmem:[%s16051_s1 + $0xf0] sm:$0xff]  ;;  %v53_v56 = vld [vmem:[%s16051_s1 + $0xb8] sm:$0xff] }
 0x34f   :  { %8090 = vmatprep.subr.bf16.mxu0 %v11240_v57  ;;  %8295 = vmatprep.subr.bf16.mxu1 %v11242_v58  ;;  %v61_v57 = vld [vmem:[%s16051_s1 + $0xf8] sm:$0xff]  ;;  %v10171_v58 = vcombine.low %v36_v39, %v44_v44  ;;  %v10188_v62 = vcombine.high %v52_v54, %v60_v55  ;;  %v10252_v39 = vcombine.high %v116_v28, %v124_v59 }
 0x350   :  { %v10190_v0 = vcombine.high %v53_v56, %v61_v57  ;;  %v10189_v6 = vcombine.low %v53_v56, %v61_v57  ;;  %v148_v56 = vld [vmem:[%s16051_s1 + $0x3b0] sm:$0xff] }
 0x351   :  { %v156_v57 = vld [vmem:[%s16051_s1 + $0x3f0] sm:$0xff] }
 0x352   :  { %8091 = vmatpush1.bf16.msra.mxu0 %v11239_v2  ;;  %8296 = vmatpush1.bf16.msra.mxu1 %v11241_v3  ;;  %v76_v2 = vld [vmem:[%s16051_s1 + $0x170] sm:$0xff]  ;;  %v69_v3 = vld [vmem:[%s16051_s1 + $0x138] sm:$0xff] }
 0x353   :  { %8092 = vmatprep.subr.bf16.mxu0 %v11256_v4  ;;  %8297 = vmatprep.subr.bf16.mxu1 %v11258_v5  ;;  %v77_v4 = vld [vmem:[%s16051_s1 + $0x178] sm:$0xff]  ;;  %v10187_v5 = vcombine.low %v52_v54, %v60_v55  ;;  %v10204_v7 = vcombine.high %v68_v1, %v76_v2  ;;  %v10268_v54 = vcombine.high %v132_v45, %v140_v47 }
 0x354   :  { %v10206_v8 = vcombine.high %v69_v3, %v77_v4  ;;  %v10205_v15 = vcombine.low %v69_v3, %v77_v4  ;;  %v164_v3 = vld [vmem:[%s16051_s1 + $0x430] sm:$0xff] }
 0x355   :  { %v172_v4 = vld [vmem:[%s16051_s1 + $0x470] sm:$0xff] }
 0x356   :  { %8093 = vmatpush1.bf16.msra.mxu0 %v11255_v11  ;;  %8298 = vmatpush1.bf16.msra.mxu1 %v11257_v12  ;;  %v92_v11 = vld [vmem:[%s16051_s1 + $0x1f0] sm:$0xff]  ;;  %v85_v12 = vld [vmem:[%s16051_s1 + $0x1b8] sm:$0xff] }
 0x357   :  { %8094 = vmatprep.subr.bf16.mxu0 %v11272_v13  ;;  %8299 = vmatprep.subr.bf16.mxu1 %v11274_v14  ;;  %v93_v13 = vld [vmem:[%s16051_s1 + $0x1f8] sm:$0xff]  ;;  %v10203_v14 = vcombine.low %v68_v1, %v76_v2  ;;  %v10220_v17 = vcombine.high %v84_v10, %v92_v11  ;;  %v10284_v1 = vcombine.high %v148_v56, %v156_v57 }
 0x358   :  { %v10222_v18 = vcombine.high %v85_v12, %v93_v13 }
 0x35a   :  { %8095 = vmatpush1.bf16.msra.mxu0 %v11271_v20  ;;  %8300 = vmatpush1.bf16.msra.mxu1 %v11273_v21  ;;  %v108_v20 = vld [vmem:[%s16051_s1 + $0x270] sm:$0xff]  ;;  %v109_v21 = vld [vmem:[%s16051_s1 + $0x278] sm:$0xff] }
 0x35b   :  { %8096 = vmatprep.subr.bf16.mxu0 %v11288_v22  ;;  %8301 = vmatprep.subr.bf16.mxu1 %v11290_v24  ;;  %v10219_v22 = vcombine.low %v84_v10, %v92_v11  ;;  %v10221_v24 = vcombine.low %v85_v12, %v93_v13  ;;  %v10236_v25 = vcombine.high %v100_v19, %v108_v20  ;;  %v180_v12 = vld [vmem:[%s16051_s1 + $0x4b0] sm:$0xff] }
 0x35c   :  { %v10300_v10 = vcombine.high %v164_v3, %v172_v4  ;;  %v188_v13 = vld [vmem:[%s16051_s1 + $0x4f0] sm:$0xff] }
 0x35e   :  { %8097 = vmatpush1.bf16.msra.mxu0 %v11287_v30  ;;  %8302 = vmatpush1.bf16.msra.mxu1 %v11289_v35  ;;  %v117_v30 = vld [vmem:[%s16051_s1 + $0x2b8] sm:$0xff] }
 0x35f   :  { %8098 = vmatprep.subr.bf16.mxu0 %v11304_v36  ;;  %8303 = vmatprep.subr.bf16.mxu1 %v11306_v38  ;;  %v125_v35 = vld [vmem:[%s16051_s1 + $0x2f8] sm:$0xff]  ;;  %v10235_v36 = vcombine.low %v100_v19, %v108_v20  ;;  %v10316_v19 = vcombine.high %v180_v12, %v188_v13 }
 0x360   :  { %v10254_v44 = vcombine.high %v117_v30, %v125_v35 }
 0x362   :  { %8099 = vmatpush1.bf16.msra.mxu0 %v11303_v48  ;;  %8304 = vmatpush1.bf16.msra.mxu1 %v11305_v49  ;;  %v133_v48 = vld [vmem:[%s16051_s1 + $0x338] sm:$0xff] }
 0x363   :  { %8330 = vmatprep.subr.bf16.mxu0 %v10172_v51  ;;  %8535 = vmatprep.subr.bf16.mxu1 %v10174_v52  ;;  %v141_v49 = vld [vmem:[%s16051_s1 + $0x378] sm:$0xff]  ;;  %v10251_v51 = vcombine.low %v116_v28, %v124_v59  ;;  %v10253_v52 = vcombine.low %v117_v30, %v125_v35  ;;  %v212_v30 = vld [vmem:[%s16051_s1 + $0x5b0] sm:$0xff] }
 0x364   :  { %v10270_v55 = vcombine.high %v133_v48, %v141_v49  ;;  %v220_v35 = vld [vmem:[%s16051_s1 + $0x5f0] sm:$0xff] }
 0x365   :  { %8117 = vmatmul.mubr.bf16.vlgmr.msra.gmra.mrb[8].mxu0 %v12913_v29  ;;  %8322 = vmatmul.mubr.bf16.vlgmr.msra.gmra.mrb[8].mxu1 %v12913_v29 }
 0x366   :  { %8331 = vmatpush1.bf16.msra.mxu0 %v10171_v58  ;;  %8536 = vmatpush1.bf16.msra.mxu1 %v10173_v60  ;;  %v149_v58 = vld [vmem:[%s16051_s1 + $0x3b8] sm:$0xff] }
 0x367   :  { %8332 = vmatprep.subr.bf16.mxu0 %v10188_v62  ;;  %8537 = vmatprep.subr.bf16.mxu1 %v10190_v0  ;;  %v157_v60 = vld [vmem:[%s16051_s1 + $0x3f8] sm:$0xff]  ;;  %v10267_v62 = vcombine.low %v132_v45, %v140_v47  ;;  %v10269_v0 = vcombine.low %v133_v48, %v141_v49  ;;  %v10348_v45 = vcombine.high %v212_v30, %v220_v35  ;;  %v228_v48 = vld [vmem:[%s16051_s1 + $0x630] sm:$0xff] }
 0x368   :  { %8362 = vmatprep.mubr.bf16.mxu0 %v12075_v9  ;;  %8567 = vmatprep.mubr.bf16.mxu1 %v12075_v9  ;;  %v101_v9 = vld [vmem:[%s16051_s1 + $0x238] sm:$0xff]  ;;  %v10286_v2 = vcombine.high %v149_v58, %v157_v60  ;;  %v236_v49 = vld [vmem:[%s16051_s1 + $0x670] sm:$0xff] }
 0x369   :  { %v10238_v26 = vcombine.high %v101_v9, %v109_v21  ;;  %v10237_v38 = vcombine.low %v101_v9, %v109_v21  ;;  %v196_v9 = vld [vmem:[%s16051_s1 + $0x530] sm:$0xff] }
 0x36a   :  { %8333 = vmatpush1.bf16.msra.mxu0 %v10187_v5  ;;  %8538 = vmatpush1.bf16.msra.mxu1 %v10189_v6  ;;  %v165_v5 = vld [vmem:[%s16051_s1 + $0x438] sm:$0xff]  ;;  %v204_v21 = vld [vmem:[%s16051_s1 + $0x570] sm:$0xff] }
 0x36b   :  { %8334 = vmatprep.subr.bf16.mxu0 %v10204_v7  ;;  %8539 = vmatprep.subr.bf16.mxu1 %v10206_v8  ;;  %v173_v6 = vld [vmem:[%s16051_s1 + $0x478] sm:$0xff]  ;;  %v10283_v7 = vcombine.low %v148_v56, %v156_v57  ;;  %v10285_v8 = vcombine.low %v149_v58, %v157_v60  ;;  %v10332_v28 = vcombine.high %v196_v9, %v204_v21  ;;  %v244_v58 = vld [vmem:[%s16051_s1 + $0x6b0] sm:$0xff] }
 0x36c   :  { %v10302_v11 = vcombine.high %v165_v5, %v173_v6  ;;  %v10364_v56 = vcombine.high %v228_v48, %v236_v49  ;;  %v252_v60 = vld [vmem:[%s16051_s1 + $0x6f0] sm:$0xff] }
 0x36e   :  { %8335 = vmatpush1.bf16.msra.mxu0 %v10203_v14  ;;  %8540 = vmatpush1.bf16.msra.mxu1 %v10205_v15  ;;  %v181_v14 = vld [vmem:[%s16051_s1 + $0x4b8] sm:$0xff] }
 0x36f   :  { %8336 = vmatprep.subr.bf16.mxu0 %v10220_v17  ;;  %8541 = vmatprep.subr.bf16.mxu1 %v10222_v18  ;;  %v189_v15 = vld [vmem:[%s16051_s1 + $0x4f8] sm:$0xff]  ;;  %v10299_v17 = vcombine.low %v164_v3, %v172_v4  ;;  %v10301_v18 = vcombine.low %v165_v5, %v173_v6  ;;  %v10380_v3 = vcombine.high %v244_v58, %v252_v60  ;;  %v260_v5 = vld [vmem:[%s16051_s1 + $0x730] sm:$0xff] }
 0x370   :  { %v10318_v20 = vcombine.high %v181_v14, %v189_v15  ;;  %v268_v6 = vld [vmem:[%s16051_s1 + $0x770] sm:$0xff] }
 0x372   :  { %8337 = vmatpush1.bf16.msra.mxu0 %v10219_v22  ;;  %8542 = vmatpush1.bf16.msra.mxu1 %v10221_v24  ;;  %v197_v22 = vld [vmem:[%s16051_s1 + $0x538] sm:$0xff] }
 0x373   :  { %8338 = vmatprep.subr.bf16.mxu0 %v10236_v25  ;;  %8543 = vmatprep.subr.bf16.mxu1 %v10238_v26  ;;  %v205_v24 = vld [vmem:[%s16051_s1 + $0x578] sm:$0xff]  ;;  %v10315_v25 = vcombine.low %v180_v12, %v188_v13  ;;  %v10317_v26 = vcombine.low %v181_v14, %v189_v15  ;;  %v10396_v12 = vcombine.high %v260_v5, %v268_v6  ;;  %v276_v14 = vld [vmem:[%s16051_s1 + $0x7b0] sm:$0xff] }
 0x374   :  { %v10334_v59 = vcombine.high %v197_v22, %v205_v24  ;;  %v284_v15 = vld [vmem:[%s16051_s1 + $0x7f0] sm:$0xff] }
 0x376   :  { %8339 = vmatpush1.bf16.msra.mxu0 %v10235_v36  ;;  %8544 = vmatpush1.bf16.msra.mxu1 %v10237_v38  ;;  %v213_v36 = vld [vmem:[%s16051_s1 + $0x5b8] sm:$0xff] }
 0x377   :  { %8340 = vmatprep.subr.bf16.mxu0 %v10252_v39  ;;  %8545 = vmatprep.subr.bf16.mxu1 %v10254_v44  ;;  %v221_v38 = vld [vmem:[%s16051_s1 + $0x5f8] sm:$0xff]  ;;  %v10331_v39 = vcombine.low %v196_v9, %v204_v21  ;;  %v10333_v44 = vcombine.low %v197_v22, %v205_v24  ;;  %v10412_v9 = vcombine.high %v276_v14, %v284_v15  ;;  %v292_v22 = vld [vmem:[%s16051_s1 + $0x830] sm:$0xff] }
 0x378   :  { %v10350_v47 = vcombine.high %v213_v36, %v221_v38  ;;  %v300_v24 = vld [vmem:[%s16051_s1 + $0x870] sm:$0xff] }
 0x37a   :  { %8341 = vmatpush1.bf16.msra.mxu0 %v10251_v51  ;;  %8546 = vmatpush1.bf16.msra.mxu1 %v10253_v52  ;;  %v229_v51 = vld [vmem:[%s16051_s1 + $0x638] sm:$0xff] }
 0x37b   :  { %8342 = vmatprep.subr.bf16.mxu0 %v10268_v54  ;;  %8547 = vmatprep.subr.bf16.mxu1 %v10270_v55  ;;  %v237_v52 = vld [vmem:[%s16051_s1 + $0x678] sm:$0xff]  ;;  %v10347_v54 = vcombine.low %v212_v30, %v220_v35  ;;  %v10349_v55 = vcombine.low %v213_v36, %v221_v38  ;;  %v10428_v30 = vcombine.high %v292_v22, %v300_v24  ;;  %v308_v36 = vld [vmem:[%s16051_s1 + $0x8b0] sm:$0xff] }
 0x37c   :  { %v10366_v57 = vcombine.high %v229_v51, %v237_v52  ;;  %v316_v38 = vld [vmem:[%s16051_s1 + $0x8f0] sm:$0xff] }
 0x37e   :  { %8343 = vmatpush1.bf16.msra.mxu0 %v10267_v62  ;;  %8548 = vmatpush1.bf16.msra.mxu1 %v10269_v0  ;;  %v245_v62 = vld [vmem:[%s16051_s1 + $0x6b8] sm:$0xff] }
 0x37f   :  { %8344 = vmatprep.subr.bf16.mxu0 %v10284_v1  ;;  %8549 = vmatprep.subr.bf16.mxu1 %v10286_v2  ;;  %v253_v0 = vld [vmem:[%s16051_s1 + $0x6f8] sm:$0xff]  ;;  %v10363_v1 = vcombine.low %v228_v48, %v236_v49  ;;  %v10365_v2 = vcombine.low %v229_v51, %v237_v52  ;;  %v10444_v48 = vcombine.high %v308_v36, %v316_v38  ;;  %v324_v51 = vld [vmem:[%s16051_s1 + $0x930] sm:$0xff] }
 0x380   :  { %v10382_v4 = vcombine.high %v245_v62, %v253_v0  ;;  %v332_v52 = vld [vmem:[%s16051_s1 + $0x970] sm:$0xff] }
 0x382   :  { %8345 = vmatpush1.bf16.msra.mxu0 %v10283_v7  ;;  %8550 = vmatpush1.bf16.msra.mxu1 %v10285_v8  ;;  %v261_v7 = vld [vmem:[%s16051_s1 + $0x738] sm:$0xff] }
 0x383   :  { %8346 = vmatprep.subr.bf16.mxu0 %v10300_v10  ;;  %8551 = vmatprep.subr.bf16.mxu1 %v10302_v11  ;;  %v269_v8 = vld [vmem:[%s16051_s1 + $0x778] sm:$0xff]  ;;  %v10379_v10 = vcombine.low %v244_v58, %v252_v60  ;;  %v10381_v11 = vcombine.low %v245_v62, %v253_v0  ;;  %v10460_v58 = vcombine.high %v324_v51, %v332_v52  ;;  %v340_v62 = vld [vmem:[%s16051_s1 + $0x9b0] sm:$0xff] }
 0x384   :  { %v10398_v13 = vcombine.high %v261_v7, %v269_v8  ;;  %v348_v0 = vld [vmem:[%s16051_s1 + $0x9f0] sm:$0xff] }
 0x386   :  { %8347 = vmatpush1.bf16.msra.mxu0 %v10299_v17  ;;  %8552 = vmatpush1.bf16.msra.mxu1 %v10301_v18  ;;  %v277_v17 = vld [vmem:[%s16051_s1 + $0x7b8] sm:$0xff] }
 0x387   :  { %8348 = vmatprep.subr.bf16.mxu0 %v10316_v19  ;;  %8553 = vmatprep.subr.bf16.mxu1 %v10318_v20  ;;  %v285_v18 = vld [vmem:[%s16051_s1 + $0x7f8] sm:$0xff]  ;;  %v10395_v19 = vcombine.low %v260_v5, %v268_v6  ;;  %v10397_v20 = vcombine.low %v261_v7, %v269_v8  ;;  %v356_v6 = vld [vmem:[%s16051_s1 + $0xa30] sm:$0xff] }
 0x388   :  { %v10414_v21 = vcombine.high %v277_v17, %v285_v18  ;;  %v364_v7 = vld [vmem:[%s16051_s1 + $0xa70] sm:$0xff]  ;;  %v365_v8 = vld [vmem:[%s16051_s1 + $0xa78] sm:$0xff] }
 0x38a   :  { %8349 = vmatpush1.bf16.msra.mxu0 %v10315_v25  ;;  %8554 = vmatpush1.bf16.msra.mxu1 %v10317_v26  ;;  %v293_v25 = vld [vmem:[%s16051_s1 + $0x838] sm:$0xff] }
 0x38b   :  { %8350 = vmatprep.subr.bf16.mxu0 %v10332_v28  ;;  %8555 = vmatprep.subr.bf16.mxu1 %v10334_v59  ;;  %v301_v26 = vld [vmem:[%s16051_s1 + $0x878] sm:$0xff]  ;;  %v10411_v28 = vcombine.low %v276_v14, %v284_v15  ;;  %v10413_v59 = vcombine.low %v277_v17, %v285_v18  ;;  %v372_v14 = vld [vmem:[%s16051_s1 + $0xab0] sm:$0xff] }
 0x38c   :  { %v10430_v35 = vcombine.high %v293_v25, %v301_v26  ;;  %v380_v15 = vld [vmem:[%s16051_s1 + $0xaf0] sm:$0xff]  ;;  %v373_v17 = vld [vmem:[%s16051_s1 + $0xab8] sm:$0xff] }
 0x38d   :  { %v381_v18 = vld [vmem:[%s16051_s1 + $0xaf8] sm:$0xff] }
 0x38e   :  { %8351 = vmatpush1.bf16.msra.mxu0 %v10331_v39  ;;  %8556 = vmatpush1.bf16.msra.mxu1 %v10333_v44  ;;  %v309_v39 = vld [vmem:[%s16051_s1 + $0x8b8] sm:$0xff] }
 0x38f   :  { %8352 = vmatprep.subr.bf16.mxu0 %v10348_v45  ;;  %8557 = vmatprep.subr.bf16.mxu1 %v10350_v47  ;;  %v317_v44 = vld [vmem:[%s16051_s1 + $0x8f8] sm:$0xff]  ;;  %v10427_v45 = vcombine.low %v292_v22, %v300_v24  ;;  %v10429_v47 = vcombine.low %v293_v25, %v301_v26  ;;  %v388_v22 = vld [vmem:[%s16051_s1 + $0xb30] sm:$0xff] }
 0x390   :  { %v10446_v49 = vcombine.high %v309_v39, %v317_v44  ;;  %v396_v24 = vld [vmem:[%s16051_s1 + $0xb70] sm:$0xff]  ;;  %v389_v25 = vld [vmem:[%s16051_s1 + $0xb38] sm:$0xff] }
 0x391   :  { %v397_v26 = vld [vmem:[%s16051_s1 + $0xb78] sm:$0xff] }
 0x392   :  { %8353 = vmatpush1.bf16.msra.mxu0 %v10347_v54  ;;  %8558 = vmatpush1.bf16.msra.mxu1 %v10349_v55  ;;  %v325_v54 = vld [vmem:[%s16051_s1 + $0x938] sm:$0xff] }
 0x393   :  { %8354 = vmatprep.subr.bf16.mxu0 %v10364_v56  ;;  %8559 = vmatprep.subr.bf16.mxu1 %v10366_v57  ;;  %v333_v55 = vld [vmem:[%s16051_s1 + $0x978] sm:$0xff]  ;;  %v10443_v56 = vcombine.low %v308_v36, %v316_v38  ;;  %v10445_v57 = vcombine.low %v309_v39, %v317_v44  ;;  %v404_v36 = vld [vmem:[%s16051_s1 + $0xbb0] sm:$0xff] }
 0x394   :  { %v10462_v60 = vcombine.high %v325_v54, %v333_v55  ;;  %v412_v38 = vld [vmem:[%s16051_s1 + $0xbf0] sm:$0xff]  ;;  %v405_v39 = vld [vmem:[%s16051_s1 + $0xbb8] sm:$0xff] }
 0x395   :  { %v413_v44 = vld [vmem:[%s16051_s1 + $0xbf8] sm:$0xff] }
 0x396   :  { %8355 = vmatpush1.bf16.msra.mxu0 %v10363_v1  ;;  %8560 = vmatpush1.bf16.msra.mxu1 %v10365_v2  ;;  %v349_v1 = vld [vmem:[%s16051_s1 + $0x9f8] sm:$0xff]  ;;  %v10459_v2 = vcombine.low %v324_v51, %v332_v52  ;;  %v420_v51 = vld [vmem:[%s16051_s1 + $0xc30] sm:$0xff] }
 0x397   :  { %8356 = vmatprep.subr.bf16.mxu0 %v10380_v3  ;;  %8561 = vmatprep.subr.bf16.mxu1 %v10382_v4  ;;  %v10461_v3 = vcombine.low %v325_v54, %v333_v55  ;;  %v10476_v4 = vcombine.high %v340_v62, %v348_v0  ;;  %v428_v52 = vld [vmem:[%s16051_s1 + $0xc70] sm:$0xff]  ;;  %v421_v54 = vld [vmem:[%s16051_s1 + $0xc38] sm:$0xff] }
 0x398   :  { %v429_v55 = vld [vmem:[%s16051_s1 + $0xc78] sm:$0xff] }
 0x39a   :  { %8357 = vmatpush1.bf16.msra.mxu0 %v10379_v10  ;;  %8562 = vmatpush1.bf16.msra.mxu1 %v10381_v11  ;;  %v10475_v10 = vcombine.low %v340_v62, %v348_v0  ;;  %v436_v62 = vld [vmem:[%s16051_s1 + $0xcb0] sm:$0xff] }
 0x39b   :  { %8358 = vmatprep.subr.bf16.mxu0 %v10396_v12  ;;  %8563 = vmatprep.subr.bf16.mxu1 %v10398_v13  ;;  %v10492_v12 = vcombine.high %v356_v6, %v364_v7  ;;  %v444_v0 = vld [vmem:[%s16051_s1 + $0xcf0] sm:$0xff] }
 0x39e   :  { %8359 = vmatpush1.bf16.msra.mxu0 %v10395_v19  ;;  %8564 = vmatpush1.bf16.msra.mxu1 %v10397_v20  ;;  %v10491_v19 = vcombine.low %v356_v6, %v364_v7  ;;  %v452_v6 = vld [vmem:[%s16051_s1 + $0xd30] sm:$0xff] }
 0x39f   :  { %8360 = vmatprep.subr.bf16.mxu0 %v10412_v9  ;;  %8565 = vmatprep.subr.bf16.mxu1 %v10414_v21  ;;  %v10508_v9 = vcombine.high %v372_v14, %v380_v15  ;;  %v10510_v21 = vcombine.high %v373_v17, %v381_v18  ;;  %v460_v7 = vld [vmem:[%s16051_s1 + $0xd70] sm:$0xff] }
 0x3a2   :  { %8361 = vmatpush1.bf16.msra.mxu0 %v10411_v28  ;;  %8566 = vmatpush1.bf16.msra.mxu1 %v10413_v59  ;;  %v10507_v28 = vcombine.low %v372_v14, %v380_v15  ;;  %v10509_v59 = vcombine.low %v373_v17, %v381_v18  ;;  %v468_v14 = vld [vmem:[%s16051_s1 + $0xdb0] sm:$0xff]  ;;  %v469_v17 = vld [vmem:[%s16051_s1 + $0xdb8] sm:$0xff] }
 0x3a3   :  { %8371 = vmatprep.subr.bf16.mxu0 %v10428_v30  ;;  %8576 = vmatprep.subr.bf16.mxu1 %v10430_v35  ;;  %v10524_v30 = vcombine.high %v388_v22, %v396_v24  ;;  %v10526_v35 = vcombine.high %v389_v25, %v397_v26  ;;  %v476_v15 = vld [vmem:[%s16051_s1 + $0xdf0] sm:$0xff]  ;;  %v477_v18 = vld [vmem:[%s16051_s1 + $0xdf8] sm:$0xff] }
 0x3a5   :  { %8363 = vmatmul.mubr.bf16.vlgmr.msra.gmra.mrb[12].mxu0 %v12189_v23  ;;  %8568 = vmatmul.mubr.bf16.vlgmr.msra.gmra.mrb[12].mxu1 %v12189_v23  ;;  %v341_v23 = vld [vmem:[%s16051_s1 + $0x9b8] sm:$0xff] }
 0x3a6   :  { %8372 = vmatpush1.bf16.msra.mxu0 %v10427_v45  ;;  %8577 = vmatpush1.bf16.msra.mxu1 %v10429_v47  ;;  %v10478_v5 = vcombine.high %v341_v23, %v349_v1  ;;  %v10477_v11 = vcombine.low %v341_v23, %v349_v1  ;;  %v10523_v45 = vcombine.low %v388_v22, %v396_v24  ;;  %v437_v23 = vld [vmem:[%s16051_s1 + $0xcb8] sm:$0xff]  ;;  %v484_v22 = vld [vmem:[%s16051_s1 + $0xe30] sm:$0xff] }
 0x3a7   :  { %8373 = vmatprep.subr.bf16.mxu0 %v10444_v48  ;;  %8578 = vmatprep.subr.bf16.mxu1 %v10446_v49  ;;  %v10525_v47 = vcombine.low %v389_v25, %v397_v26  ;;  %v10540_v48 = vcombine.high %v404_v36, %v412_v38  ;;  %v10542_v49 = vcombine.high %v405_v39, %v413_v44  ;;  %v445_v1 = vld [vmem:[%s16051_s1 + $0xcf8] sm:$0xff]  ;;  %v492_v24 = vld [vmem:[%s16051_s1 + $0xe70] sm:$0xff] }
 0x3a8   :  { %8403 = vmatprep.mubr.bf16.mxu0 %v12211_v33  ;;  %8608 = vmatprep.mubr.bf16.mxu1 %v12211_v33  ;;  %v357_v33 = vld [vmem:[%s16051_s1 + $0xa38] sm:$0xff] }
 0x3a9   :  { %v10494_v13 = vcombine.high %v357_v33, %v365_v8  ;;  %v10493_v20 = vcombine.low %v357_v33, %v365_v8  ;;  %v453_v33 = vld [vmem:[%s16051_s1 + $0xd38] sm:$0xff] }
 0x3aa   :  { %8374 = vmatpush1.bf16.msra.mxu0 %v10443_v56  ;;  %8579 = vmatpush1.bf16.msra.mxu1 %v10445_v57  ;;  %v10539_v56 = vcombine.low %v404_v36, %v412_v38  ;;  %v10541_v57 = vcombine.low %v405_v39, %v413_v44  ;;  %v461_v8 = vld [vmem:[%s16051_s1 + $0xd78] sm:$0xff]  ;;  %v500_v36 = vld [vmem:[%s16051_s1 + $0xeb0] sm:$0xff] }
 0x3ab   :  { %8375 = vmatprep.subr.bf16.mxu0 %v10460_v58  ;;  %8580 = vmatprep.subr.bf16.mxu1 %v10462_v60  ;;  %v10556_v58 = vcombine.high %v420_v51, %v428_v52  ;;  %v10558_v60 = vcombine.high %v421_v54, %v429_v55  ;;  %v485_v25 = vld [vmem:[%s16051_s1 + $0xe38] sm:$0xff]  ;;  %v508_v38 = vld [vmem:[%s16051_s1 + $0xef0] sm:$0xff] }
 0x3ac   :  { %v493_v26 = vld [vmem:[%s16051_s1 + $0xe78] sm:$0xff] }
 0x3ad   :  { %v501_v39 = vld [vmem:[%s16051_s1 + $0xeb8] sm:$0xff] }
 0x3ae   :  { %8376 = vmatpush1.bf16.msra.mxu0 %v10459_v2  ;;  %8581 = vmatpush1.bf16.msra.mxu1 %v10461_v3  ;;  %v10555_v2 = vcombine.low %v420_v51, %v428_v52  ;;  %v10557_v3 = vcombine.low %v421_v54, %v429_v55  ;;  %v509_v44 = vld [vmem:[%s16051_s1 + $0xef8] sm:$0xff]  ;;  %v516_v51 = vld [vmem:[%s16051_s1 + $0xf30] sm:$0xff] }
 0x3af   :  { %8377 = vmatprep.subr.bf16.mxu0 %v10476_v4  ;;  %8582 = vmatprep.subr.bf16.mxu1 %v10478_v5  ;;  %v10572_v4 = vcombine.high %v436_v62, %v444_v0  ;;  %v10574_v5 = vcombine.high %v437_v23, %v445_v1  ;;  %v524_v52 = vld [vmem:[%s16051_s1 + $0xf70] sm:$0xff]  ;;  %v517_v54 = vld [vmem:[%s16051_s1 + $0xf38] sm:$0xff] }
 0x3b0   :  { %v525_v55 = vld [vmem:[%s16051_s1 + $0xf78] sm:$0xff] }
 0x3b2   :  { %8378 = vmatpush1.bf16.msra.mxu0 %v10475_v10  ;;  %8583 = vmatpush1.bf16.msra.mxu1 %v10477_v11  ;;  %v10571_v10 = vcombine.low %v436_v62, %v444_v0  ;;  %v10573_v11 = vcombine.low %v437_v23, %v445_v1  ;;  %v532_v62 = vld [vmem:[%s16051_s1 + $0xfb0] sm:$0xff]  ;;  %v533_v23 = vld [vmem:[%s16051_s1 + $0xfb8] sm:$0xff] }
 0x3b3   :  { %8379 = vmatprep.subr.bf16.mxu0 %v10492_v12  ;;  %8584 = vmatprep.subr.bf16.mxu1 %v10494_v13  ;;  %v10588_v12 = vcombine.high %v452_v6, %v460_v7  ;;  %v10590_v13 = vcombine.high %v453_v33, %v461_v8  ;;  %v540_v0 = vld [vmem:[%s16051_s1 + $0xff0] sm:$0xff]  ;;  %v541_v1 = vld [vmem:[%s16051_s1 + $0xff8] sm:$0xff] }
 0x3b6   :  { %8380 = vmatpush1.bf16.msra.mxu0 %v10491_v19  ;;  %8585 = vmatpush1.bf16.msra.mxu1 %v10493_v20  ;;  %v10587_v19 = vcombine.low %v452_v6, %v460_v7  ;;  %v10589_v20 = vcombine.low %v453_v33, %v461_v8  ;;  %v548_v6 = vld [vmem:[%s16051_s1 + $0x1030] sm:$0xff]  ;;  %v549_v33 = vld [vmem:[%s16051_s1 + $0x1038] sm:$0xff] }
 0x3b7   :  { %8381 = vmatprep.subr.bf16.mxu0 %v10508_v9  ;;  %8586 = vmatprep.subr.bf16.mxu1 %v10510_v21  ;;  %v10604_v9 = vcombine.high %v468_v14, %v476_v15  ;;  %v10606_v21 = vcombine.high %v469_v17, %v477_v18  ;;  %v556_v7 = vld [vmem:[%s16051_s1 + $0x1070] sm:$0xff]  ;;  %v557_v8 = vld [vmem:[%s16051_s1 + $0x1078] sm:$0xff] }
 0x3ba   :  { %8382 = vmatpush1.bf16.msra.mxu0 %v10507_v28  ;;  %8587 = vmatpush1.bf16.msra.mxu1 %v10509_v59  ;;  %v10603_v28 = vcombine.low %v468_v14, %v476_v15  ;;  %v10605_v59 = vcombine.low %v469_v17, %v477_v18  ;;  %v564_v14 = vld [vmem:[%s16051_s1 + $0x10b0] sm:$0xff]  ;;  %v565_v17 = vld [vmem:[%s16051_s1 + $0x10b8] sm:$0xff] }
 0x3bb   :  { %8383 = vmatprep.subr.bf16.mxu0 %v10524_v30  ;;  %8588 = vmatprep.subr.bf16.mxu1 %v10526_v35  ;;  %v10620_v30 = vcombine.high %v484_v22, %v492_v24  ;;  %v10622_v35 = vcombine.high %v485_v25, %v493_v26  ;;  %v572_v15 = vld [vmem:[%s16051_s1 + $0x10f0] sm:$0xff]  ;;  %v573_v18 = vld [vmem:[%s16051_s1 + $0x10f8] sm:$0xff] }
 0x3be   :  { %8384 = vmatpush1.bf16.msra.mxu0 %v10523_v45  ;;  %8589 = vmatpush1.bf16.msra.mxu1 %v10525_v47  ;;  %v10619_v45 = vcombine.low %v484_v22, %v492_v24  ;;  %v10621_v47 = vcombine.low %v485_v25, %v493_v26  ;;  %v580_v22 = vld [vmem:[%s16051_s1 + $0x1130] sm:$0xff]  ;;  %v581_v25 = vld [vmem:[%s16051_s1 + $0x1138] sm:$0xff] }
 0x3bf   :  { %8385 = vmatprep.subr.bf16.mxu0 %v10540_v48  ;;  %8590 = vmatprep.subr.bf16.mxu1 %v10542_v49  ;;  %v10636_v48 = vcombine.high %v500_v36, %v508_v38  ;;  %v10638_v49 = vcombine.high %v501_v39, %v509_v44  ;;  %v588_v24 = vld [vmem:[%s16051_s1 + $0x1170] sm:$0xff]  ;;  %v589_v26 = vld [vmem:[%s16051_s1 + $0x1178] sm:$0xff] }
 0x3c2   :  { %8386 = vmatpush1.bf16.msra.mxu0 %v10539_v56  ;;  %8591 = vmatpush1.bf16.msra.mxu1 %v10541_v57  ;;  %v10635_v56 = vcombine.low %v500_v36, %v508_v38  ;;  %v10637_v57 = vcombine.low %v501_v39, %v509_v44  ;;  %v596_v36 = vld [vmem:[%s16051_s1 + $0x11b0] sm:$0xff]  ;;  %v605_v39 = vld [vmem:[%s16051_s1 + $0x11f8] sm:$0xff]  ;;  %v10715_v44 = vcombine.low %v580_v22, %v588_v24 }
 0x3c3   :  { %8387 = vmatprep.subr.bf16.mxu0 %v10556_v58  ;;  %8592 = vmatprep.subr.bf16.mxu1 %v10558_v60  ;;  %v10652_v58 = vcombine.high %v516_v51, %v524_v52  ;;  %v10654_v60 = vcombine.high %v517_v54, %v525_v55  ;;  %v604_v38 = vld [vmem:[%s16051_s1 + $0x11f0] sm:$0xff] }
 0x3c6   :  { %8388 = vmatpush1.bf16.msra.mxu0 %v10555_v2  ;;  %8593 = vmatpush1.bf16.msra.mxu1 %v10557_v3  ;;  %v10651_v2 = vcombine.low %v516_v51, %v524_v52  ;;  %v10653_v3 = vcombine.low %v517_v54, %v525_v55  ;;  %v620_v51 = vld [vmem:[%s16051_s1 + $0x1270] sm:$0xff]  ;;  %v621_v52 = vld [vmem:[%s16051_s1 + $0x1278] sm:$0xff]  ;;  %v10731_v54 = vcombine.low %v596_v36, %v604_v38 }
 0x3c7   :  { %8389 = vmatprep.subr.bf16.mxu0 %v10572_v4  ;;  %8594 = vmatprep.subr.bf16.mxu1 %v10574_v5  ;;  %v10668_v4 = vcombine.high %v532_v62, %v540_v0  ;;  %v10670_v5 = vcombine.high %v533_v23, %v541_v1 }
 0x3ca   :  { %8390 = vmatpush1.bf16.msra.mxu0 %v10571_v10  ;;  %8595 = vmatpush1.bf16.msra.mxu1 %v10573_v11  ;;  %v10667_v10 = vcombine.low %v532_v62, %v540_v0  ;;  %v10669_v11 = vcombine.low %v533_v23, %v541_v1  ;;  %v629_v62 = vld [vmem:[%s16051_s1 + $0x12b8] sm:$0xff] }
 0x3cb   :  { %8391 = vmatprep.subr.bf16.mxu0 %v10588_v12  ;;  %8596 = vmatprep.subr.bf16.mxu1 %v10590_v13  ;;  %v10684_v12 = vcombine.high %v548_v6, %v556_v7  ;;  %v10686_v13 = vcombine.high %v549_v33, %v557_v8  ;;  %v637_v0 = vld [vmem:[%s16051_s1 + $0x12f8] sm:$0xff] }
 0x3ce   :  { %8392 = vmatpush1.bf16.msra.mxu0 %v10587_v19  ;;  %8597 = vmatpush1.bf16.msra.mxu1 %v10589_v20  ;;  %v10683_v19 = vcombine.low %v548_v6, %v556_v7  ;;  %v10685_v20 = vcombine.low %v549_v33, %v557_v8  ;;  %v645_v6 = vld [vmem:[%s16051_s1 + $0x1338] sm:$0xff]  ;;  %v10765_v8 = vcombine.low %v629_v62, %v637_v0 }
 0x3cf   :  { %8393 = vmatprep.subr.bf16.mxu0 %v10604_v9  ;;  %8598 = vmatprep.subr.bf16.mxu1 %v10606_v21  ;;  %v10700_v9 = vcombine.high %v564_v14, %v572_v15  ;;  %v10702_v21 = vcombine.high %v565_v17, %v573_v18  ;;  %v653_v7 = vld [vmem:[%s16051_s1 + $0x1378] sm:$0xff] }
 0x3d2   :  { %8394 = vmatpush1.bf16.msra.mxu0 %v10603_v28  ;;  %8599 = vmatpush1.bf16.msra.mxu1 %v10605_v59  ;;  %v10699_v28 = vcombine.low %v564_v14, %v572_v15  ;;  %v10701_v59 = vcombine.low %v565_v17, %v573_v18  ;;  %v661_v14 = vld [vmem:[%s16051_s1 + $0x13b8] sm:$0xff]  ;;  %v10781_v18 = vcombine.low %v645_v6, %v653_v7 }
 0x3d3   :  { %8395 = vmatprep.subr.bf16.mxu0 %v10620_v30  ;;  %8600 = vmatprep.subr.bf16.mxu1 %v10622_v35  ;;  %v10716_v30 = vcombine.high %v580_v22, %v588_v24  ;;  %v10718_v35 = vcombine.high %v581_v25, %v589_v26  ;;  %v669_v15 = vld [vmem:[%s16051_s1 + $0x13f8] sm:$0xff] }
 0x3d4   :  { %v677_v22 = vld [vmem:[%s16051_s1 + $0x1438] sm:$0xff] }
 0x3d5   :  { %v685_v24 = vld [vmem:[%s16051_s1 + $0x1478] sm:$0xff] }
 0x3d6   :  { %8396 = vmatpush1.bf16.msra.mxu0 %v10619_v45  ;;  %8601 = vmatpush1.bf16.msra.mxu1 %v10621_v47  ;;  %v10717_v45 = vcombine.low %v581_v25, %v589_v26  ;;  %v10732_v47 = vcombine.high %v596_v36, %v604_v38  ;;  %v10797_v26 = vcombine.low %v661_v14, %v669_v15  ;;  %v693_v36 = vld [vmem:[%s16051_s1 + $0x14b8] sm:$0xff] }
 0x3d7   :  { %8397 = vmatprep.subr.bf16.mxu0 %v10636_v48  ;;  %8602 = vmatprep.subr.bf16.mxu1 %v10638_v49  ;;  %v612_v49 = vld [vmem:[%s16051_s1 + $0x1230] sm:$0xff]  ;;  %v701_v38 = vld [vmem:[%s16051_s1 + $0x14f8] sm:$0xff] }
 0x3d8   :  { %v10747_v23 = vcombine.low %v612_v49, %v620_v51 }
 0x3da   :  { %8398 = vmatpush1.bf16.msra.mxu0 %v10635_v56  ;;  %8603 = vmatpush1.bf16.msra.mxu1 %v10637_v57  ;;  %v10748_v56 = vcombine.high %v612_v49, %v620_v51  ;;  %v709_v49 = vld [vmem:[%s16051_s1 + $0x1538] sm:$0xff] }
 0x3db   :  { %8399 = vmatprep.subr.bf16.mxu0 %v10652_v58  ;;  %8604 = vmatprep.subr.bf16.mxu1 %v10654_v60  ;;  %v628_v58 = vld [vmem:[%s16051_s1 + $0x12b0] sm:$0xff]  ;;  %v717_v51 = vld [vmem:[%s16051_s1 + $0x1578] sm:$0xff] }
 0x3dc   :  { %v636_v60 = vld [vmem:[%s16051_s1 + $0x12f0] sm:$0xff] }
 0x3dd   :  { %v10763_v33 = vcombine.low %v628_v58, %v636_v60 }
 0x3de   :  { %8400 = vmatpush1.bf16.msra.mxu0 %v10651_v2  ;;  %8605 = vmatpush1.bf16.msra.mxu1 %v10653_v3  ;;  %v10764_v2 = vcombine.high %v628_v58, %v636_v60  ;;  %v10766_v3 = vcombine.high %v629_v62, %v637_v0  ;;  %v725_v58 = vld [vmem:[%s16051_s1 + $0x15b8] sm:$0xff]  ;;  %v10845_v0 = vcombine.low %v709_v49, %v717_v51 }
 0x3df   :  { %8401 = vmatprep.subr.bf16.mxu0 %v10668_v4  ;;  %8606 = vmatprep.subr.bf16.mxu1 %v10670_v5  ;;  %v644_v4 = vld [vmem:[%s16051_s1 + $0x1330] sm:$0xff]  ;;  %v733_v60 = vld [vmem:[%s16051_s1 + $0x15f8] sm:$0xff] }
 0x3e0   :  { %v652_v5 = vld [vmem:[%s16051_s1 + $0x1370] sm:$0xff] }
 0x3e1   :  { %v10779_v17 = vcombine.low %v644_v4, %v652_v5 }
 0x3e2   :  { %8402 = vmatpush1.bf16.msra.mxu0 %v10667_v10  ;;  %8607 = vmatpush1.bf16.msra.mxu1 %v10669_v11  ;;  %v10780_v10 = vcombine.high %v644_v4, %v652_v5  ;;  %v10782_v11 = vcombine.high %v645_v6, %v653_v7  ;;  %v741_v4 = vld [vmem:[%s16051_s1 + $0x1638] sm:$0xff]  ;;  %v10861_v7 = vcombine.low %v725_v58, %v733_v60 }
 0x3e3   :  { %8412 = vmatprep.subr.bf16.mxu0 %v10684_v12  ;;  %8617 = vmatprep.subr.bf16.mxu1 %v10686_v13  ;;  %v660_v12 = vld [vmem:[%s16051_s1 + $0x13b0] sm:$0xff]  ;;  %v749_v5 = vld [vmem:[%s16051_s1 + $0x1678] sm:$0xff] }
 0x3e4   :  { %v668_v13 = vld [vmem:[%s16051_s1 + $0x13f0] sm:$0xff] }
 0x3e5   :  { %8404 = vmatmul.mubr.bf16.vlgmr.msra.gmra.mrb[12].mxu0 %v12406_v40  ;;  %8609 = vmatmul.mubr.bf16.vlgmr.msra.gmra.mrb[12].mxu1 %v12406_v40  ;;  %v597_v40 = vld [vmem:[%s16051_s1 + $0x11b8] sm:$0xff]  ;;  %v10795_v25 = vcombine.low %v660_v12, %v668_v13 }
 0x3e6   :  { %8413 = vmatpush1.bf16.msra.mxu0 %v10683_v19  ;;  %8618 = vmatpush1.bf16.msra.mxu1 %v10685_v20  ;;  %v10734_v48 = vcombine.high %v597_v40, %v605_v39  ;;  %v10733_v55 = vcombine.low %v597_v40, %v605_v39  ;;  %v10796_v19 = vcombine.high %v660_v12, %v668_v13  ;;  %v757_v12 = vld [vmem:[%s16051_s1 + $0x16b8] sm:$0xff] }
 0x3e7   :  { %8414 = vmatprep.subr.bf16.mxu0 %v10700_v9  ;;  %8619 = vmatprep.subr.bf16.mxu1 %v10702_v21  ;;  %v10798_v20 = vcombine.high %v661_v14, %v669_v15  ;;  %v676_v9 = vld [vmem:[%s16051_s1 + $0x1430] sm:$0xff]  ;;  %v10813_v39 = vcombine.low %v677_v22, %v685_v24  ;;  %v765_v13 = vld [vmem:[%s16051_s1 + $0x16f8] sm:$0xff]  ;;  %v10877_v15 = vcombine.low %v741_v4, %v749_v5 }
 0x3e8   :  { %8444 = vmatprep.mubr.bf16.mxu0 %v12421_v50  ;;  %8649 = vmatprep.mubr.bf16.mxu1 %v12421_v50  ;;  %v613_v50 = vld [vmem:[%s16051_s1 + $0x1238] sm:$0xff]  ;;  %v684_v21 = vld [vmem:[%s16051_s1 + $0x1470] sm:$0xff] }
 0x3e9   :  { %v10750_v57 = vcombine.high %v613_v50, %v621_v52  ;;  %v10749_v1 = vcombine.low %v613_v50, %v621_v52  ;;  %v10811_v40 = vcombine.low %v676_v9, %v684_v21  ;;  %v10829_v52 = vcombine.low %v693_v36, %v701_v38 }
 0x3ea   :  { %8415 = vmatpush1.bf16.msra.mxu0 %v10699_v28  ;;  %8620 = vmatpush1.bf16.msra.mxu1 %v10701_v59  ;;  %v10812_v28 = vcombine.high %v676_v9, %v684_v21  ;;  %v10814_v59 = vcombine.high %v677_v22, %v685_v24  ;;  %v773_v9 = vld [vmem:[%s16051_s1 + $0x1738] sm:$0xff]  ;;  %v10893_v24 = vcombine.low %v757_v12, %v765_v13 }
 0x3eb   :  { %8416 = vmatprep.subr.bf16.mxu0 %v10716_v30  ;;  %8621 = vmatprep.subr.bf16.mxu1 %v10718_v35  ;;  %v692_v30 = vld [vmem:[%s16051_s1 + $0x14b0] sm:$0xff]  ;;  %v781_v21 = vld [vmem:[%s16051_s1 + $0x1778] sm:$0xff] }
 0x3ec   :  { %v700_v35 = vld [vmem:[%s16051_s1 + $0x14f0] sm:$0xff] }
 0x3ed   :  { %v10827_v50 = vcombine.low %v692_v30, %v700_v35 }
 0x3ee   :  { %8417 = vmatpush1.bf16.msra.mxu0 %v10715_v44  ;;  %8622 = vmatpush1.bf16.msra.mxu1 %v10717_v45  ;;  %v10828_v44 = vcombine.high %v692_v30, %v700_v35  ;;  %v10830_v45 = vcombine.high %v693_v36, %v701_v38  ;;  %v789_v30 = vld [vmem:[%s16051_s1 + $0x17b8] sm:$0xff]  ;;  %v10909_v38 = vcombine.low %v773_v9, %v781_v21 }
 0x3ef   :  { %8418 = vmatprep.subr.bf16.mxu0 %v10732_v47  ;;  %8623 = vmatprep.subr.bf16.mxu1 %v10734_v48  ;;  %v708_v47 = vld [vmem:[%s16051_s1 + $0x1530] sm:$0xff]  ;;  %v797_v35 = vld [vmem:[%s16051_s1 + $0x17f8] sm:$0xff] }
 0x3f0   :  { %v716_v48 = vld [vmem:[%s16051_s1 + $0x1570] sm:$0xff] }
 0x3f1   :  { %v10843_v62 = vcombine.low %v708_v47, %v716_v48 }
 0x3f2   :  { %8419 = vmatpush1.bf16.msra.mxu0 %v10731_v54  ;;  %8624 = vmatpush1.bf16.msra.mxu1 %v10733_v55  ;;  %v10844_v54 = vcombine.high %v708_v47, %v716_v48  ;;  %v10846_v55 = vcombine.high %v709_v49, %v717_v51  ;;  %v805_v47 = vld [vmem:[%s16051_s1 + $0x1838] sm:$0xff]  ;;  %v10925_v51 = vcombine.low %v789_v30, %v797_v35 }
 0x3f3   :  { %8420 = vmatprep.subr.bf16.mxu0 %v10748_v56  ;;  %8625 = vmatprep.subr.bf16.mxu1 %v10750_v57  ;;  %v724_v56 = vld [vmem:[%s16051_s1 + $0x15b0] sm:$0xff]  ;;  %v813_v48 = vld [vmem:[%s16051_s1 + $0x1878] sm:$0xff] }
 0x3f4   :  { %v732_v57 = vld [vmem:[%s16051_s1 + $0x15f0] sm:$0xff] }
 0x3f5   :  { %v10859_v6 = vcombine.low %v724_v56, %v732_v57 }
 0x3f6   :  { %8421 = vmatpush1.bf16.msra.mxu0 %v10747_v23  ;;  %8626 = vmatpush1.bf16.msra.mxu1 %v10749_v1  ;;  %v10860_v23 = vcombine.high %v724_v56, %v732_v57  ;;  %v10862_v1 = vcombine.high %v725_v58, %v733_v60  ;;  %v821_v56 = vld [vmem:[%s16051_s1 + $0x18b8] sm:$0xff]  ;;  %v10941_v60 = vcombine.low %v805_v47, %v813_v48 }
 0x3f7   :  { %8422 = vmatprep.subr.bf16.mxu0 %v10764_v2  ;;  %8627 = vmatprep.subr.bf16.mxu1 %v10766_v3  ;;  %v740_v2 = vld [vmem:[%s16051_s1 + $0x1630] sm:$0xff]  ;;  %v829_v57 = vld [vmem:[%s16051_s1 + $0x18f8] sm:$0xff] }
 0x3f8   :  { %v748_v3 = vld [vmem:[%s16051_s1 + $0x1670] sm:$0xff] }
 0x3f9   :  { %v10875_v14 = vcombine.low %v740_v2, %v748_v3 }
 0x3fa   :  { %8423 = vmatpush1.bf16.msra.mxu0 %v10763_v33  ;;  %8628 = vmatpush1.bf16.msra.mxu1 %v10765_v8  ;;  %v10876_v33 = vcombine.high %v740_v2, %v748_v3  ;;  %v10878_v8 = vcombine.high %v741_v4, %v749_v5  ;;  %v837_v2 = vld [vmem:[%s16051_s1 + $0x1938] sm:$0xff]  ;;  %v10957_v5 = vcombine.low %v821_v56, %v829_v57 }
 0x3fb   :  { %8424 = vmatprep.subr.bf16.mxu0 %v10780_v10  ;;  %8629 = vmatprep.subr.bf16.mxu1 %v10782_v11  ;;  %v756_v10 = vld [vmem:[%s16051_s1 + $0x16b0] sm:$0xff]  ;;  %v845_v3 = vld [vmem:[%s16051_s1 + $0x1978] sm:$0xff] }
 0x3fc   :  { %v764_v11 = vld [vmem:[%s16051_s1 + $0x16f0] sm:$0xff] }
 0x3fd   :  { %v10891_v22 = vcombine.low %v756_v10, %v764_v11 }
 0x3fe   :  { %8425 = vmatpush1.bf16.msra.mxu0 %v10779_v17  ;;  %8630 = vmatpush1.bf16.msra.mxu1 %v10781_v18  ;;  %v10892_v17 = vcombine.high %v756_v10, %v764_v11  ;;  %v10894_v18 = vcombine.high %v757_v12, %v765_v13  ;;  %v861_v10 = vld [vmem:[%s16051_s1 + $0x19f8] sm:$0xff]  ;;  %v10973_v12 = vcombine.low %v837_v2, %v845_v3 }
 0x3ff   :  { %8426 = vmatprep.subr.bf16.mxu0 %v10796_v19  ;;  %8631 = vmatprep.subr.bf16.mxu1 %v10798_v20  ;;  %v772_v19 = vld [vmem:[%s16051_s1 + $0x1730] sm:$0xff] }
 0x400   :  { %v780_v20 = vld [vmem:[%s16051_s1 + $0x1770] sm:$0xff] }
 0x401   :  { %v10907_v36 = vcombine.low %v772_v19, %v780_v20 }
 0x402   :  { %8427 = vmatpush1.bf16.msra.mxu0 %v10795_v25  ;;  %8632 = vmatpush1.bf16.msra.mxu1 %v10797_v26  ;;  %v10908_v25 = vcombine.high %v772_v19, %v780_v20  ;;  %v10910_v26 = vcombine.high %v773_v9, %v781_v21 }
 0x403   :  { %8428 = vmatprep.subr.bf16.mxu0 %v10812_v28  ;;  %8633 = vmatprep.subr.bf16.mxu1 %v10814_v59  ;;  %v788_v28 = vld [vmem:[%s16051_s1 + $0x17b0] sm:$0xff] }
 0x404   :  { %v796_v59 = vld [vmem:[%s16051_s1 + $0x17f0] sm:$0xff] }
 0x405   :  { %v10923_v49 = vcombine.low %v788_v28, %v796_v59 }
 0x406   :  { %8429 = vmatpush1.bf16.msra.mxu0 %v10811_v40  ;;  %8634 = vmatpush1.bf16.msra.mxu1 %v10813_v39  ;;  %v10924_v40 = vcombine.high %v788_v28, %v796_v59  ;;  %v10926_v39 = vcombine.high %v789_v30, %v797_v35  ;;  %v1183_v59 = vld [vmem:[%s16052_s2 + $0x8] sm:$0xff]  ;;  %v1188_v30 = vsub.s32 0, %v12022_v43 }
 0x407   :  { %8430 = vmatprep.subr.bf16.mxu0 %v10828_v44  ;;  %8635 = vmatprep.subr.bf16.mxu1 %v10830_v45  ;;  %v804_v44 = vld [vmem:[%s16051_s1 + $0x1830] sm:$0xff] }
 0x408   :  { %v812_v45 = vld [vmem:[%s16051_s1 + $0x1870] sm:$0xff] }
 0x409   :  { %v10939_v58 = vcombine.low %v804_v44, %v812_v45 }
 0x40a   :  { %8431 = vmatpush1.bf16.msra.mxu0 %v10827_v50  ;;  %8636 = vmatpush1.bf16.msra.mxu1 %v10829_v52  ;;  %v10940_v50 = vcombine.high %v804_v44, %v812_v45  ;;  %v10942_v52 = vcombine.high %v805_v47, %v813_v48  ;;  %v900_v44 = vld [vmem:[%s16051_s1 + $0x1b30] sm:$0xff]  ;;  %v1200_v47 = vsub.s32 3, %v12022_v43  ;;  %v1221_v48 = vrot.slane %v1183_v59, %v1188_v30 }
 0x40b   :  { %8432 = vmatprep.subr.bf16.mxu0 %v10844_v54  ;;  %8637 = vmatprep.subr.bf16.mxu1 %v10846_v55  ;;  %v820_v54 = vld [vmem:[%s16051_s1 + $0x18b0] sm:$0xff] }
 0x40c   :  { %v828_v55 = vld [vmem:[%s16051_s1 + $0x18f0] sm:$0xff] }
 0x40d   :  { %v10955_v4 = vcombine.low %v820_v54, %v828_v55  ;;  %v908_v45 = vld [vmem:[%s16051_s1 + $0x1b70] sm:$0xff] }
 0x40e   :  { %8433 = vmatpush1.bf16.msra.mxu0 %v10843_v62  ;;  %8638 = vmatpush1.bf16.msra.mxu1 %v10845_v0  ;;  %v10956_v62 = vcombine.high %v820_v54, %v828_v55  ;;  %v10958_v0 = vcombine.high %v821_v56, %v829_v57  ;;  %v1233_v55 = vrot.slane %v1183_v59, %v1200_v47 }
 0x40f   :  { %8434 = vmatprep.subr.bf16.mxu0 %v10860_v23  ;;  %8639 = vmatprep.subr.bf16.mxu1 %v10862_v1  ;;  %v836_v23 = vld [vmem:[%s16051_s1 + $0x1930] sm:$0xff]  ;;  %v11036_v57 = vcombine.high %v900_v44, %v908_v45 }
 0x410   :  { %v844_v1 = vld [vmem:[%s16051_s1 + $0x1970] sm:$0xff] }
 0x411   :  { %v10971_v11 = vcombine.low %v836_v23, %v844_v1 }
 0x412   :  { %8435 = vmatpush1.bf16.msra.mxu0 %v10859_v6  ;;  %8640 = vmatpush1.bf16.msra.mxu1 %v10861_v7  ;;  %v10972_v6 = vcombine.high %v836_v23, %v844_v1  ;;  %v10974_v7 = vcombine.high %v837_v2, %v845_v3  ;;  %v917_v3 = vld [vmem:[%s16051_s1 + $0x1bb8] sm:$0xff] }
 0x413   :  { %8436 = vmatprep.subr.bf16.mxu0 %v10876_v33  ;;  %8641 = vmatprep.subr.bf16.mxu1 %v10878_v8  ;;  %v852_v33 = vld [vmem:[%s16051_s1 + $0x19b0] sm:$0xff] }
 0x414   :  { %v860_v8 = vld [vmem:[%s16051_s1 + $0x19f0] sm:$0xff] }
 0x415   :  { %v10988_v13 = vcombine.high %v852_v33, %v860_v8  ;;  %v10987_v19 = vcombine.low %v852_v33, %v860_v8  ;;  %v11035_v8 = vcombine.low %v900_v44, %v908_v45  ;;  %v964_v44 = vld [vmem:[%s16051_s1 + $0x1d30] sm:$0xff] }
 0x416   :  { %8437 = vmatpush1.bf16.msra.mxu0 %v10875_v14  ;;  %8642 = vmatpush1.bf16.msra.mxu1 %v10877_v15  ;;  %v868_v15 = vld [vmem:[%s16051_s1 + $0x1a30] sm:$0xff] }
 0x417   :  { %8438 = vmatprep.subr.bf16.mxu0 %v10892_v17  ;;  %8643 = vmatprep.subr.bf16.mxu1 %v10894_v18  ;;  %v876_v17 = vld [vmem:[%s16051_s1 + $0x1a70] sm:$0xff]  ;;  %v877_v18 = vld [vmem:[%s16051_s1 + $0x1a78] sm:$0xff] }
 0x418   :  { %v11004_v9 = vcombine.high %v868_v15, %v876_v17  ;;  %v11003_v28 = vcombine.low %v868_v15, %v876_v17  ;;  %v932_v17 = vld [vmem:[%s16051_s1 + $0x1c30] sm:$0xff] }
 0x419   :  { %v972_v45 = vld [vmem:[%s16051_s1 + $0x1d70] sm:$0xff] }
 0x41a   :  { %8439 = vmatpush1.bf16.msra.mxu0 %v10891_v22  ;;  %8644 = vmatpush1.bf16.msra.mxu1 %v10893_v24  ;;  %v884_v22 = vld [vmem:[%s16051_s1 + $0x1ab0] sm:$0xff] }
 0x41b   :  { %8440 = vmatprep.subr.bf16.mxu0 %v10908_v25  ;;  %8645 = vmatprep.subr.bf16.mxu1 %v10910_v26  ;;  %v892_v24 = vld [vmem:[%s16051_s1 + $0x1af0] sm:$0xff]  ;;  %v885_v25 = vld [vmem:[%s16051_s1 + $0x1ab8] sm:$0xff] }
 0x41c   :  { %v893_v26 = vld [vmem:[%s16051_s1 + $0x1af8] sm:$0xff]  ;;  %v11019_v54 = vcombine.low %v884_v22, %v892_v24 }
 0x41d   :  { %v11021_v56 = vcombine.low %v885_v25, %v893_v26 }
 0x41e   :  { %8441 = vmatpush1.bf16.msra.mxu0 %v10907_v36  ;;  %8646 = vmatpush1.bf16.msra.mxu1 %v10909_v38  ;;  %v11020_v36 = vcombine.high %v884_v22, %v892_v24  ;;  %v1196_v38 = vsub.s32 2, %v12022_v43  ;;  %v948_v24 = vld [vmem:[%s16051_s1 + $0x1cb0] sm:$0xff] }
 0x41f   :  { %8442 = vmatprep.subr.bf16.mxu0 %v10924_v40  ;;  %8647 = vmatprep.subr.bf16.mxu1 %v10926_v39  ;;  %v1192_v40 = vsub.s32 1, %v12022_v43  ;;  %v11022_v39 = vcombine.high %v885_v25, %v893_v26  ;;  %v956_v25 = vld [vmem:[%s16051_s1 + $0x1cf0] sm:$0xff]  ;;  %v949_v26 = vld [vmem:[%s16051_s1 + $0x1cb8] sm:$0xff] }
 0x422   :  { %8443 = vmatpush1.bf16.msra.mxu0 %v10923_v49  ;;  %8648 = vmatpush1.bf16.msra.mxu1 %v10925_v51  ;;  %v901_v49 = vld [vmem:[%s16051_s1 + $0x1b38] sm:$0xff] }
 0x423   :  { %8453 = vmatprep.subr.bf16.mxu0 %v10940_v50  ;;  %8658 = vmatprep.subr.bf16.mxu1 %v10942_v52  ;;  %v909_v51 = vld [vmem:[%s16051_s1 + $0x1b78] sm:$0xff]  ;;  %v1229_v50 = vrot.slane %v1183_v59, %v1196_v38  ;;  %v1225_v52 = vrot.slane %v1183_v59, %v1192_v40 }
 0x425   :  { %8445 = vmatmul.mubr.bf16.vlgmr.msra.gmra.mrb[12].mxu0 %v12609_v61  ;;  %8650 = vmatmul.mubr.bf16.vlgmr.msra.gmra.mrb[12].mxu1 %v12609_v61  ;;  %v853_v61 = vld [vmem:[%s16051_s1 + $0x19b8] sm:$0xff] }
 0x426   :  { %8454 = vmatpush1.bf16.msra.mxu0 %v10939_v58  ;;  %8659 = vmatpush1.bf16.msra.mxu1 %v10941_v60  ;;  %v10990_v14 = vcombine.high %v853_v61, %v861_v10  ;;  %v10989_v20 = vcombine.low %v853_v61, %v861_v10  ;;  %v11038_v60 = vcombine.high %v901_v49, %v909_v51 }
 0x427   :  { %8455 = vmatprep.subr.bf16.mxu0 %v10956_v62  ;;  %8660 = vmatprep.subr.bf16.mxu1 %v10958_v0  ;;  %v916_v62 = vld [vmem:[%s16051_s1 + $0x1bb0] sm:$0xff] }
 0x428   :  { %8485 = vmatprep.mubr.bf16.mxu0 %v12619_v63  ;;  %8690 = vmatprep.mubr.bf16.mxu1 %v12619_v63  ;;  %v869_v63 = vld [vmem:[%s16051_s1 + $0x1a38] sm:$0xff]  ;;  %v924_v0 = vld [vmem:[%s16051_s1 + $0x1bf0] sm:$0xff] }
 0x429   :  { %v11006_v21 = vcombine.high %v869_v63, %v877_v18  ;;  %v11005_v35 = vcombine.low %v869_v63, %v877_v18  ;;  %v940_v63 = vld [vmem:[%s16051_s1 + $0x1c70] sm:$0xff]  ;;  %v933_v18 = vld [vmem:[%s16051_s1 + $0x1c38] sm:$0xff] }
 0x42a   :  { %8456 = vmatpush1.bf16.msra.mxu0 %v10955_v4  ;;  %8661 = vmatpush1.bf16.msra.mxu1 %v10957_v5  ;;  %v925_v4 = vld [vmem:[%s16051_s1 + $0x1bf8] sm:$0xff]  ;;  %v11067_v59 = vcombine.low %v932_v17, %v940_v63 }
 0x42b   :  { %8457 = vmatprep.subr.bf16.mxu0 %v10972_v6  ;;  %8662 = vmatprep.subr.bf16.mxu1 %v10974_v7  ;;  %v11054_v15 = vcombine.high %v917_v3, %v925_v4 }
 0x42e   :  { %8458 = vmatpush1.bf16.msra.mxu0 %v10971_v11  ;;  %8663 = vmatpush1.bf16.msra.mxu1 %v10973_v12  ;;  %v11037_v12 = vcombine.low %v901_v49, %v909_v51  ;;  %v973_v49 = vld [vmem:[%s16051_s1 + $0x1d78] sm:$0xff]  ;;  %v11083_v51 = vcombine.low %v948_v24, %v956_v25 }
 0x42f   :  { %8459 = vmatprep.subr.bf16.mxu0 %v10988_v13  ;;  %8664 = vmatprep.subr.bf16.mxu1 %v10990_v14  ;;  %v11052_v13 = vcombine.high %v916_v62, %v924_v0 }
 0x432   :  { %8460 = vmatpush1.bf16.msra.mxu0 %v10987_v19  ;;  %8665 = vmatpush1.bf16.msra.mxu1 %v10989_v20  ;;  %v941_v19 = vld [vmem:[%s16051_s1 + $0x1c78] sm:$0xff]  ;;  %v11051_v20 = vcombine.low %v916_v62, %v924_v0 }
 0x433   :  { %8461 = vmatprep.subr.bf16.mxu0 %v11004_v9  ;;  %8666 = vmatprep.subr.bf16.mxu1 %v11006_v21  ;;  %v11053_v9 = vcombine.low %v917_v3, %v925_v4  ;;  %v11068_v21 = vcombine.high %v932_v17, %v940_v63  ;;  %v11070_v22 = vcombine.high %v933_v18, %v941_v19  ;;  %v1004_v3 = vld [vmem:[%s16051_s1 + $0x1e70] sm:$0xff]  ;;  %v997_v4 = vld [vmem:[%s16051_s1 + $0x1e38] sm:$0xff] }
 0x436   :  { %8462 = vmatpush1.bf16.msra.mxu0 %v11003_v28  ;;  %8667 = vmatpush1.bf16.msra.mxu1 %v11005_v35  ;;  %v957_v28 = vld [vmem:[%s16051_s1 + $0x1cf8] sm:$0xff]  ;;  %v11069_v35 = vcombine.low %v933_v18, %v941_v19 }
 0x437   :  { %8463 = vmatprep.subr.bf16.mxu0 %v11020_v36  ;;  %8668 = vmatprep.subr.bf16.mxu1 %v11022_v39  ;;  %v11084_v36 = vcombine.high %v948_v24, %v956_v25  ;;  %v11086_v39 = vcombine.high %v949_v26, %v957_v28 }
 0x438   :  { %v8118_v58 = vpop.f32.mrb[8].mxu0  ;;  %v8323_v1 = vpop.f32.mrb[8].mxu1 }
 0x439   :  { %v15378_v23 = vadd.f32 %v8118_v58, %v1221_v48  ;;  %v8120_v2 = vpop.f32.mrb[9].mxu0  ;;  %v15386_v5 = vadd.f32 %v8323_v1, %v1229_v50  ;;  %v8325_v7 = vpop.f32.mrb[9].mxu1  ;;  %v965_v48 = vld [vmem:[%s16051_s1 + $0x1d38] sm:$0xff]  ;;  %v11085_v50 = vcombine.low %v949_v26, %v957_v28 }
 0x43a   :  { %v15388_v6 = vadd.f32 %v8120_v2, %v1225_v52  ;;  %v8122_v33 = vpop.f32.mrb[10].mxu0  ;;  %8464 = vmatpush1.bf16.msra.mxu0 %v11019_v54  ;;  %v15390_v61 = vadd.f32 %v8325_v7, %v1233_v55  ;;  %v8327_v10 = vpop.f32.mrb[10].mxu1  ;;  %8669 = vmatpush1.bf16.msra.mxu1 %v11021_v56  ;;  %v11100_v52 = vcombine.high %v964_v44, %v972_v45  ;;  %v980_v55 = vld [vmem:[%s16051_s1 + $0x1db0] sm:$0xff]  ;;  %v989_v58 = vld [vmem:[%s16051_s1 + $0x1df8] sm:$0xff] }
 0x43b   :  { %v8123_v11 = vpop.f32.mrb[11].mxu0  ;;  %8465 = vmatprep.subr.bf16.mxu0 %v11036_v57  ;;  %v8328_v14 = vpop.f32.mrb[11].mxu1  ;;  %8670 = vmatprep.subr.bf16.mxu1 %v11038_v60  ;;  %v11102_v54 = vcombine.high %v965_v48, %v973_v49  ;;  %v988_v56 = vld [vmem:[%s16051_s1 + $0x1df0] sm:$0xff]  ;;  %v981_v57 = vld [vmem:[%s16051_s1 + $0x1db8] sm:$0xff]  ;;  %v11099_v60 = vcombine.low %v964_v44, %v972_v45  ;;  %v11101_v62 = vcombine.low %v965_v48, %v973_v49 }
 0x43c   :  { %v11116_v0 = vcombine.high %v980_v55, %v988_v56  ;;  %v11118_v1 = vcombine.high %v981_v57, %v989_v58  ;;  %v996_v2 = vld [vmem:[%s16051_s1 + $0x1e30] sm:$0xff]  ;;  %v1005_v7 = vld [vmem:[%s16051_s1 + $0x1e78] sm:$0xff]  ;;  %v11115_v33 = vcombine.low %v980_v55, %v988_v56 }
 0x43d   :  { %v11132_v10 = vcombine.high %v996_v2, %v1004_v3  ;;  %v11134_v11 = vcombine.high %v997_v4, %v1005_v7  ;;  %v1013_v14 = vld [vmem:[%s16051_s1 + $0x1eb8] sm:$0xff]  ;;  %v11131_v17 = vcombine.low %v996_v2, %v1004_v3  ;;  %v11133_v63 = vcombine.low %v997_v4, %v1005_v7 }
 0x43e   :  { %8466 = vmatpush1.bf16.msra.mxu0 %v11035_v8  ;;  %8671 = vmatpush1.bf16.msra.mxu1 %v11037_v12  ;;  %v11117_v8 = vcombine.low %v981_v57, %v989_v58  ;;  %v1012_v12 = vld [vmem:[%s16051_s1 + $0x1eb0] sm:$0xff] }
 0x43f   :  { %8467 = vmatprep.subr.bf16.mxu0 %v11052_v13  ;;  %8672 = vmatprep.subr.bf16.mxu1 %v11054_v15  ;;  %v1020_v13 = vld [vmem:[%s16051_s1 + $0x1ef0] sm:$0xff]  ;;  %v1021_v15 = vld [vmem:[%s16051_s1 + $0x1ef8] sm:$0xff] }
 0x440   :  { %v11148_v18 = vcombine.high %v1012_v12, %v1020_v13  ;;  %v11150_v19 = vcombine.high %v1013_v14, %v1021_v15  ;;  %v11147_v24 = vcombine.low %v1012_v12, %v1020_v13  ;;  %v11149_v25 = vcombine.low %v1013_v14, %v1021_v15 }
 0x442   :  { %8468 = vmatpush1.bf16.msra.mxu0 %v11051_v20  ;;  %8673 = vmatpush1.bf16.msra.mxu1 %v11053_v9  ;;  %v1028_v20 = vld [vmem:[%s16051_s1 + $0x1f30] sm:$0xff] }
 0x443   :  { %8469 = vmatprep.subr.bf16.mxu0 %v11068_v21  ;;  %8674 = vmatprep.subr.bf16.mxu1 %v11070_v22  ;;  %v1036_v9 = vld [vmem:[%s16051_s1 + $0x1f70] sm:$0xff]  ;;  %v1029_v21 = vld [vmem:[%s16051_s1 + $0x1f38] sm:$0xff] }
 0x444   :  { %v1037_v22 = vld [vmem:[%s16051_s1 + $0x1f78] sm:$0xff]  ;;  %v11164_v26 = vcombine.high %v1028_v20, %v1036_v9  ;;  %v11163_v44 = vcombine.low %v1028_v20, %v1036_v9 }
 0x445   :  { %v11166_v28 = vcombine.high %v1029_v21, %v1037_v22  ;;  %v11165_v45 = vcombine.low %v1029_v21, %v1037_v22  ;;  %v1124_v22 = vld [vmem:[%s16051_s1 + $0x2230] sm:$0xff] }
 0x446   :  { %8470 = vmatpush1.bf16.msra.mxu0 %v11067_v59  ;;  %8675 = vmatpush1.bf16.msra.mxu1 %v11069_v35  ;;  %v1044_v59 = vld [vmem:[%s16051_s1 + $0x1fb0] sm:$0xff] }
 0x447   :  { %8471 = vmatprep.subr.bf16.mxu0 %v11084_v36  ;;  %8676 = vmatprep.subr.bf16.mxu1 %v11086_v39  ;;  %v1052_v35 = vld [vmem:[%s16051_s1 + $0x1ff0] sm:$0xff]  ;;  %v1045_v36 = vld [vmem:[%s16051_s1 + $0x1fb8] sm:$0xff] }
 0x448   :  { %v1053_v39 = vld [vmem:[%s16051_s1 + $0x1ff8] sm:$0xff]  ;;  %v11180_v48 = vcombine.high %v1044_v59, %v1052_v35  ;;  %v11179_v55 = vcombine.low %v1044_v59, %v1052_v35 }
 0x449   :  { %v11182_v49 = vcombine.high %v1045_v36, %v1053_v39  ;;  %v11181_v56 = vcombine.low %v1045_v36, %v1053_v39  ;;  %v1140_v36 = vld [vmem:[%s16051_s1 + $0x22b0] sm:$0xff] }
 0x44a   :  { %8472 = vmatpush1.bf16.msra.mxu0 %v11083_v51  ;;  %8677 = vmatpush1.bf16.msra.mxu1 %v11085_v50  ;;  %v1060_v51 = vld [vmem:[%s16051_s1 + $0x2030] sm:$0xff] }
 0x44b   :  { %8473 = vmatprep.subr.bf16.mxu0 %v11100_v52  ;;  %8678 = vmatprep.subr.bf16.mxu1 %v11102_v54  ;;  %v1068_v50 = vld [vmem:[%s16051_s1 + $0x2070] sm:$0xff]  ;;  %v1061_v52 = vld [vmem:[%s16051_s1 + $0x2038] sm:$0xff] }
 0x44c   :  { %v1069_v54 = vld [vmem:[%s16051_s1 + $0x2078] sm:$0xff]  ;;  %v11196_v57 = vcombine.high %v1060_v51, %v1068_v50  ;;  %v11195_v2 = vcombine.low %v1060_v51, %v1068_v50  ;;  %v1148_v39 = vld [vmem:[%s16051_s1 + $0x22f0] sm:$0xff] }
 0x44d   :  { %v11198_v58 = vcombine.high %v1061_v52, %v1069_v54  ;;  %v11197_v3 = vcombine.low %v1061_v52, %v1069_v54  ;;  %v11276_v51 = vcombine.high %v1140_v36, %v1148_v39  ;;  %v1156_v52 = vld [vmem:[%s16051_s1 + $0x2330] sm:$0xff] }
 0x44e   :  { %8474 = vmatpush1.bf16.msra.mxu0 %v11099_v60  ;;  %8679 = vmatpush1.bf16.msra.mxu1 %v11101_v62  ;;  %v1076_v60 = vld [vmem:[%s16051_s1 + $0x20b0] sm:$0xff] }
 0x44f   :  { %8475 = vmatprep.subr.bf16.mxu0 %v11116_v0  ;;  %8680 = vmatprep.subr.bf16.mxu1 %v11118_v1  ;;  %v1084_v62 = vld [vmem:[%s16051_s1 + $0x20f0] sm:$0xff]  ;;  %v1077_v0 = vld [vmem:[%s16051_s1 + $0x20b8] sm:$0xff] }
 0x450   :  { %v1085_v1 = vld [vmem:[%s16051_s1 + $0x20f8] sm:$0xff]  ;;  %v11212_v4 = vcombine.high %v1076_v60, %v1084_v62  ;;  %v11211_v12 = vcombine.low %v1076_v60, %v1084_v62  ;;  %v1164_v54 = vld [vmem:[%s16051_s1 + $0x2370] sm:$0xff] }
 0x451   :  { %v11214_v7 = vcombine.high %v1077_v0, %v1085_v1  ;;  %v11213_v13 = vcombine.low %v1077_v0, %v1085_v1  ;;  %v11292_v62 = vcombine.high %v1156_v52, %v1164_v54  ;;  %v1172_v1 = vld [vmem:[%s16051_s1 + $0x23b0] sm:$0xff] }
 0x452   :  { %8476 = vmatpush1.bf16.msra.mxu0 %v11115_v33  ;;  %8681 = vmatpush1.bf16.msra.mxu1 %v11117_v8  ;;  %v1092_v33 = vld [vmem:[%s16051_s1 + $0x2130] sm:$0xff] }
 0x453   :  { %8477 = vmatprep.subr.bf16.mxu0 %v11132_v10  ;;  %8682 = vmatprep.subr.bf16.mxu1 %v11134_v11  ;;  %v1100_v8 = vld [vmem:[%s16051_s1 + $0x2170] sm:$0xff]  ;;  %v1093_v10 = vld [vmem:[%s16051_s1 + $0x2138] sm:$0xff] }
 0x454   :  { %v1101_v11 = vld [vmem:[%s16051_s1 + $0x2178] sm:$0xff]  ;;  %v11228_v14 = vcombine.high %v1092_v33, %v1100_v8 }
 0x455   :  { %v11230_v15 = vcombine.high %v1093_v10, %v1101_v11  ;;  %v11229_v20 = vcombine.low %v1093_v10, %v1101_v11 }
 0x456   :  { %8478 = vmatpush1.bf16.msra.mxu0 %v11131_v17  ;;  %8683 = vmatpush1.bf16.msra.mxu1 %v11133_v63  ;;  %v1108_v17 = vld [vmem:[%s16051_s1 + $0x21b0] sm:$0xff] }
 0x457   :  { %8479 = vmatprep.subr.bf16.mxu0 %v11148_v18  ;;  %8684 = vmatprep.subr.bf16.mxu1 %v11150_v19  ;;  %v1116_v63 = vld [vmem:[%s16051_s1 + $0x21f0] sm:$0xff]  ;;  %v1117_v18 = vld [vmem:[%s16051_s1 + $0x21f8] sm:$0xff]  ;;  %v11227_v19 = vcombine.low %v1092_v33, %v1100_v8  ;;  %v11291_v8 = vcombine.low %v1156_v52, %v1164_v54  ;;  %v11787_v52 = vld [vmem:[%s16053_s3 + $0x28] sm:$0xff]  }
 0x458   :  { %v11244_v9 = vcombine.high %v1108_v17, %v1116_v63 }
 0x45a   :  { %8480 = vmatpush1.bf16.msra.mxu0 %v11147_v24  ;;  %8685 = vmatpush1.bf16.msra.mxu1 %v11149_v25  ;;  %v1132_v24 = vld [vmem:[%s16051_s1 + $0x2270] sm:$0xff]  ;;  %v1133_v25 = vld [vmem:[%s16051_s1 + $0x2278] sm:$0xff] }
 0x45b   :  { %8481 = vmatprep.subr.bf16.mxu0 %v11164_v26  ;;  %8686 = vmatprep.subr.bf16.mxu1 %v11166_v28  ;;  %v11243_v26 = vcombine.low %v1108_v17, %v1116_v63  ;;  %v11260_v59 = vcombine.high %v1124_v22, %v1132_v24  ;;  %v11766_v17 = vld [vmem:[%s16053_s3 + $0xc0] sm:$0xff]  }
 0x45e   :  { %8482 = vmatpush1.bf16.msra.mxu0 %v11163_v44  ;;  %8687 = vmatpush1.bf16.msra.mxu1 %v11165_v45  ;;  %v1141_v44 = vld [vmem:[%s16051_s1 + $0x22b8] sm:$0xff] }
 0x45f   :  { %8483 = vmatprep.subr.bf16.mxu0 %v11180_v48  ;;  %8688 = vmatprep.subr.bf16.mxu1 %v11182_v49  ;;  %v1149_v45 = vld [vmem:[%s16051_s1 + $0x22f8] sm:$0xff]  ;;  %v11259_v48 = vcombine.low %v1124_v22, %v1132_v24  ;;  %v11772_v22 = vld [vmem:[%s16053_s3 + $0x88] sm:$0xff]   ;;  %v11773_v24 = vld [vmem:[%s16053_s3 + $0x50] sm:$0xff]  }
 0x460   :  { %v11278_v50 = vcombine.high %v1141_v44, %v1149_v45  ;;  %v11277_v60 = vcombine.low %v1141_v44, %v1149_v45  ;;  %v11783_v44 = vld [vmem:[%s16053_s3 + $0x20] sm:$0xff]  }
 0x461   :  { %v11784_v45 = vld [vmem:[%s16053_s3 + $0xa0] sm:$0xff]  }
 0x462   :  { %8484 = vmatpush1.bf16.msra.mxu0 %v11179_v55  ;;  %8689 = vmatpush1.bf16.msra.mxu1 %v11181_v56  ;;  %v1157_v55 = vld [vmem:[%s16051_s1 + $0x2338] sm:$0xff] }
 0x463   :  { %8494 = vmatprep.subr.bf16.mxu0 %v11196_v57  ;;  %8699 = vmatprep.subr.bf16.mxu1 %v11198_v58  ;;  %v1165_v56 = vld [vmem:[%s16051_s1 + $0x2378] sm:$0xff]  ;;  %v15579_v57 = vld [vmem:[%s16052_s2] sm:$0xff]  ;;  %v11275_v58 = vcombine.low %v1140_v36, %v1148_v39 }
 0x464   :  { %v11294_v0 = vcombine.high %v1157_v55, %v1165_v56  ;;  %v1201_v33 = vrot.slane %v15579_v57, %v1200_v47  ;;  %v11293_v10 = vcombine.low %v1157_v55, %v1165_v56  ;;  %v11765_v47 = vld [vmem:[%s16053_s3 + $0x40] sm:$0xff]   ;;  %v1189_v54 = vrot.slane %v15579_v57, %v1188_v30  ;;  %v11788_v55 = vld [vmem:[%s16053_s3 + $0xa8] sm:$0xff]   ;;  %v11789_v56 = vld [vmem:[%s16053_s3 + $0x70] sm:$0xff]  }
 0x465   :  { %8486 = vmatmul.mubr.bf16.vlgmr.msra.gmra.mrb[12].mxu0 %v12807_v16  ;;  %8691 = vmatmul.mubr.bf16.vlgmr.msra.gmra.mrb[12].mxu1 %v12807_v16  ;;  %v1109_v16 = vld [vmem:[%s16051_s1 + $0x21b8] sm:$0xff]  ;;  %v11781_v36 = vld [vmem:[%s16053_s3 + $0x60] sm:$0xff]  }
 0x466   :  { %8495 = vmatpush1.bf16.msra.mxu0 %v11195_v2  ;;  %8700 = vmatpush1.bf16.msra.mxu1 %v11197_v3  ;;  %v11246_v21 = vcombine.high %v1109_v16, %v1117_v18  ;;  %v11245_v28 = vcombine.low %v1109_v16, %v1117_v18  ;;  %v1180_v2 = vld [vmem:[%s16051_s1 + $0x23f0] sm:$0xff]  ;;  %v1193_v3 = vrot.slane %v15579_v57, %v1192_v40  ;;  %v11769_v18 = vld [vmem:[%s16053_s3 + $0x48] sm:$0xff]   ;;  %v11782_v39 = vld [vmem:[%s16053_s3 + $0xe0] sm:$0xff]  }
 0x467   :  { %8496 = vmatprep.subr.bf16.mxu0 %v11212_v4  ;;  %8701 = vmatprep.subr.bf16.mxu1 %v11214_v7  ;;  %v1173_v4 = vld [vmem:[%s16051_s1 + $0x23b8] sm:$0xff]  ;;  %v11308_v11 = vcombine.high %v1172_v1, %v1180_v2 }
 0x468   :  { %8526 = vmatprep.mubr.bf16.mxu0 %v11923_v34  ;;  %8731 = vmatprep.mubr.bf16.mxu1 %v11923_v34  ;;  %v1125_v34 = vld [vmem:[%s16051_s1 + $0x2238] sm:$0xff] }
 0x469   :  { %v11262_v35 = vcombine.high %v1125_v34, %v1133_v25  ;;  %v11261_v49 = vcombine.low %v1125_v34, %v1133_v25  ;;  %v1181_v7 = vld [vmem:[%s16051_s1 + $0x23f8] sm:$0xff]  ;;  %v11775_v34 = vld [vmem:[%s16053_s3 + $0x10] sm:$0xff]  }
 0x46a   :  { %8497 = vmatpush1.bf16.msra.mxu0 %v11211_v12  ;;  %8702 = vmatpush1.bf16.msra.mxu1 %v11213_v13  ;;  %v11310_v40 = vcombine.high %v1173_v4, %v1181_v7  ;;  %v11617_v12 = vadd.f32 %v13583_v42, %v1193_v3  ;;  %v11619_v13 = vadd.f32 %v13591_v46, %v1201_v33  ;;  %v11767_v42 = vld [vmem:[%s16053_s3] sm:$0xff]   ;;  %v11776_v25 = vld [vmem:[%s16053_s3 + $0x90] sm:$0xff]   ;;  %v11795_v33 = vld [vmem:[%s16053_s3 + $0x38] sm:$0xff]  }
 0x46b   :  { %8498 = vmatprep.subr.bf16.mxu0 %v11228_v14  ;;  %8703 = vmatprep.subr.bf16.mxu1 %v11230_v15  ;;  %v11307_v14 = vcombine.low %v1172_v1, %v1180_v2  ;;  %v11309_v15 = vcombine.low %v1173_v4, %v1181_v7  ;;  %v11768_v46 = vld [vmem:[%s16053_s3 + $0x80] sm:$0xff]   ;;  %v11792_v1 = vld [vmem:[%s16053_s3 + $0xb0] sm:$0xff]   ;;  %v11793_v2 = vld [vmem:[%s16053_s3 + $0x78] sm:$0xff]  }
 0x46c   :  { %v8741_v63 = vmax.f32 %v11617_v12, 0.0  ;;  %v8743_v16 = vmax.f32 %v11619_v13, 0.0  ;;  %v11794_v4 = vld [vmem:[%s16053_s3 + $0xf8] sm:$0xff]   ;;  %v11799_v12 = vld [vmem:[%s16053_s3 + $0x100] sm:$0xff]  }
 0x46e   :  { %8499 = vmatpush1.bf16.msra.mxu0 %v11227_v19  ;;  %8704 = vmatpush1.bf16.msra.mxu1 %v11229_v20  ;;  %v8758_v19 = vpack.c.bf16 %v8741_v63, %v8741_v63  ;;  %v11770_v20 = vld [vmem:[%s16053_s3 + $0xc8] sm:$0xff]  }
 0x46f   :  { %8500 = vmatprep.subr.bf16.mxu0 %v11244_v9  ;;  %8705 = vmatprep.subr.bf16.mxu1 %v11246_v21  ;;  %v8760_v9 = vpack.c.bf16 %v8743_v16, %v8743_v16  ;;  %v11771_v21 = vld [vmem:[%s16053_s3 + $0x8] sm:$0xff]  }
 0x470   :  { %v11802_v63 = vld [vmem:[%s16053_s3 + $0x1c8] sm:$0xff]  }
 0x472   :  { %8501 = vmatpush1.bf16.msra.mxu0 %v11243_v26  ;;  %8706 = vmatpush1.bf16.msra.mxu1 %v11245_v28  ;;  %v11777_v26 = vld [vmem:[%s16053_s3 + $0x58] sm:$0xff]  }
 0x473   :  { %8502 = vmatprep.subr.bf16.mxu0 %v11260_v59  ;;  %8707 = vmatprep.subr.bf16.mxu1 %v11262_v35  ;;  %v11778_v28 = vld [vmem:[%s16053_s3 + $0xd8] sm:$0xff]  }
 0x474   :  { %v11779_v59 = vld [vmem:[%s16053_s3 + $0x18] sm:$0xff]  }
 0x475   :  { %v11780_v35 = vld [vmem:[%s16053_s3 + $0x98] sm:$0xff]  }
 0x476   :  { %8503 = vmatpush1.bf16.msra.mxu0 %v11259_v48  ;;  %8708 = vmatpush1.bf16.msra.mxu1 %v11261_v49  ;;  %v11785_v48 = vld [vmem:[%s16053_s3 + $0x68] sm:$0xff]  }
 0x477   :  { %8504 = vmatprep.subr.bf16.mxu0 %v11276_v51  ;;  %8709 = vmatprep.subr.bf16.mxu1 %v11278_v50  ;;  %v11786_v49 = vld [vmem:[%s16053_s3 + $0xe8] sm:$0xff]   ;;  %v1208_v51 = vsub.s32 5, %v12022_v43  ;;  %v1216_v50 = vsub.s32 7, %v12022_v43 }
 0x479   :  { %v1209_v30 = vrot.slane %v15579_v57, %v1208_v51 }
 0x47a   :  { %8505 = vmatpush1.bf16.msra.mxu0 %v11275_v58  ;;  %8710 = vmatpush1.bf16.msra.mxu1 %v11277_v60  ;;  %v1197_v58 = vrot.slane %v15579_v57, %v1196_v38  ;;  %v11790_v60 = vld [vmem:[%s16053_s3 + $0xf0] sm:$0xff]   ;;  %v11616_v38 = vadd.f32 %v13573_v37, %v1189_v54 }
 0x47b   :  { %8506 = vmatprep.subr.bf16.mxu0 %v11292_v62  ;;  %8711 = vmatprep.subr.bf16.mxu1 %v11294_v0  ;;  %v1217_v62 = vrot.slane %v15579_v57, %v1216_v50  ;;  %v11791_v0 = vld [vmem:[%s16053_s3 + $0x30] sm:$0xff]   ;;  %v11621_v7 = vadd.f32 %v14475_v32, %v1209_v30  ;;  %v11798_v32 = vld [vmem:[%s16053_s3 + $0x1c0] sm:$0xff]   ;;  %v11826_v30 = vld [vmem:[%s16053_s3 + $0x1f8] sm:$0xff]  }
 0x47c   :  { %v11618_v3 = vadd.f32 %v13581_v41, %v1197_v58  ;;  %v11796_v41 = vld [vmem:[%s16053_s3 + $0xb8] sm:$0xff]   ;;  %v11822_v54 = vld [vmem:[%s16053_s3 + $0x1f0] sm:$0xff]  }
 0x47d   :  { %v11623_v37 = vadd.f32 %v14483_v53, %v1217_v62  ;;  %v8745_v53 = vmax.f32 %v11621_v7, 0.0  ;;  %v11824_v58 = vld [vmem:[%s16053_s3 + $0x1b0] sm:$0xff]  }
 0x47e   :  { %8507 = vmatpush1.bf16.msra.mxu0 %v11291_v8  ;;  %8712 = vmatpush1.bf16.msra.mxu1 %v11293_v10  ;;  %v8740_v8 = vmax.f32 %v11616_v38, 0.0  ;;  %v11797_v10 = vld [vmem:[%s16053_s3 + $0x140] sm:$0xff]  }
 0x47f   :  { %8508 = vmatprep.subr.bf16.mxu0 %v11308_v11  ;;  %8713 = vmatprep.subr.bf16.mxu1 %v11310_v40  ;;  %v8742_v11 = vmax.f32 %v11618_v3, 0.0  ;;  %v8747_v40 = vmax.f32 %v11623_v37, 0.0  ;;  %v8751_v3 = vmax.f32 %v15390_v61, 0.0  ;;  %v11832_v37 = vld [vmem:[%s16053_s3 + $0x280] sm:$0xff]   ;;  %v11834_v61 = vld [vmem:[%s16053_s3 + $0x2c8] sm:$0xff]  }
 0x480   :  { %v8757_v13 = vpack.c.bf16 %v8740_v8, %v8740_v8 }
 0x481   :  { %v8764_v16 = vpack.c.bf16 %v8747_v40, %v8747_v40  ;;  %v11839_v40 = vld [vmem:[%s16053_s3 + $0x210] sm:$0xff]  }
 0x482   :  { %8509 = vmatpush1.bf16.msra.mxu0 %v11307_v14  ;;  %8714 = vmatpush1.bf16.msra.mxu1 %v11309_v15  ;;  %v11800_v14 = vld [vmem:[%s16053_s3 + $0x180] sm:$0xff]   ;;  %v8759_v15 = vpack.c.bf16 %v8742_v11, %v8742_v11  ;;  %v11836_v11 = vld [vmem:[%s16053_s3 + $0x288] sm:$0xff]  }
 0x483   :  { %11440 = vmatprep.subr.bf16.mxu0 %v11765_v47  ;;  %11462 = vmatprep.subr.bf16.mxu1 %v11766_v17  ;;  %v11801_v47 = vld [vmem:[%s16053_s3 + $0x148] sm:$0xff]   ;;  %v8762_v17 = vpack.c.bf16 %v8745_v53, %v8745_v53  ;;  %v11838_v53 = vld [vmem:[%s16053_s3 + $0x2d0] sm:$0xff]  }
 0x485   :  { %8527 = vmatmul.mubr.bf16.vlgmr.msra.gmra.mrb[12].mxu0 %v12913_v29  ;;  %8732 = vmatmul.mubr.bf16.vlgmr.msra.gmra.mrb[12].mxu1 %v12913_v29  ;;  %v11774_v29 = vld [vmem:[%s16053_s3 + $0xd0] sm:$0xff]  }
 0x486   :  { %11441 = vmatpush3.bf16.msra.mxu0 %v11767_v42  ;;  %9829 = vmatprep.mubr.bf16.mxu0 %v8758_v19  ;;  %v11803_v42 = vld [vmem:[%s16053_s3 + $0x108] sm:$0xff]   ;;  %v11806_v19 = vld [vmem:[%s16053_s3 + $0x1d0] sm:$0xff]  }
 0x487   :  { %11463 = vmatpush3.bf16.msra.mxu1 %v11768_v46  ;;  %9869 = vmatprep.mubr.bf16.mxu1 %v8760_v9  ;;  %v11804_v46 = vld [vmem:[%s16053_s3 + $0x188] sm:$0xff]   ;;  %v11808_v9 = vld [vmem:[%s16053_s3 + $0x190] sm:$0xff]  }
 0x488   :  { %11442 = vmatprep.subr.bf16.mxu0 %v11769_v18  ;;  %11464 = vmatprep.subr.bf16.mxu1 %v11770_v20  ;;  %v11805_v18 = vld [vmem:[%s16053_s3 + $0x150] sm:$0xff]  }
 0x489   :  { %v11807_v20 = vld [vmem:[%s16053_s3 + $0x110] sm:$0xff]  }
 0x48a   :  { %11443 = vmatpush3.bf16.msra.mxu0 %v11771_v21  ;;  %v11809_v21 = vld [vmem:[%s16053_s3 + $0x158] sm:$0xff]  }
 0x48b   :  { %11465 = vmatpush3.bf16.msra.mxu1 %v11772_v22  ;;  %11444 = vmatprep.subr.bf16.mxu0 %v11773_v24  ;;  %v11810_v22 = vld [vmem:[%s16053_s3 + $0x1d8] sm:$0xff]  }
 0x48c   :  { %11466 = vmatprep.subr.bf16.mxu1 %v11774_v29  ;;  %v11811_v24 = vld [vmem:[%s16053_s3 + $0x118] sm:$0xff]  }
 0x48d   :  { %v11812_v29 = vld [vmem:[%s16053_s3 + $0x198] sm:$0xff]  }
 0x48e   :  { %11445 = vmatpush3.bf16.msra.mxu0 %v11775_v34  ;;  %v11813_v34 = vld [vmem:[%s16053_s3 + $0x160] sm:$0xff]  }
 0x48f   :  { %11467 = vmatpush3.bf16.msra.mxu1 %v11776_v25  ;;  %11446 = vmatprep.subr.bf16.mxu0 %v11777_v26  ;;  %v11814_v25 = vld [vmem:[%s16053_s3 + $0x1e0] sm:$0xff]  }
 0x490   :  { %11468 = vmatprep.subr.bf16.mxu1 %v11778_v28  ;;  %v11815_v26 = vld [vmem:[%s16053_s3 + $0x120] sm:$0xff]   ;;  %v1204_v28 = vsub.s32 4, %v12022_v43 }
 0x492   :  { %11447 = vmatpush3.bf16.msra.mxu0 %v11779_v59  ;;  %v11816_v59 = vld [vmem:[%s16053_s3 + $0x1a0] sm:$0xff]  }
 0x493   :  { %11469 = vmatpush3.bf16.msra.mxu1 %v11780_v35  ;;  %11448 = vmatprep.subr.bf16.mxu0 %v11781_v36  ;;  %v11817_v35 = vld [vmem:[%s16053_s3 + $0x168] sm:$0xff]   ;;  %v1212_v36 = vsub.s32 6, %v12022_v43 }
 0x494   :  { %11470 = vmatprep.subr.bf16.mxu1 %v11782_v39  ;;  %v11818_v39 = vld [vmem:[%s16053_s3 + $0x1e8] sm:$0xff]  }
 0x496   :  { %11449 = vmatpush3.bf16.msra.mxu0 %v11783_v44  ;;  %v11819_v44 = vld [vmem:[%s16053_s3 + $0x128] sm:$0xff]  }
 0x497   :  { %11471 = vmatpush3.bf16.msra.mxu1 %v11784_v45  ;;  %11450 = vmatprep.subr.bf16.mxu0 %v11785_v48  ;;  %v1205_v45 = vrot.slane %v15579_v57, %v1204_v28  ;;  %v11820_v48 = vld [vmem:[%s16053_s3 + $0x1a8] sm:$0xff]  }
 0x498   :  { %11472 = vmatprep.subr.bf16.mxu1 %v11786_v49  ;;  %v11821_v49 = vld [vmem:[%s16053_s3 + $0x170] sm:$0xff]  }
 0x49a   :  { %11451 = vmatpush3.bf16.msra.mxu0 %v11787_v52  ;;  %v1213_v52 = vrot.slane %v15579_v57, %v1212_v36  ;;  %v11825_v57 = vld [vmem:[%s16053_s3 + $0x178] sm:$0xff]  }
 0x49b   :  { %11473 = vmatpush3.bf16.msra.mxu1 %v11788_v55  ;;  %11452 = vmatprep.subr.bf16.mxu0 %v11789_v56  ;;  %v11823_v55 = vld [vmem:[%s16053_s3 + $0x130] sm:$0xff]   ;;  %v11620_v56 = vadd.f32 %v14465_v27, %v1205_v45  ;;  %v11827_v27 = vld [vmem:[%s16053_s3 + $0x138] sm:$0xff]  }
 0x49c   :  { %11474 = vmatprep.subr.bf16.mxu1 %v11790_v60  ;;  %v11622_v60 = vadd.f32 %v14473_v31, %v1213_v52  ;;  %v11829_v31 = vld [vmem:[%s16053_s3 + $0x240] sm:$0xff]   ;;  %v11866_v52 = vld [vmem:[%s16053_s3 + $0x3c8] sm:$0xff]  }
 0x49d   :  { %v8744_v62 = vmax.f32 %v11620_v56, 0.0  ;;  %v11869_v56 = vld [vmem:[%s16053_s3 + $0x350] sm:$0xff]  }
 0x49e   :  { %11453 = vmatpush3.bf16.msra.mxu0 %v11791_v0  ;;  %v11828_v0 = vld [vmem:[%s16053_s3 + $0x1b8] sm:$0xff]   ;;  %v8746_v38 = vmax.f32 %v11622_v60, 0.0  ;;  %v11872_v60 = vld [vmem:[%s16053_s3 + $0x390] sm:$0xff]  }
 0x49f   :  { %11475 = vmatpush3.bf16.msra.mxu1 %v11792_v1  ;;  %11454 = vmatprep.subr.bf16.mxu0 %v11793_v2  ;;  %v11830_v1 = vld [vmem:[%s16053_s3 + $0x2c0] sm:$0xff]   ;;  %v8749_v2 = vmax.f32 %v15388_v6, 0.0  ;;  %v8761_v7 = vpack.c.bf16 %v8744_v62, %v8744_v62  ;;  %v11833_v6 = vld [vmem:[%s16053_s3 + $0x248] sm:$0xff]   ;;  %v11875_v62 = vld [vmem:[%s16053_s3 + $0x318] sm:$0xff]  }
 0x4a0   :  { %11476 = vmatprep.subr.bf16.mxu1 %v11794_v4  ;;  %v11831_v4 = vld [vmem:[%s16053_s3 + $0x200] sm:$0xff]  }
 0x4a1   :  { %v8766_v8 = vpack.c.bf16 %v8749_v2, %v8749_v2  ;;  %v11880_v2 = vld [vmem:[%s16053_s3 + $0x3a0] sm:$0xff]  }
 0x4a2   :  { %11455 = vmatpush3.bf16.msra.mxu0 %v11795_v33  ;;  %v8763_v33 = vpack.c.bf16 %v8746_v38, %v8746_v38  ;;  %v11878_v38 = vld [vmem:[%s16053_s3 + $0x3e0] sm:$0xff]  }
 0x4a3   :  { %11477 = vmatpush3.bf16.msra.mxu1 %v11796_v41  ;;  %11484 = vmatprep.subr.bf16.mxu0 %v11797_v10  ;;  %v8768_v41 = vpack.c.bf16 %v8751_v3, %v8751_v3  ;;  %v11835_v10 = vld [vmem:[%s16053_s3 + $0x208] sm:$0xff]  }
 0x4a4   :  { %11506 = vmatprep.subr.bf16.mxu1 %v11798_v32  ;;  %v11837_v32 = vld [vmem:[%s16053_s3 + $0x250] sm:$0xff]   ;;  %v11881_v3 = vld [vmem:[%s16053_s3 + $0x368] sm:$0xff]  }
 0x4a5   :  { %9830 = vmatmul.mubr.bf16.vlgmr.msra.gmra.mrb[16].mxu0 %v8757_v13  ;;  %v11841_v13 = vld [vmem:[%s16053_s3 + $0x258] sm:$0xff]  }
 0x4a6   :  { %9870 = vmatmul.mubr.bf16.vlgmr.msra.gmra.mrb[16].mxu1 %v8759_v15  ;;  %11485 = vmatpush3.bf16.msra.mxu0 %v11799_v12  ;;  %v11840_v12 = vld [vmem:[%s16053_s3 + $0x290] sm:$0xff]   ;;  %v11843_v15 = vld [vmem:[%s16053_s3 + $0x218] sm:$0xff]  }
 0x4a7   :  { %9909 = vmatprep.mubr.bf16.mxu0 %v8762_v17  ;;  %11507 = vmatpush3.bf16.msra.mxu1 %v11800_v14  ;;  %v11842_v14 = vld [vmem:[%s16053_s3 + $0x2d8] sm:$0xff]   ;;  %v11845_v17 = vld [vmem:[%s16053_s3 + $0x260] sm:$0xff]  }
 0x4a8   :  { %9949 = vmatprep.mubr.bf16.mxu1 %v8764_v16  ;;  %11486 = vmatprep.subr.bf16.mxu0 %v11801_v47  ;;  %v11844_v47 = vld [vmem:[%s16053_s3 + $0x298] sm:$0xff]   ;;  %v11847_v16 = vld [vmem:[%s16053_s3 + $0x220] sm:$0xff]  }
 0x4a9   :  { %11508 = vmatprep.subr.bf16.mxu1 %v11802_v63  ;;  %v11846_v63 = vld [vmem:[%s16053_s3 + $0x2e0] sm:$0xff]  }
 0x4aa   :  { %11487 = vmatpush3.bf16.msra.mxu0 %v11803_v42  ;;  %v11848_v42 = vld [vmem:[%s16053_s3 + $0x2a0] sm:$0xff]  }
 0x4ab   :  { %11509 = vmatpush3.bf16.msra.mxu1 %v11804_v46  ;;  %11488 = vmatprep.subr.bf16.mxu0 %v11805_v18  ;;  %v11849_v46 = vld [vmem:[%s16053_s3 + $0x268] sm:$0xff]  }
 0x4ac   :  { %11510 = vmatprep.subr.bf16.mxu1 %v11806_v19  ;;  %v11850_v18 = vld [vmem:[%s16053_s3 + $0x2e8] sm:$0xff]  }
 0x4ad   :  { %v11851_v19 = vld [vmem:[%s16053_s3 + $0x228] sm:$0xff]  }
 0x4ae   :  { %11489 = vmatpush3.bf16.msra.mxu0 %v11807_v20  ;;  %v11852_v20 = vld [vmem:[%s16053_s3 + $0x2a8] sm:$0xff]  }
 0x4af   :  { %11511 = vmatpush3.bf16.msra.mxu1 %v11808_v9  ;;  %11490 = vmatprep.subr.bf16.mxu0 %v11809_v21  ;;  %v11853_v9 = vld [vmem:[%s16053_s3 + $0x270] sm:$0xff]  }
 0x4b0   :  { %11512 = vmatprep.subr.bf16.mxu1 %v11810_v22  ;;  %v11854_v21 = vld [vmem:[%s16053_s3 + $0x2f0] sm:$0xff]  }
 0x4b1   :  { %v11855_v22 = vld [vmem:[%s16053_s3 + $0x230] sm:$0xff]  }
 0x4b2   :  { %11491 = vmatpush3.bf16.msra.mxu0 %v11811_v24  ;;  %v11856_v24 = vld [vmem:[%s16053_s3 + $0x2b0] sm:$0xff]  }
 0x4b3   :  { %11513 = vmatpush3.bf16.msra.mxu1 %v11812_v29  ;;  %11492 = vmatprep.subr.bf16.mxu0 %v11813_v34  ;;  %v11857_v29 = vld [vmem:[%s16053_s3 + $0x278] sm:$0xff]  }
 0x4b4   :  { %11514 = vmatprep.subr.bf16.mxu1 %v11814_v25  ;;  %v11858_v34 = vld [vmem:[%s16053_s3 + $0x2f8] sm:$0xff]  }
 0x4b5   :  { %v11859_v25 = vld [vmem:[%s16053_s3 + $0x238] sm:$0xff]  }
 0x4b6   :  { %11493 = vmatpush3.bf16.msra.mxu0 %v11815_v26  ;;  %v8748_v26 = vmax.f32 %v15378_v23, 0.0  ;;  %v11863_v23 = vld [vmem:[%s16053_s3 + $0x300] sm:$0xff]  }
 0x4b7   :  { %11515 = vmatpush3.bf16.msra.mxu1 %v11816_v59  ;;  %11494 = vmatprep.subr.bf16.mxu0 %v11817_v35  ;;  %v11860_v59 = vld [vmem:[%s16053_s3 + $0x2b8] sm:$0xff]   ;;  %v11861_v35 = vld [vmem:[%s16053_s3 + $0x340] sm:$0xff]  }
 0x4b8   :  { %11516 = vmatprep.subr.bf16.mxu1 %v11818_v39  ;;  %v8750_v39 = vmax.f32 %v15386_v5, 0.0  ;;  %v8765_v45 = vpack.c.bf16 %v8748_v26, %v8748_v26  ;;  %v11865_v5 = vld [vmem:[%s16053_s3 + $0x348] sm:$0xff]  }
 0x4ba   :  { %11495 = vmatpush3.bf16.msra.mxu0 %v11819_v44  ;;  %v11862_v44 = vld [vmem:[%s16053_s3 + $0x3c0] sm:$0xff]  }
 0x4bb   :  { %11517 = vmatpush3.bf16.msra.mxu1 %v11820_v48  ;;  %11496 = vmatprep.subr.bf16.mxu0 %v11821_v49  ;;  %v11864_v48 = vld [vmem:[%s16053_s3 + $0x380] sm:$0xff]   ;;  %v8767_v49 = vpack.c.bf16 %v8750_v39, %v8750_v39 }
 0x4bc   :  { %11518 = vmatprep.subr.bf16.mxu1 %v11822_v54  ;;  %v11867_v54 = vld [vmem:[%s16053_s3 + $0x308] sm:$0xff]  }
 0x4be   :  { %11497 = vmatpush3.bf16.msra.mxu0 %v11823_v55  ;;  %v11868_v55 = vld [vmem:[%s16053_s3 + $0x388] sm:$0xff]  }
 0x4bf   :  { %11519 = vmatpush3.bf16.msra.mxu1 %v11824_v58  ;;  %11498 = vmatprep.subr.bf16.mxu0 %v11825_v57  ;;  %v11870_v58 = vld [vmem:[%s16053_s3 + $0x3d0] sm:$0xff]  }
 0x4c0   :  { %11520 = vmatprep.subr.bf16.mxu1 %v11826_v30  ;;  %v11871_v57 = vld [vmem:[%s16053_s3 + $0x310] sm:$0xff]   ;;  %v11873_v30 = vld [vmem:[%s16053_s3 + $0x358] sm:$0xff]  }
 0x4c2   :  { %11499 = vmatpush3.bf16.msra.mxu0 %v11827_v27  ;;  %v11874_v27 = vld [vmem:[%s16053_s3 + $0x3d8] sm:$0xff]  }
 0x4c3   :  { %11521 = vmatpush3.bf16.msra.mxu1 %v11828_v0  ;;  %11528 = vmatprep.subr.bf16.mxu0 %v11829_v31  ;;  %v11876_v0 = vld [vmem:[%s16053_s3 + $0x398] sm:$0xff]   ;;  %v11877_v31 = vld [vmem:[%s16053_s3 + $0x360] sm:$0xff]  }
 0x4c4   :  { %11550 = vmatprep.subr.bf16.mxu1 %v11830_v1  ;;  %v11879_v1 = vld [vmem:[%s16053_s3 + $0x320] sm:$0xff]  }
 0x4c5   :  { %9910 = vmatmul.mubr.bf16.vlgmr.msra.gmra.mrb[20].mxu0 %v8761_v7  ;;  %v11883_v7 = vld [vmem:[%s16053_s3 + $0x328] sm:$0xff]  }
 0x4c6   :  { %9950 = vmatmul.mubr.bf16.vlgmr.msra.gmra.mrb[20].mxu1 %v8763_v33  ;;  %11529 = vmatpush3.bf16.msra.mxu0 %v11831_v4  ;;  %v11882_v4 = vld [vmem:[%s16053_s3 + $0x3e8] sm:$0xff]   ;;  %v11885_v33 = vld [vmem:[%s16053_s3 + $0x370] sm:$0xff]  }
 0x4c7   :  { %9989 = vmatprep.mubr.bf16.mxu0 %v8766_v8  ;;  %11551 = vmatpush3.bf16.msra.mxu1 %v11832_v37  ;;  %v11884_v37 = vld [vmem:[%s16053_s3 + $0x3a8] sm:$0xff]   ;;  %v11887_v8 = vld [vmem:[%s16053_s3 + $0x330] sm:$0xff]  }
 0x4c8   :  { %10029 = vmatprep.mubr.bf16.mxu1 %v8768_v41  ;;  %11530 = vmatprep.subr.bf16.mxu0 %v11833_v6  ;;  %v11886_v6 = vld [vmem:[%s16053_s3 + $0x3f0] sm:$0xff]   ;;  %v11889_v41 = vld [vmem:[%s16053_s3 + $0x378] sm:$0xff]  }
 0x4c9   :  { %11552 = vmatprep.subr.bf16.mxu1 %v11834_v61  ;;  %v11888_v61 = vld [vmem:[%s16053_s3 + $0x3b0] sm:$0xff]  }
 0x4ca   :  { %11531 = vmatpush3.bf16.msra.mxu0 %v11835_v10  ;;  %v11890_v10 = vld [vmem:[%s16053_s3 + $0x3f8] sm:$0xff]  }
 0x4cb   :  { %11553 = vmatpush3.bf16.msra.mxu1 %v11836_v11  ;;  %11532 = vmatprep.subr.bf16.mxu0 %v11837_v32  ;;  %v11891_v11 = vld [vmem:[%s16053_s3 + $0x338] sm:$0xff]  }
 0x4cc   :  { %11554 = vmatprep.subr.bf16.mxu1 %v11838_v53  ;;  %v11892_v32 = vld [vmem:[%s16053_s3 + $0x3b8] sm:$0xff]   ;;  %v11897_v53 = vld [vmem:[%s16052_s2 + $0x8] sm:$0xff] }
 0x4ce   :  { %11533 = vmatpush3.bf16.msra.mxu0 %v11839_v40  ;;  %v1237_v40 = vrot.slane %v11897_v53, %v1204_v28 }
 0x4cf   :  { %11555 = vmatpush3.bf16.msra.mxu1 %v11840_v12  ;;  %11534 = vmatprep.subr.bf16.mxu0 %v11841_v13  ;;  %v1245_v12 = vrot.slane %v11897_v53, %v1212_v36  ;;  %v1241_v13 = vrot.slane %v11897_v53, %v1208_v51 }
 0x4d0   :  { %11556 = vmatprep.subr.bf16.mxu1 %v11842_v14  ;;  %v1249_v14 = vrot.slane %v11897_v53, %v1216_v50 }
 0x4d2   :  { %11535 = vmatpush3.bf16.msra.mxu0 %v11843_v15 }
 0x4d3   :  { %11557 = vmatpush3.bf16.msra.mxu1 %v11844_v47  ;;  %11536 = vmatprep.subr.bf16.mxu0 %v11845_v17 }
 0x4d4   :  { %11558 = vmatprep.subr.bf16.mxu1 %v11846_v63 }
 0x4d6   :  { %11537 = vmatpush3.bf16.msra.mxu0 %v11847_v16 }
 0x4d7   :  { %11559 = vmatpush3.bf16.msra.mxu1 %v11848_v42  ;;  %11538 = vmatprep.subr.bf16.mxu0 %v11849_v46 }
 0x4d8   :  { %11560 = vmatprep.subr.bf16.mxu1 %v11850_v18 }
 0x4da   :  { %11539 = vmatpush3.bf16.msra.mxu0 %v11851_v19 }
 0x4db   :  { %11561 = vmatpush3.bf16.msra.mxu1 %v11852_v20  ;;  %11540 = vmatprep.subr.bf16.mxu0 %v11853_v9 }
 0x4dc   :  { %11562 = vmatprep.subr.bf16.mxu1 %v11854_v21 }
 0x4de   :  { %11541 = vmatpush3.bf16.msra.mxu0 %v11855_v22 }
 0x4df   :  { %11563 = vmatpush3.bf16.msra.mxu1 %v11856_v24  ;;  %11542 = vmatprep.subr.bf16.mxu0 %v11857_v29 }
 0x4e0   :  { %11564 = vmatprep.subr.bf16.mxu1 %v11858_v34 }
 0x4e2   :  { %11543 = vmatpush3.bf16.msra.mxu0 %v11859_v25 }
 0x4e3   :  { %11565 = vmatpush3.bf16.msra.mxu1 %v11860_v59  ;;  %11572 = vmatprep.subr.bf16.mxu0 %v11861_v35 }
 0x4e4   :  { %11594 = vmatprep.subr.bf16.mxu1 %v11862_v44 }
 0x4e5   :  { %9990 = vmatmul.mubr.bf16.vlgmr.msra.gmra.mrb[24].mxu0 %v8765_v45 }
 0x4e6   :  { %10030 = vmatmul.mubr.bf16.vlgmr.msra.gmra.mrb[24].mxu1 %v8767_v49  ;;  %11573 = vmatpush3.bf16.msra.mxu0 %v11863_v23 }
 0x4e7   :  { %11595 = vmatpush3.bf16.msra.mxu1 %v11864_v48  ;;  %11574 = vmatprep.subr.bf16.mxu0 %v11865_v5 }
 0x4e8   :  { %11596 = vmatprep.subr.bf16.mxu1 %v11866_v52 }
 0x4ea   :  { %11575 = vmatpush3.bf16.msra.mxu0 %v11867_v54 }
 0x4eb   :  { %11597 = vmatpush3.bf16.msra.mxu1 %v11868_v55  ;;  %11576 = vmatprep.subr.bf16.mxu0 %v11869_v56 }
 0x4ec   :  { %11598 = vmatprep.subr.bf16.mxu1 %v11870_v58 }
 0x4ee   :  { %11577 = vmatpush3.bf16.msra.mxu0 %v11871_v57 }
 0x4ef   :  { %11599 = vmatpush3.bf16.msra.mxu1 %v11872_v60  ;;  %11578 = vmatprep.subr.bf16.mxu0 %v11873_v30 }
 0x4f0   :  { %11600 = vmatprep.subr.bf16.mxu1 %v11874_v27 }
 0x4f2   :  { %11579 = vmatpush3.bf16.msra.mxu0 %v11875_v62 }
 0x4f3   :  { %11601 = vmatpush3.bf16.msra.mxu1 %v11876_v0  ;;  %11580 = vmatprep.subr.bf16.mxu0 %v11877_v31  ;;  %v11924_v31 = vmov 0.0  }
 0x4f4   :  { %11602 = vmatprep.subr.bf16.mxu1 %v11878_v38  ;;  %27 = vst.msk [vmem:[#allocation2] sm:$0x3] %vm26_vm0, %v11924_v31 }
 0x4f6   :  { %11581 = vmatpush3.bf16.msra.mxu0 %v11879_v1 }
 0x4f7   :  { %11603 = vmatpush3.bf16.msra.mxu1 %v11880_v2  ;;  %11582 = vmatprep.subr.bf16.mxu0 %v11881_v3 }
 0x4f8   :  { %11604 = vmatprep.subr.bf16.mxu1 %v11882_v4 }
 0x4fa   :  { %11583 = vmatpush3.bf16.msra.mxu0 %v11883_v7 }
 0x4fb   :  { %11605 = vmatpush3.bf16.msra.mxu1 %v11884_v37  ;;  %11584 = vmatprep.subr.bf16.mxu0 %v11885_v33 }
 0x4fc   :  { %11606 = vmatprep.subr.bf16.mxu1 %v11886_v6 }
 0x4fe   :  { %11585 = vmatpush3.bf16.msra.mxu0 %v11887_v8 }
 0x4ff   :  { %11607 = vmatpush3.bf16.msra.mxu1 %v11888_v61  ;;  %11586 = vmatprep.subr.bf16.mxu0 %v11889_v41 }
 0x500   :  { %11608 = vmatprep.subr.bf16.mxu1 %v11890_v10 }
 0x502   :  { %11587 = vmatpush3.bf16.msra.mxu0 %v11891_v11 }
 0x503   :  { %11609 = vmatpush3.bf16.msra.mxu1 %v11892_v32 }
 0x558   :  { %v8528_v15 = vpop.f32.mrb[12].mxu0  ;;  %v8733_v17 = vpop.f32.mrb[12].mxu1 }
 0x559   :  { %v11628_v47 = vadd.f32 %v8528_v15, %v1237_v40  ;;  %v8530_v63 = vpop.f32.mrb[13].mxu0  ;;  %v11630_v16 = vadd.f32 %v8733_v17, %v1245_v12  ;;  %v8735_v46 = vpop.f32.mrb[13].mxu1 }
 0x55a   :  { %v11629_v42 = vadd.f32 %v8530_v63, %v1241_v13  ;;  %v8532_v18 = vpop.f32.mrb[14].mxu0  ;;  %v11631_v20 = vadd.f32 %v8735_v46, %v1249_v14  ;;  %v8737_v28 = vpop.f32.mrb[14].mxu1  ;;  %v8756_v63 = vld [vmem:[#allocation2] sm:$0x3] }
 0x55b   :  { %v8752_v19 = vmax.f32 %v11628_v47, 0.0  ;;  %v8533_v9 = vpop.f32.mrb[15].mxu0  ;;  %v8754_v21 = vmax.f32 %v11630_v16, 0.0  ;;  %v8738_v22 = vpop.f32.mrb[15].mxu1  ;;  %v11439_v46 = vld [vmem:[%s16054_s4] ss:$0 sm:$0xff] }
 0x55c   :  { %v8753_v36 = vmax.f32 %v11629_v42, 0.0  ;;  %v8755_v24 = vmax.f32 %v11631_v20, 0.0  ;;  %s11898_s4 = scalar_lea.vmem %s10151_s28, 32 }
 0x55d   :  { %v8769_v29 = vpack.c.bf16 %v8752_v19, %v8752_v19  ;;  %v8771_v50 = vpack.c.bf16 %v8754_v21, %v8754_v21  ;;  %p11899_p0 = scmp.ne.s32.totalorder %s10151_s28, %s11898_s4  ;;  %p11904_p2 = scmp.lt.s32.totalorder %s11898_s4, %s11898_s4 }
 0x55e   :  { %v8770_v51 = vpack.c.bf16 %v8753_v36, %v8753_v36  ;;  %v8772_v43 = vpack.c.bf16 %v8755_v24, %v8755_v24 }
 0x55f   :  { %p11905_p3 = por %p11904_p2, %p11903_p1 }
 0x560   :  { %10069 = vmatprep.mubr.bf16.mxu0 %v8770_v51  ;;  %10109 = vmatprep.mubr.bf16.mxu1 %v8772_v43 }
 0x561   :  { %10070 = vmatmul.mubr.bf16.vlgmr.msra.gmra.mrb[28].mxu0 %v8769_v29  ;;  %10110 = vmatmul.mubr.bf16.vlgmr.msra.gmra.mrb[28].mxu1 %v8771_v50  ;;  %p11906_p4 = pnand %p11905_p3, %p11899_p0 }
 0x578   :  { %v11456_v34 = vpop.f32.mrb[16].mxu0 }
 0x579   :  { %v11478_v25 = vpop.f32.mrb[16].mxu1  ;;  %v11457_v26 = vpop.f32.mrb[17].mxu0 }
 0x57a   :  { %v11458_v59 = vadd.f32 %v11457_v26, %v11456_v34  ;;  %v11479_v35 = vpop.f32.mrb[17].mxu1  ;;  %v11459_v39 = vpop.f32.mrb[18].mxu0 }
 0x57b   :  { %v11480_v44 = vadd.f32 %v11479_v35, %v11478_v25  ;;  %v11481_v23 = vpop.f32.mrb[18].mxu1  ;;  %v11460_v45 = vpop.f32.mrb[19].mxu0 }
 0x57c   :  { %v11482_v48 = vpop.f32.mrb[19].mxu1 }
 0x57d   :  { %v9872_v5 = vadd.f32 %v11480_v44, %v11458_v59 }
 0x598   :  { %v11500_v49 = vpop.f32.mrb[20].mxu0 }
 0x599   :  { %v11522_v52 = vpop.f32.mrb[20].mxu1  ;;  %v11501_v54 = vpop.f32.mrb[21].mxu0 }
 0x59a   :  { %v11502_v55 = vadd.f32 %v11501_v54, %v11500_v49  ;;  %v11523_v56 = vpop.f32.mrb[21].mxu1  ;;  %v11503_v58 = vpop.f32.mrb[22].mxu0 }
 0x59b   :  { %v11524_v57 = vadd.f32 %v11523_v56, %v11522_v52  ;;  %v11525_v60 = vpop.f32.mrb[22].mxu1  ;;  %v11504_v30 = vpop.f32.mrb[23].mxu0 }
 0x59c   :  { %v9912_v27 = vadd.f32 %v11502_v55, %v9872_v5  ;;  %v11526_v62 = vpop.f32.mrb[23].mxu1 }
 0x59e   :  { %v9952_v0 = vadd.f32 %v11524_v57, %v9912_v27 }
 0x5b8   :  { %v11544_v38 = vpop.f32.mrb[24].mxu0 }
 0x5b9   :  { %v11566_v1 = vpop.f32.mrb[24].mxu1  ;;  %v11545_v2 = vpop.f32.mrb[25].mxu0 }
 0x5ba   :  { %v11546_v3 = vadd.f32 %v11545_v2, %v11544_v38  ;;  %v11567_v4 = vpop.f32.mrb[25].mxu1  ;;  %v11547_v7 = vpop.f32.mrb[26].mxu0 }
 0x5bb   :  { %v11568_v37 = vadd.f32 %v11567_v4, %v11566_v1  ;;  %v11569_v33 = vpop.f32.mrb[26].mxu1  ;;  %v11548_v6 = vpop.f32.mrb[27].mxu0 }
 0x5bc   :  { %v9992_v8 = vadd.f32 %v11546_v3, %v9952_v0  ;;  %v11570_v61 = vpop.f32.mrb[27].mxu1 }
 0x5be   :  { %v10032_v41 = vadd.f32 %v11568_v37, %v9992_v8 }
 0x634   :  { %v11588_v10 = vpop.f32.mrb[28].mxu0  ;;  %v11610_v11 = vpop.f32.mrb[28].mxu1 }
 0x635   :  { %v11589_v32 = vpop.f32.mrb[29].mxu0  ;;  %v11611_v40 = vpop.f32.mrb[29].mxu1 }
 0x636   :  { %v11590_v53 = vadd.f32 %v11589_v32, %v11588_v10  ;;  %v11591_v12 = vpop.f32.mrb[30].mxu0  ;;  %v11612_v13 = vadd.f32 %v11611_v40, %v11610_v11  ;;  %v11613_v14 = vpop.f32.mrb[30].mxu1 }
 0x637   :  { %v11592_v15 = vpop.f32.mrb[31].mxu0  ;;  %v11614_v17 = vpop.f32.mrb[31].mxu1 }
 0x638   :  { %v10072_v47 = vadd.f32 %v11590_v53, %v10032_v41 }
 0x63a   :  { %v10112_v16 = vadd.f32 %v11612_v13, %v10072_v47 }
 0x63c   :  { %v10117_v42 = vadd.f32 %v10112_v16, %v8756_v63 }
 0x63e   :  { %10119 = vst.msk [vmem:[#allocation2] sm:$0x3] %vm26_vm0, %v10117_v42 }
 0x645   :  { %v10123_v18 = vld [vmem:[#allocation2] sm:$0x3] }
 0x646   :  { %v10131_v19 = vadd.f32 %v11439_v46, %v10123_v18 }
 0x648   :  { %v10132_v20 = vsel %vm26_vm0, %v10131_v19, -inf }
 0x649   :  { %10133 = vmax.xlane.f32.xlu0 %v10132_v20 }
 0x6d6   :  { %v10134_v28 = vpop.xlane.xlu0 %10133 }
 0x6d7   :  { %v10135_v9 = vsub.f32 %v10131_v19, %v10134_v28 }
 0x6d9   :  { %v10136_v21 = vmul.f32 1.442695, %v10135_v9 }
 0x6db   :  { %11893 = vpow2.f32 %v10136_v21 }
 0x6e5   :  { %v11894_v36 = vpop.eup %11893 }
 0x6e6   :  { %v10138_v22 = vsel %vm26_vm0, %v11894_v36, 0.0 }
 0x6e7   :  { %10139 = vadd.xlane.f32.xlu0 %v10138_v22 }
 0x774   :  { %v10140_v24 = vpop.xlane.xlu0 %10139 }
 0x775   :  { %11895 = vrcp.f32 %v10140_v24 }
 0x77f   :  { %v11896_v51 = vpop.eup %11895 }
 0x780   :  { %v10142_v29 = vmul.f32 %v11896_v51, %v11894_v36 }
 0x782   :  { %10143 = vst.msk [vmem:[#allocation3] sm:$0x3] %vm26_vm0, %v10142_v29 }
 0x783   :  { %11909 = shalt.err (!%p11906_p4)
}
 0x784   :  { %s11910_s6 = scalar_lea.hbm %s16055_s5, 32 }
 0x785   :  { %p11911_p5 = scmp.ne.s32.totalorder %s16055_s5, %s11910_s6  ;;  %p11914_p6 = scmp.lt.u32.totalorder %s11910_s6, %s16055_s5 }
 0x787   :  { %p11916_p7 = pnand %p11914_p6, %p11911_p5 }
 0x789   :  { %11919 = shalt.err (!%p11916_p7)
}
 0x78a   :  { %10153 = dma.vmem_to_hbm [thread:$0]  %s10151_s28, 32, %s16055_s5, [#allocation4]  }
 0x78b   :  { %11920 = dma.done.wait [#allocation4], 32  }
 0x78c   :  { %11921 = vsyncadd [#allocation4], 4294967264 }
 0x78d   :  { %10157 = vsyncpa [#allocation4], 1 }

</bundles_post_ra>
